<compile_context>
chip_gen: v7x
topology: tpu7x:2x2x1
jax: 0.10.0
libtpu: 0.0.40
codegen_flags: <defaults>
</compile_context>

<pallas_src>
import jax
import jax.numpy as jnp
from jax import lax
from jax.experimental import pallas as pl
from jax.experimental.pallas import tpu as pltpu

KH = KW = 3   # 3x3 convs
CP = 128      # lane-padded channel count (lane tile width)


def basic_block_forward(x_nchw, w1, w2, scale1, bias1, scale2, bias2):
    """x_nchw: (N, Cin, H, W); w1: (Cout, Cin, 3, 3); w2: (Cout, Cout, 3, 3)."""
    N, Cin, H, W = x_nchw.shape
    Cout = w1.shape[0]
    if Cin != Cout:
        raise ValueError("BasicBlock with downsample=None requires Cin == Cout")
    if max(Cin, Cout) > CP:
        raise ValueError("channel counts above 128 need multi-tile channel support")

    # Padded row width (power of two so the in-kernel column mask is a
    # bitwise AND).  Need Wf >= W + 4 (2 columns of padding on each side).
    Wf = max(8, pl.next_power_of_2(W + 4))
    L_in = (H + 6) * Wf   # input rows: 2 top padding, image, 4 bottom slack
    L1 = (H + 3) * Wf     # conv1 / padded-h domain rows (H+2 used, 1 slack)
    L2 = H * Wf           # output domain rows

    def kernel(xf_ref, w1_ref, w2_ref, sb1_ref, sb2_ref, out_ref):
        # xf_ref : (1, L_in, CP) bf16  flattened, spatially+channel zero-padded x
        # w1_ref : (9, CP, CP)   bf16  conv1 taps, tap index = ky*3 + kx
        # w2_ref : (9, CP, CP)   bf16  conv2 taps
        # sb1/sb2: (2, CP)       f32   folded BatchNorm [scale; bias]
        # out_ref: (1, L2, CP)   f32   lane-dense output slab
        xr = jnp.maximum(xf_ref[0].astype(jnp.float32), 0.0)   # relu(x); zeros stay zero

        # conv1 evaluated on the enlarged (H+2)-row domain: 9 lane-dense
        # matmuls, each (L1, 128) x (128, 128), bf16 operands, f32 accumulate.
        acc1 = jnp.zeros((L1, CP), jnp.float32)
        for ky in range(KH):
            for kx in range(KW):
                o = ky * Wf + kx
                patch = xr[o:o + L1, :].astype(jnp.bfloat16)
                acc1 = acc1 + jnp.dot(patch, w1_ref[ky * KW + kx],
                                      preferred_element_type=jnp.float32)

        # folded bn1 + relu
        h = jnp.maximum(acc1 * sb1_ref[0:1, :] + sb1_ref[1:2, :], 0.0)

        # Zero everything outside the valid conv1-output region; the zeroed
        # ring is exactly conv2's zero padding (replaces the pad_ref scratch).
        p = lax.broadcasted_iota(jnp.int32, (L1, 1), 0)
        col = jnp.bitwise_and(p, Wf - 1)
        valid = (p >= Wf) & (p < (H + 1) * Wf) & (col >= 1) & (col <= W)
        hp = jnp.where(valid, h, 0.0)

        # conv2 on the (H, W) output domain
        acc2 = jnp.zeros((L2, CP), jnp.float32)
        for ky in range(KH):
            for kx in range(KW):
                o = ky * Wf + kx
                patch = hp[o:o + L2, :].astype(jnp.bfloat16)
                acc2 = acc2 + jnp.dot(patch, w2_ref[ky * KW + kx],
                                      preferred_element_type=jnp.float32)

        # folded bn2 + residual (relu(x) at the un-shifted positions)
        res = xr[2 * Wf + 2: 2 * Wf + 2 + L2, :]
        out_ref[0] = acc2 * sb2_ref[0:1, :] + sb2_ref[1:2, :] + res

    # ---- wrapper glue: NCHW -> flattened lane-dense NHWC slabs, bf16 ----
    x_nhwc = jnp.transpose(x_nchw, (0, 2, 3, 1))
    xp = jnp.pad(x_nhwc, ((0, 0), (2, 4), (2, Wf - W - 2), (0, CP - Cin)))
    xf = xp.reshape(N, L_in, CP).astype(jnp.bfloat16)

    def prep_w(w, cin):
        wt = jnp.transpose(w, (2, 3, 1, 0))                       # (3,3,cin,Cout)
        wt = jnp.pad(wt, ((0, 0), (0, 0), (0, CP - cin), (0, CP - Cout)))
        return wt.reshape(KH * KW, CP, CP).astype(jnp.bfloat16)

    w1_t = prep_w(w1, Cin)
    w2_t = prep_w(w2, Cout)

    def prep_sb(s, b):
        return jnp.stack([jnp.pad(s, (0, CP - Cout)),
                          jnp.pad(b, (0, CP - Cout))]).astype(jnp.float32)

    sb1 = prep_sb(scale1, bias1)
    sb2 = prep_sb(scale2, bias2)

    out_flat = pl.pallas_call(
        kernel,
        out_shape=jax.ShapeDtypeStruct((N, L2, CP), jnp.float32),
        grid_spec=pltpu.PrefetchScalarGridSpec(
            num_scalar_prefetch=0,
            grid=(N,),
            in_specs=[
                pl.BlockSpec((1, L_in, CP), lambda b: (b, 0, 0)),
                pl.BlockSpec((KH * KW, CP, CP), lambda b: (0, 0, 0)),
                pl.BlockSpec((KH * KW, CP, CP), lambda b: (0, 0, 0)),
                pl.BlockSpec((2, CP), lambda b: (0, 0)),
                pl.BlockSpec((2, CP), lambda b: (0, 0)),
            ],
            out_specs=pl.BlockSpec((1, L2, CP), lambda b: (b, 0, 0)),
        ),
        compiler_params=pltpu.CompilerParams(
            dimension_semantics=("parallel",)),
    )(xf, w1_t, w2_t, sb1, sb2)

    # lane-dense slab -> NCHW, drop spatial/channel padding
    out = out_flat.reshape(N, H, Wf, CP)[:, :, :W, :Cout]
    return jnp.transpose(out, (0, 3, 1, 2))


def reference_forward(x, w1, w2, scale1, bias1, scale2, bias2):
    """Pure-JAX f32 reference with the same semantics (NCHW)."""
    x = jnp.maximum(x, 0.0)
    residual = x
    dn = ("NCHW", "OIHW", "NCHW")
    out = lax.conv_general_dilated(x, w1, (1, 1), [(1, 1), (1, 1)],
                                   dimension_numbers=dn)
    out = out * scale1[None, :, None, None] + bias1[None, :, None, None]
    out = jnp.maximum(out, 0.0)
    out = lax.conv_general_dilated(out, w2, (1, 1), [(1, 1), (1, 1)],
                                   dimension_numbers=dn)
    out = out * scale2[None, :, None, None] + bias2[None, :, None, None]
    return out + residual


if __name__ == "__main__":
    # Small shapes consistent with BasicBlock(inplanes=4, planes=4)
    N, Cin, H, W = 2, 4, 16, 16
    Cout = 4

    key = jax.random.PRNGKey(0)
    kx, kw1, kw2, kg1, kb1, km1, kv1, kg2, kb2, km2, kv2 = jax.random.split(key, 11)

    x = jax.random.normal(kx, (N, Cin, H, W), dtype=jnp.float32)
    w1 = jax.random.normal(kw1, (Cout, Cin, KH, KW), dtype=jnp.float32) * 0.1
    w2 = jax.random.normal(kw2, (Cout, Cout, KH, KW), dtype=jnp.float32) * 0.1

    # Pre-round x / weights to bf16-representable values so the kernel's bf16
    # MXU operands are exact; remaining differences come from f32 accumulation
    # order and the bf16 rounding of conv2's input activations.
    x = x.astype(jnp.bfloat16).astype(jnp.float32)
    w1 = w1.astype(jnp.bfloat16).astype(jnp.float32)
    w2 = w2.astype(jnp.bfloat16).astype(jnp.float32)

    # BatchNorm (eval mode) parameters, folded into scale/bias
    eps = 1e-5
    gamma1 = jax.random.normal(kg1, (Cout,), jnp.float32) * 0.1 + 1.0
    beta1 = jax.random.normal(kb1, (Cout,), jnp.float32) * 0.1
    mean1 = jax.random.normal(km1, (Cout,), jnp.float32) * 0.1
    var1 = jnp.abs(jax.random.normal(kv1, (Cout,), jnp.float32)) * 0.1 + 1.0
    gamma2 = jax.random.normal(kg2, (Cout,), jnp.float32) * 0.1 + 1.0
    beta2 = jax.random.normal(kb2, (Cout,), jnp.float32) * 0.1
    mean2 = jax.random.normal(km2, (Cout,), jnp.float32) * 0.1
    var2 = jnp.abs(jax.random.normal(kv2, (Cout,), jnp.float32)) * 0.1 + 1.0

    scale1 = gamma1 / jnp.sqrt(var1 + eps)
    bias1 = beta1 - mean1 * scale1
    scale2 = gamma2 / jnp.sqrt(var2 + eps)
    bias2 = beta2 - mean2 * scale2

    out = basic_block_forward(x, w1, w2, scale1, bias1, scale2, bias2)
    out = jax.block_until_ready(out)

    ref = reference_forward(x, w1, w2, scale1, bias1, scale2, bias2)
    ref = jax.block_until_ready(ref)

    assert out.shape == (N, Cout, H, W), out.shape
    # bf16 operands inside the kernel (conv2 input is bf16-rounded) vs a pure
    # f32 reference -> tolerance relaxed accordingly.
    if not jnp.allclose(out, ref, atol=1e-2, rtol=1e-2):
        max_err = jnp.max(jnp.abs(out - ref))
        raise AssertionError(f"Pallas kernel output mismatch vs reference "
                             f"(max abs err {max_err})")

    print("KERNEL_OK")
</pallas_src>

<mosaic_0001>
module attributes {stable_mosaic.version = 11 : i64} {
  func.func @kernel(%arg0: i32, %arg1: memref<1x704x128xbf16, #tpu.memory_space<vmem>>, %arg2: memref<9x128x128xbf16, #tpu.memory_space<vmem>>, %arg3: memref<9x128x128xbf16, #tpu.memory_space<vmem>>, %arg4: memref<2x128xf32, #tpu.memory_space<vmem>>, %arg5: memref<2x128xf32, #tpu.memory_space<vmem>>, %arg6: memref<1x512x128xf32, #tpu.memory_space<vmem>>) attributes {dimension_semantics = [#tpu.dimension_semantics<parallel>], iteration_bounds = array<i64: 2>, scalar_prefetch = 0 : i64, scratch_operands = 0 : i64, tpu.core_type = #tpu.core_type<tc>, window_params = [{transform_indices = @transform_0, window_bounds = array<i64: 1, 704, 128>}, {pipeline_mode = #tpu.pipeline_mode<synchronous>, transform_indices = @transform_1, window_bounds = array<i64: 9, 128, 128>}, {pipeline_mode = #tpu.pipeline_mode<synchronous>, transform_indices = @transform_2, window_bounds = array<i64: 9, 128, 128>}, {pipeline_mode = #tpu.pipeline_mode<synchronous>, transform_indices = @transform_3, window_bounds = array<i64: 2, 128>}, {pipeline_mode = #tpu.pipeline_mode<synchronous>, transform_indices = @transform_4, window_bounds = array<i64: 2, 128>}, {transform_indices = @transform_5, window_bounds = array<i64: 1, 512, 128>}]} {
    %c0 = arith.constant 0 : index
    %c0_0 = arith.constant 0 : index
    %c0_1 = arith.constant 0 : index
    %0 = vector.load %arg1[%c0, %c0_0, %c0_1] : memref<1x704x128xbf16, #tpu.memory_space<vmem>>, vector<1x704x128xbf16>
    %1 = vector.shape_cast %0 : vector<1x704x128xbf16> to vector<704x128xbf16>
    %2 = arith.extf %1 : vector<704x128xbf16> to vector<704x128xf32>
    %cst = arith.constant 0.000000e+00 : f32
    %3 = vector.broadcast %cst : f32 to vector<704x128xf32>
    %4 = arith.maximumf %2, %3 : vector<704x128xf32>
    %cst_2 = arith.constant 0.000000e+00 : f32
    %5 = vector.broadcast %cst_2 : f32 to vector<608x128xf32>
    %6 = vector.extract_strided_slice %4 {offsets = [0, 0], sizes = [608, 128], strides = [1, 1]} : vector<704x128xf32> to vector<608x128xf32>
    %7 = arith.truncf %6 : vector<608x128xf32> to vector<608x128xbf16>
    %c0_3 = arith.constant 0 : index
    %c0_4 = arith.constant 0 : index
    %c0_5 = arith.constant 0 : index
    %8 = vector.load %arg2[%c0_3, %c0_4, %c0_5] : memref<9x128x128xbf16, #tpu.memory_space<vmem>>, vector<1x128x128xbf16>
    %9 = vector.shape_cast %8 : vector<1x128x128xbf16> to vector<128x128xbf16>
    %cst_6 = arith.constant dense<0.000000e+00> : vector<608x128xf32>
    %10 = tpu.matmul %7, %9, %cst_6 {dimension_numbers = #tpu.dot_dimension_numbers<[1], [0], [0], [1], [0, 0, 1, 1], [], []>} : vector<608x128xbf16>, vector<128x128xbf16>, vector<608x128xf32> -> vector<608x128xf32>
    %11 = arith.addf %5, %10 : vector<608x128xf32>
    %12 = vector.extract_strided_slice %4 {offsets = [1, 0], sizes = [608, 128], strides = [1, 1]} : vector<704x128xf32> to vector<608x128xf32>
    %13 = arith.truncf %12 : vector<608x128xf32> to vector<608x128xbf16>
    %c1 = arith.constant 1 : index
    %c0_7 = arith.constant 0 : index
    %c0_8 = arith.constant 0 : index
    %14 = vector.load %arg2[%c1, %c0_7, %c0_8] : memref<9x128x128xbf16, #tpu.memory_space<vmem>>, vector<1x128x128xbf16>
    %15 = vector.shape_cast %14 : vector<1x128x128xbf16> to vector<128x128xbf16>
    %cst_9 = arith.constant dense<0.000000e+00> : vector<608x128xf32>
    %16 = tpu.matmul %13, %15, %cst_9 {dimension_numbers = #tpu.dot_dimension_numbers<[1], [0], [0], [1], [0, 0, 1, 1], [], []>} : vector<608x128xbf16>, vector<128x128xbf16>, vector<608x128xf32> -> vector<608x128xf32>
    %17 = arith.addf %11, %16 : vector<608x128xf32>
    %18 = vector.extract_strided_slice %4 {offsets = [2, 0], sizes = [608, 128], strides = [1, 1]} : vector<704x128xf32> to vector<608x128xf32>
    %19 = arith.truncf %18 : vector<608x128xf32> to vector<608x128xbf16>
    %c2 = arith.constant 2 : index
    %c0_10 = arith.constant 0 : index
    %c0_11 = arith.constant 0 : index
    %20 = vector.load %arg2[%c2, %c0_10, %c0_11] : memref<9x128x128xbf16, #tpu.memory_space<vmem>>, vector<1x128x128xbf16>
    %21 = vector.shape_cast %20 : vector<1x128x128xbf16> to vector<128x128xbf16>
    %cst_12 = arith.constant dense<0.000000e+00> : vector<608x128xf32>
    %22 = tpu.matmul %19, %21, %cst_12 {dimension_numbers = #tpu.dot_dimension_numbers<[1], [0], [0], [1], [0, 0, 1, 1], [], []>} : vector<608x128xbf16>, vector<128x128xbf16>, vector<608x128xf32> -> vector<608x128xf32>
    %23 = arith.addf %17, %22 : vector<608x128xf32>
    %24 = vector.extract_strided_slice %4 {offsets = [32, 0], sizes = [608, 128], strides = [1, 1]} : vector<704x128xf32> to vector<608x128xf32>
    %25 = arith.truncf %24 : vector<608x128xf32> to vector<608x128xbf16>
    %c3 = arith.constant 3 : index
    %c0_13 = arith.constant 0 : index
    %c0_14 = arith.constant 0 : index
    %26 = vector.load %arg2[%c3, %c0_13, %c0_14] : memref<9x128x128xbf16, #tpu.memory_space<vmem>>, vector<1x128x128xbf16>
    %27 = vector.shape_cast %26 : vector<1x128x128xbf16> to vector<128x128xbf16>
    %cst_15 = arith.constant dense<0.000000e+00> : vector<608x128xf32>
    %28 = tpu.matmul %25, %27, %cst_15 {dimension_numbers = #tpu.dot_dimension_numbers<[1], [0], [0], [1], [0, 0, 1, 1], [], []>} : vector<608x128xbf16>, vector<128x128xbf16>, vector<608x128xf32> -> vector<608x128xf32>
    %29 = arith.addf %23, %28 : vector<608x128xf32>
    %30 = vector.extract_strided_slice %4 {offsets = [33, 0], sizes = [608, 128], strides = [1, 1]} : vector<704x128xf32> to vector<608x128xf32>
    %31 = arith.truncf %30 : vector<608x128xf32> to vector<608x128xbf16>
    %c4 = arith.constant 4 : index
    %c0_16 = arith.constant 0 : index
    %c0_17 = arith.constant 0 : index
    %32 = vector.load %arg2[%c4, %c0_16, %c0_17] : memref<9x128x128xbf16, #tpu.memory_space<vmem>>, vector<1x128x128xbf16>
    %33 = vector.shape_cast %32 : vector<1x128x128xbf16> to vector<128x128xbf16>
    %cst_18 = arith.constant dense<0.000000e+00> : vector<608x128xf32>
    %34 = tpu.matmul %31, %33, %cst_18 {dimension_numbers = #tpu.dot_dimension_numbers<[1], [0], [0], [1], [0, 0, 1, 1], [], []>} : vector<608x128xbf16>, vector<128x128xbf16>, vector<608x128xf32> -> vector<608x128xf32>
    %35 = arith.addf %29, %34 : vector<608x128xf32>
    %36 = vector.extract_strided_slice %4 {offsets = [34, 0], sizes = [608, 128], strides = [1, 1]} : vector<704x128xf32> to vector<608x128xf32>
    %37 = arith.truncf %36 : vector<608x128xf32> to vector<608x128xbf16>
    %c5 = arith.constant 5 : index
    %c0_19 = arith.constant 0 : index
    %c0_20 = arith.constant 0 : index
    %38 = vector.load %arg2[%c5, %c0_19, %c0_20] : memref<9x128x128xbf16, #tpu.memory_space<vmem>>, vector<1x128x128xbf16>
    %39 = vector.shape_cast %38 : vector<1x128x128xbf16> to vector<128x128xbf16>
    %cst_21 = arith.constant dense<0.000000e+00> : vector<608x128xf32>
    %40 = tpu.matmul %37, %39, %cst_21 {dimension_numbers = #tpu.dot_dimension_numbers<[1], [0], [0], [1], [0, 0, 1, 1], [], []>} : vector<608x128xbf16>, vector<128x128xbf16>, vector<608x128xf32> -> vector<608x128xf32>
    %41 = arith.addf %35, %40 : vector<608x128xf32>
    %42 = vector.extract_strided_slice %4 {offsets = [64, 0], sizes = [608, 128], strides = [1, 1]} : vector<704x128xf32> to vector<608x128xf32>
    %43 = arith.truncf %42 : vector<608x128xf32> to vector<608x128xbf16>
    %c6 = arith.constant 6 : index
    %c0_22 = arith.constant 0 : index
    %c0_23 = arith.constant 0 : index
    %44 = vector.load %arg2[%c6, %c0_22, %c0_23] : memref<9x128x128xbf16, #tpu.memory_space<vmem>>, vector<1x128x128xbf16>
    %45 = vector.shape_cast %44 : vector<1x128x128xbf16> to vector<128x128xbf16>
    %cst_24 = arith.constant dense<0.000000e+00> : vector<608x128xf32>
    %46 = tpu.matmul %43, %45, %cst_24 {dimension_numbers = #tpu.dot_dimension_numbers<[1], [0], [0], [1], [0, 0, 1, 1], [], []>} : vector<608x128xbf16>, vector<128x128xbf16>, vector<608x128xf32> -> vector<608x128xf32>
    %47 = arith.addf %41, %46 : vector<608x128xf32>
    %48 = vector.extract_strided_slice %4 {offsets = [65, 0], sizes = [608, 128], strides = [1, 1]} : vector<704x128xf32> to vector<608x128xf32>
    %49 = arith.truncf %48 : vector<608x128xf32> to vector<608x128xbf16>
    %c7 = arith.constant 7 : index
    %c0_25 = arith.constant 0 : index
    %c0_26 = arith.constant 0 : index
    %50 = vector.load %arg2[%c7, %c0_25, %c0_26] : memref<9x128x128xbf16, #tpu.memory_space<vmem>>, vector<1x128x128xbf16>
    %51 = vector.shape_cast %50 : vector<1x128x128xbf16> to vector<128x128xbf16>
    %cst_27 = arith.constant dense<0.000000e+00> : vector<608x128xf32>
    %52 = tpu.matmul %49, %51, %cst_27 {dimension_numbers = #tpu.dot_dimension_numbers<[1], [0], [0], [1], [0, 0, 1, 1], [], []>} : vector<608x128xbf16>, vector<128x128xbf16>, vector<608x128xf32> -> vector<608x128xf32>
    %53 = arith.addf %47, %52 : vector<608x128xf32>
    %54 = vector.extract_strided_slice %4 {offsets = [66, 0], sizes = [608, 128], strides = [1, 1]} : vector<704x128xf32> to vector<608x128xf32>
    %55 = arith.truncf %54 : vector<608x128xf32> to vector<608x128xbf16>
    %c8 = arith.constant 8 : index
    %c0_28 = arith.constant 0 : index
    %c0_29 = arith.constant 0 : index
    %56 = vector.load %arg2[%c8, %c0_28, %c0_29] : memref<9x128x128xbf16, #tpu.memory_space<vmem>>, vector<1x128x128xbf16>
    %57 = vector.shape_cast %56 : vector<1x128x128xbf16> to vector<128x128xbf16>
    %cst_30 = arith.constant dense<0.000000e+00> : vector<608x128xf32>
    %58 = tpu.matmul %55, %57, %cst_30 {dimension_numbers = #tpu.dot_dimension_numbers<[1], [0], [0], [1], [0, 0, 1, 1], [], []>} : vector<608x128xbf16>, vector<128x128xbf16>, vector<608x128xf32> -> vector<608x128xf32>
    %59 = arith.addf %53, %58 : vector<608x128xf32>
    %c0_31 = arith.constant 0 : index
    %c0_32 = arith.constant 0 : index
    %60 = vector.load %arg4[%c0_31, %c0_32] : memref<2x128xf32, #tpu.memory_space<vmem>>, vector<1x128xf32>
    %61 = vector.broadcast %60 : vector<1x128xf32> to vector<608x128xf32>
    %62 = arith.mulf %59, %61 : vector<608x128xf32>
    %c1_33 = arith.constant 1 : index
    %c0_34 = arith.constant 0 : index
    %63 = vector.load %arg4[%c1_33, %c0_34] : memref<2x128xf32, #tpu.memory_space<vmem>>, vector<1x128xf32>
    %64 = vector.broadcast %63 : vector<1x128xf32> to vector<608x128xf32>
    %65 = arith.addf %62, %64 : vector<608x128xf32>
    %cst_35 = arith.constant 0.000000e+00 : f32
    %66 = vector.broadcast %cst_35 : f32 to vector<608x128xf32>
    %67 = arith.maximumf %65, %66 : vector<608x128xf32>
    %68 = tpu.iota {dimensions = array<i32: 0>} : vector<608x1xi32>
    %c31_i32 = arith.constant 31 : i32
    %69 = vector.broadcast %c31_i32 : i32 to vector<608x1xi32>
    %70 = arith.andi %68, %69 : vector<608x1xi32>
    %c32_i32 = arith.constant 32 : i32
    %71 = vector.broadcast %c32_i32 : i32 to vector<608x1xi32>
    %72 = arith.cmpi sge, %68, %71 : vector<608x1xi32>
    %c544_i32 = arith.constant 544 : i32
    %73 = vector.broadcast %c544_i32 : i32 to vector<608x1xi32>
    %74 = arith.cmpi slt, %68, %73 : vector<608x1xi32>
    %75 = arith.andi %72, %74 : vector<608x1xi1>
    %c1_i32 = arith.constant 1 : i32
    %76 = vector.broadcast %c1_i32 : i32 to vector<608x1xi32>
    %77 = arith.cmpi sge, %70, %76 : vector<608x1xi32>
    %78 = arith.andi %75, %77 : vector<608x1xi1>
    %c16_i32 = arith.constant 16 : i32
    %79 = vector.broadcast %c16_i32 : i32 to vector<608x1xi32>
    %80 = arith.cmpi sle, %70, %79 : vector<608x1xi32>
    %81 = arith.andi %78, %80 : vector<608x1xi1>
    %cst_36 = arith.constant 0.000000e+00 : f32
    %82 = vector.shape_cast %81 : vector<608x1xi1> to vector<608x1xi1>
    %83 = vector.broadcast %82 : vector<608x1xi1> to vector<608x128xi1>
    %84 = vector.broadcast %cst_36 : f32 to vector<608x128xf32>
    %85 = arith.select %83, %67, %84 : vector<608x128xi1>, vector<608x128xf32>
    %cst_37 = arith.constant 0.000000e+00 : f32
    %86 = vector.broadcast %cst_37 : f32 to vector<512x128xf32>
    %87 = vector.extract_strided_slice %85 {offsets = [0, 0], sizes = [512, 128], strides = [1, 1]} : vector<608x128xf32> to vector<512x128xf32>
    %88 = arith.truncf %87 : vector<512x128xf32> to vector<512x128xbf16>
    %c0_38 = arith.constant 0 : index
    %c0_39 = arith.constant 0 : index
    %c0_40 = arith.constant 0 : index
    %89 = vector.load %arg3[%c0_38, %c0_39, %c0_40] : memref<9x128x128xbf16, #tpu.memory_space<vmem>>, vector<1x128x128xbf16>
    %90 = vector.shape_cast %89 : vector<1x128x128xbf16> to vector<128x128xbf16>
    %cst_41 = arith.constant dense<0.000000e+00> : vector<512x128xf32>
    %91 = tpu.matmul %88, %90, %cst_41 {dimension_numbers = #tpu.dot_dimension_numbers<[1], [0], [0], [1], [0, 0, 1, 1], [], []>} : vector<512x128xbf16>, vector<128x128xbf16>, vector<512x128xf32> -> vector<512x128xf32>
    %92 = arith.addf %86, %91 : vector<512x128xf32>
    %93 = vector.extract_strided_slice %85 {offsets = [1, 0], sizes = [512, 128], strides = [1, 1]} : vector<608x128xf32> to vector<512x128xf32>
    %94 = arith.truncf %93 : vector<512x128xf32> to vector<512x128xbf16>
    %c1_42 = arith.constant 1 : index
    %c0_43 = arith.constant 0 : index
    %c0_44 = arith.constant 0 : index
    %95 = vector.load %arg3[%c1_42, %c0_43, %c0_44] : memref<9x128x128xbf16, #tpu.memory_space<vmem>>, vector<1x128x128xbf16>
    %96 = vector.shape_cast %95 : vector<1x128x128xbf16> to vector<128x128xbf16>
    %cst_45 = arith.constant dense<0.000000e+00> : vector<512x128xf32>
    %97 = tpu.matmul %94, %96, %cst_45 {dimension_numbers = #tpu.dot_dimension_numbers<[1], [0], [0], [1], [0, 0, 1, 1], [], []>} : vector<512x128xbf16>, vector<128x128xbf16>, vector<512x128xf32> -> vector<512x128xf32>
    %98 = arith.addf %92, %97 : vector<512x128xf32>
    %99 = vector.extract_strided_slice %85 {offsets = [2, 0], sizes = [512, 128], strides = [1, 1]} : vector<608x128xf32> to vector<512x128xf32>
    %100 = arith.truncf %99 : vector<512x128xf32> to vector<512x128xbf16>
    %c2_46 = arith.constant 2 : index
    %c0_47 = arith.constant 0 : index
    %c0_48 = arith.constant 0 : index
    %101 = vector.load %arg3[%c2_46, %c0_47, %c0_48] : memref<9x128x128xbf16, #tpu.memory_space<vmem>>, vector<1x128x128xbf16>
    %102 = vector.shape_cast %101 : vector<1x128x128xbf16> to vector<128x128xbf16>
    %cst_49 = arith.constant dense<0.000000e+00> : vector<512x128xf32>
    %103 = tpu.matmul %100, %102, %cst_49 {dimension_numbers = #tpu.dot_dimension_numbers<[1], [0], [0], [1], [0, 0, 1, 1], [], []>} : vector<512x128xbf16>, vector<128x128xbf16>, vector<512x128xf32> -> vector<512x128xf32>
    %104 = arith.addf %98, %103 : vector<512x128xf32>
    %105 = vector.extract_strided_slice %85 {offsets = [32, 0], sizes = [512, 128], strides = [1, 1]} : vector<608x128xf32> to vector<512x128xf32>
    %106 = arith.truncf %105 : vector<512x128xf32> to vector<512x128xbf16>
    %c3_50 = arith.constant 3 : index
    %c0_51 = arith.constant 0 : index
    %c0_52 = arith.constant 0 : index
    %107 = vector.load %arg3[%c3_50, %c0_51, %c0_52] : memref<9x128x128xbf16, #tpu.memory_space<vmem>>, vector<1x128x128xbf16>
    %108 = vector.shape_cast %107 : vector<1x128x128xbf16> to vector<128x128xbf16>
    %cst_53 = arith.constant dense<0.000000e+00> : vector<512x128xf32>
    %109 = tpu.matmul %106, %108, %cst_53 {dimension_numbers = #tpu.dot_dimension_numbers<[1], [0], [0], [1], [0, 0, 1, 1], [], []>} : vector<512x128xbf16>, vector<128x128xbf16>, vector<512x128xf32> -> vector<512x128xf32>
    %110 = arith.addf %104, %109 : vector<512x128xf32>
    %111 = vector.extract_strided_slice %85 {offsets = [33, 0], sizes = [512, 128], strides = [1, 1]} : vector<608x128xf32> to vector<512x128xf32>
    %112 = arith.truncf %111 : vector<512x128xf32> to vector<512x128xbf16>
    %c4_54 = arith.constant 4 : index
    %c0_55 = arith.constant 0 : index
    %c0_56 = arith.constant 0 : index
    %113 = vector.load %arg3[%c4_54, %c0_55, %c0_56] : memref<9x128x128xbf16, #tpu.memory_space<vmem>>, vector<1x128x128xbf16>
    %114 = vector.shape_cast %113 : vector<1x128x128xbf16> to vector<128x128xbf16>
    %cst_57 = arith.constant dense<0.000000e+00> : vector<512x128xf32>
    %115 = tpu.matmul %112, %114, %cst_57 {dimension_numbers = #tpu.dot_dimension_numbers<[1], [0], [0], [1], [0, 0, 1, 1], [], []>} : vector<512x128xbf16>, vector<128x128xbf16>, vector<512x128xf32> -> vector<512x128xf32>
    %116 = arith.addf %110, %115 : vector<512x128xf32>
    %117 = vector.extract_strided_slice %85 {offsets = [34, 0], sizes = [512, 128], strides = [1, 1]} : vector<608x128xf32> to vector<512x128xf32>
    %118 = arith.truncf %117 : vector<512x128xf32> to vector<512x128xbf16>
    %c5_58 = arith.constant 5 : index
    %c0_59 = arith.constant 0 : index
    %c0_60 = arith.constant 0 : index
    %119 = vector.load %arg3[%c5_58, %c0_59, %c0_60] : memref<9x128x128xbf16, #tpu.memory_space<vmem>>, vector<1x128x128xbf16>
    %120 = vector.shape_cast %119 : vector<1x128x128xbf16> to vector<128x128xbf16>
    %cst_61 = arith.constant dense<0.000000e+00> : vector<512x128xf32>
    %121 = tpu.matmul %118, %120, %cst_61 {dimension_numbers = #tpu.dot_dimension_numbers<[1], [0], [0], [1], [0, 0, 1, 1], [], []>} : vector<512x128xbf16>, vector<128x128xbf16>, vector<512x128xf32> -> vector<512x128xf32>
    %122 = arith.addf %116, %121 : vector<512x128xf32>
    %123 = vector.extract_strided_slice %85 {offsets = [64, 0], sizes = [512, 128], strides = [1, 1]} : vector<608x128xf32> to vector<512x128xf32>
    %124 = arith.truncf %123 : vector<512x128xf32> to vector<512x128xbf16>
    %c6_62 = arith.constant 6 : index
    %c0_63 = arith.constant 0 : index
    %c0_64 = arith.constant 0 : index
    %125 = vector.load %arg3[%c6_62, %c0_63, %c0_64] : memref<9x128x128xbf16, #tpu.memory_space<vmem>>, vector<1x128x128xbf16>
    %126 = vector.shape_cast %125 : vector<1x128x128xbf16> to vector<128x128xbf16>
    %cst_65 = arith.constant dense<0.000000e+00> : vector<512x128xf32>
    %127 = tpu.matmul %124, %126, %cst_65 {dimension_numbers = #tpu.dot_dimension_numbers<[1], [0], [0], [1], [0, 0, 1, 1], [], []>} : vector<512x128xbf16>, vector<128x128xbf16>, vector<512x128xf32> -> vector<512x128xf32>
    %128 = arith.addf %122, %127 : vector<512x128xf32>
    %129 = vector.extract_strided_slice %85 {offsets = [65, 0], sizes = [512, 128], strides = [1, 1]} : vector<608x128xf32> to vector<512x128xf32>
    %130 = arith.truncf %129 : vector<512x128xf32> to vector<512x128xbf16>
    %c7_66 = arith.constant 7 : index
    %c0_67 = arith.constant 0 : index
    %c0_68 = arith.constant 0 : index
    %131 = vector.load %arg3[%c7_66, %c0_67, %c0_68] : memref<9x128x128xbf16, #tpu.memory_space<vmem>>, vector<1x128x128xbf16>
    %132 = vector.shape_cast %131 : vector<1x128x128xbf16> to vector<128x128xbf16>
    %cst_69 = arith.constant dense<0.000000e+00> : vector<512x128xf32>
    %133 = tpu.matmul %130, %132, %cst_69 {dimension_numbers = #tpu.dot_dimension_numbers<[1], [0], [0], [1], [0, 0, 1, 1], [], []>} : vector<512x128xbf16>, vector<128x128xbf16>, vector<512x128xf32> -> vector<512x128xf32>
    %134 = arith.addf %128, %133 : vector<512x128xf32>
    %135 = vector.extract_strided_slice %85 {offsets = [66, 0], sizes = [512, 128], strides = [1, 1]} : vector<608x128xf32> to vector<512x128xf32>
    %136 = arith.truncf %135 : vector<512x128xf32> to vector<512x128xbf16>
    %c8_70 = arith.constant 8 : index
    %c0_71 = arith.constant 0 : index
    %c0_72 = arith.constant 0 : index
    %137 = vector.load %arg3[%c8_70, %c0_71, %c0_72] : memref<9x128x128xbf16, #tpu.memory_space<vmem>>, vector<1x128x128xbf16>
    %138 = vector.shape_cast %137 : vector<1x128x128xbf16> to vector<128x128xbf16>
    %cst_73 = arith.constant dense<0.000000e+00> : vector<512x128xf32>
    %139 = tpu.matmul %136, %138, %cst_73 {dimension_numbers = #tpu.dot_dimension_numbers<[1], [0], [0], [1], [0, 0, 1, 1], [], []>} : vector<512x128xbf16>, vector<128x128xbf16>, vector<512x128xf32> -> vector<512x128xf32>
    %140 = arith.addf %134, %139 : vector<512x128xf32>
    %141 = vector.extract_strided_slice %4 {offsets = [66, 0], sizes = [512, 128], strides = [1, 1]} : vector<704x128xf32> to vector<512x128xf32>
    %c0_74 = arith.constant 0 : index
    %c0_75 = arith.constant 0 : index
    %142 = vector.load %arg5[%c0_74, %c0_75] : memref<2x128xf32, #tpu.memory_space<vmem>>, vector<1x128xf32>
    %143 = vector.broadcast %142 : vector<1x128xf32> to vector<512x128xf32>
    %144 = arith.mulf %140, %143 : vector<512x128xf32>
    %c1_76 = arith.constant 1 : index
    %c0_77 = arith.constant 0 : index
    %145 = vector.load %arg5[%c1_76, %c0_77] : memref<2x128xf32, #tpu.memory_space<vmem>>, vector<1x128xf32>
    %146 = vector.broadcast %145 : vector<1x128xf32> to vector<512x128xf32>
    %147 = arith.addf %144, %146 : vector<512x128xf32>
    %148 = arith.addf %147, %141 : vector<512x128xf32>
    %c0_78 = arith.constant 0 : index
    %c0_79 = arith.constant 0 : index
    %c0_80 = arith.constant 0 : index
    %149 = vector.load %arg6[%c0_78, %c0_79, %c0_80] : memref<1x512x128xf32, #tpu.memory_space<vmem>>, vector<1x512x128xf32>
    %150 = vector.shape_cast %149 : vector<1x512x128xf32> to vector<512x128xf32>
    %151 = vector.shape_cast %148 : vector<512x128xf32> to vector<1x512x128xf32>
    tpu.vector_store %arg6[%c0_78, %c0_79, %c0_80], %151 {strides = array<i32>} : memref<1x512x128xf32, #tpu.memory_space<vmem>>, vector<1x512x128xf32>,
    return
  }
  func.func @transform_0(%arg0: i32) -> (i32, i32, i32) {
    %c0_i32 = arith.constant 0 : i32
    %c0_i32_0 = arith.constant 0 : i32
    %c0_i32_1 = arith.constant 0 : i32
    return %arg0, %c0_i32, %c0_i32_0 : i32, i32, i32
  }
  func.func @transform_1(%arg0: i32) -> (i32, i32, i32) {
    %c0_i32 = arith.constant 0 : i32
    %c0_i32_0 = arith.constant 0 : i32
    %c0_i32_1 = arith.constant 0 : i32
    %c0_i32_2 = arith.constant 0 : i32
    return %c0_i32, %c0_i32_0, %c0_i32_1 : i32, i32, i32
  }
  func.func @transform_2(%arg0: i32) -> (i32, i32, i32) {
    %c0_i32 = arith.constant 0 : i32
    %c0_i32_0 = arith.constant 0 : i32
    %c0_i32_1 = arith.constant 0 : i32
    %c0_i32_2 = arith.constant 0 : i32
    return %c0_i32, %c0_i32_0, %c0_i32_1 : i32, i32, i32
  }
  func.func @transform_3(%arg0: i32) -> (i32, i32) {
    %c0_i32 = arith.constant 0 : i32
    %c0_i32_0 = arith.constant 0 : i32
    %c0_i32_1 = arith.constant 0 : i32
    return %c0_i32, %c0_i32_0 : i32, i32
  }
  func.func @transform_4(%arg0: i32) -> (i32, i32) {
    %c0_i32 = arith.constant 0 : i32
    %c0_i32_0 = arith.constant 0 : i32
    %c0_i32_1 = arith.constant 0 : i32
    return %c0_i32, %c0_i32_0 : i32, i32
  }
  func.func @transform_5(%arg0: i32) -> (i32, i32, i32) {
    %c0_i32 = arith.constant 0 : i32
    %c0_i32_0 = arith.constant 0 : i32
    %c0_i32_1 = arith.constant 0 : i32
    return %arg0, %c0_i32, %c0_i32_0 : i32, i32, i32
  }
}

</mosaic_0001>

<bundles_post_ra>
// kernel: tpu_custom_call.1
= control target key start
LH: loop header
LB: loop body
LE: loop exit
PB: predicated region body
PF: predicated region fallthrough
CT: control target
= control target key end

     0   :  { %10 = vsyncpa [#allocation3], 0  ;;  %s19034_s0 = inlined_call_operand.hbm [shape: bf16[2,704,128], index: 0, kind: input, shape index: {}]   ;;  %s19035_s1 = inlined_call_operand.hbm [shape: bf16[9,128,128], index: 1, kind: input, shape index: {}]   ;;  %s19036_s2 = inlined_call_operand.hbm [shape: bf16[9,128,128], index: 2, kind: input, shape index: {}]   ;;  %s19037_s3 = inlined_call_operand.vmem [shape: f32[2,128], index: 3, kind: input, shape index: {}]   ;;  %s19038_s4 = inlined_call_operand.vmem [shape: f32[2,128], index: 4, kind: input, shape index: {}]   ;;  %s19039_s5 = inlined_call_operand.hbm [shape: f32[2,512,128], index: 5, kind: output, shape index: {}]  }
   0x1   :  { %12 = vsyncpa [#allocation3 + $0x1], 0 }
   0x2   :  { %13 = vsyncpa [#allocation6], 0 }
   0x3   :  { %14 = vsyncpa [#allocation4], 0 }
   0x4   :  { %16 = vsyncpa [#allocation4 + $0x1], 0  ;;  %s15575_s18 = smov 0   ;;  %s15577_s19 = smov 0  }
   0x5   :  { %s15579_s20 = smov 0   ;;  %s15581_s21 = smov 0  }
   0x6 LB: > { %s15596_s22 = sadd.s32 4294967295, %s15531_s21   ;;  %s11151_s23 = sadd.s32 4294967294, %s15531_s21   ;;  %s15531_s21 = sphi %s15581_s21, %s20382_s21   ;;  %s15527_s20 = sphi %s15579_s20, %s20381_s20   ;;  %s15523_s19 = sphi %s15577_s19, %s20380_s19   ;;  %s15519_s18 = sphi %s15575_s18, %s20379_s18  }
   0x7   : > { %p42_p0 = scmp.ne.s32.totalorder %s15523_s19, %s15519_s18  ;;  %p19040_p1 = scmp.eq.s32.totalorder %s15596_s22, 0 }
   0x8   : > { %p156_p3 = scmp.eq.s32.totalorder %s11151_s23, 1  ;;  %p11152_p5 = scmp.ge.s32.totalorder %s15531_s21, 1 }
   0x9   : > { %p15605_p4 = por %p19040_p1, %p42_p0  ;;  %p163_p7 = scmp.lt.s32.totalorder %s15531_s21, 3 }
   0xa   : > { %p15610_p6 = por %p156_p3, %p42_p0  ;;  %s15533_s27 = smov [#allocation5]  }
   0xb   : > { %s19461_s24 = scalar_select %p15605_p4, 1, 0 }
   0xc   : > { %s19462_s25 = scalar_select %p15610_p6, 1, 0 }
   0xd   : > { %p15615_p8 = pnand %p11152_p5, %p163_p7  ;;  %s175_s28 = sshll.u32 %s15533_s27, 4  ;;  %s15619_s28 = int_to_ptr.vmem [resolvable:$true] %s175_s28 }
   0xe   : > { %s15534_s30 = smov [#allocation7]   ;;  %s15375_s9 = scalar_lea.hbm %s19035_s1, 9216 }
   0xf   : > { %p15166_p9 = pneg %p15615_p8  ;;  %s188_s6 = sshll.u32 %s15534_s30, 4  ;;  %s15630_s6 = int_to_ptr.vmem [resolvable:$true] %s188_s6 }
  0x10   : > { %p15376_p12 = scmp.ne.s32.totalorder %s19035_s1, %s15375_s9  ;;  %p15382_p5 = scmp.lt.u32.totalorder %s15375_s9, %s19035_s1 }
  0x11   : > { %p15626_p11 = pnand %p15166_p9, %p19040_p1 }
  0x13   : > { %p15377_p13 = pneg %p15626_p11 }
  0x15   : > { %p15378_p0 = pnand %p15377_p13, %p15376_p12 }
  0x17   : > { %p15379_p3 = pneg %p15378_p0 }
  0x19   : > { %p15384_p7 = pnand %p15382_p5, %p15379_p3 }
  0x1b   : > { %15387 = shalt.err (!%p15384_p7)
}
  0x1c   : > { %s15388_s14 = scalar_lea.vmem %s15619_s28, 9216  ;;  %p15396_p2 = scmp.lt.s32.totalorder %s15619_s28, %s15619_s28 }
  0x1d   : > { %p15389_p9 = scmp.ne.s32.totalorder %s15619_s28, %s15388_s14  ;;  %p15397_p12 = scmp.lt.s32.totalorder %s15388_s14, %s15388_s14 }
  0x1f   : > { %p15391_p10 = pnand %p15389_p9, %p15377_p13  ;;  %p15398_p0 = por %p15397_p12, %p15396_p2 }
  0x21   : > { %p15392_p1 = pneg %p15391_p10 }
  0x23   : > { %p15399_p6 = pnand %p15398_p0, %p15392_p1 }
  0x25   : > { %15402 = shalt.err (!%p15399_p6)
}
  0x26   : > { %s19041_s15 = smov 64   ;;  %s15536_s16 = smov 4  }
  0x27   : > { %15169 = dma.hbm_to_vmem [thread:$0]  (!%p15626_p11), %s19035_s1, 9216, %s15619_s28, [#allocation6], %s19041_s15, %s19041_s15, %s15536_s16  }
  0x28   : > { %s15403_s7 = scalar_lea.hbm %s19036_s2, 9216 }
  0x29   : > { %p15404_p1 = scmp.ne.s32.totalorder %s19036_s2, %s15403_s7  ;;  %p15410_p10 = scmp.lt.u32.totalorder %s15403_s7, %s19036_s2 }
  0x2b   : > { %p15406_p2 = pnand %p15404_p1, %p15377_p13 }
  0x2d   : > { %p15407_p6 = pneg %p15406_p2 }
  0x2f   : > { %p15412_p3 = pnand %p15410_p10, %p15407_p6 }
  0x31   : > { %15415 = shalt.err (!%p15412_p3)
}
  0x32   : > { %s15416_s28 = scalar_lea.vmem %s15630_s6, 9216  ;;  %p15424_p12 = scmp.lt.s32.totalorder %s15630_s6, %s15630_s6 }
  0x33   : > { %p15417_p5 = scmp.ne.s32.totalorder %s15630_s6, %s15416_s28  ;;  %p15425_p0 = scmp.lt.s32.totalorder %s15416_s28, %s15416_s28 }
  0x35   : > { %p15419_p7 = pnand %p15417_p5, %p15377_p13  ;;  %p15426_p1 = por %p15425_p0, %p15424_p12 }
  0x37   : > { %p15420_p9 = pneg %p15419_p7 }
  0x39   : > { %p15427_p2 = pnand %p15426_p1, %p15420_p9 }
  0x3b   : > { %15430 = shalt.err (!%p15427_p2)
}
  0x3c   : > { %15172 = dma.hbm_to_vmem [thread:$0]  (!%p15626_p11), %s19036_s2, 9216, %s15630_s6, [#allocation6], %s19041_s15, %s19041_s15, %s15536_s16  }
  0x3d   : > { %s15691_s29 = sadd.s32 1, %s15531_s21   ;;  %s29_s14 = sadd.s32 1, %s15527_s20 }
  0x3e   : > { %s26_s17 = ssub.s32 %s15531_s21, %s15691_s29  ;;  %p36_p13 = scmp.ne.s32.totalorder %s15527_s20, %s15523_s19 }
  0x3f   : > { %p27_p6 = scmp.eq.s32.totalorder %s26_s17, 0  ;;  %p37_p10 = scmp.eq.s32.totalorder %s15531_s21, 0 }
  0x40   : > { %p19465_p3 = scmp.eq.s32.totalorder %s15596_s22, 1  ;;  %p15183_p7 = scmp.lt.s32.totalorder %s15531_s21, 2 }
  0x41   : > { %s15707_s27 = scalar_select %p27_p6, %s15527_s20, %s29_s14  }
  0x42   : > { %p15701_p5 = por %p19465_p3, %p36_p13  ;;  %p38_p9 = por %p37_p10, %p36_p13 }
  0x43   : > { %s208_s30 = sand.u32 1, %s15527_s20   ;;  %s15152_s6 = smul.u32 5632, %s15531_s21 }
  0x44   : > { %s19466_s23 = scalar_select %p15701_p5, 1, 0 }
  0x45   : > { %s15151_s7 = smul.u32 352, %s208_s30  ;;  %p15711_p11 = pnand %p15183_p7, %p38_p9 }
  0x46   : > { %s15718_s11 = scalar_lea.hbm %s19034_s0, %s15152_s6  ;;  %s15722_s13 = scalar_lea.sflag [#allocation3], %s208_s30 }
  0x47   : > { %s212_s28 = scalar_lea.vmem [#allocation2], %s15151_s7  ;;  %s15431_s14 = scalar_lea.hbm %s15718_s11, 5632 }
  0x48   : > { %s219_s12 = sshll.u32 %s212_s28, 4  ;;  %p15432_p12 = scmp.ne.s32.totalorder %s15718_s11, %s15431_s14  ;;  %s15720_s12 = int_to_ptr.vmem [resolvable:$true] %s219_s12 }
  0x49   : > { %p15433_p0 = pneg %p15711_p11  ;;  %s15436_s9 = scalar_lea.hbm %s19034_s0, 11264 }
  0x4a   : > { %p15437_p13 = scmp.lt.u32.totalorder %s15718_s11, %s19034_s0  ;;  %p15438_p6 = scmp.lt.u32.totalorder %s15436_s9, %s15431_s14 }
  0x4b   : > { %p15434_p1 = pnand %p15433_p0, %p15432_p12  ;;  %p15440_p3 = scmp.lt.u32.totalorder %s15431_s14, %s15718_s11 }
  0x4c   : > { %p15439_p10 = por %p15438_p6, %p15437_p13 }
  0x4d   : > { %p15435_p2 = pneg %p15434_p1 }
  0x4e   : > { %p15441_p7 = por %p15440_p3, %p15439_p10 }
  0x50   : > { %p15442_p9 = pnand %p15441_p7, %p15435_p2 }
  0x52   : > { %15445 = shalt.err (!%p15442_p9)
}
  0x53   : > { %s15446_s30 = scalar_lea.vmem %s15720_s12, 5632  ;;  %s15537_s7 = smov [#allocation2]  }
  0x54   : > { %p15447_p12 = scmp.ne.s32.totalorder %s15720_s12, %s15446_s30  ;;  %s15451_s28 = sshll.u32 %s15537_s7, 4  ;;  %s15452_s28 = int_to_ptr.vmem [resolvable:$false] %s15451_s28 }
  0x55   : > { %s15453_s15 = scalar_lea.vmem %s15452_s28, 11264  ;;  %p15454_p4 = scmp.lt.s32.totalorder %s15720_s12, %s15452_s28 }
  0x56   : > { %p15449_p1 = pnand %p15447_p12, %p15433_p0  ;;  %p15455_p13 = scmp.lt.s32.totalorder %s15453_s15, %s15446_s30 }
  0x58   : > { %p15450_p5 = pneg %p15449_p1  ;;  %p15456_p6 = por %p15455_p13, %p15454_p4 }
  0x5a   : > { %p15457_p10 = pnand %p15456_p6, %p15450_p5 }
  0x5c   : > { %15460 = shalt.err (!%p15457_p10)
}
  0x5d   : > { %s19468_s14 = smov 64   ;;  %231 = sbr.rel (%p15615_p8) target bundleno = 2899 (0xb53), region = 40 }
  0x5e   : > { %15176 = dma.hbm_to_vmem [thread:$0]  (!%p15711_p11), %s15718_s11, 5632, %s15720_s12, %s15722_s13, %s19468_s14, %s19468_s14, %s15536_s16  }
  0x64   : > { %s15756_s17 = sand.u32 1, %s15523_s19   ;;  %p19469_p4 = scmp.ne.s32.totalorder %s19461_s24, 0 }
  0x65   : > { %s15153_s6 = smul.u32 352, %s15756_s17  ;;  %s234_s9 = scalar_lea.sflag [#allocation3], %s15756_s17 }
  0x67   : > { %s15760_s10 = scalar_lea.vmem [#allocation2], %s15153_s6 }
  0x68   : > { %15506 = dma.done.wait (%p19469_p4), %s234_s9, 5632  }
  0x69   : > { %15508 = vsyncadd (%p19469_p4), %s234_s9, 4294961664  ;;  %p19470_p5 = scmp.eq.s32.totalorder %s15596_s22, 0 }
  0x6b   : > { %15510 = dma.done.wait (%p19470_p5), [#allocation6], 18432   ;;  %p19471_p8 = pmov %p19470_p5 }
  0x6c   : > { %v15229_v0 = vld [vmem:[#allocation5 + $0x40] sm:$0xff]   ;;  %v15230_v1 = vld [vmem:[#allocation5 + $0x48] sm:$0xff]   ;;  %v15231_v2 = vld [vmem:[#allocation5 + $0x50] sm:$0xff]   ;;  %vm19259_vm0 = vsmask.f32 7424  ;;  %vm19258_vm1 = vcmask 1046528  }
  0x6d   : > { %15512 = vsyncadd (%p19471_p8), [#allocation6], 4294948864  ;;  %12574 = vmatprep.subr.bf16.mxu0 %v15229_v0  ;;  %14122 = vmatprep.subr.bf16.mxu1 %v15229_v0  ;;  %v15232_v3 = vld [vmem:[#allocation5 + $0x58] sm:$0xff]   ;;  %v11592_v4 = vld [vmem:[%s15760_s10] sm:$0xff]   ;;  %s11160_s6 = sshll.u32 %s15756_s17, 9  ;;  %p20376_p0 = scmp.ne.s32.totalorder %s19466_s23, 0 }
  0x6e   : > { %12575 = vmatpush3.bf16.msra.mxu0 %v15229_v0  ;;  %14130 = vmatpush3.bf16.msra.mxu1 %v15229_v0  ;;  %v11759_v5 = vld [vmem:[%s15760_s10 + $0x8] sm:$0xff]   ;;  %v11760_v6 = vld [vmem:[%s15760_s10 + $0x10] sm:$0xff]   ;;  %v11593_v7 = vunpack.c.l.bf16 %v11592_v4  ;;  %v11594_v8 = vunpack.c.h.bf16 %v11592_v4  ;;  %v11761_v17 = vld [vmem:[%s15760_s10 + $0x18] sm:$0xff]   ;;  %s18679_s9 = scalar_lea.vmem [#allocation8], %s11160_s6  ;;  %s15542_s12 = smov [#allocation8]  }
  0x6f   : > { %12576 = vmatprep.subr.bf16.mxu0 %v15230_v1  ;;  %14123 = vmatprep.subr.bf16.mxu1 %v15230_v1  ;;  %v11597_v9 = vunpack.c.l.bf16 %v11759_v5  ;;  %v11598_v10 = vunpack.c.h.bf16 %v11759_v5  ;;  %v11601_v11 = vunpack.c.l.bf16 %v11760_v6  ;;  %v11602_v12 = vunpack.c.h.bf16 %v11760_v6  ;;  %v15233_v18 = vld [vmem:[#allocation5 + $0x60] sm:$0xff]   ;;  %v15234_v31 = vld [vmem:[#allocation5 + $0x68] sm:$0xff]   ;;  %v15235_v42 = vld [vmem:[#allocation5 + $0x70] sm:$0xff]   ;;  %s11059_s24 = sshll.u32 %s18679_s9, 4  ;;  %s15465_s13 = sshll.u32 %s15542_s12, 4  ;;  %s18987_s24 = int_to_ptr.vmem [resolvable:$true] %s11059_s24  ;;  %s15466_s13 = int_to_ptr.vmem [resolvable:$false] %s15465_s13 }
  0x70   : > { %v443_v13 = vmax.f32 %v11593_v7, 0.0  ;;  %v444_v14 = vmax.f32 %v11594_v8, 0.0  ;;  %v11605_v19 = vunpack.c.l.bf16 %v11761_v17  ;;  %v11606_v20 = vunpack.c.h.bf16 %v11761_v17  ;;  %v11762_v24 = vld [vmem:[%s15760_s10 + $0x20] sm:$0xff]   ;;  %v11763_v32 = vld [vmem:[%s15760_s10 + $0x28] sm:$0xff]   ;;  %v15236_v48 = vld [vmem:[#allocation5 + $0x78] sm:$0xff]   ;;  %s15461_s11 = scalar_lea.vmem %s18987_s24, 8192  ;;  %p15468_p7 = scmp.lt.s32.totalorder %s18987_s24, %s15466_s13 }
  0x71   : > { %v445_v15 = vmax.f32 %v11597_v9, 0.0  ;;  %v446_v16 = vmax.f32 %v11598_v10, 0.0  ;;  %v447_v23 = vmax.f32 %v11601_v11, 0.0  ;;  %v448_v25 = vmax.f32 %v11602_v12, 0.0  ;;  %v11764_v53 = vld [vmem:[%s15760_s10 + $0x30] sm:$0xff]   ;;  %v11765_v55 = vld [vmem:[%s15760_s10 + $0x38] sm:$0xff]   ;;  %p15462_p11 = scmp.ne.s32.totalorder %s18987_s24, %s15461_s11 }
  0x72   : > { %12577 = vmatpush3.bf16.msra.mxu0 %v15230_v1  ;;  %14131 = vmatpush3.bf16.msra.mxu1 %v15230_v1  ;;  %v15774_v21 = vpack.c.bf16 %v444_v14, %v443_v13  ;;  %v449_v26 = vmax.f32 %v11605_v19, 0.0  ;;  %v450_v30 = vmax.f32 %v11606_v20, 0.0  ;;  %v11609_v35 = vunpack.c.l.bf16 %v11762_v24  ;;  %v15237_v61 = vld [vmem:[#allocation5] sm:$0xff]   ;;  %v15238_v10 = vld [vmem:[#allocation5 + $0x8] sm:$0xff]   ;;  %s15467_s30 = scalar_lea.vmem %s15466_s13, 16384 }
  0x73   : > { %12578 = vmatprep.subr.bf16.mxu0 %v15231_v2  ;;  %14124 = vmatprep.subr.bf16.mxu1 %v15231_v2  ;;  %v15776_v22 = vpack.c.bf16 %v446_v16, %v445_v15  ;;  %v11610_v36 = vunpack.c.h.bf16 %v11762_v24  ;;  %v15783_v37 = vpack.c.bf16 %v448_v25, %v447_v23  ;;  %v11613_v40 = vunpack.c.l.bf16 %v11763_v32  ;;  %v11766_v6 = vld [vmem:[%s15760_s10 + $0x40] sm:$0xff]   ;;  %v11767_v16 = vld [vmem:[%s15760_s10 + $0x48] sm:$0xff]   ;;  %v15239_v24 = vld [vmem:[#allocation5 + $0x10] sm:$0xff]   ;;  %p15463_p2 = pnand %p15462_p11, %p20376_p0  ;;  %p15469_p9 = scmp.lt.s32.totalorder %s15467_s30, %s15461_s11 }
  0x74   : > { %v602_v27 = vshrl.u32 %v15774_v21, 16  ;;  %v604_v28 = vshll.u32 %v15774_v21, 16  ;;  %v15785_v39 = vpack.c.bf16 %v450_v30, %v449_v26  ;;  %v11614_v41 = vunpack.c.h.bf16 %v11763_v32 }
  0x75   : > { %v609_v29 = vshll.u32 %v15776_v22, 16  ;;  %v15788_v44 = vmax.f32 %v11609_v35, 0.0  ;;  %v15790_v45 = vmax.f32 %v11610_v36, 0.0  ;;  %v613_v46 = vshrl.u32 %v15776_v22, 16  ;;  %v11769_v36 = vld [vmem:[%s15760_s10 + $0x58] sm:$0xff]   ;;  %p15464_p3 = pneg %p15463_p2  ;;  %p15470_p12 = por %p15469_p9, %p15468_p7 }
  0x76   : > { %12579 = vmatpush3.bf16.msra.mxu0 %v15231_v2  ;;  %14132 = vmatpush3.bf16.msra.mxu1 %v15231_v2  ;;  %v606_v33 = vrot.slane %v604_v28, 1  ;;  %v617_v47 = vshll.u32 %v15783_v37, 16  ;;  %v621_v49 = vshrl.u32 %v15783_v37, 16  ;;  %v625_v50 = vshll.u32 %v15785_v39, 16 }
  0x77   : > { %12580 = vmatprep.subr.bf16.mxu0 %v15232_v3  ;;  %14125 = vmatprep.subr.bf16.mxu1 %v15232_v3  ;;  %v611_v34 = vrot.slane %v609_v29, 1  ;;  %19472 = vst [vmem:[#allocation12_spill] sm:$0xff] %v15788_v44  ;;  %19473 = vst [vmem:[#allocation13_spill] sm:$0xff] %v15790_v45  ;;  %v15796_v51 = vmax.f32 %v11613_v40, 0.0  ;;  %v15798_v52 = vmax.f32 %v11614_v41, 0.0  ;;  %v15803_v54 = vpack.c.bf16 %v15790_v45, %v15788_v44  ;;  %v11768_v29 = vld [vmem:[%s15760_s10 + $0x50] sm:$0xff]   ;;  %p15471_p1 = pnand %p15470_p12, %p15464_p3 }
  0x78   : > { %v607_v38 = vor.u32 %v606_v33, %v602_v27  ;;  %v619_v56 = vrot.slane %v617_v47, 1  ;;  %v11617_v57 = vunpack.c.l.bf16 %v11764_v53  ;;  %v11618_v58 = vunpack.c.h.bf16 %v11764_v53 }
  0x79   : > { %19474 = vst [vmem:[#allocation14_spill] sm:$0xff] %v15796_v51  ;;  %19475 = vst [vmem:[#allocation15_spill] sm:$0xff] %v15798_v52  ;;  %v615_v59 = vor.u32 %v613_v46, %v611_v34  ;;  %v15808_v60 = vpack.c.bf16 %v15798_v52, %v15796_v51  ;;  %v627_v63 = vrot.slane %v625_v50, 1  ;;  %v11621_v0 = vunpack.c.l.bf16 %v11765_v55  ;;  %v15258_v52 = vld [vmem:[#allocation5 + $0xe8] sm:$0xff]  }
  0x7a   : > { %12581 = vmatpush3.bf16.msra.mxu0 %v15232_v3  ;;  %14133 = vmatpush3.bf16.msra.mxu1 %v15232_v3  ;;  %v612_v43 = vsel %vm19259_vm0, %v607_v38, %v611_v34  ;;  %v623_v62 = vor.u32 %v621_v49, %v619_v56  ;;  %v11622_v1 = vunpack.c.h.bf16 %v11765_v55  ;;  %v633_v2 = vshll.u32 %v15803_v54, 16 }
  0x7b   : > { %12582 = vmatprep.subr.bf16.mxu0 %v15233_v18  ;;  %14126 = vmatprep.subr.bf16.mxu1 %v15233_v18  ;;  %v629_v3 = vshrl.u32 %v15785_v39, 16  ;;  %v15812_v4 = vmax.f32 %v11617_v57, 0.0  ;;  %v15814_v5 = vmax.f32 %v11618_v58, 0.0  ;;  %v620_v7 = vsel %vm19259_vm0, %v615_v59, %v619_v56  ;;  %v15241_v57 = vld [vmem:[#allocation5 + $0x20] sm:$0xff]  }
  0x7c   : > { %12590 = vmatprep.mubr.bf16.mxu0 %v612_v43  ;;  %v637_v8 = vshrl.u32 %v15803_v54, 16  ;;  %v641_v9 = vshll.u32 %v15808_v60, 16  ;;  %v15821_v11 = vsel %vm19259_vm0, %v623_v62, %v627_v63  ;;  %v15823_v12 = vmax.f32 %v11621_v0, 0.0  ;;  %v11770_v62 = vld [vmem:[%s15760_s10 + $0x60] sm:$0xff]  }
  0x7d   : > { %19476 = vst [vmem:[#allocation16_spill] sm:$0xff] %v15812_v4  ;;  %19477 = vst [vmem:[#allocation17_spill] sm:$0xff] %v15814_v5  ;;  %v15825_v13 = vmax.f32 %v11622_v1, 0.0  ;;  %v635_v14 = vrot.slane %v633_v2, 1  ;;  %v11625_v15 = vunpack.c.l.bf16 %v11766_v6  ;;  %v15830_v17 = vpack.c.bf16 %v15814_v5, %v15812_v4  ;;  %v15242_v1 = vld [vmem:[#allocation5 + $0x28] sm:$0xff]  }
  0x7e   : > { %12583 = vmatpush3.bf16.msra.mxu0 %v15233_v18  ;;  %14134 = vmatpush3.bf16.msra.mxu1 %v15233_v18  ;;  %19478 = vst [vmem:[#allocation18_spill] sm:$0xff] %v15823_v12  ;;  %v11626_v18 = vunpack.c.h.bf16 %v11766_v6  ;;  %v631_v19 = vor.u32 %v629_v3, %v627_v63  ;;  %v643_v23 = vrot.slane %v641_v9, 1  ;;  %v11629_v26 = vunpack.c.l.bf16 %v11767_v16 }
  0x7f   : > { %12584 = vmatprep.subr.bf16.mxu0 %v15234_v31  ;;  %14127 = vmatprep.subr.bf16.mxu1 %v15234_v31  ;;  %19479 = vst [vmem:[#allocation19_spill] sm:$0xff] %v15825_v13  ;;  %v639_v20 = vor.u32 %v637_v8, %v635_v14  ;;  %v15835_v25 = vpack.c.bf16 %v15825_v13, %v15823_v12  ;;  %v11630_v27 = vunpack.c.h.bf16 %v11767_v16  ;;  %v15837_v28 = vmax.f32 %v11625_v15, 0.0 }
  0x80   : > { %v649_v30 = vshll.u32 %v15830_v17, 16  ;;  %v15841_v32 = vmax.f32 %v11626_v18, 0.0  ;;  %v15844_v33 = vsel %vm19259_vm0, %v631_v19, %v635_v14  ;;  %v645_v35 = vshrl.u32 %v15808_v60, 16 }
  0x81   : > { %19480 = vst [vmem:[#allocation20_spill] sm:$0xff] %v15835_v25  ;;  %19481 = vst [vmem:[#allocation21_spill] sm:$0xff] %v15837_v28  ;;  %v15847_v34 = vsel %vm19259_vm0, %v639_v20, %v643_v23  ;;  %v653_v38 = vshrl.u32 %v15830_v17, 16  ;;  %v657_v40 = vshll.u32 %v15835_v25, 16  ;;  %v15853_v41 = vmax.f32 %v11629_v26, 0.0 }
  0x82   : > { %12585 = vmatpush3.bf16.msra.mxu0 %v15234_v31  ;;  %14135 = vmatpush3.bf16.msra.mxu1 %v15234_v31  ;;  %v15240_v31 = vld [vmem:[#allocation5 + $0x18] sm:$0xff]   ;;  %19482 = vst [vmem:[#allocation22_spill] sm:$0xff] %v15841_v32  ;;  %v11633_v43 = vunpack.c.l.bf16 %v11768_v29  ;;  %v11634_v46 = vunpack.c.h.bf16 %v11768_v29  ;;  %v651_v47 = vrot.slane %v649_v30, 1  ;;  %v647_v49 = vor.u32 %v645_v35, %v643_v23 }
  0x83   : > { %12586 = vmatprep.subr.bf16.mxu0 %v15235_v42  ;;  %14128 = vmatprep.subr.bf16.mxu1 %v15235_v42  ;;  %19483 = vst [vmem:[#allocation23_spill] sm:$0xff] %v15853_v41  ;;  %v11637_v50 = vunpack.c.l.bf16 %v11769_v36  ;;  %v11638_v53 = vunpack.c.h.bf16 %v11769_v36  ;;  %v659_v56 = vrot.slane %v657_v40, 1  ;;  %v661_v63 = vshrl.u32 %v15835_v25, 16  ;;  %v15244_v40 = vld [vmem:[#allocation5 + $0x38] sm:$0xff]  }
  0x84   : > { %v655_v55 = vor.u32 %v653_v38, %v651_v47  ;;  %v15867_v59 = vmax.f32 %v11633_v43, 0.0  ;;  %v15875_v2 = vsel %vm19259_vm0, %v647_v49, %v651_v47  ;;  %v11641_v15 = vunpack.c.l.bf16 %v11770_v62 }
  0x85   : > { %v15877_v3 = vmax.f32 %v11637_v50, 0.0  ;;  %v15879_v6 = vmax.f32 %v11638_v53, 0.0  ;;  %v11642_v16 = vunpack.c.h.bf16 %v11770_v62  ;;  %v663_v18 = vor.u32 %v661_v63, %v659_v56  ;;  %v15245_v50 = vld [vmem:[#allocation5 + $0x80] sm:$0xff]  }
  0x86   : > { %12587 = vmatpush3.bf16.msra.mxu0 %v15235_v42  ;;  %14136 = vmatpush3.bf16.msra.mxu1 %v15235_v42  ;;  %v15855_v42 = vmax.f32 %v11630_v27, 0.0  ;;  %19487 = vst [vmem:[#allocation27_spill] sm:$0xff] %v15867_v59  ;;  %v15897_v27 = vmax.f32 %v11641_v15, 0.0  ;;  %v15249_v15 = vld [vmem:[#allocation5 + $0xa0] sm:$0xff]  }
  0x87   : > { %12588 = vmatprep.subr.bf16.mxu0 %v15236_v48  ;;  %14129 = vmatprep.subr.bf16.mxu1 %v15236_v48  ;;  %19489 = vst [vmem:[#allocation29_spill] sm:$0xff] %v15877_v3  ;;  %19490 = vst [vmem:[#allocation30_spill] sm:$0xff] %v15879_v6  ;;  %v15894_v19 = vpack.c.bf16 %v15879_v6, %v15877_v3  ;;  %v15899_v29 = vmax.f32 %v11642_v16, 0.0  ;;  %v15250_v16 = vld [vmem:[#allocation5 + $0xa8] sm:$0xff]  }
  0x88   : > { %19484 = vst [vmem:[#allocation24_spill] sm:$0xff] %v15855_v42  ;;  %v15865_v58 = vpack.c.bf16 %v15855_v42, %v15853_v41  ;;  %19493 = vst [vmem:[#allocation33_spill] sm:$0xff] %v15897_v27 }
  0x89   : > { %19492 = vst [vmem:[#allocation32_spill] sm:$0xff] %v15894_v19  ;;  %19494 = vst [vmem:[#allocation34_spill] sm:$0xff] %v15899_v29  ;;  %v689_v35 = vshll.u32 %v15894_v19, 16 }
  0x8a   : > { %12589 = vmatpush3.bf16.msra.mxu0 %v15236_v48  ;;  %14137 = vmatpush3.bf16.msra.mxu1 %v15236_v48  ;;  %v15860_v48 = vpack.c.bf16 %v15841_v32, %v15837_v28  ;;  %19486 = vst [vmem:[#allocation26_spill] sm:$0xff] %v15865_v58  ;;  %v673_v9 = vshll.u32 %v15865_v58, 16 }
  0x8b   : > { %12666 = vmatprep.subr.bf16.mxu0 %v15237_v61  ;;  %v691_v49 = vrot.slane %v689_v35, 1 }
  0x8c   : > { %19485 = vst [vmem:[#allocation25_spill] sm:$0xff] %v15860_v48  ;;  %v665_v0 = vshll.u32 %v15860_v48, 16  ;;  %v669_v8 = vshrl.u32 %v15860_v48, 16  ;;  %v675_v23 = vrot.slane %v673_v9, 1  ;;  %v15247_v9 = vld [vmem:[#allocation5 + $0x90] sm:$0xff]  }
  0x8d   : > { %12591 = vmatmul.mubr.bf16.vlgmr.msra.gmra.mrb[0].mxu0 %v620_v7  ;;  %v15882_v7 = vsel %vm19259_vm0, %v655_v55, %v659_v56  ;;  %v693_v55 = vshrl.u32 %v15894_v19, 16 }
  0x8e   : > { %12667 = vmatpush3.bf16.msra.mxu0 %v15237_v61  ;;  %12594 = vmatprep.mubr.bf16.mxu0 %v15821_v11  ;;  %v15869_v61 = vmax.f32 %v11634_v46, 0.0  ;;  %v667_v14 = vrot.slane %v665_v0, 1  ;;  %v15913_v46 = vpack.c.bf16 %v15899_v29, %v15897_v27 }
  0x8f   : > { %12668 = vmatprep.subr.bf16.mxu0 %v15238_v10  ;;  %v695_v63 = vor.u32 %v693_v55, %v691_v49 }
  0x90   : > { %19488 = vst [vmem:[#allocation28_spill] sm:$0xff] %v15869_v61  ;;  %v671_v20 = vor.u32 %v669_v8, %v667_v14  ;;  %v15902_v30 = vsel %vm19259_vm0, %v663_v18, %v667_v14  ;;  %19495 = vst [vmem:[#allocation35_spill] sm:$0xff] %v15913_v46  ;;  %v697_v56 = vshll.u32 %v15913_v46, 16  ;;  %v15246_v8 = vld [vmem:[#allocation5 + $0x88] sm:$0xff]   ;;  %v15248_v14 = vld [vmem:[#allocation5 + $0x98] sm:$0xff]  }
  0x91   : > { %v15251_v18 = vld [vmem:[#allocation5 + $0xb0] sm:$0xff]  }
  0x92   : > { %12669 = vmatpush3.bf16.msra.mxu0 %v15238_v10  ;;  %v15888_v10 = vpack.c.bf16 %v15869_v61, %v15867_v59  ;;  %v15907_v36 = vsel %vm19259_vm0, %v671_v20, %v675_v23  ;;  %v15926_v0 = vrot.slane %v697_v56, 1  ;;  %v15252_v20 = vld [vmem:[#allocation5 + $0xb8] sm:$0xff]  }
  0x93   : > { %12670 = vmatprep.subr.bf16.mxu0 %v15239_v24 }
  0x94   : > { %19491 = vst [vmem:[#allocation31_spill] sm:$0xff] %v15888_v10  ;;  %v681_v26 = vshll.u32 %v15888_v10, 16  ;;  %v685_v38 = vshrl.u32 %v15888_v10, 16 }
  0x95   : > { %12595 = vmatmul.mubr.bf16.gmra.mrb[4].mxu0 %v15844_v33 }
  0x96   : > { %12671 = vmatpush3.bf16.msra.mxu0 %v15239_v24  ;;  %12598 = vmatprep.mubr.bf16.mxu0 %v15847_v34  ;;  %v15243_v24 = vld [vmem:[#allocation5 + $0x30] sm:$0xff]   ;;  %v683_v43 = vrot.slane %v681_v26, 1 }
  0x97   : > { %12672 = vmatprep.subr.bf16.mxu0 %v15240_v31  ;;  %v11772_v26 = vld [vmem:[%s15760_s10 + $0x70] sm:$0xff]  }
  0x98   : > { %v687_v53 = vor.u32 %v685_v38, %v683_v43  ;;  %v11649_v38 = vunpack.c.l.bf16 %v11772_v26 }
  0x9a   : > { %12673 = vmatpush3.bf16.msra.mxu0 %v15240_v31  ;;  %v677_v31 = vshrl.u32 %v15865_v58, 16  ;;  %v15922_v62 = vsel %vm19259_vm0, %v687_v53, %v691_v49  ;;  %v15957_v53 = vmax.f32 %v11649_v38, 0.0 }
  0x9b   : > { %12674 = vmatprep.subr.bf16.mxu0 %v15241_v57 }
  0x9c   : > { %v679_v47 = vor.u32 %v677_v31, %v675_v23  ;;  %v15942_v23 = vld [vmem:[#allocation5 + $0xc0] sm:$0xff]   ;;  %19498 = vst [vmem:[#allocation38_spill] sm:$0xff] %v15957_v53 }
  0x9d   : > { %12599 = vmatmul.mubr.bf16.gmra.mrb[8].mxu0 %v15875_v2 }
  0x9e   : > { %12602 = vmatprep.mubr.bf16.mxu0 %v15882_v7  ;;  %12675 = vmatpush3.bf16.msra.mxu0 %v15241_v57  ;;  %v15919_v57 = vsel %vm19259_vm0, %v679_v47, %v683_v43  ;;  %v11773_v43 = vld [vmem:[%s15760_s10 + $0x78] sm:$0xff]  }
  0x9f   : > { %12676 = vmatprep.subr.bf16.mxu0 %v15242_v1 }
  0xa2   : > { %12677 = vmatpush3.bf16.msra.mxu0 %v15242_v1  ;;  %v15930_v1 = vsel %vm19259_vm0, %v695_v63, %v15926_v0  ;;  %v11653_v63 = vunpack.c.l.bf16 %v11773_v43 }
  0xa3   : > { %12678 = vmatprep.subr.bf16.mxu0 %v15243_v24 }
  0xa5   : > { %12603 = vmatmul.mubr.bf16.gmra.mrb[12].mxu0 %v15902_v30 }
  0xa6   : > { %12606 = vmatprep.mubr.bf16.mxu0 %v15907_v36  ;;  %12679 = vmatpush3.bf16.msra.mxu0 %v15243_v24  ;;  %v11771_v24 = vld [vmem:[%s15760_s10 + $0x68] sm:$0xff]  }
  0xa7   : > { %12680 = vmatprep.subr.bf16.mxu0 %v15244_v40  ;;  %v11645_v31 = vunpack.c.l.bf16 %v11771_v24  ;;  %v11646_v35 = vunpack.c.h.bf16 %v11771_v24  ;;  %v11776_v24 = vld [vmem:[%s15760_s10 + $0x90] sm:$0xff]  }
  0xa9   : > { %v15951_v47 = vmax.f32 %v11645_v31, 0.0  ;;  %v15953_v49 = vmax.f32 %v11646_v35, 0.0 }
  0xaa   : > { %12681 = vmatpush3.bf16.msra.mxu0 %v15244_v40  ;;  %v11650_v40 = vunpack.c.h.bf16 %v11772_v26 }
  0xab   : > { %12758 = vmatprep.subr.bf16.mxu0 %v15245_v50  ;;  %19496 = vst [vmem:[#allocation36_spill] sm:$0xff] %v15951_v47  ;;  %19497 = vst [vmem:[#allocation37_spill] sm:$0xff] %v15953_v49  ;;  %v15963_v56 = vpack.c.bf16 %v15953_v49, %v15951_v47 }
  0xac   : > { %v15959_v55 = vmax.f32 %v11650_v40, 0.0 }
  0xad   : > { %12607 = vmatmul.mubr.bf16.gmra.mrb[16].mxu0 %v15919_v57  ;;  %19500 = vst [vmem:[#allocation40_spill] sm:$0xff] %v15963_v56 }
  0xae   : > { %12610 = vmatprep.mubr.bf16.mxu0 %v15922_v62  ;;  %19499 = vst [vmem:[#allocation39_spill] sm:$0xff] %v15959_v55 }
  0xb5   : > { %12611 = vmatmul.mubr.bf16.gmra.mrb[20].mxu0 %v15930_v1 }
  0xb6   : > { %12682 = vmatprep.mubr.bf16.mxu0 %v15774_v21 }
  0xbd   : > { %12683 = vmatmul.mubr.bf16.vlgmr.msra.gmra.mrb[24].mxu0 %v15776_v22 }
  0xbe   : > { %12759 = vmatpush3.bf16.msra.mxu0 %v15245_v50  ;;  %12686 = vmatprep.mubr.bf16.mxu0 %v15783_v37  ;;  %v11774_v50 = vld [vmem:[%s15760_s10 + $0x80] sm:$0xff]  }
  0xbf   : > { %12760 = vmatprep.subr.bf16.mxu0 %v15246_v8 }
  0xc2   : > { %12761 = vmatpush3.bf16.msra.mxu0 %v15246_v8  ;;  %v11654_v8 = vunpack.c.h.bf16 %v11773_v43 }
  0xc3   : > { %12762 = vmatprep.subr.bf16.mxu0 %v15247_v9 }
  0xc5   : > { %12687 = vmatmul.mubr.bf16.gmra.mrb[4].mxu0 %v15785_v39 }
  0xc6   : > { %12690 = vmatprep.mubr.bf16.mxu0 %v15803_v54  ;;  %12763 = vmatpush3.bf16.msra.mxu0 %v15247_v9  ;;  %v15967_v9 = vpack.c.bf16 %v15959_v55, %v15957_v53 }
  0xc7   : > { %12764 = vmatprep.subr.bf16.mxu0 %v15248_v14 }
  0xc8   : > { %19501 = vst [vmem:[#allocation41_spill] sm:$0xff] %v15967_v9 }
  0xca   : > { %12765 = vmatpush3.bf16.msra.mxu0 %v15248_v14  ;;  %v11657_v14 = vunpack.c.l.bf16 %v11774_v50 }
  0xcb   : > { %12766 = vmatprep.subr.bf16.mxu0 %v15249_v15 }
  0xcc   : > { %v15977_v26 = vmax.f32 %v11657_v14, 0.0 }
  0xcd   : > { %12691 = vmatmul.mubr.bf16.gmra.mrb[8].mxu0 %v15808_v60 }
  0xce   : > { %12694 = vmatprep.mubr.bf16.mxu0 %v15830_v17  ;;  %12767 = vmatpush3.bf16.msra.mxu0 %v15249_v15  ;;  %v11658_v15 = vunpack.c.h.bf16 %v11774_v50  ;;  %19504 = vst [vmem:[#allocation44_spill] sm:$0xff] %v15977_v26  ;;  %v11665_v50 = vunpack.c.l.bf16 %v11776_v24 }
  0xcf   : > { %12768 = vmatprep.subr.bf16.mxu0 %v15250_v16 }
  0xd0   : > { %v15979_v31 = vmax.f32 %v11658_v15, 0.0  ;;  %v15995_v15 = vmax.f32 %v11665_v50, 0.0 }
  0xd2   : > { %12769 = vmatpush3.bf16.msra.mxu0 %v15250_v16  ;;  %v11775_v16 = vld [vmem:[%s15760_s10 + $0x88] sm:$0xff]   ;;  %19505 = vst [vmem:[#allocation45_spill] sm:$0xff] %v15979_v31  ;;  %v15987_v43 = vpack.c.bf16 %v15979_v31, %v15977_v26  ;;  %19510 = vst [vmem:[#allocation50_spill] sm:$0xff] %v15995_v15 }
  0xd3   : > { %12770 = vmatprep.subr.bf16.mxu0 %v15251_v18  ;;  %v11661_v38 = vunpack.c.l.bf16 %v11775_v16  ;;  %v11662_v40 = vunpack.c.h.bf16 %v11775_v16  ;;  %v11777_v16 = vld [vmem:[%s15760_s10 + $0x98] sm:$0xff]  }
  0xd4   : > { %19507 = vst [vmem:[#allocation47_spill] sm:$0xff] %v15987_v43  ;;  %v11670_v26 = vunpack.c.h.bf16 %v11777_v16 }
  0xd5   : > { %12695 = vmatmul.mubr.bf16.gmra.mrb[12].mxu0 %v15835_v25  ;;  %v15992_v14 = vmax.f32 %v11662_v40, 0.0 }
  0xd6   : > { %12698 = vmatprep.mubr.bf16.mxu0 %v15860_v48  ;;  %12771 = vmatpush3.bf16.msra.mxu0 %v15251_v18  ;;  %v15971_v18 = vmax.f32 %v11653_v63, 0.0  ;;  %v11666_v63 = vunpack.c.h.bf16 %v11776_v24  ;;  %v11669_v24 = vunpack.c.l.bf16 %v11777_v16  ;;  %v11779_v16 = vld [vmem:[%s15760_s10 + $0xa8] sm:$0xff]  }
  0xd7   : > { %12772 = vmatprep.subr.bf16.mxu0 %v15252_v20  ;;  %19509 = vst [vmem:[#allocation49_spill] sm:$0xff] %v15992_v14 }
  0xd8   : > { %19502 = vst [vmem:[#allocation42_spill] sm:$0xff] %v15971_v18  ;;  %v15997_v55 = vmax.f32 %v11666_v63, 0.0  ;;  %v16010_v50 = vmax.f32 %v11669_v24, 0.0  ;;  %v16012_v63 = vmax.f32 %v11670_v26, 0.0 }
  0xda   : > { %12773 = vmatpush3.bf16.msra.mxu0 %v15252_v20  ;;  %v15973_v20 = vmax.f32 %v11654_v8, 0.0  ;;  %v15990_v8 = vmax.f32 %v11661_v38, 0.0  ;;  %19511 = vst [vmem:[#allocation51_spill] sm:$0xff] %v15997_v55  ;;  %v16007_v38 = vpack.c.bf16 %v15997_v55, %v15995_v15  ;;  %19514 = vst [vmem:[#allocation54_spill] sm:$0xff] %v16010_v50  ;;  %v16023_v55 = vpack.c.bf16 %v16012_v63, %v16010_v50  ;;  %v11782_v50 = vld [vmem:[%s15760_s10 + $0xc0] sm:$0xff]  }
  0xdb   : > { %12850 = vmatprep.subr.bf16.mxu0 %v15942_v23  ;;  %19515 = vst [vmem:[#allocation55_spill] sm:$0xff] %v16012_v63  ;;  %v11678_v15 = vunpack.c.h.bf16 %v11779_v16  ;;  %v11690_v47 = vunpack.c.h.bf16 %v11782_v50 }
  0xdc   : > { %19503 = vst [vmem:[#allocation43_spill] sm:$0xff] %v15973_v20  ;;  %v15983_v35 = vpack.c.bf16 %v15973_v20, %v15971_v18  ;;  %19508 = vst [vmem:[#allocation48_spill] sm:$0xff] %v15990_v8  ;;  %v11778_v20 = vld [vmem:[%s15760_s10 + $0xa0] sm:$0xff]   ;;  %v16003_v31 = vpack.c.bf16 %v15992_v14, %v15990_v8  ;;  %v11780_v8 = vld [vmem:[%s15760_s10 + $0xb0] sm:$0xff]  }
  0xdd   : > { %12699 = vmatmul.mubr.bf16.gmra.mrb[16].mxu0 %v15865_v58  ;;  %19513 = vst [vmem:[#allocation53_spill] sm:$0xff] %v16007_v38  ;;  %v11673_v40 = vunpack.c.l.bf16 %v11778_v20  ;;  %v11674_v18 = vunpack.c.h.bf16 %v11778_v20  ;;  %19518 = vst [vmem:[#allocation58_spill] sm:$0xff] %v16023_v55  ;;  %v11677_v20 = vunpack.c.l.bf16 %v11779_v16  ;;  %v11681_v24 = vunpack.c.l.bf16 %v11780_v8  ;;  %v11781_v16 = vld [vmem:[%s15760_s10 + $0xb8] sm:$0xff]  }
  0xde   : > { %12702 = vmatprep.mubr.bf16.mxu0 %v15888_v10  ;;  %19506 = vst [vmem:[#allocation46_spill] sm:$0xff] %v15983_v35  ;;  %19512 = vst [vmem:[#allocation52_spill] sm:$0xff] %v16003_v31  ;;  %v11682_v29 = vunpack.c.h.bf16 %v11780_v8  ;;  %v11685_v8 = vunpack.c.l.bf16 %v11781_v16 }
  0xdf   : > { %v16015_v53 = vmax.f32 %v11673_v40, 0.0  ;;  %v16017_v14 = vmax.f32 %v11674_v18, 0.0  ;;  %v16030_v40 = vmax.f32 %v11677_v20, 0.0  ;;  %v16032_v18 = vmax.f32 %v11678_v15, 0.0 }
  0xe0   : > { %v16035_v49 = vmax.f32 %v11681_v24, 0.0  ;;  %v16037_v63 = vmax.f32 %v11682_v29, 0.0  ;;  %v11689_v20 = vunpack.c.l.bf16 %v11782_v50  ;;  %v16050_v24 = vmax.f32 %v11685_v8, 0.0 }
  0xe1   : > { %19516 = vst [vmem:[#allocation56_spill] sm:$0xff] %v16015_v53  ;;  %19517 = vst [vmem:[#allocation57_spill] sm:$0xff] %v16017_v14  ;;  %v16027_v26 = vpack.c.bf16 %v16017_v14, %v16015_v53  ;;  %v16043_v14 = vpack.c.bf16 %v16032_v18, %v16030_v40  ;;  %v11686_v53 = vunpack.c.h.bf16 %v11781_v16  ;;  %v11783_v16 = vld [vmem:[%s15760_s10 + $0xc8] sm:$0xff]  }
  0xe2   : > { %19520 = vst [vmem:[#allocation60_spill] sm:$0xff] %v16030_v40  ;;  %19521 = vst [vmem:[#allocation61_spill] sm:$0xff] %v16032_v18  ;;  %v16047_v15 = vpack.c.bf16 %v16037_v63, %v16035_v49  ;;  %v16055_v27 = vmax.f32 %v11689_v20, 0.0  ;;  %v16057_v18 = vmax.f32 %v11690_v47, 0.0  ;;  %v11784_v40 = vld [vmem:[%s15760_s10 + $0xd0] sm:$0xff]   ;;  %v11693_v50 = vunpack.c.l.bf16 %v11783_v16 }
  0xe3   : > { %19519 = vst [vmem:[#allocation59_spill] sm:$0xff] %v16027_v26  ;;  %19522 = vst [vmem:[#allocation62_spill] sm:$0xff] %v16035_v49  ;;  %v16052_v29 = vmax.f32 %v11686_v53, 0.0  ;;  %v11694_v49 = vunpack.c.h.bf16 %v11783_v16  ;;  %v11697_v8 = vunpack.c.l.bf16 %v11784_v40  ;;  %v11698_v61 = vunpack.c.h.bf16 %v11784_v40  ;;  %v11785_v16 = vld [vmem:[%s15760_s10 + $0xd8] sm:$0xff]  }
  0xe4   : > { %19523 = vst [vmem:[#allocation63_spill] sm:$0xff] %v16037_v63  ;;  %19524 = vst [vmem:[#allocation64_spill] sm:$0xff] %v16043_v14  ;;  %v16067_v53 = vpack.c.bf16 %v16057_v18, %v16055_v27  ;;  %v16070_v20 = vmax.f32 %v11693_v50, 0.0  ;;  %v11701_v40 = vunpack.c.l.bf16 %v11785_v16 }
  0xe5   : > { %12703 = vmatmul.mubr.bf16.gmra.mrb[20].mxu0 %v15894_v19  ;;  %19525 = vst [vmem:[#allocation65_spill] sm:$0xff] %v16047_v15  ;;  %19526 = vst [vmem:[#allocation66_spill] sm:$0xff] %v16050_v24  ;;  %v16063_v63 = vpack.c.bf16 %v16052_v29, %v16050_v24  ;;  %v16072_v47 = vmax.f32 %v11694_v49, 0.0  ;;  %v16075_v6 = vmax.f32 %v11697_v8, 0.0  ;;  %v11786_v24 = vld [vmem:[%s15760_s10 + $0xe0] sm:$0xff]  }
  0xe6   : > { %12706 = vmatprep.mubr.bf16.mxu0 %v15913_v46  ;;  %19527 = vst [vmem:[#allocation67_spill] sm:$0xff] %v16052_v29  ;;  %19528 = vst [vmem:[#allocation68_spill] sm:$0xff] %v16055_v27  ;;  %v16077_v29 = vmax.f32 %v11698_v61, 0.0  ;;  %v11702_v27 = vunpack.c.h.bf16 %v11785_v16  ;;  %v11705_v50 = vunpack.c.l.bf16 %v11786_v24  ;;  %v11706_v3 = vunpack.c.h.bf16 %v11786_v24  ;;  %v11787_v16 = vld [vmem:[%s15760_s10 + $0xe8] sm:$0xff]  }
  0xe7   : > { %19529 = vst [vmem:[#allocation69_spill] sm:$0xff] %v16057_v18  ;;  %19530 = vst [vmem:[#allocation70_spill] sm:$0xff] %v16063_v63  ;;  %v16083_v18 = vpack.c.bf16 %v16072_v47, %v16070_v20  ;;  %v16090_v8 = vmax.f32 %v11701_v40, 0.0  ;;  %v11709_v24 = vunpack.c.l.bf16 %v11787_v16 }
  0xe8   : > { %19531 = vst [vmem:[#allocation71_spill] sm:$0xff] %v16067_v53  ;;  %19532 = vst [vmem:[#allocation72_spill] sm:$0xff] %v16070_v20  ;;  %v16087_v49 = vpack.c.bf16 %v16077_v29, %v16075_v6  ;;  %v16092_v61 = vmax.f32 %v11702_v27, 0.0  ;;  %v16095_v59 = vmax.f32 %v11705_v50, 0.0  ;;  %v11788_v20 = vld [vmem:[%s15760_s10 + $0xf0] sm:$0xff]  }
  0xe9   : > { %19533 = vst [vmem:[#allocation73_spill] sm:$0xff] %v16072_v47  ;;  %19534 = vst [vmem:[#allocation74_spill] sm:$0xff] %v16075_v6  ;;  %v16097_v47 = vmax.f32 %v11706_v3, 0.0  ;;  %v11710_v6 = vunpack.c.h.bf16 %v11787_v16  ;;  %v11713_v40 = vunpack.c.l.bf16 %v11788_v20  ;;  %v11714_v32 = vunpack.c.h.bf16 %v11788_v20  ;;  %v11789_v16 = vld [vmem:[%s15760_s10 + $0xf8] sm:$0xff]  }
  0xea   : > { %19535 = vst [vmem:[#allocation75_spill] sm:$0xff] %v16077_v29  ;;  %19536 = vst [vmem:[#allocation76_spill] sm:$0xff] %v16083_v18  ;;  %v16103_v29 = vpack.c.bf16 %v16092_v61, %v16090_v8  ;;  %v16110_v50 = vmax.f32 %v11709_v24, 0.0  ;;  %v11717_v20 = vunpack.c.l.bf16 %v11789_v16 }
  0xeb   : > { %19537 = vst [vmem:[#allocation77_spill] sm:$0xff] %v16087_v49  ;;  %19538 = vst [vmem:[#allocation78_spill] sm:$0xff] %v16090_v8  ;;  %v16107_v27 = vpack.c.bf16 %v16097_v47, %v16095_v59  ;;  %v16112_v3 = vmax.f32 %v11710_v6, 0.0  ;;  %v16115_v42 = vmax.f32 %v11713_v40, 0.0  ;;  %v11790_v8 = vld [vmem:[%s15760_s10 + $0x100] sm:$0xff]  }
  0xec   : > { %19539 = vst [vmem:[#allocation79_spill] sm:$0xff] %v16092_v61  ;;  %19540 = vst [vmem:[#allocation80_spill] sm:$0xff] %v16095_v59  ;;  %v16117_v61 = vmax.f32 %v11714_v32, 0.0  ;;  %v11718_v59 = vunpack.c.h.bf16 %v11789_v16  ;;  %v11721_v24 = vunpack.c.l.bf16 %v11790_v8  ;;  %v11722_v41 = vunpack.c.h.bf16 %v11790_v8  ;;  %v11791_v16 = vld [vmem:[%s15760_s10 + $0x108] sm:$0xff]  }
  0xed   : > { %12707 = vmatmul.mubr.bf16.gmra.mrb[28].mxu0 %v15963_v56  ;;  %19541 = vst [vmem:[#allocation81_spill] sm:$0xff] %v16097_v47  ;;  %19542 = vst [vmem:[#allocation82_spill] sm:$0xff] %v16103_v29  ;;  %v16123_v47 = vpack.c.bf16 %v16112_v3, %v16110_v50  ;;  %v16130_v40 = vmax.f32 %v11717_v20, 0.0  ;;  %v11725_v8 = vunpack.c.l.bf16 %v11791_v16 }
  0xee   : > { %12710 = vmatprep.mubr.bf16.mxu0 %v15967_v9  ;;  %19543 = vst [vmem:[#allocation83_spill] sm:$0xff] %v16107_v27  ;;  %19544 = vst [vmem:[#allocation84_spill] sm:$0xff] %v16110_v50  ;;  %v16127_v6 = vpack.c.bf16 %v16117_v61, %v16115_v42  ;;  %v16132_v32 = vmax.f32 %v11718_v59, 0.0  ;;  %v16135_v28 = vmax.f32 %v11721_v24, 0.0  ;;  %v11792_v50 = vld [vmem:[%s15760_s10 + $0x110] sm:$0xff]  }
  0xef   : > { %19545 = vst [vmem:[#allocation85_spill] sm:$0xff] %v16112_v3  ;;  %19546 = vst [vmem:[#allocation86_spill] sm:$0xff] %v16115_v42  ;;  %v16137_v3 = vmax.f32 %v11722_v41, 0.0  ;;  %v11726_v42 = vunpack.c.h.bf16 %v11791_v16  ;;  %v11729_v20 = vunpack.c.l.bf16 %v11792_v50  ;;  %v11730_v5 = vunpack.c.h.bf16 %v11792_v50  ;;  %v11793_v16 = vld [vmem:[%s15760_s10 + $0x118] sm:$0xff]  }
  0xf0   : > { %19547 = vst [vmem:[#allocation87_spill] sm:$0xff] %v16117_v61  ;;  %19548 = vst [vmem:[#allocation88_spill] sm:$0xff] %v16123_v47  ;;  %v16143_v61 = vpack.c.bf16 %v16132_v32, %v16130_v40  ;;  %v16150_v24 = vmax.f32 %v11725_v8, 0.0  ;;  %v11733_v50 = vunpack.c.l.bf16 %v11793_v16 }
  0xf1   : > { %19549 = vst [vmem:[#allocation89_spill] sm:$0xff] %v16127_v6  ;;  %19550 = vst [vmem:[#allocation90_spill] sm:$0xff] %v16130_v40  ;;  %v16147_v59 = vpack.c.bf16 %v16137_v3, %v16135_v28  ;;  %v16152_v41 = vmax.f32 %v11726_v42, 0.0  ;;  %v16155_v13 = vmax.f32 %v11729_v20, 0.0  ;;  %v11794_v40 = vld [vmem:[%s15760_s10 + $0x120] sm:$0xff]  }
  0xf2   : > { %19551 = vst [vmem:[#allocation91_spill] sm:$0xff] %v16132_v32  ;;  %19552 = vst [vmem:[#allocation92_spill] sm:$0xff] %v16135_v28  ;;  %v16157_v32 = vmax.f32 %v11730_v5, 0.0  ;;  %v11734_v28 = vunpack.c.h.bf16 %v11793_v16  ;;  %v11737_v42 = vunpack.c.l.bf16 %v11794_v40  ;;  %v11738_v12 = vunpack.c.h.bf16 %v11794_v40 }
  0xf3   : > { %19553 = vst [vmem:[#allocation93_spill] sm:$0xff] %v16137_v3  ;;  %19554 = vst [vmem:[#allocation94_spill] sm:$0xff] %v16143_v61  ;;  %v16163_v3 = vpack.c.bf16 %v16152_v41, %v16150_v24  ;;  %v16170_v20 = vmax.f32 %v11733_v50, 0.0 }
  0xf4   : > { %19555 = vst [vmem:[#allocation95_spill] sm:$0xff] %v16150_v24  ;;  %19556 = vst [vmem:[#allocation96_spill] sm:$0xff] %v16152_v41  ;;  %v16167_v8 = vpack.c.bf16 %v16157_v32, %v16155_v13  ;;  %v16172_v5 = vmax.f32 %v11734_v28, 0.0  ;;  %v16175_v4 = vmax.f32 %v11737_v42, 0.0  ;;  %v516_v41 = vmax.f32 %v11738_v12, 0.0  ;;  %v11795_v24 = vld [vmem:[%s15760_s10 + $0x128] sm:$0xff]  }
  0xf5   : > { %12711 = vmatmul.mubr.bf16.gmra.mrb[32].mxu0 %v15983_v35  ;;  %19557 = vst [vmem:[#allocation97_spill] sm:$0xff] %v16155_v13  ;;  %19558 = vst [vmem:[#allocation98_spill] sm:$0xff] %v16157_v32  ;;  %v11741_v32 = vunpack.c.l.bf16 %v11795_v24  ;;  %v11742_v13 = vunpack.c.h.bf16 %v11795_v24  ;;  %v1768_v42 = vrot.slane %v15774_v21, 1  ;;  %v1769_v12 = vrot.slane %v15776_v22, 1  ;;  %v15254_v21 = vld [vmem:[#allocation5 + $0xc8] sm:$0xff]  }
  0xf6   : > { %12714 = vmatprep.mubr.bf16.mxu0 %v15987_v43  ;;  %19559 = vst [vmem:[#allocation99_spill] sm:$0xff] %v16163_v3  ;;  %19560 = vst [vmem:[#allocation100_spill] sm:$0xff] %v16170_v20  ;;  %v16180_v16 = vpack.c.bf16 %v16172_v5, %v16170_v20  ;;  %v16183_v40 = vpack.c.bf16 %v516_v41, %v16175_v4  ;;  %v1771_v24 = vrot.slane %v15783_v37, 1  ;;  %v1773_v41 = vrot.slane %v15785_v39, 1 }
  0xf7   : > { %19561 = vst [vmem:[#allocation101_spill] sm:$0xff] %v16172_v5  ;;  %19562 = vst [vmem:[#allocation102_spill] sm:$0xff] %v16175_v4  ;;  %v517_v50 = vmax.f32 %v11741_v32, 0.0  ;;  %v518_v28 = vmax.f32 %v11742_v13, 0.0  ;;  %v1770_v5 = vsel %vm19258_vm1, %v1768_v42, %v1769_v12  ;;  %v1775_v22 = vrot.slane %v15803_v54, 1 }
  0xf8   : > { %v1772_v13 = vsel %vm19258_vm1, %v1769_v12, %v1771_v24  ;;  %v16197_v32 = vsel %vm19258_vm1, %v1771_v24, %v1773_v41  ;;  %v15256_v12 = vld [vmem:[#allocation5 + $0xd8] sm:$0xff]   ;;  %v1781_v24 = vrot.slane %v15835_v25, 1 }
  0xf9   : > { %v16189_v45 = vpack.c.bf16 %v518_v28, %v517_v50  ;;  %v1777_v50 = vrot.slane %v15808_v60, 1  ;;  %v16204_v28 = vsel %vm19258_vm1, %v1773_v41, %v1775_v22 }
  0xfb   : > { %v16207_v42 = vsel %vm19258_vm1, %v1775_v22, %v1777_v50 }
  0xfc   : > { %19563 = vst [vmem:[#allocation103_spill] sm:$0xff] %v16207_v42 }
  0xfd   : > { %12715 = vmatmul.mubr.bf16.gmra.mrb[36].mxu0 %v16003_v31 }
  0xfe   : > { %12718 = vmatprep.mubr.bf16.mxu0 %v16007_v38 }
 0x105   : > { %12719 = vmatmul.mubr.bf16.gmra.mrb[40].mxu0 %v16023_v55 }
 0x106   : > { %12722 = vmatprep.mubr.bf16.mxu0 %v16027_v26 }
 0x10d   : > { %12723 = vmatmul.mubr.bf16.gmra.mrb[44].mxu0 %v16043_v14 }
 0x10e   : > { %12726 = vmatprep.mubr.bf16.mxu0 %v16047_v15 }
 0x115   : > { %12727 = vmatmul.mubr.bf16.gmra.mrb[48].mxu0 %v16063_v63 }
 0x116   : > { %12730 = vmatprep.mubr.bf16.mxu0 %v16067_v53 }
 0x11d   : > { %12731 = vmatmul.mubr.bf16.gmra.mrb[52].mxu0 %v16083_v18 }
 0x11e   : > { %12734 = vmatprep.mubr.bf16.mxu0 %v16087_v49 }
 0x125   : > { %12735 = vmatmul.mubr.bf16.gmra.mrb[56].mxu0 %v16103_v29 }
 0x126   : > { %12738 = vmatprep.mubr.bf16.mxu0 %v16107_v27 }
 0x12d   : > { %12739 = vmatmul.mubr.bf16.gmra.mrb[60].mxu0 %v16123_v47 }
 0x12e   : > { %12742 = vmatprep.mubr.bf16.mxu0 %v16127_v6 }
 0x135   : > { %12743 = vmatmul.mubr.bf16.gmra.mrb[64].mxu0 %v16143_v61 }
 0x136   : > { %12746 = vmatprep.mubr.bf16.mxu0 %v16147_v59 }
 0x13d   : > { %12747 = vmatmul.mubr.bf16.gmra.mrb[68].mxu0 %v16163_v3 }
 0x13e   : > { %12750 = vmatprep.mubr.bf16.mxu0 %v16167_v8 }
 0x145   : > { %12751 = vmatmul.mubr.bf16.gmra.mrb[72].mxu0 %v16180_v16 }
 0x146   : > { %12754 = vmatprep.mubr.bf16.mxu0 %v16183_v40 }
 0x14d   : > { %12755 = vmatmul.mubr.bf16.gmra.mrb[76].mxu0 %v16189_v45 }
 0x14e   : > { %12774 = vmatprep.mubr.bf16.mxu0 %v1770_v5  ;;  %v15255_v5 = vld [vmem:[#allocation5 + $0xd0] sm:$0xff]  }
 0x155   : > { %12775 = vmatmul.mubr.bf16.vlgmr.msra.gmra.mrb[80].mxu0 %v1772_v13  ;;  %v15257_v13 = vld [vmem:[#allocation5 + $0xe0] sm:$0xff]  }
 0x156   : > { %12851 = vmatpush3.bf16.msra.mxu0 %v15942_v23  ;;  %12778 = vmatprep.mubr.bf16.mxu0 %v16197_v32  ;;  %v1779_v23 = vrot.slane %v15830_v17, 1 }
 0x157   : > { %12852 = vmatprep.subr.bf16.mxu0 %v15254_v21 }
 0x158   : > { %v16217_v44 = vsel %vm19258_vm1, %v1779_v23, %v1781_v24 }
 0x159   : > { %19565 = vst [vmem:[#allocation105_spill] sm:$0xff] %v16217_v44 }
 0x15a   : > { %12853 = vmatpush3.bf16.msra.mxu0 %v15254_v21  ;;  %v16214_v21 = vsel %vm19258_vm1, %v1777_v50, %v1779_v23  ;;  %v15260_v23 = vld [vmem:[#allocation5 + $0xf8] sm:$0xff]  }
 0x15b   : > { %12854 = vmatprep.subr.bf16.mxu0 %v15255_v5  ;;  %19564 = vst [vmem:[#allocation104_spill] sm:$0xff] %v16214_v21 }
 0x15d   : > { %12779 = vmatmul.mubr.bf16.gmra.mrb[4].mxu0 %v16204_v28 }
 0x15e   : > { %12782 = vmatprep.mubr.bf16.mxu0 %v16207_v42  ;;  %12855 = vmatpush3.bf16.msra.mxu0 %v15255_v5  ;;  %v1783_v5 = vrot.slane %v15860_v48, 1 }
 0x15f   : > { %12856 = vmatprep.subr.bf16.mxu0 %v15256_v12 }
 0x160   : > { %v12592_v4 = vpop.f32.mrb[0].mxu0  ;;  %v16224_v50 = vsel %vm19258_vm1, %v1781_v24, %v1783_v5 }
 0x161   : > { %v1029_v41 = vpop.f32.mrb[1].mxu0  ;;  %v1785_v4 = vrot.slane %v15865_v58, 1  ;;  %19566 = vst [vmem:[#allocation106_spill] sm:$0xff] %v16224_v50 }
 0x162   : > { %v12593_v20 = vpop.f32.mrb[2].mxu0  ;;  %12857 = vmatpush3.bf16.msra.mxu0 %v15256_v12  ;;  %v1787_v41 = vrot.slane %v15888_v10, 1 }
 0x163   : > { %v1032_v22 = vpop.f32.mrb[3].mxu0  ;;  %12858 = vmatprep.subr.bf16.mxu0 %v15257_v13  ;;  %v15259_v20 = vld [vmem:[#allocation5 + $0xf0] sm:$0xff]   ;;  %v16227_v12 = vsel %vm19258_vm1, %v1783_v5, %v1785_v4  ;;  %v1791_v5 = vrot.slane %v15913_v46, 1 }
 0x164   : > { %19567 = vst [vmem:[#allocation107_spill] sm:$0xff] %v16227_v12  ;;  %v16233_v22 = vld [vmem:[#allocation5 + $0x100] sm:$0xff]   ;;  %v16236_v24 = vsel %vm19258_vm1, %v1785_v4, %v1787_v41 }
 0x165   : > { %12783 = vmatmul.mubr.bf16.gmra.mrb[8].mxu0 %v16214_v21  ;;  %19568 = vst [vmem:[#allocation108_spill] sm:$0xff] %v16236_v24 }
 0x166   : > { %12786 = vmatprep.mubr.bf16.mxu0 %v16217_v44  ;;  %12859 = vmatpush3.bf16.msra.mxu0 %v15257_v13  ;;  %v1789_v13 = vrot.slane %v15894_v19, 1 }
 0x167   : > { %12860 = vmatprep.subr.bf16.mxu0 %v15258_v52 }
 0x168   : > { %v16247_v51 = vsel %vm19258_vm1, %v1789_v13, %v1791_v5 }
 0x169   : > { %19570 = vst [vmem:[#allocation110_spill] sm:$0xff] %v16247_v51 }
 0x16a   : > { %12861 = vmatpush3.bf16.msra.mxu0 %v15258_v52  ;;  %v16239_v52 = vsel %vm19258_vm1, %v1787_v41, %v1789_v13  ;;  %v1797_v41 = vrot.slane %v15983_v35, 1  ;;  %v1799_v13 = vrot.slane %v15987_v43, 1 }
 0x16b   : > { %12862 = vmatprep.subr.bf16.mxu0 %v15259_v20  ;;  %19569 = vst [vmem:[#allocation109_spill] sm:$0xff] %v16239_v52 }
 0x16d   : > { %12787 = vmatmul.mubr.bf16.gmra.mrb[12].mxu0 %v16224_v50 }
 0x16e   : > { %12790 = vmatprep.mubr.bf16.mxu0 %v16227_v12  ;;  %12863 = vmatpush3.bf16.msra.mxu0 %v15259_v20  ;;  %v1793_v20 = vrot.slane %v15963_v56, 1 }
 0x16f   : > { %12864 = vmatprep.subr.bf16.mxu0 %v15260_v23 }
 0x170   : > { %v16250_v4 = vsel %vm19258_vm1, %v1791_v5, %v1793_v20  ;;  %v1801_v5 = vrot.slane %v16003_v31, 1 }
 0x171   : > { %19571 = vst [vmem:[#allocation111_spill] sm:$0xff] %v16250_v4 }
 0x172   : > { %12865 = vmatpush3.bf16.msra.mxu0 %v15260_v23  ;;  %v1795_v23 = vrot.slane %v15967_v9, 1 }
 0x173   : > { %12942 = vmatprep.subr.bf16.mxu0 %v16233_v22 }
 0x175   : > { %12791 = vmatmul.mubr.bf16.gmra.mrb[16].mxu0 %v16236_v24  ;;  %v16260_v24 = vsel %vm19258_vm1, %v1795_v23, %v1797_v41 }
 0x176   : > { %12794 = vmatprep.mubr.bf16.mxu0 %v16239_v52  ;;  %v16257_v52 = vsel %vm19258_vm1, %v1793_v20, %v1795_v23  ;;  %19573 = vst [vmem:[#allocation113_spill] sm:$0xff] %v16260_v24  ;;  %v1803_v20 = vrot.slane %v16007_v38, 1  ;;  %v1805_v23 = vrot.slane %v16023_v55, 1 }
 0x177   : > { %19572 = vst [vmem:[#allocation112_spill] sm:$0xff] %v16257_v52 }
 0x178   : > { %v16277_v50 = vsel %vm19258_vm1, %v1801_v5, %v1803_v20 }
 0x17d   : > { %12795 = vmatmul.mubr.bf16.gmra.mrb[20].mxu0 %v16247_v51  ;;  %v16270_v51 = vsel %vm19258_vm1, %v1799_v13, %v1801_v5 }
 0x17e   : > { %12798 = vmatprep.mubr.bf16.mxu0 %v16250_v4  ;;  %v16267_v4 = vsel %vm19258_vm1, %v1797_v41, %v1799_v13  ;;  %19575 = vst [vmem:[#allocation115_spill] sm:$0xff] %v16270_v51  ;;  %v16280_v41 = vsel %vm19258_vm1, %v1803_v20, %v1805_v23  ;;  %v1807_v13 = vrot.slane %v16027_v26, 1  ;;  %v1815_v20 = vrot.slane %v16067_v53, 1 }
 0x17f   : > { %19574 = vst [vmem:[#allocation114_spill] sm:$0xff] %v16267_v4  ;;  %19576 = vst [vmem:[#allocation116_spill] sm:$0xff] %v16280_v41 }
 0x185   : > { %12799 = vmatmul.mubr.bf16.gmra.mrb[28].mxu0 %v16257_v52 }
 0x186   : > { %12802 = vmatprep.mubr.bf16.mxu0 %v16260_v24 }
 0x18d   : > { %12803 = vmatmul.mubr.bf16.gmra.mrb[32].mxu0 %v16267_v4  ;;  %v16287_v4 = vsel %vm19258_vm1, %v1805_v23, %v1807_v13  ;;  %v1817_v23 = vrot.slane %v16083_v18, 1 }
 0x18e   : > { %12806 = vmatprep.mubr.bf16.mxu0 %v16270_v51  ;;  %v1809_v51 = vrot.slane %v16043_v14, 1  ;;  %19577 = vst [vmem:[#allocation117_spill] sm:$0xff] %v16287_v4 }
 0x190   : > { %v12684_v52 = vpop.f32.mrb[24].mxu0 }
 0x191   : > { %v1411_v24 = vpop.f32.mrb[25].mxu0 }
 0x192   : > { %v12685_v12 = vpop.f32.mrb[26].mxu0  ;;  %v1813_v24 = vrot.slane %v16063_v63, 1 }
 0x193   : > { %v1414_v44 = vpop.f32.mrb[27].mxu0  ;;  %v16290_v12 = vsel %vm19258_vm1, %v1807_v13, %v1809_v51 }
 0x194   : > { %19578 = vst [vmem:[#allocation118_spill] sm:$0xff] %v16290_v12  ;;  %v1811_v44 = vrot.slane %v16047_v15, 1  ;;  %v16307_v13 = vsel %vm19258_vm1, %v1813_v24, %v1815_v20 }
 0x195   : > { %12807 = vmatmul.mubr.bf16.gmra.mrb[36].mxu0 %v16277_v50  ;;  %19581 = vst [vmem:[#allocation121_spill] sm:$0xff] %v16307_v13 }
 0x196   : > { %12810 = vmatprep.mubr.bf16.mxu0 %v16280_v41  ;;  %v16297_v52 = vsel %vm19258_vm1, %v1809_v51, %v1811_v44  ;;  %v16300_v5 = vsel %vm19258_vm1, %v1811_v44, %v1813_v24  ;;  %v1819_v51 = vrot.slane %v16087_v49, 1  ;;  %v1821_v44 = vrot.slane %v16103_v29, 1 }
 0x197   : > { %19579 = vst [vmem:[#allocation119_spill] sm:$0xff] %v16297_v52  ;;  %19580 = vst [vmem:[#allocation120_spill] sm:$0xff] %v16300_v5  ;;  %v1823_v24 = vrot.slane %v16107_v27, 1 }
 0x19d   : > { %12811 = vmatmul.mubr.bf16.gmra.mrb[40].mxu0 %v16287_v4 }
 0x19e   : > { %12814 = vmatprep.mubr.bf16.mxu0 %v16290_v12  ;;  %v16310_v12 = vsel %vm19258_vm1, %v1815_v20, %v1817_v23  ;;  %v1825_v20 = vrot.slane %v16123_v47, 1 }
 0x19f   : > { %19582 = vst [vmem:[#allocation122_spill] sm:$0xff] %v16310_v12 }
 0x1a5   : > { %12815 = vmatmul.mubr.bf16.gmra.mrb[44].mxu0 %v16297_v52  ;;  %v16320_v52 = vsel %vm19258_vm1, %v1819_v51, %v1821_v44 }
 0x1a6   : > { %12818 = vmatprep.mubr.bf16.mxu0 %v16300_v5  ;;  %v16317_v5 = vsel %vm19258_vm1, %v1817_v23, %v1819_v51  ;;  %19584 = vst [vmem:[#allocation124_spill] sm:$0xff] %v16320_v52  ;;  %v1827_v23 = vrot.slane %v16127_v6, 1  ;;  %v1829_v51 = vrot.slane %v16143_v61, 1 }
 0x1a7   : > { %19583 = vst [vmem:[#allocation123_spill] sm:$0xff] %v16317_v5 }
 0x1ad   : > { %12819 = vmatmul.mubr.bf16.gmra.mrb[48].mxu0 %v16307_v13  ;;  %v16330_v13 = vsel %vm19258_vm1, %v1823_v24, %v1825_v20 }
 0x1ae   : > { %12822 = vmatprep.mubr.bf16.mxu0 %v16310_v12  ;;  %v16327_v12 = vsel %vm19258_vm1, %v1821_v44, %v1823_v24  ;;  %19586 = vst [vmem:[#allocation126_spill] sm:$0xff] %v16330_v13  ;;  %v1831_v44 = vrot.slane %v16147_v59, 1  ;;  %v1833_v24 = vrot.slane %v16163_v3, 1 }
 0x1af   : > { %19585 = vst [vmem:[#allocation125_spill] sm:$0xff] %v16327_v12 }
 0x1b5   : > { %12823 = vmatmul.mubr.bf16.gmra.mrb[52].mxu0 %v16317_v5  ;;  %v16340_v5 = vsel %vm19258_vm1, %v1827_v23, %v1829_v51 }
 0x1b6   : > { %12826 = vmatprep.mubr.bf16.mxu0 %v16320_v52  ;;  %v16337_v52 = vsel %vm19258_vm1, %v1825_v20, %v1827_v23  ;;  %19588 = vst [vmem:[#allocation128_spill] sm:$0xff] %v16340_v5  ;;  %v1835_v20 = vrot.slane %v16167_v8, 1  ;;  %v1837_v23 = vrot.slane %v16180_v16, 1 }
 0x1b7   : > { %19587 = vst [vmem:[#allocation127_spill] sm:$0xff] %v16337_v52 }
 0x1bd   : > { %12827 = vmatmul.mubr.bf16.gmra.mrb[56].mxu0 %v16327_v12  ;;  %v16350_v12 = vsel %vm19258_vm1, %v1831_v44, %v1833_v24 }
 0x1be   : > { %12830 = vmatprep.mubr.bf16.mxu0 %v16330_v13  ;;  %v16347_v13 = vsel %vm19258_vm1, %v1829_v51, %v1831_v44  ;;  %19590 = vst [vmem:[#allocation130_spill] sm:$0xff] %v16350_v12  ;;  %v16364_v51 = vsel %vm19258_vm1, %v1835_v20, %v1837_v23  ;;  %v1839_v44 = vrot.slane %v16183_v40, 1 }
 0x1bf   : > { %19589 = vst [vmem:[#allocation129_spill] sm:$0xff] %v16347_v13  ;;  %19592 = vst [vmem:[#allocation132_spill] sm:$0xff] %v16364_v51 }
 0x1c0   : > { %v16375_v41 = vsel %vm19258_vm1, %v1837_v23, %v1839_v44  ;;  %v15262_v23 = vld [vmem:[#allocation5 + $0x108] sm:$0xff]  }
 0x1c1   : > { %19593 = vst [vmem:[#allocation133_spill] sm:$0xff] %v16375_v41 }
 0x1c5   : > { %12831 = vmatmul.mubr.bf16.gmra.mrb[60].mxu0 %v16337_v52  ;;  %v16357_v52 = vld [vmem:[%s15760_s10 + $0x130] sm:$0xff]  }
 0x1c6   : > { %12834 = vmatprep.mubr.bf16.mxu0 %v16340_v5  ;;  %v16360_v5 = vsel %vm19258_vm1, %v1833_v24, %v1835_v20  ;;  %v11745_v4 = vunpack.c.l.bf16 %v16357_v52 }
 0x1c7   : > { %19591 = vst [vmem:[#allocation131_spill] sm:$0xff] %v16360_v5 }
 0x1cd   : > { %12835 = vmatmul.mubr.bf16.gmra.mrb[64].mxu0 %v16347_v13  ;;  %v16372_v13 = vrot.slane %v16189_v45, 1 }
 0x1ce   : > { %12838 = vmatprep.mubr.bf16.mxu0 %v16350_v12  ;;  %v16369_v12 = vmax.f32 %v11745_v4, 0.0 }
 0x1cf   : > { %v16383_v20 = vsel %vm19258_vm1, %v1839_v44, %v16372_v13  ;;  %v15263_v44 = vld [vmem:[#allocation5 + $0x110] sm:$0xff]  }
 0x1d0   : > { %v16379_v24 = vpack.c.bf16 %v16369_v12, %v16369_v12  ;;  %19595 = vst [vmem:[#allocation135_spill] sm:$0xff] %v16383_v20 }
 0x1d2   : > { %19594 = vst [vmem:[#allocation134_spill] sm:$0xff] %v16379_v24  ;;  %v1843_v4 = vrot.slane %v16379_v24, 1 }
 0x1d5   : > { %12839 = vmatmul.mubr.bf16.gmra.mrb[68].mxu0 %v16360_v5 }
 0x1d6   : > { %12842 = vmatprep.mubr.bf16.mxu0 %v16364_v51  ;;  %v1844_v51 = vsel %vm19258_vm1, %v16372_v13, %v1843_v4  ;;  %v16400_v4 = vld [vmem:[#allocation5 + $0x140] sm:$0xff]  }
 0x1dd   : > { %12843 = vmatmul.mubr.bf16.gmra.mrb[84].mxu0 %v16375_v41 }
 0x1de   : > { %12846 = vmatprep.mubr.bf16.mxu0 %v16383_v20  ;;  %v15264_v20 = vld [vmem:[#allocation5 + $0x118] sm:$0xff]  }
 0x1e5   : > { %12847 = vmatmul.mubr.bf16.gmra.mrb[88].mxu0 %v1844_v51  ;;  %v15265_v51 = vld [vmem:[#allocation5 + $0x120] sm:$0xff]  }
 0x1e6   : > { %12866 = vmatprep.mubr.bf16.mxu0 %v15783_v37  ;;  %v15266_v37 = vld [vmem:[#allocation5 + $0x128] sm:$0xff]  }
 0x1ed   : > { %12867 = vmatmul.mubr.bf16.vlgmr.msra.gmra.mrb[92].mxu0 %v15785_v39  ;;  %v15267_v39 = vld [vmem:[#allocation5 + $0x130] sm:$0xff]  }
 0x1ee   : > { %12943 = vmatpush3.bf16.msra.mxu0 %v16233_v22  ;;  %12870 = vmatprep.mubr.bf16.mxu0 %v15803_v54  ;;  %v15268_v22 = vld [vmem:[#allocation5 + $0x138] sm:$0xff]  }
 0x1ef   : > { %12944 = vmatprep.subr.bf16.mxu0 %v15262_v23 }
 0x1f2   : > { %12945 = vmatpush3.bf16.msra.mxu0 %v15262_v23 }
 0x1f3   : > { %12946 = vmatprep.subr.bf16.mxu0 %v15263_v44 }
 0x1f5   : > { %12871 = vmatmul.mubr.bf16.gmra.mrb[4].mxu0 %v15808_v60 }
 0x1f6   : > { %12874 = vmatprep.mubr.bf16.mxu0 %v15830_v17  ;;  %12947 = vmatpush3.bf16.msra.mxu0 %v15263_v44 }
 0x1f7   : > { %12948 = vmatprep.subr.bf16.mxu0 %v15264_v20 }
 0x1fa   : > { %12949 = vmatpush3.bf16.msra.mxu0 %v15264_v20 }
 0x1fb   : > { %12950 = vmatprep.subr.bf16.mxu0 %v15265_v51 }
 0x1fd   : > { %12875 = vmatmul.mubr.bf16.gmra.mrb[8].mxu0 %v15835_v25 }
 0x1fe   : > { %12878 = vmatprep.mubr.bf16.mxu0 %v15860_v48  ;;  %12951 = vmatpush3.bf16.msra.mxu0 %v15265_v51 }
 0x1ff   : > { %12952 = vmatprep.subr.bf16.mxu0 %v15266_v37 }
 0x202   : > { %12953 = vmatpush3.bf16.msra.mxu0 %v15266_v37 }
 0x203   : > { %12954 = vmatprep.subr.bf16.mxu0 %v15267_v39 }
 0x205   : > { %12879 = vmatmul.mubr.bf16.gmra.mrb[12].mxu0 %v15865_v58 }
 0x206   : > { %12882 = vmatprep.mubr.bf16.mxu0 %v15888_v10  ;;  %12955 = vmatpush3.bf16.msra.mxu0 %v15267_v39  ;;  %v705_v10 = vshll.u32 %v15963_v56, 16 }
 0x207   : > { %12956 = vmatprep.subr.bf16.mxu0 %v15268_v22 }
 0x20a   : > { %12957 = vmatpush3.bf16.msra.mxu0 %v15268_v22 }
 0x20b   : > { %13034 = vmatprep.subr.bf16.mxu0 %v16400_v4 }
 0x20d   : > { %12883 = vmatmul.mubr.bf16.gmra.mrb[16].mxu0 %v15894_v19  ;;  %v701_v19 = vshrl.u32 %v15913_v46, 16 }
 0x20e   : > { %12886 = vmatprep.mubr.bf16.mxu0 %v15913_v46 }
 0x215   : > { %12887 = vmatmul.mubr.bf16.gmra.mrb[20].mxu0 %v15963_v56 }
 0x216   : > { %12890 = vmatprep.mubr.bf16.mxu0 %v15967_v9 }
 0x218   : > { %v12752_v20 = vpop.f32.mrb[72].mxu0 }
 0x219   : > { %v1683_v23 = vpop.f32.mrb[73].mxu0  ;;  %v709_v20 = vshrl.u32 %v15963_v56, 16 }
 0x21a   : > { %v12753_v44 = vpop.f32.mrb[74].mxu0  ;;  %v713_v23 = vshll.u32 %v15967_v9, 16 }
 0x21b   : > { %v1686_v51 = vpop.f32.mrb[75].mxu0  ;;  %v703_v44 = vor.u32 %v701_v19, %v15926_v0  ;;  %v725_v0 = vshrl.u32 %v15983_v35, 16 }
 0x21c   : > { %v707_v51 = vrot.slane %v705_v10, 1  ;;  %v717_v10 = vshrl.u32 %v15967_v9, 16 }
 0x21d   : > { %12891 = vmatmul.mubr.bf16.gmra.mrb[28].mxu0 %v15983_v35 }
 0x21e   : > { %12894 = vmatprep.mubr.bf16.mxu0 %v15987_v43 }
 0x220   : > { %v12756_v37 = vpop.f32.mrb[76].mxu0 }
 0x221   : > { %v1699_v39 = vpop.f32.mrb[77].mxu0  ;;  %v715_v37 = vrot.slane %v713_v23, 1 }
 0x222   : > { %v12757_v22 = vpop.f32.mrb[78].mxu0 }
 0x223   : > { %v1702_v24 = vpop.f32.mrb[79].mxu0  ;;  %v711_v22 = vor.u32 %v709_v20, %v707_v51  ;;  %v719_v20 = vor.u32 %v717_v10, %v715_v37  ;;  %v745_v10 = vshll.u32 %v16007_v38, 16 }
 0x224   : > { %v16417_v24 = vsel %vm19259_vm0, %v703_v44, %v707_v51 }
 0x225   : > { %12895 = vmatmul.mubr.bf16.gmra.mrb[32].mxu0 %v16003_v31  ;;  %12614 = vmatprep.mubr.bf16.mxu1 %v16417_v24  ;;  %v16421_v25 = vsel %vm19259_vm0, %v711_v22, %v715_v37  ;;  %v733_v37 = vshrl.u32 %v15987_v43, 16 }
 0x226   : > { %12898 = vmatprep.mubr.bf16.mxu0 %v16007_v38  ;;  %12615 = vmatmul.mubr.bf16.vlgmr.msra.gmra.mrb[0].mxu1 %v16421_v25 }
 0x228   : > { %v12776_v58 = vpop.f32.mrb[80].mxu0 }
 0x229   : > { %v1965_v39 = vpop.f32.mrb[81].mxu0  ;;  %v721_v58 = vshll.u32 %v15983_v35, 16  ;;  %v849_v35 = vshll.u32 %v16143_v61, 16 }
 0x22a   : > { %v12777_v48 = vpop.f32.mrb[82].mxu0  ;;  %v737_v39 = vshll.u32 %v16003_v31, 16 }
 0x22b   : > { %v1968_v46 = vpop.f32.mrb[83].mxu0  ;;  %v723_v19 = vrot.slane %v721_v58, 1  ;;  %v729_v48 = vshll.u32 %v15987_v43, 16  ;;  %v741_v58 = vshrl.u32 %v16003_v31, 16 }
 0x22c   : > { %v739_v22 = vrot.slane %v737_v39, 1  ;;  %v753_v39 = vshll.u32 %v16023_v55, 16 }
 0x22d   : > { %12899 = vmatmul.mubr.bf16.gmra.mrb[36].mxu0 %v16023_v55  ;;  %v727_v46 = vor.u32 %v725_v0, %v723_v19  ;;  %v731_v23 = vrot.slane %v729_v48, 1  ;;  %v16431_v44 = vsel %vm19259_vm0, %v719_v20, %v723_v19  ;;  %v747_v48 = vrot.slane %v745_v10, 1 }
 0x22e   : > { %12902 = vmatprep.mubr.bf16.mxu0 %v16027_v26  ;;  %12618 = vmatprep.mubr.bf16.mxu1 %v16431_v44  ;;  %v743_v0 = vor.u32 %v741_v58, %v739_v22  ;;  %v757_v58 = vshrl.u32 %v16023_v55, 16  ;;  %v781_v55 = vshrl.u32 %v16047_v15, 16 }
 0x22f   : > { %v16434_v51 = vsel %vm19259_vm0, %v727_v46, %v731_v23  ;;  %v735_v19 = vor.u32 %v733_v37, %v731_v23  ;;  %v749_v23 = vshrl.u32 %v16007_v38, 16  ;;  %v755_v37 = vrot.slane %v753_v39, 1 }
 0x230   : > { %12619 = vmatmul.mubr.bf16.gmra.mrb[4].mxu1 %v16434_v51  ;;  %v16448_v46 = vsel %vm19259_vm0, %v743_v0, %v747_v48  ;;  %v765_v38 = vshrl.u32 %v16027_v26, 16  ;;  %v769_v39 = vshll.u32 %v16043_v14, 16 }
 0x231   : > { %v16445_v20 = vsel %vm19259_vm0, %v735_v19, %v739_v22  ;;  %v761_v22 = vshll.u32 %v16027_v26, 16  ;;  %v751_v10 = vor.u32 %v749_v23, %v747_v48  ;;  %v759_v19 = vor.u32 %v757_v58, %v755_v37 }
 0x232   : > { %12622 = vmatprep.mubr.bf16.mxu1 %v16445_v20  ;;  %v773_v48 = vshrl.u32 %v16043_v14, 16  ;;  %v777_v23 = vshll.u32 %v16047_v15, 16  ;;  %v771_v58 = vrot.slane %v769_v39, 1 }
 0x233   : > { %v763_v0 = vrot.slane %v761_v22, 1  ;;  %v16459_v31 = vsel %vm19259_vm0, %v751_v10, %v755_v37 }
 0x234   : > { %v779_v22 = vrot.slane %v777_v23, 1 }
 0x235   : > { %12903 = vmatmul.mubr.bf16.gmra.mrb[40].mxu0 %v16043_v14  ;;  %v16462_v43 = vsel %vm19259_vm0, %v759_v19, %v763_v0  ;;  %v767_v37 = vor.u32 %v765_v38, %v763_v0  ;;  %v775_v19 = vor.u32 %v773_v48, %v771_v58  ;;  %v785_v14 = vshll.u32 %v16063_v63, 16 }
 0x236   : > { %12906 = vmatprep.mubr.bf16.mxu0 %v16047_v15  ;;  %v789_v38 = vshrl.u32 %v16063_v63, 16  ;;  %v793_v0 = vshll.u32 %v16067_v53, 16  ;;  %v783_v39 = vor.u32 %v781_v55, %v779_v22  ;;  %v797_v15 = vshrl.u32 %v16067_v53, 16 }
 0x237   : > { %v16473_v10 = vsel %vm19259_vm0, %v767_v37, %v771_v58  ;;  %v16477_v26 = vsel %vm19259_vm0, %v775_v19, %v779_v22  ;;  %v787_v48 = vrot.slane %v785_v14, 1  ;;  %v805_v55 = vshrl.u32 %v16083_v18, 16 }
 0x238   : > { %12623 = vmatmul.mubr.bf16.gmra.mrb[8].mxu1 %v16448_v46  ;;  %v795_v23 = vrot.slane %v793_v0, 1  ;;  %v809_v14 = vshll.u32 %v16087_v49, 16 }
 0x239   : > { %12626 = vmatprep.mubr.bf16.mxu1 %v16459_v31  ;;  %v16487_v37 = vsel %vm19259_vm0, %v783_v39, %v787_v48  ;;  %v791_v58 = vor.u32 %v789_v38, %v787_v48 }
 0x23a   : > { %v799_v22 = vor.u32 %v797_v15, %v795_v23  ;;  %v811_v0 = vrot.slane %v809_v14, 1  ;;  %v825_v15 = vshll.u32 %v16107_v27, 16 }
 0x23b   : > { %v16491_v19 = vsel %vm19259_vm0, %v791_v58, %v795_v23 }
 0x23c   : > { %v827_v14 = vrot.slane %v825_v15, 1 }
 0x23d   : > { %12907 = vmatmul.mubr.bf16.gmra.mrb[44].mxu0 %v16063_v63  ;;  %v801_v63 = vshll.u32 %v16083_v18, 16 }
 0x23e   : > { %12910 = vmatprep.mubr.bf16.mxu0 %v16067_v53  ;;  %v813_v53 = vshrl.u32 %v16087_v49, 16 }
 0x23f   : > { %v803_v38 = vrot.slane %v801_v63, 1  ;;  %v821_v63 = vshrl.u32 %v16103_v29, 16 }
 0x240   : > { %12627 = vmatmul.mubr.bf16.gmra.mrb[12].mxu1 %v16462_v43  ;;  %v815_v23 = vor.u32 %v813_v53, %v811_v0  ;;  %v841_v53 = vshll.u32 %v16127_v6, 16 }
 0x241   : > { %12630 = vmatprep.mubr.bf16.mxu1 %v16473_v10  ;;  %v16501_v39 = vsel %vm19259_vm0, %v799_v22, %v803_v38  ;;  %v807_v48 = vor.u32 %v805_v55, %v803_v38 }
 0x242   : > { %v843_v15 = vrot.slane %v841_v53, 1  ;;  %v851_v53 = vrot.slane %v849_v35, 1  ;;  %v861_v35 = vshrl.u32 %v16147_v59, 16 }
 0x243   : > { %v16505_v58 = vsel %vm19259_vm0, %v807_v48, %v811_v0 }
 0x245   : > { %12911 = vmatmul.mubr.bf16.gmra.mrb[48].mxu0 %v16083_v18  ;;  %v817_v18 = vshll.u32 %v16103_v29, 16 }
 0x246   : > { %12914 = vmatprep.mubr.bf16.mxu0 %v16087_v49  ;;  %v829_v49 = vshrl.u32 %v16107_v27, 16 }
 0x247   : > { %v819_v55 = vrot.slane %v817_v18, 1  ;;  %v837_v18 = vshrl.u32 %v16123_v47, 16 }
 0x248   : > { %12631 = vmatmul.mubr.bf16.gmra.mrb[16].mxu1 %v16477_v26  ;;  %v831_v0 = vor.u32 %v829_v49, %v827_v14  ;;  %v11797_v49 = vld [vmem:[%s15760_s10 + $0x138] sm:$0xff]  }
 0x249   : > { %12634 = vmatprep.mubr.bf16.mxu1 %v16487_v37  ;;  %v16515_v22 = vsel %vm19259_vm0, %v815_v23, %v819_v55  ;;  %v823_v38 = vor.u32 %v821_v63, %v819_v55 }
 0x24b   : > { %v16519_v48 = vsel %vm19259_vm0, %v823_v38, %v827_v14  ;;  %v11746_v38 = vunpack.c.h.bf16 %v16357_v52  ;;  %v853_v14 = vshrl.u32 %v16143_v61, 16  ;;  %v857_v52 = vshll.u32 %v16147_v59, 16 }
 0x24d   : > { %12915 = vmatmul.mubr.bf16.gmra.mrb[52].mxu0 %v16103_v29  ;;  %v833_v29 = vshll.u32 %v16123_v47, 16 }
 0x24e   : > { %12918 = vmatprep.mubr.bf16.mxu0 %v16107_v27 }
 0x24f   : > { %v835_v63 = vrot.slane %v833_v29, 1  ;;  %v520_v29 = vmax.f32 %v11746_v38, 0.0 }
 0x250   : > { %12635 = vmatmul.mubr.bf16.gmra.mrb[20].mxu1 %v16491_v19 }
 0x251   : > { %12638 = vmatprep.mubr.bf16.mxu1 %v16501_v39  ;;  %v16529_v23 = vsel %vm19259_vm0, %v831_v0, %v835_v63  ;;  %v839_v55 = vor.u32 %v837_v18, %v835_v63  ;;  %v859_v0 = vrot.slane %v857_v52, 1  ;;  %v11749_v63 = vunpack.c.l.bf16 %v11797_v49 }
 0x252   : > { %v16548_v56 = vpack.c.bf16 %v520_v29, %v16369_v12  ;;  %v869_v12 = vshrl.u32 %v16163_v3, 16  ;;  %v873_v29 = vshll.u32 %v16167_v8, 16 }
 0x253   : > { %v16534_v27 = vsel %vm19259_vm0, %v839_v55, %v843_v15  ;;  %v11750_v55 = vunpack.c.h.bf16 %v11797_v49  ;;  %v863_v49 = vor.u32 %v861_v35, %v859_v0 }
 0x255   : > { %12919 = vmatmul.mubr.bf16.gmra.mrb[56].mxu0 %v16123_v47  ;;  %v845_v47 = vshrl.u32 %v16127_v6, 16 }
 0x256   : > { %12922 = vmatprep.mubr.bf16.mxu0 %v16127_v6  ;;  %v855_v6 = vor.u32 %v853_v14, %v851_v53 }
 0x257   : > { %v847_v18 = vor.u32 %v845_v47, %v843_v15  ;;  %v522_v47 = vmax.f32 %v11750_v55, 0.0  ;;  %v865_v15 = vshll.u32 %v16163_v3, 16  ;;  %v877_v55 = vshrl.u32 %v16167_v8, 16 }
 0x258   : > { %12639 = vmatmul.mubr.bf16.gmra.mrb[24].mxu1 %v16505_v58  ;;  %v16552_v38 = vsel %vm19259_vm0, %v855_v6, %v859_v0  ;;  %v875_v6 = vrot.slane %v873_v29, 1  ;;  %v889_v0 = vshll.u32 %v16183_v40, 16 }
 0x259   : > { %12642 = vmatprep.mubr.bf16.mxu1 %v16515_v22  ;;  %v16545_v9 = vsel %vm19259_vm0, %v847_v18, %v851_v53  ;;  %v867_v14 = vrot.slane %v865_v15, 1 }
 0x25a   : > { %v891_v15 = vrot.slane %v889_v0, 1  ;;  %v15274_v0 = vld [vmem:[#allocation5 + $0x168] sm:$0xff]  }
 0x25b   : > { %v16564_v18 = vsel %vm19259_vm0, %v863_v49, %v867_v14  ;;  %v871_v53 = vor.u32 %v869_v12, %v867_v14  ;;  %v15270_v49 = vld [vmem:[#allocation5 + $0x148] sm:$0xff]  }
 0x25d   : > { %12923 = vmatmul.mubr.bf16.gmra.mrb[60].mxu0 %v16143_v61  ;;  %v521_v61 = vmax.f32 %v11749_v63, 0.0  ;;  %v16568_v63 = vsel %vm19259_vm0, %v871_v53, %v875_v6  ;;  %v897_v53 = vshll.u32 %v16189_v45, 16 }
 0x25e   : > { %12926 = vmatprep.mubr.bf16.mxu0 %v16147_v59  ;;  %19596 = vst [vmem:[#allocation136_spill] sm:$0xff] %v16568_v63 }
 0x25f   : > { %v16561_v52 = vpack.c.bf16 %v522_v47, %v521_v61  ;;  %v885_v61 = vshrl.u32 %v16180_v16, 16  ;;  %v879_v47 = vor.u32 %v877_v55, %v875_v6  ;;  %v16590_v55 = vrot.slane %v897_v53, 1 }
 0x260   : > { %12643 = vmatmul.mubr.bf16.gmra.mrb[28].mxu1 %v16519_v48 }
 0x261   : > { %12646 = vmatprep.mubr.bf16.mxu1 %v16529_v23 }
 0x265   : > { %12927 = vmatmul.mubr.bf16.gmra.mrb[64].mxu0 %v16163_v3  ;;  %v881_v3 = vshll.u32 %v16180_v16, 16 }
 0x266   : > { %12930 = vmatprep.mubr.bf16.mxu0 %v16167_v8 }
 0x267   : > { %v883_v35 = vrot.slane %v881_v3, 1  ;;  %v15271_v3 = vld [vmem:[#allocation5 + $0x150] sm:$0xff]  }
 0x268   : > { %12647 = vmatmul.mubr.bf16.gmra.mrb[32].mxu1 %v16534_v27 }
 0x269   : > { %12650 = vmatprep.mubr.bf16.mxu1 %v16545_v9  ;;  %v16578_v12 = vsel %vm19259_vm0, %v879_v47, %v883_v35  ;;  %v887_v29 = vor.u32 %v885_v61, %v883_v35  ;;  %v15275_v47 = vld [vmem:[#allocation5 + $0x170] sm:$0xff]   ;;  %v15276_v35 = vld [vmem:[#allocation5 + $0x178] sm:$0xff]  }
 0x26a   : > { %19597 = vst [vmem:[#allocation137_spill] sm:$0xff] %v16578_v12 }
 0x26b   : > { %v16582_v14 = vsel %vm19259_vm0, %v887_v29, %v891_v15 }
 0x26c   : > { %19598 = vst [vmem:[#allocation138_spill] sm:$0xff] %v16582_v14 }
 0x26d   : > { %12931 = vmatmul.mubr.bf16.gmra.mrb[68].mxu0 %v16180_v16 }
 0x26e   : > { %12934 = vmatprep.mubr.bf16.mxu0 %v16183_v40 }
 0x270   : > { %12651 = vmatmul.mubr.bf16.gmra.mrb[36].mxu1 %v16552_v38 }
 0x271   : > { %12654 = vmatprep.mubr.bf16.mxu1 %v16564_v18 }
 0x275   : > { %12935 = vmatmul.mubr.bf16.gmra.mrb[96].mxu0 %v16189_v45 }
 0x276   : > { %12938 = vmatprep.mubr.bf16.mxu0 %v16548_v56 }
 0x278   : > { %12655 = vmatmul.mubr.bf16.gmra.mrb[40].mxu1 %v16568_v63 }
 0x279   : > { %12658 = vmatprep.mubr.bf16.mxu1 %v16578_v12 }
 0x27d   : > { %12939 = vmatmul.mubr.bf16.gmra.mrb[100].mxu0 %v16561_v52 }
 0x27e   : > { %12958 = vmatprep.mubr.bf16.mxu0 %v15821_v11  ;;  %v893_v11 = vshrl.u32 %v16183_v40, 16 }
 0x280   : > { %12659 = vmatmul.mubr.bf16.gmra.mrb[44].mxu1 %v16582_v14  ;;  %v895_v6 = vor.u32 %v893_v11, %v891_v15  ;;  %v16603_v15 = vld [vmem:[#allocation5 + $0x180] sm:$0xff]  }
 0x282   : > { %v16594_v61 = vsel %vm19259_vm0, %v895_v6, %v16590_v55 }
 0x283   : > { %12662 = vmatprep.mubr.bf16.mxu1 %v16594_v61 }
 0x285   : > { %12959 = vmatmul.mubr.bf16.vlgmr.msra.gmra.mrb[104].mxu0 %v15844_v33  ;;  %v15272_v33 = vld [vmem:[#allocation5 + $0x158] sm:$0xff]  }
 0x286   : > { %13035 = vmatpush3.bf16.msra.mxu0 %v16400_v4  ;;  %12962 = vmatprep.mubr.bf16.mxu0 %v15847_v34  ;;  %v15273_v4 = vld [vmem:[#allocation5 + $0x160] sm:$0xff]  }
 0x287   : > { %13036 = vmatprep.subr.bf16.mxu0 %v15270_v49 }
 0x28a   : > { %13037 = vmatpush3.bf16.msra.mxu0 %v15270_v49 }
 0x28b   : > { %13038 = vmatprep.subr.bf16.mxu0 %v15271_v3 }
 0x28d   : > { %12963 = vmatmul.mubr.bf16.gmra.mrb[4].mxu0 %v15875_v2 }
 0x28e   : > { %12966 = vmatprep.mubr.bf16.mxu0 %v15882_v7  ;;  %13039 = vmatpush3.bf16.msra.mxu0 %v15271_v3 }
 0x28f   : > { %13040 = vmatprep.subr.bf16.mxu0 %v15272_v33 }
 0x292   : > { %13041 = vmatpush3.bf16.msra.mxu0 %v15272_v33 }
 0x293   : > { %13042 = vmatprep.subr.bf16.mxu0 %v15273_v4 }
 0x295   : > { %12967 = vmatmul.mubr.bf16.gmra.mrb[8].mxu0 %v15902_v30 }
 0x296   : > { %12970 = vmatprep.mubr.bf16.mxu0 %v15907_v36  ;;  %13043 = vmatpush3.bf16.msra.mxu0 %v15273_v4 }
 0x297   : > { %13044 = vmatprep.subr.bf16.mxu0 %v15274_v0 }
 0x29a   : > { %13045 = vmatpush3.bf16.msra.mxu0 %v15274_v0 }
 0x29b   : > { %13046 = vmatprep.subr.bf16.mxu0 %v15275_v47 }
 0x29d   : > { %12971 = vmatmul.mubr.bf16.gmra.mrb[12].mxu0 %v15919_v57 }
 0x29e   : > { %12974 = vmatprep.mubr.bf16.mxu0 %v15922_v62  ;;  %13047 = vmatpush3.bf16.msra.mxu0 %v15275_v47 }
 0x29f   : > { %13048 = vmatprep.subr.bf16.mxu0 %v15276_v35 }
 0x2a2   : > { %13049 = vmatpush3.bf16.msra.mxu0 %v15276_v35 }
 0x2a3   : > { %13126 = vmatprep.subr.bf16.mxu0 %v16603_v15 }
 0x2a5   : > { %12975 = vmatmul.mubr.bf16.gmra.mrb[16].mxu0 %v15930_v1 }
 0x2a6   : > { %12978 = vmatprep.mubr.bf16.mxu0 %v16417_v24 }
 0x2ad   : > { %12979 = vmatmul.mubr.bf16.gmra.mrb[20].mxu0 %v16421_v25 }
 0x2ae   : > { %12982 = vmatprep.mubr.bf16.mxu0 %v16431_v44 }
 0x2b0   : > { %v12844_v29 = vpop.f32.mrb[84].mxu0 }
 0x2b1   : > { %v2237_v49 = vpop.f32.mrb[85].mxu0 }
 0x2b2   : > { %v12845_v11 = vpop.f32.mrb[86].mxu0  ;;  %v16629_v49 = vld [vmem:[%s15760_s10 + $0x140] sm:$0xff]  }
 0x2b3   : > { %v2240_v53 = vpop.f32.mrb[87].mxu0  ;;  %v11753_v11 = vunpack.c.l.bf16 %v16629_v49 }
 0x2b4   : > { %v2831_v53 = vshll.u32 %v16548_v56, 16 }
 0x2b5   : > { %12983 = vmatmul.mubr.bf16.gmra.mrb[28].mxu0 %v16434_v51 }
 0x2b6   : > { %12986 = vmatprep.mubr.bf16.mxu0 %v16445_v20 }
 0x2b8   : > { %v12848_v3 = vpop.f32.mrb[88].mxu0 }
 0x2b9   : > { %v2253_v6 = vpop.f32.mrb[89].mxu0  ;;  %v901_v3 = vshrl.u32 %v16189_v45, 16 }
 0x2ba   : > { %v12849_v33 = vpop.f32.mrb[90].mxu0  ;;  %v16636_v6 = vmax.f32 %v11753_v11, 0.0 }
 0x2bb   : > { %v2256_v4 = vpop.f32.mrb[91].mxu0  ;;  %v2835_v33 = vshrl.u32 %v16548_v56, 16 }
 0x2bc   : > { %v2839_v4 = vshll.u32 %v16561_v52, 16 }
 0x2bd   : > { %12987 = vmatmul.mubr.bf16.gmra.mrb[32].mxu0 %v16448_v46 }
 0x2be   : > { %12990 = vmatprep.mubr.bf16.mxu0 %v16459_v31 }
 0x2c0   : > { %v12868_v0 = vpop.f32.mrb[92].mxu0 }
 0x2c1   : > { %v2439_v47 = vpop.f32.mrb[93].mxu0  ;;  %v2833_v0 = vrot.slane %v2831_v53, 1 }
 0x2c2   : > { %v12869_v35 = vpop.f32.mrb[94].mxu0  ;;  %v16643_v47 = vor.u32 %v901_v3, %v16590_v55 }
 0x2c3   : > { %v2442_v29 = vpop.f32.mrb[95].mxu0  ;;  %v16647_v35 = vpack.c.bf16 %v16636_v6, %v16636_v6 }
 0x2c4   : > { %19599 = vst [vmem:[#allocation139_spill] sm:$0xff] %v16643_v47  ;;  %v2837_v29 = vor.u32 %v2835_v33, %v2833_v0  ;;  %v16651_v11 = vsel %vm19259_vm0, %v16643_v47, %v2833_v0  ;;  %v15279_v0 = vld [vmem:[#allocation5 + $0x190] sm:$0xff]   ;;  %v19608_v47 = vld [vmem:[#allocation111_spill] sm:$0xff] }
 0x2c5   : > { %12991 = vmatmul.mubr.bf16.gmra.mrb[36].mxu0 %v16462_v43 }
 0x2c6   : > { %12994 = vmatprep.mubr.bf16.mxu0 %v16473_v10 }
 0x2cd   : > { %12995 = vmatmul.mubr.bf16.gmra.mrb[40].mxu0 %v16477_v26 }
 0x2ce   : > { %12998 = vmatprep.mubr.bf16.mxu0 %v16487_v37 }
 0x2d5   : > { %12999 = vmatmul.mubr.bf16.gmra.mrb[44].mxu0 %v16491_v19 }
 0x2d6   : > { %13002 = vmatprep.mubr.bf16.mxu0 %v16501_v39 }
 0x2dd   : > { %13003 = vmatmul.mubr.bf16.gmra.mrb[48].mxu0 %v16505_v58 }
 0x2de   : > { %13006 = vmatprep.mubr.bf16.mxu0 %v16515_v22 }
 0x2e5   : > { %13007 = vmatmul.mubr.bf16.gmra.mrb[52].mxu0 %v16519_v48 }
 0x2e6   : > { %13010 = vmatprep.mubr.bf16.mxu0 %v16529_v23 }
 0x2ed   : > { %13011 = vmatmul.mubr.bf16.gmra.mrb[56].mxu0 %v16534_v27 }
 0x2ee   : > { %13014 = vmatprep.mubr.bf16.mxu0 %v16545_v9 }
 0x2f5   : > { %13015 = vmatmul.mubr.bf16.gmra.mrb[60].mxu0 %v16552_v38 }
 0x2f6   : > { %13018 = vmatprep.mubr.bf16.mxu0 %v16564_v18 }
 0x2fd   : > { %13019 = vmatmul.mubr.bf16.gmra.mrb[64].mxu0 %v16568_v63  ;;  %v2843_v63 = vshrl.u32 %v16561_v52, 16 }
 0x2fe   : > { %13022 = vmatprep.mubr.bf16.mxu0 %v16578_v12  ;;  %v2841_v12 = vrot.slane %v2839_v4, 1  ;;  %v15278_v4 = vld [vmem:[#allocation5 + $0x188] sm:$0xff]  }
 0x300   : > { %v16656_v53 = vsel %vm19259_vm0, %v2837_v29, %v2841_v12  ;;  %v16660_v55 = vor.u32 %v2843_v63, %v2841_v12  ;;  %v15280_v63 = vld [vmem:[#allocation5 + $0x198] sm:$0xff]   ;;  %v19602_v12 = vld [vmem:[#allocation105_spill] sm:$0xff]  ;;  %v15283_v29 = vld [vmem:[#allocation5 + $0x1b0] sm:$0xff]  }
 0x301   : > { %19600 = vst [vmem:[#allocation140_spill] sm:$0xff] %v16656_v53 }
 0x302   : > { %19601 = vst [vmem:[#allocation141_spill] sm:$0xff] %v16660_v55 }
 0x305   : > { %13023 = vmatmul.mubr.bf16.gmra.mrb[68].mxu0 %v16582_v14  ;;  %v2847_v14 = vshll.u32 %v16647_v35, 16 }
 0x306   : > { %13026 = vmatprep.mubr.bf16.mxu0 %v16594_v61 }
 0x307   : > { %v2849_v3 = vrot.slane %v2847_v14, 1  ;;  %v15281_v14 = vld [vmem:[#allocation5 + $0x1a0] sm:$0xff]  }
 0x309   : > { %v2850_v33 = vsel %vm19259_vm0, %v16660_v55, %v2849_v3  ;;  %v15284_v3 = vld [vmem:[#allocation5 + $0x1b8] sm:$0xff]  }
 0x30d   : > { %13027 = vmatmul.mubr.bf16.gmra.mrb[108].mxu0 %v16651_v11 }
 0x30e   : > { %13030 = vmatprep.mubr.bf16.mxu0 %v16656_v53 }
 0x315   : > { %13031 = vmatmul.mubr.bf16.gmra.mrb[112].mxu0 %v2850_v33  ;;  %v19605_v33 = vld [vmem:[#allocation108_spill] sm:$0xff] }
 0x316   : > { %13050 = vmatprep.mubr.bf16.mxu0 %v16197_v32  ;;  %v15282_v32 = vld [vmem:[#allocation5 + $0x1a8] sm:$0xff]  }
 0x31d   : > { %13051 = vmatmul.mubr.bf16.vlgmr.msra.gmra.mrb[116].mxu0 %v16204_v28  ;;  %v19603_v28 = vld [vmem:[#allocation106_spill] sm:$0xff] }
 0x31e   : > { %13127 = vmatpush3.bf16.msra.mxu0 %v16603_v15  ;;  %13054 = vmatprep.mubr.bf16.mxu0 %v16207_v42  ;;  %v19604_v15 = vld [vmem:[#allocation107_spill] sm:$0xff] }
 0x31f   : > { %13128 = vmatprep.subr.bf16.mxu0 %v15278_v4 }
 0x322   : > { %13129 = vmatpush3.bf16.msra.mxu0 %v15278_v4  ;;  %v19606_v4 = vld [vmem:[#allocation109_spill] sm:$0xff] }
 0x323   : > { %13130 = vmatprep.subr.bf16.mxu0 %v15279_v0 }
 0x325   : > { %13055 = vmatmul.mubr.bf16.gmra.mrb[4].mxu0 %v16214_v21 }
 0x326   : > { %13058 = vmatprep.mubr.bf16.mxu0 %v19602_v12  ;;  %13131 = vmatpush3.bf16.msra.mxu0 %v15279_v0  ;;  %v15285_v0 = vld [vmem:[#allocation5 + $0x1c0] sm:$0xff]  }
 0x327   : > { %13132 = vmatprep.subr.bf16.mxu0 %v15280_v63 }
 0x32a   : > { %13133 = vmatpush3.bf16.msra.mxu0 %v15280_v63  ;;  %v19607_v63 = vld [vmem:[#allocation110_spill] sm:$0xff] }
 0x32b   : > { %13134 = vmatprep.subr.bf16.mxu0 %v15281_v14 }
 0x32d   : > { %13059 = vmatmul.mubr.bf16.gmra.mrb[8].mxu0 %v19603_v28 }
 0x32e   : > { %13062 = vmatprep.mubr.bf16.mxu0 %v19604_v15  ;;  %13135 = vmatpush3.bf16.msra.mxu0 %v15281_v14  ;;  %v19609_v15 = vld [vmem:[#allocation112_spill] sm:$0xff]  ;;  %v19610_v14 = vld [vmem:[#allocation113_spill] sm:$0xff] }
 0x32f   : > { %13136 = vmatprep.subr.bf16.mxu0 %v15282_v32 }
 0x332   : > { %13137 = vmatpush3.bf16.msra.mxu0 %v15282_v32 }
 0x333   : > { %13138 = vmatprep.subr.bf16.mxu0 %v15283_v29 }
 0x335   : > { %13063 = vmatmul.mubr.bf16.gmra.mrb[12].mxu0 %v19605_v33  ;;  %v19611_v33 = vld [vmem:[#allocation114_spill] sm:$0xff] }
 0x336   : > { %13066 = vmatprep.mubr.bf16.mxu0 %v19606_v4  ;;  %13139 = vmatpush3.bf16.msra.mxu0 %v15283_v29  ;;  %v19612_v4 = vld [vmem:[#allocation115_spill] sm:$0xff] }
 0x337   : > { %13140 = vmatprep.subr.bf16.mxu0 %v15284_v3 }
 0x33a   : > { %13141 = vmatpush3.bf16.msra.mxu0 %v15284_v3 }
 0x33b   : > { %13218 = vmatprep.subr.bf16.mxu0 %v15285_v0 }
 0x33d   : > { %13067 = vmatmul.mubr.bf16.gmra.mrb[16].mxu0 %v19607_v63  ;;  %v19613_v63 = vld [vmem:[#allocation116_spill] sm:$0xff] }
 0x33e   : > { %13070 = vmatprep.mubr.bf16.mxu0 %v19608_v47 }
 0x345   : > { %13071 = vmatmul.mubr.bf16.gmra.mrb[20].mxu0 %v19609_v15 }
 0x346   : > { %13074 = vmatprep.mubr.bf16.mxu0 %v19610_v14 }
 0x348   : > { %v12936_v32 = vpop.f32.mrb[96].mxu0 }
 0x349   : > { %v2711_v28 = vpop.f32.mrb[97].mxu0  ;;  %v19614_v32 = vld [vmem:[#allocation117_spill] sm:$0xff] }
 0x34a   : > { %v12937_v12 = vpop.f32.mrb[98].mxu0  ;;  %v19617_v28 = vld [vmem:[#allocation120_spill] sm:$0xff] }
 0x34b   : > { %v2714_v21 = vpop.f32.mrb[99].mxu0  ;;  %v19615_v12 = vld [vmem:[#allocation118_spill] sm:$0xff] }
 0x34c   : > { %v19616_v21 = vld [vmem:[#allocation119_spill] sm:$0xff] }
 0x34d   : > { %13075 = vmatmul.mubr.bf16.gmra.mrb[28].mxu0 %v19611_v33 }
 0x34e   : > { %13078 = vmatprep.mubr.bf16.mxu0 %v19612_v4 }
 0x350   : > { %v12940_v29 = vpop.f32.mrb[100].mxu0 }
 0x351   : > { %v2727_v42 = vpop.f32.mrb[101].mxu0  ;;  %v19618_v29 = vld [vmem:[#allocation121_spill] sm:$0xff] }
 0x352   : > { %v12941_v3 = vpop.f32.mrb[102].mxu0  ;;  %v19619_v42 = vld [vmem:[#allocation122_spill] sm:$0xff] }
 0x353   : > { %v2730_v55 = vpop.f32.mrb[103].mxu0  ;;  %v19621_v3 = vld [vmem:[#allocation124_spill] sm:$0xff] }
 0x354   : > { %v19620_v55 = vld [vmem:[#allocation123_spill] sm:$0xff] }
 0x355   : > { %13079 = vmatmul.mubr.bf16.gmra.mrb[32].mxu0 %v16277_v50 }
 0x356   : > { %13082 = vmatprep.mubr.bf16.mxu0 %v19613_v63 }
 0x358   : > { %v12960_v47 = vpop.f32.mrb[104].mxu0 }
 0x359   : > { %v2936_v15 = vpop.f32.mrb[105].mxu0  ;;  %v19622_v47 = vld [vmem:[#allocation125_spill] sm:$0xff] }
 0x35a   : > { %v12961_v53 = vpop.f32.mrb[106].mxu0  ;;  %v19624_v15 = vld [vmem:[#allocation127_spill] sm:$0xff] }
 0x35b   : > { %v2939_v14 = vpop.f32.mrb[107].mxu0  ;;  %v19623_v53 = vld [vmem:[#allocation126_spill] sm:$0xff] }
 0x35c   : > { %v19625_v14 = vld [vmem:[#allocation128_spill] sm:$0xff] }
 0x35d   : > { %13083 = vmatmul.mubr.bf16.gmra.mrb[36].mxu0 %v19614_v32 }
 0x35e   : > { %13086 = vmatprep.mubr.bf16.mxu0 %v19615_v12  ;;  %v19626_v12 = vld [vmem:[#allocation129_spill] sm:$0xff] }
 0x365   : > { %13087 = vmatmul.mubr.bf16.gmra.mrb[40].mxu0 %v19616_v21  ;;  %v19627_v21 = vld [vmem:[#allocation130_spill] sm:$0xff] }
 0x366   : > { %13090 = vmatprep.mubr.bf16.mxu0 %v19617_v28 }
 0x36d   : > { %13091 = vmatmul.mubr.bf16.gmra.mrb[44].mxu0 %v19618_v29  ;;  %v19628_v29 = vld [vmem:[#allocation132_spill] sm:$0xff] }
 0x36e   : > { %13094 = vmatprep.mubr.bf16.mxu0 %v19619_v42 }
 0x375   : > { %13095 = vmatmul.mubr.bf16.gmra.mrb[48].mxu0 %v19620_v55  ;;  %v19629_v55 = vld [vmem:[#allocation135_spill] sm:$0xff] }
 0x376   : > { %13098 = vmatprep.mubr.bf16.mxu0 %v19621_v3 }
 0x37d   : > { %13099 = vmatmul.mubr.bf16.gmra.mrb[52].mxu0 %v19622_v47  ;;  %v3329_v47 = vrot.slane %v16548_v56, 1 }
 0x37e   : > { %13102 = vmatprep.mubr.bf16.mxu0 %v19623_v53  ;;  %v16702_v53 = vrot.slane %v16561_v52, 1 }
 0x380   : > { %19630 = vst [vmem:[#allocation114_spill] sm:$0xff] %v16702_v53 }
 0x385   : > { %13103 = vmatmul.mubr.bf16.gmra.mrb[56].mxu0 %v19624_v15  ;;  %v19645_v15 = vld [vmem:[#allocation58_spill] sm:$0xff] }
 0x386   : > { %13106 = vmatprep.mubr.bf16.mxu0 %v19625_v14  ;;  %v16706_v14 = vsel %vm19258_vm1, %v16372_v13, %v3329_v47  ;;  %v15287_v13 = vld [vmem:[#allocation5 + $0x1d0] sm:$0xff]  }
 0x387   : > { %19631 = vst [vmem:[#allocation115_spill] sm:$0xff] %v16706_v14 }
 0x38d   : > { %13107 = vmatmul.mubr.bf16.gmra.mrb[60].mxu0 %v19626_v12 }
 0x38e   : > { %13110 = vmatprep.mubr.bf16.mxu0 %v19627_v21  ;;  %v16710_v21 = vsel %vm19258_vm1, %v3329_v47, %v16702_v53  ;;  %v15288_v47 = vld [vmem:[#allocation5 + $0x1d8] sm:$0xff]  }
 0x38f   : > { %19632 = vst [vmem:[#allocation116_spill] sm:$0xff] %v16710_v21 }
 0x395   : > { %13111 = vmatmul.mubr.bf16.gmra.mrb[64].mxu0 %v16360_v5 }
 0x396   : > { %13114 = vmatprep.mubr.bf16.mxu0 %v19628_v29  ;;  %v15286_v29 = vld [vmem:[#allocation5 + $0x1c8] sm:$0xff]  }
 0x39d   : > { %13115 = vmatmul.mubr.bf16.gmra.mrb[68].mxu0 %v16375_v41  ;;  %v3333_v41 = vrot.slane %v16647_v35, 1  ;;  %v19634_v35 = vld [vmem:[#allocation25_spill] sm:$0xff] }
 0x39e   : > { %13118 = vmatprep.mubr.bf16.mxu0 %v19629_v55 }
 0x39f   : > { %v3334_v55 = vsel %vm19258_vm1, %v16702_v53, %v3333_v41  ;;  %v15289_v41 = vld [vmem:[#allocation5 + $0x1e0] sm:$0xff]  }
 0x3a5   : > { %13119 = vmatmul.mubr.bf16.gmra.mrb[120].mxu0 %v16706_v14 }
 0x3a6   : > { %13122 = vmatprep.mubr.bf16.mxu0 %v16710_v21  ;;  %v19633_v21 = vld [vmem:[#allocation20_spill] sm:$0xff] }
 0x3ad   : > { %13123 = vmatmul.mubr.bf16.gmra.mrb[124].mxu0 %v3334_v55  ;;  %v19635_v55 = vld [vmem:[#allocation26_spill] sm:$0xff] }
 0x3ae   : > { %13142 = vmatprep.mubr.bf16.mxu0 %v15803_v54  ;;  %v15290_v54 = vld [vmem:[#allocation5 + $0x1e8] sm:$0xff]  }
 0x3b5   : > { %13143 = vmatmul.mubr.bf16.vlgmr.msra.gmra.mrb[128].mxu0 %v15808_v60  ;;  %v19636_v60 = vld [vmem:[#allocation31_spill] sm:$0xff] }
 0x3b6   : > { %13219 = vmatpush3.bf16.msra.mxu0 %v15285_v0  ;;  %13146 = vmatprep.mubr.bf16.mxu0 %v15830_v17  ;;  %v15291_v17 = vld [vmem:[#allocation5 + $0x1f0] sm:$0xff]   ;;  %v15292_v0 = vld [vmem:[#allocation5 + $0x1f8] sm:$0xff]  }
 0x3b7   : > { %13220 = vmatprep.subr.bf16.mxu0 %v15286_v29 }
 0x3ba   : > { %13221 = vmatpush3.bf16.msra.mxu0 %v15286_v29  ;;  %v19637_v29 = vld [vmem:[#allocation32_spill] sm:$0xff] }
 0x3bb   : > { %13222 = vmatprep.subr.bf16.mxu0 %v15287_v13 }
 0x3bd   : > { %13147 = vmatmul.mubr.bf16.gmra.mrb[4].mxu0 %v19633_v21  ;;  %v19638_v21 = vld [vmem:[#allocation35_spill] sm:$0xff] }
 0x3be   : > { %13150 = vmatprep.mubr.bf16.mxu0 %v19634_v35  ;;  %13223 = vmatpush3.bf16.msra.mxu0 %v15287_v13  ;;  %v15293_v13 = vld [vmem:[#allocation5 + $0x200] sm:$0xff]   ;;  %v19640_v35 = vld [vmem:[#allocation41_spill] sm:$0xff] }
 0x3bf   : > { %13224 = vmatprep.subr.bf16.mxu0 %v15288_v47 }
 0x3c2   : > { %13225 = vmatpush3.bf16.msra.mxu0 %v15288_v47  ;;  %v19639_v47 = vld [vmem:[#allocation40_spill] sm:$0xff] }
 0x3c3   : > { %13226 = vmatprep.subr.bf16.mxu0 %v15289_v41 }
 0x3c5   : > { %13151 = vmatmul.mubr.bf16.gmra.mrb[8].mxu0 %v19635_v55  ;;  %v19641_v55 = vld [vmem:[#allocation46_spill] sm:$0xff] }
 0x3c6   : > { %13154 = vmatprep.mubr.bf16.mxu0 %v19636_v60  ;;  %13227 = vmatpush3.bf16.msra.mxu0 %v15289_v41  ;;  %v19642_v41 = vld [vmem:[#allocation47_spill] sm:$0xff] }
 0x3c7   : > { %13228 = vmatprep.subr.bf16.mxu0 %v15290_v54 }
 0x3ca   : > { %13229 = vmatpush3.bf16.msra.mxu0 %v15290_v54 }
 0x3cb   : > { %13230 = vmatprep.subr.bf16.mxu0 %v15291_v17 }
 0x3cd   : > { %13155 = vmatmul.mubr.bf16.gmra.mrb[12].mxu0 %v19637_v29  ;;  %v19643_v29 = vld [vmem:[#allocation52_spill] sm:$0xff] }
 0x3ce   : > { %13158 = vmatprep.mubr.bf16.mxu0 %v19638_v21  ;;  %13231 = vmatpush3.bf16.msra.mxu0 %v15291_v17  ;;  %v19644_v21 = vld [vmem:[#allocation53_spill] sm:$0xff] }
 0x3cf   : > { %13232 = vmatprep.subr.bf16.mxu0 %v15292_v0 }
 0x3d2   : > { %13233 = vmatpush3.bf16.msra.mxu0 %v15292_v0 }
 0x3d3   : > { %13310 = vmatprep.subr.bf16.mxu0 %v15293_v13 }
 0x3d5   : > { %13159 = vmatmul.mubr.bf16.gmra.mrb[16].mxu0 %v19639_v47  ;;  %v19646_v47 = vld [vmem:[#allocation59_spill] sm:$0xff] }
 0x3d6   : > { %13162 = vmatprep.mubr.bf16.mxu0 %v19640_v35 }
 0x3dd   : > { %13163 = vmatmul.mubr.bf16.gmra.mrb[20].mxu0 %v19641_v55 }
 0x3de   : > { %13166 = vmatprep.mubr.bf16.mxu0 %v19642_v41 }
 0x3e0   : > { %v13028_v54 = vpop.f32.mrb[108].mxu0 }
 0x3e1   : > { %v3208_v60 = vpop.f32.mrb[109].mxu0  ;;  %v19647_v54 = vld [vmem:[#allocation64_spill] sm:$0xff] }
 0x3e2   : > { %v13029_v53 = vpop.f32.mrb[110].mxu0  ;;  %v19650_v60 = vld [vmem:[#allocation71_spill] sm:$0xff] }
 0x3e3   : > { %v3211_v14 = vpop.f32.mrb[111].mxu0  ;;  %v19648_v53 = vld [vmem:[#allocation65_spill] sm:$0xff] }
 0x3e4   : > { %v19649_v14 = vld [vmem:[#allocation70_spill] sm:$0xff] }
 0x3e5   : > { %13167 = vmatmul.mubr.bf16.gmra.mrb[28].mxu0 %v19643_v29  ;;  %v19651_v29 = vld [vmem:[#allocation76_spill] sm:$0xff] }
 0x3e6   : > { %13170 = vmatprep.mubr.bf16.mxu0 %v19644_v21  ;;  %v19655_v21 = vld [vmem:[#allocation88_spill] sm:$0xff] }
 0x3e8   : > { %v13032_v17 = vpop.f32.mrb[112].mxu0 }
 0x3e9   : > { %v3224_v5 = vpop.f32.mrb[113].mxu0  ;;  %v19657_v17 = vld [vmem:[#allocation94_spill] sm:$0xff] }
 0x3ea   : > { %v13033_v0 = vpop.f32.mrb[114].mxu0  ;;  %v19652_v5 = vld [vmem:[#allocation77_spill] sm:$0xff] }
 0x3eb   : > { %v3227_v12 = vpop.f32.mrb[115].mxu0  ;;  %v19658_v0 = vld [vmem:[#allocation99_spill] sm:$0xff] }
 0x3ec   : > { %v19653_v12 = vld [vmem:[#allocation82_spill] sm:$0xff] }
 0x3ed   : > { %13171 = vmatmul.mubr.bf16.gmra.mrb[32].mxu0 %v19645_v15  ;;  %v19654_v15 = vld [vmem:[#allocation83_spill] sm:$0xff] }
 0x3ee   : > { %13174 = vmatprep.mubr.bf16.mxu0 %v19646_v47  ;;  %v11754_v47 = vunpack.c.h.bf16 %v16629_v49 }
 0x3f0   : > { %v13052_v35 = vpop.f32.mrb[116].mxu0 }
 0x3f1   : > { %v3420_v55 = vpop.f32.mrb[117].mxu0  ;;  %v524_v35 = vmax.f32 %v11754_v47, 0.0  ;;  %v15304_v47 = vld [vmem:[#allocation7 + $0x58] sm:$0xff]  }
 0x3f2   : > { %v13053_v3 = vpop.f32.mrb[118].mxu0  ;;  %v11799_v55 = vld [vmem:[%s15760_s10 + $0x148] sm:$0xff]  }
 0x3f3   : > { %v3423_v41 = vpop.f32.mrb[119].mxu0  ;;  %v19656_v3 = vld [vmem:[#allocation89_spill] sm:$0xff] }
 0x3f4   : > { %v11757_v41 = vunpack.c.l.bf16 %v11799_v55 }
 0x3f5   : > { %13175 = vmatmul.mubr.bf16.gmra.mrb[36].mxu0 %v19647_v54  ;;  %v11758_v54 = vunpack.c.h.bf16 %v11799_v55  ;;  %v15305_v55 = vld [vmem:[#allocation7 + $0x60] sm:$0xff]  }
 0x3f6   : > { %13178 = vmatprep.mubr.bf16.mxu0 %v19648_v53 }
 0x3f7   : > { %v526_v53 = vmax.f32 %v11758_v54, 0.0  ;;  %v19673_v54 = vld [vmem:[#allocation109_spill] sm:$0xff] }
 0x3fd   : > { %13179 = vmatmul.mubr.bf16.gmra.mrb[40].mxu0 %v19649_v14 }
 0x3fe   : > { %13182 = vmatprep.mubr.bf16.mxu0 %v19650_v60 }
 0x405   : > { %13183 = vmatmul.mubr.bf16.gmra.mrb[44].mxu0 %v19651_v29 }
 0x406   : > { %13186 = vmatprep.mubr.bf16.mxu0 %v19652_v5  ;;  %v19667_v5 = vld [vmem:[#allocation103_spill] sm:$0xff] }
 0x40d   : > { %13187 = vmatmul.mubr.bf16.gmra.mrb[48].mxu0 %v19653_v12  ;;  %v19668_v12 = vld [vmem:[#allocation104_spill] sm:$0xff] }
 0x40e   : > { %13190 = vmatprep.mubr.bf16.mxu0 %v19654_v15  ;;  %v15301_v15 = vld [vmem:[#allocation7 + $0x40] sm:$0xff]  }
 0x40f   : > { %13402 = vmatprep.subr.bf16.mxu1 %v15301_v15 }
 0x410   : > { %13403 = vmatpush3.bf16.msra.mxu1 %v15301_v15 }
 0x415   : > { %13191 = vmatmul.mubr.bf16.gmra.mrb[52].mxu0 %v19655_v21  ;;  %v15302_v21 = vld [vmem:[#allocation7 + $0x48] sm:$0xff]  }
 0x416   : > { %13194 = vmatprep.mubr.bf16.mxu0 %v19656_v3  ;;  %v19669_v3 = vld [vmem:[#allocation105_spill] sm:$0xff]  ;;  %13404 = vmatprep.subr.bf16.mxu1 %v15302_v21 }
 0x417   : > { %13405 = vmatpush3.bf16.msra.mxu1 %v15302_v21 }
 0x41d   : > { %13195 = vmatmul.mubr.bf16.gmra.mrb[56].mxu0 %v19657_v17  ;;  %v15303_v17 = vld [vmem:[#allocation7 + $0x50] sm:$0xff]  }
 0x41e   : > { %13198 = vmatprep.mubr.bf16.mxu0 %v16147_v59  ;;  %v16755_v59 = vpack.c.bf16 %v524_v35, %v16636_v6  ;;  %13406 = vmatprep.subr.bf16.mxu1 %v15303_v17  ;;  %v19671_v35 = vld [vmem:[#allocation107_spill] sm:$0xff] }
 0x41f   : > { %13407 = vmatpush3.bf16.msra.mxu1 %v15303_v17 }
 0x420   : > { %19659 = vst [vmem:[#allocation117_spill] sm:$0xff] %v16755_v59  ;;  %13408 = vmatprep.subr.bf16.mxu1 %v15304_v47 }
 0x423   : > { %13409 = vmatpush3.bf16.msra.mxu1 %v15304_v47 }
 0x424   : > { %13410 = vmatprep.subr.bf16.mxu1 %v15305_v55 }
 0x425   : > { %13199 = vmatmul.mubr.bf16.gmra.mrb[60].mxu0 %v19658_v0  ;;  %v19670_v0 = vld [vmem:[#allocation106_spill] sm:$0xff] }
 0x426   : > { %13202 = vmatprep.mubr.bf16.mxu0 %v16167_v8  ;;  %v525_v8 = vmax.f32 %v11757_v41, 0.0  ;;  %v19672_v41 = vld [vmem:[#allocation108_spill] sm:$0xff] }
 0x427   : > { %13411 = vmatpush3.bf16.msra.mxu1 %v15305_v55 }
 0x42d   : > { %13203 = vmatmul.mubr.bf16.gmra.mrb[64].mxu0 %v16180_v16  ;;  %v16759_v16 = vpack.c.bf16 %v526_v53, %v525_v8  ;;  %v19674_v8 = vld [vmem:[#allocation110_spill] sm:$0xff]  ;;  %v19675_v53 = vld [vmem:[#allocation111_spill] sm:$0xff] }
 0x42e   : > { %13206 = vmatprep.mubr.bf16.mxu0 %v16183_v40  ;;  %v15296_v40 = vld [vmem:[#allocation5 + $0x218] sm:$0xff]  }
 0x42f   : > { %19660 = vst [vmem:[#allocation120_spill] sm:$0xff] %v16759_v16 }
 0x435   : > { %13207 = vmatmul.mubr.bf16.gmra.mrb[68].mxu0 %v16189_v45  ;;  %v15294_v45 = vld [vmem:[#allocation5 + $0x208] sm:$0xff]  }
 0x436   : > { %13210 = vmatprep.mubr.bf16.mxu0 %v16548_v56  ;;  %v15295_v56 = vld [vmem:[#allocation5 + $0x210] sm:$0xff]  }
 0x43d   : > { %13211 = vmatmul.mubr.bf16.gmra.mrb[132].mxu0 %v16561_v52  ;;  %v15297_v52 = vld [vmem:[#allocation5 + $0x220] sm:$0xff]  }
 0x43e   : > { %13214 = vmatprep.mubr.bf16.mxu0 %v16755_v59 }
 0x445   : > { %13215 = vmatmul.mubr.bf16.gmra.mrb[136].mxu0 %v16759_v16 }
 0x446   : > { %13234 = vmatprep.mubr.bf16.mxu0 %v15847_v34  ;;  %v15298_v34 = vld [vmem:[#allocation5 + $0x228] sm:$0xff]  }
 0x44d   : > { %13235 = vmatmul.mubr.bf16.vlgmr.msra.gmra.mrb[140].mxu0 %v15875_v2  ;;  %v15299_v2 = vld [vmem:[#allocation5 + $0x230] sm:$0xff]  }
 0x44e   : > { %13311 = vmatpush3.bf16.msra.mxu0 %v15293_v13  ;;  %13238 = vmatprep.mubr.bf16.mxu0 %v15882_v7  ;;  %v15300_v7 = vld [vmem:[#allocation5 + $0x238] sm:$0xff]  }
 0x44f   : > { %13312 = vmatprep.subr.bf16.mxu0 %v15294_v45 }
 0x452   : > { %13313 = vmatpush3.bf16.msra.mxu0 %v15294_v45  ;;  %v19676_v45 = vld [vmem:[#allocation112_spill] sm:$0xff] }
 0x453   : > { %13314 = vmatprep.subr.bf16.mxu0 %v15295_v56 }
 0x455   : > { %13239 = vmatmul.mubr.bf16.gmra.mrb[4].mxu0 %v15902_v30 }
 0x456   : > { %13242 = vmatprep.mubr.bf16.mxu0 %v15907_v36  ;;  %13315 = vmatpush3.bf16.msra.mxu0 %v15295_v56  ;;  %v19677_v56 = vld [vmem:[#allocation113_spill] sm:$0xff] }
 0x457   : > { %13316 = vmatprep.subr.bf16.mxu0 %v15296_v40 }
 0x45a   : > { %13317 = vmatpush3.bf16.msra.mxu0 %v15296_v40 }
 0x45b   : > { %13318 = vmatprep.subr.bf16.mxu0 %v15297_v52 }
 0x45d   : > { %13243 = vmatmul.mubr.bf16.gmra.mrb[8].mxu0 %v15919_v57 }
 0x45e   : > { %13246 = vmatprep.mubr.bf16.mxu0 %v15922_v62  ;;  %13319 = vmatpush3.bf16.msra.mxu0 %v15297_v52 }
 0x45f   : > { %13320 = vmatprep.subr.bf16.mxu0 %v15298_v34 }
 0x462   : > { %13321 = vmatpush3.bf16.msra.mxu0 %v15298_v34 }
 0x463   : > { %13322 = vmatprep.subr.bf16.mxu0 %v15299_v2 }
 0x465   : > { %13247 = vmatmul.mubr.bf16.gmra.mrb[12].mxu0 %v15930_v1 }
 0x466   : > { %13250 = vmatprep.mubr.bf16.mxu0 %v16417_v24  ;;  %13323 = vmatpush3.bf16.msra.mxu0 %v15299_v2 }
 0x467   : > { %13324 = vmatprep.subr.bf16.mxu0 %v15300_v7 }
 0x46a   : > { %13325 = vmatpush3.bf16.msra.mxu0 %v15300_v7 }
 0x46d   : > { %13251 = vmatmul.mubr.bf16.gmra.mrb[16].mxu0 %v16421_v25 }
 0x46e   : > { %13254 = vmatprep.mubr.bf16.mxu0 %v16431_v44 }
 0x475   : > { %13255 = vmatmul.mubr.bf16.gmra.mrb[20].mxu0 %v16434_v51 }
 0x476   : > { %13258 = vmatprep.mubr.bf16.mxu0 %v16445_v20 }
 0x478   : > { %v13120_v30 = vpop.f32.mrb[120].mxu0 }
 0x479   : > { %v3692_v36 = vpop.f32.mrb[121].mxu0 }
 0x47a   : > { %v13121_v57 = vpop.f32.mrb[122].mxu0 }
 0x47b   : > { %v3695_v62 = vpop.f32.mrb[123].mxu0 }
 0x47c   : > { %v19678_v62 = vld [vmem:[#allocation118_spill] sm:$0xff] }
 0x47d   : > { %13259 = vmatmul.mubr.bf16.gmra.mrb[28].mxu0 %v16448_v46  ;;  %v19663_v46 = vld [vmem:[#allocation138_spill] sm:$0xff] }
 0x47e   : > { %13262 = vmatprep.mubr.bf16.mxu0 %v16459_v31  ;;  %v19661_v31 = vld [vmem:[#allocation136_spill] sm:$0xff] }
 0x480   : > { %v13124_v1 = vpop.f32.mrb[124].mxu0 }
 0x481   : > { %v3708_v24 = vpop.f32.mrb[125].mxu0 }
 0x482   : > { %v13125_v49 = vpop.f32.mrb[126].mxu0 }
 0x483   : > { %v3711_v6 = vpop.f32.mrb[127].mxu0  ;;  %v19679_v49 = vld [vmem:[#allocation119_spill] sm:$0xff] }
 0x484   : > { %v15306_v6 = vld [vmem:[#allocation7 + $0x68] sm:$0xff]  }
 0x485   : > { %13263 = vmatmul.mubr.bf16.gmra.mrb[32].mxu0 %v16462_v43  ;;  %v19662_v43 = vld [vmem:[#allocation137_spill] sm:$0xff]  ;;  %13412 = vmatprep.subr.bf16.mxu1 %v15306_v6 }
 0x486   : > { %13266 = vmatprep.mubr.bf16.mxu0 %v16473_v10  ;;  %13413 = vmatpush3.bf16.msra.mxu1 %v15306_v6 }
 0x488   : > { %v13144_v25 = vpop.f32.mrb[128].mxu0 }
 0x489   : > { %v3894_v44 = vpop.f32.mrb[129].mxu0  ;;  %v15307_v25 = vld [vmem:[#allocation7 + $0x70] sm:$0xff]  }
 0x48a   : > { %v13145_v51 = vpop.f32.mrb[130].mxu0  ;;  %13414 = vmatprep.subr.bf16.mxu1 %v15307_v25  ;;  %v19683_v44 = vld [vmem:[#allocation125_spill] sm:$0xff] }
 0x48b   : > { %v3897_v20 = vpop.f32.mrb[131].mxu0  ;;  %13415 = vmatpush3.bf16.msra.mxu1 %v15307_v25  ;;  %v19684_v51 = vld [vmem:[#allocation126_spill] sm:$0xff] }
 0x48c   : > { %v19685_v20 = vld [vmem:[#allocation134_spill] sm:$0xff] }
 0x48d   : > { %13267 = vmatmul.mubr.bf16.gmra.mrb[36].mxu0 %v16477_v26  ;;  %v357_v26 = vld [vmem:[%s15760_s10 + $0x150] sm:$0xf]  ;;  %s11590_s10 = sshll.u32 %s15596_s22, 13  ;;  %s11046_s22 = scalar_lea.sflag [#allocation4], %s15756_s17 }
 0x48e   : > { %13270 = vmatprep.mubr.bf16.mxu0 %v16487_v37  ;;  %v442_v10 = vunpack.c.l.bf16 %v357_v26  ;;  %v4286_v37 = vshll.u32 %v16755_v59, 16  ;;  %v19687_v26 = vld [vmem:[#allocation128_spill] sm:$0xff]  ;;  %s18985_s8 = scalar_lea.hbm %s19039_s5, %s11590_s10 }
 0x495   : > { %13271 = vmatmul.mubr.bf16.gmra.mrb[40].mxu0 %v16491_v19  ;;  %v527_v19 = vmax.f32 %v442_v10, 0.0  ;;  %v15308_v10 = vld [vmem:[#allocation7 + $0x78] sm:$0xff]  }
 0x496   : > { %13274 = vmatprep.mubr.bf16.mxu0 %v16501_v39  ;;  %v4288_v39 = vrot.slane %v4286_v37, 1  ;;  %v19689_v37 = vld [vmem:[#allocation129_spill] sm:$0xff]  ;;  %13416 = vmatprep.subr.bf16.mxu1 %v15308_v10 }
 0x497   : > { %13417 = vmatpush3.bf16.msra.mxu1 %v15308_v10 }
 0x49d   : > { %13275 = vmatmul.mubr.bf16.gmra.mrb[44].mxu0 %v16505_v58  ;;  %v19664_v58 = vld [vmem:[#allocation140_spill] sm:$0xff] }
 0x49e   : > { %13278 = vmatprep.mubr.bf16.mxu0 %v16515_v22  ;;  %v16801_v22 = vpack.c.bf16 %v527_v19, %v527_v19  ;;  %v19690_v19 = vld [vmem:[#allocation130_spill] sm:$0xff] }
 0x4a0   : > { %19665 = vst [vmem:[#allocation122_spill] sm:$0xff] %v16801_v22  ;;  %v4302_v13 = vshll.u32 %v16801_v22, 16 }
 0x4a5   : > { %13279 = vmatmul.mubr.bf16.gmra.mrb[48].mxu0 %v16519_v48 }
 0x4a6   : > { %13282 = vmatprep.mubr.bf16.mxu0 %v16529_v23 }
 0x4ad   : > { %13283 = vmatmul.mubr.bf16.gmra.mrb[52].mxu0 %v16534_v27  ;;  %v4290_v27 = vshrl.u32 %v16755_v59, 16  ;;  %v19212_v59 = vmov 0.0  }
 0x4ae   : > { %13286 = vmatprep.mubr.bf16.mxu0 %v16545_v9  ;;  %v4294_v9 = vshll.u32 %v16759_v16, 16 }
 0x4af   : > { %v4292_v48 = vor.u32 %v4290_v27, %v4288_v39  ;;  %v15538_v27 = vmov 0  }
 0x4b0   : > { %v4296_v23 = vrot.slane %v4294_v9, 1  ;;  %v16841_v9 = vrot.slane %v15538_v27, 1 }
 0x4b2   : > { %v4297_v14 = vsel %vm19259_vm0, %v4292_v48, %v4296_v23  ;;  %19691 = vst [vmem:[#allocation20_spill] sm:$0xff] %v16841_v9  ;;  %v16846_v48 = vld [vmem:[#allocation7] sm:$0xff]  }
 0x4b3   : > { %13482 = vmatprep.subr.bf16.mxu1 %v16846_v48 }
 0x4b5   : > { %13287 = vmatmul.mubr.bf16.gmra.mrb[56].mxu0 %v16552_v38  ;;  %v19666_v38 = vld [vmem:[#allocation141_spill] sm:$0xff] }
 0x4b6   : > { %13290 = vmatprep.mubr.bf16.mxu0 %v16564_v18  ;;  %v4289_v18 = vsel %vm19259_vm0, %v19666_v38, %v4288_v39  ;;  %v19692_v39 = vld [vmem:[#allocation131_spill] sm:$0xff] }
 0x4b7   : > { %v19695_v38 = vld [vmem:[#allocation135_spill] sm:$0xff] }
 0x4bd   : > { %13291 = vmatmul.mubr.bf16.gmra.mrb[60].mxu0 %v19661_v31  ;;  %v19686_v31 = vld [vmem:[#allocation127_spill] sm:$0xff] }
 0x4be   : > { %13294 = vmatprep.mubr.bf16.mxu0 %v19662_v43 }
 0x4c5   : > { %13295 = vmatmul.mubr.bf16.gmra.mrb[64].mxu0 %v19663_v46 }
 0x4c6   : > { %13298 = vmatprep.mubr.bf16.mxu0 %v16594_v61  ;;  %v4298_v61 = vshrl.u32 %v16759_v16, 16 }
 0x4c8   : > { %v4300_v60 = vor.u32 %v4298_v61, %v4296_v23  ;;  %v19694_v23 = vld [vmem:[#allocation133_spill] sm:$0xff]  ;;  %v16852_v61 = vpop.f32.mrb[0].mxu1 }
 0x4cd   : > { %13299 = vmatmul.mubr.bf16.gmra.mrb[68].mxu0 %v16651_v11  ;;  %v4304_v11 = vrot.slane %v4302_v13, 1  ;;  %v19697_v13 = vld [vmem:[#allocation116_spill] sm:$0xff] }
 0x4ce   : > { %13302 = vmatprep.mubr.bf16.mxu0 %v19664_v58  ;;  %v19693_v58 = vld [vmem:[#allocation132_spill] sm:$0xff] }
 0x4cf   : > { %v4305_v29 = vsel %vm19259_vm0, %v4300_v60, %v4304_v11 }
 0x4d5   : > { %13303 = vmatmul.mubr.bf16.gmra.mrb[144].mxu0 %v4289_v18  ;;  %v19696_v18 = vld [vmem:[#allocation115_spill] sm:$0xff] }
 0x4d6   : > { %13306 = vmatprep.mubr.bf16.mxu0 %v4297_v14  ;;  %v16855_v14 = vpop.f32.mrb[1].mxu1 }
 0x4d7   : > { %v12617_v60 = vpop.f32.mrb[2].mxu1 }
 0x4d8   : > { %v16857_v11 = vpop.f32.mrb[3].mxu1 }
 0x4dd   : > { %13307 = vmatmul.mubr.bf16.gmra.mrb[148].mxu0 %v4305_v29  ;;  %v16859_v29 = vpop.f32.mrb[4].mxu1 }
 0x4de   : > { %13326 = vmatprep.mubr.bf16.mxu0 %v19667_v5  ;;  %v16861_v5 = vpop.f32.mrb[5].mxu1 }
 0x4e5   : > { %13327 = vmatmul.mubr.bf16.vlgmr.msra.gmra.mrb[152].mxu0 %v19668_v12  ;;  %v12621_v12 = vpop.f32.mrb[6].mxu1 }
 0x4e6   : > { %13330 = vmatprep.mubr.bf16.mxu0 %v19669_v3  ;;  %v16863_v15 = vpop.f32.mrb[7].mxu1 }
 0x4e7   : > { %v16865_v21 = vpop.f32.mrb[8].mxu1 }
 0x4e8   : > { %v16867_v3 = vpop.f32.mrb[9].mxu1 }
 0x4e9   : > { %v12625_v17 = vpop.f32.mrb[10].mxu1 }
 0x4ed   : > { %13331 = vmatmul.mubr.bf16.gmra.mrb[4].mxu0 %v19670_v0  ;;  %v16869_v0 = vpop.f32.mrb[11].mxu1 }
 0x4ee   : > { %13334 = vmatprep.mubr.bf16.mxu0 %v19671_v35  ;;  %v16871_v47 = vpop.f32.mrb[12].mxu1 }
 0x4ef   : > { %v16873_v35 = vpop.f32.mrb[13].mxu1 }
 0x4f0   : > { %v12629_v55 = vpop.f32.mrb[14].mxu1 }
 0x4f5   : > { %13335 = vmatmul.mubr.bf16.gmra.mrb[8].mxu0 %v19672_v41  ;;  %v16875_v41 = vpop.f32.mrb[15].mxu1 }
 0x4f6   : > { %13338 = vmatprep.mubr.bf16.mxu0 %v19673_v54  ;;  %v16877_v54 = vpop.f32.mrb[16].mxu1 }
 0x4fd   : > { %13339 = vmatmul.mubr.bf16.gmra.mrb[12].mxu0 %v19674_v8  ;;  %v16879_v8 = vpop.f32.mrb[17].mxu1 }
 0x4fe   : > { %13342 = vmatprep.mubr.bf16.mxu0 %v19675_v53  ;;  %v12633_v53 = vpop.f32.mrb[18].mxu1 }
 0x505   : > { %13343 = vmatmul.mubr.bf16.gmra.mrb[16].mxu0 %v19676_v45  ;;  %v16881_v45 = vpop.f32.mrb[19].mxu1 }
 0x506   : > { %13346 = vmatprep.mubr.bf16.mxu0 %v19677_v56  ;;  %v16883_v56 = vpop.f32.mrb[20].mxu1 }
 0x50d   : > { %13347 = vmatmul.mubr.bf16.gmra.mrb[20].mxu0 %v19611_v33 }
 0x50e   : > { %13350 = vmatprep.mubr.bf16.mxu0 %v19612_v4 }
 0x510   : > { %v13212_v40 = vpop.f32.mrb[132].mxu0 }
 0x511   : > { %v4166_v52 = vpop.f32.mrb[133].mxu0  ;;  %v16885_v40 = vpop.f32.mrb[21].mxu1 }
 0x512   : > { %v13213_v34 = vpop.f32.mrb[134].mxu0  ;;  %v12637_v52 = vpop.f32.mrb[22].mxu1 }
 0x513   : > { %v4169_v2 = vpop.f32.mrb[135].mxu0  ;;  %v16887_v34 = vpop.f32.mrb[23].mxu1 }
 0x514   : > { %v16889_v2 = vpop.f32.mrb[24].mxu1 }
 0x515   : > { %13351 = vmatmul.mubr.bf16.gmra.mrb[28].mxu0 %v16277_v50  ;;  %v19680_v50 = vld [vmem:[#allocation121_spill] sm:$0xff] }
 0x516   : > { %13354 = vmatprep.mubr.bf16.mxu0 %v19613_v63  ;;  %v19681_v63 = vld [vmem:[#allocation123_spill] sm:$0xff] }
 0x518   : > { %v13216_v7 = vpop.f32.mrb[136].mxu0 }
 0x519   : > { %v4182_v30 = vpop.f32.mrb[137].mxu0  ;;  %v16891_v7 = vpop.f32.mrb[25].mxu1 }
 0x51a   : > { %v13217_v36 = vpop.f32.mrb[138].mxu0  ;;  %v12641_v30 = vpop.f32.mrb[26].mxu1 }
 0x51b   : > { %v4185_v57 = vpop.f32.mrb[139].mxu0  ;;  %v16893_v36 = vpop.f32.mrb[27].mxu1  ;;  %v16928_v30 = vld [vmem:[%s19037_s3] ss:$0 sm:$0xff] }
 0x51c   : > { %19698 = vst [vmem:[#allocation25_spill] sm:$0xff] %v16893_v36  ;;  %v16895_v57 = vpop.f32.mrb[28].mxu1 }
 0x51d   : > { %13355 = vmatmul.mubr.bf16.gmra.mrb[32].mxu0 %v19614_v32  ;;  %v19682_v32 = vld [vmem:[#allocation124_spill] sm:$0xff]  ;;  %19699 = vst [vmem:[#allocation26_spill] sm:$0xff] %v16895_v57 }
 0x51e   : > { %13358 = vmatprep.mubr.bf16.mxu0 %v19678_v62  ;;  %v16897_v62 = vpop.f32.mrb[29].mxu1 }
 0x51f   : > { %19700 = vst [vmem:[#allocation31_spill] sm:$0xff] %v16897_v62 }
 0x520   : > { %v13236_v1 = vpop.f32.mrb[140].mxu0 }
 0x521   : > { %v4391_v33 = vpop.f32.mrb[141].mxu0  ;;  %v12645_v1 = vpop.f32.mrb[30].mxu1 }
 0x522   : > { %v13237_v24 = vpop.f32.mrb[142].mxu0  ;;  %v16899_v33 = vpop.f32.mrb[31].mxu1 }
 0x523   : > { %v4394_v4 = vpop.f32.mrb[143].mxu0  ;;  %19701 = vst [vmem:[#allocation32_spill] sm:$0xff] %v16899_v33  ;;  %v16901_v24 = vpop.f32.mrb[32].mxu1 }
 0x524   : > { %19702 = vst [vmem:[#allocation35_spill] sm:$0xff] %v16901_v24  ;;  %v16903_v4 = vpop.f32.mrb[33].mxu1 }
 0x525   : > { %13359 = vmatmul.mubr.bf16.gmra.mrb[36].mxu0 %v19679_v49  ;;  %19703 = vst [vmem:[#allocation40_spill] sm:$0xff] %v16903_v4  ;;  %v12649_v6 = vpop.f32.mrb[34].mxu1 }
 0x526   : > { %13362 = vmatprep.mubr.bf16.mxu0 %v19617_v28  ;;  %v905_v28 = vshll.u32 %v19685_v20, 16 }
 0x528   : > { %v907_v43 = vrot.slane %v905_v28, 1 }
 0x52d   : > { %13363 = vmatmul.mubr.bf16.gmra.mrb[40].mxu0 %v19680_v50 }
 0x52e   : > { %13366 = vmatprep.mubr.bf16.mxu0 %v19619_v42  ;;  %v19688_v42 = vld [vmem:[#allocation139_spill] sm:$0xff] }
 0x52f   : > { %v908_v46 = vsel %vm19259_vm0, %v19688_v42, %v907_v43  ;;  %v5477_v42 = vlaneseq }
 0x530   : > { %12663 = vmatmul.mubr.bf16.gmra.mrb[48].mxu1 %v908_v46 }
 0x531   : > { %13418 = vmatprep.mubr.bf16.mxu1 %v16841_v9  ;;  %v16913_v10 = vshrl.u32 %v5477_v42, 7 }
 0x533   : > { %v5482_v60 = vadd.s32 32, %v16913_v10  ;;  %v5488_v17 = vadd.s32 80, %v16913_v10  ;;  %v5486_v53 = vadd.s32 64, %v16913_v10  ;;  %v5490_v42 = vadd.s32 96, %v16913_v10 }
 0x535   : > { %13367 = vmatmul.mubr.bf16.gmra.mrb[44].mxu0 %v19681_v63  ;;  %v16905_v63 = vpop.f32.mrb[35].mxu1  ;;  %v5555_v6 = vand.u32 31, %v5482_v60 }
 0x536   : > { %13370 = vmatprep.mubr.bf16.mxu0 %v19682_v32  ;;  %19704 = vst [vmem:[#allocation41_spill] sm:$0xff] %v16905_v63 }
 0x537   : > { %vm16952_vm3 = vcmp.ge.s32.totalorder %v5555_v6, 1  ;;  %v19721_v6 = vmov 0 }
 0x53d   : > { %13371 = vmatmul.mubr.bf16.gmra.mrb[48].mxu0 %v19683_v44  ;;  %v16907_v44 = vpop.f32.mrb[36].mxu1 }
 0x53e   : > { %13374 = vmatprep.mubr.bf16.mxu0 %v19684_v51  ;;  %19705 = vst [vmem:[#allocation46_spill] sm:$0xff] %v16907_v44  ;;  %v16909_v51 = vpop.f32.mrb[37].mxu1  ;;  %v17045_v44 = vadd.s32 288, %v16913_v10 }
 0x53f   : > { %19706 = vst [vmem:[#allocation47_spill] sm:$0xff] %v16909_v51  ;;  %v12653_v28 = vpop.f32.mrb[38].mxu1  ;;  %v15310_v51 = vld [vmem:[#allocation7 + $0x8] sm:$0xff]  }
 0x540   : > { %v16911_v43 = vpop.f32.mrb[39].mxu1 }
 0x541   : > { %19707 = vst [vmem:[#allocation52_spill] sm:$0xff] %v16911_v43 }
 0x545   : > { %13375 = vmatmul.mubr.bf16.gmra.mrb[52].mxu0 %v19686_v31 }
 0x546   : > { %13378 = vmatprep.mubr.bf16.mxu0 %v19687_v26 }
 0x54d   : > { %13379 = vmatmul.mubr.bf16.gmra.mrb[56].mxu0 %v19689_v37  ;;  %v16915_v37 = vpop.f32.mrb[40].mxu1 }
 0x54e   : > { %13382 = vmatprep.mubr.bf16.mxu0 %v19690_v19  ;;  %19708 = vst [vmem:[#allocation53_spill] sm:$0xff] %v16915_v37  ;;  %v16917_v27 = vpop.f32.mrb[41].mxu1 }
 0x54f   : > { %19709 = vst [vmem:[#allocation58_spill] sm:$0xff] %v16917_v27  ;;  %v17005_v27 = vadd.s32 256, %v16913_v10 }
 0x555   : > { %13383 = vmatmul.mubr.bf16.gmra.mrb[60].mxu0 %v19692_v39 }
 0x556   : > { %13386 = vmatprep.mubr.bf16.mxu0 %v19693_v58  ;;  %v12657_v58 = vpop.f32.mrb[42].mxu1 }
 0x55d   : > { %13387 = vmatmul.mubr.bf16.gmra.mrb[64].mxu0 %v19694_v23 }
 0x55e   : > { %13390 = vmatprep.mubr.bf16.mxu0 %v19695_v38  ;;  %v5484_v38 = vadd.s32 48, %v16913_v10 }
 0x560   : > { %v5557_v1 = vand.u32 31, %v5484_v38 }
 0x562   : > { %vm16941_vm2 = vcmp.le.s32.totalorder %v5557_v1, 16  ;;  %v16966_v1 = vadd.s32 160, %v16913_v10 }
 0x565   : > { %13391 = vmatmul.mubr.bf16.gmra.mrb[68].mxu0 %v19696_v18  ;;  %v16920_v18 = vpop.f32.mrb[43].mxu1 }
 0x566   : > { %13394 = vmatprep.mubr.bf16.mxu0 %v19697_v13  ;;  %19710 = vst [vmem:[#allocation59_spill] sm:$0xff] %v16920_v18  ;;  %v12660_v12 = vpop.f32.mrb[44].mxu1 }
 0x567   : > { %v1301_v55 = vpop.f32.mrb[45].mxu1 }
 0x568   : > { %v12661_v52 = vpop.f32.mrb[46].mxu1 }
 0x569   : > { %v16963_v52 = vadd.s32 176, %v16913_v10 }
 0x5a8   : > { %v13304_v49 = vpop.f32.mrb[144].mxu0 }
 0x5a9   : > { %v4663_v50 = vpop.f32.mrb[145].mxu0  ;;  %v1304_v49 = vpop.f32.mrb[47].mxu1 }
 0x5aa   : > { %v13305_v32 = vpop.f32.mrb[146].mxu0  ;;  %v5492_v50 = vadd.s32 112, %v16913_v10 }
 0x5ab   : > { %v4666_v25 = vpop.f32.mrb[147].mxu0 }
 0x5ac   : > { %v16934_v25 = vld [vmem:[%s19037_s3 + $0x1] ss:$0 sm:$0xff]  ;;  %v5565_v12 = vand.u32 31, %v5492_v50  ;;  %v5563_v50 = vand.u32 31, %v5490_v42  ;;  %v16987_v42 = vadd.s32 240, %v16913_v10 }
 0x5ae   : > { %vm17023_vm6 = vcmp.le.s32.totalorder %v5565_v12, 16  ;;  %vm17028_vm7 = vcmp.ge.s32.totalorder %v5563_v50, 1  ;;  %v17037_v12 = vadd.s32 304, %v16913_v10 }
 0x5b0   : > { %v13308_v20 = vpop.f32.mrb[148].mxu0 }
 0x5b1   : > { %v4679_v31 = vpop.f32.mrb[149].mxu0  ;;  %v5561_v20 = vand.u32 31, %v5488_v17 }
 0x5b2   : > { %v13309_v26 = vpop.f32.mrb[150].mxu0 }
 0x5b3   : > { %v4682_v46 = vpop.f32.mrb[151].mxu0  ;;  %v5559_v26 = vand.u32 31, %v5486_v53  ;;  %vm16958_vm4 = vcmp.le.s32.totalorder %v5561_v20, 16  ;;  %v19718_v53 = vmov 0  ;;  %v16975_v20 = vadd.s32 208, %v16913_v10 }
 0x5b4   : > { %v16939_v46 = vadd.s32 144, %v16913_v10  ;;  %v19719_v53 = vsel %vm16958_vm4, 4294967295, %v19718_v53 }
 0x5b5   : > { %19720 = vst [vmem:[#allocation71_spill] sm:$0xff] %v19719_v53  ;;  %vm16969_vm5 = vcmp.ge.s32.totalorder %v5559_v26, 1 }
 0x5b6   : > { %v19722_v6 = vsel %vm16969_vm5, 4294967295, %v19721_v6 }
 0x5b7   : > { %19723 = vst [vmem:[#allocation76_spill] sm:$0xff] %v19722_v6 }
 0x5b8   : > { %v13328_v19 = vpop.f32.mrb[152].mxu0 }
 0x5b9   : > { %v4875_v39 = vpop.f32.mrb[153].mxu0  ;;  %v19711_v19 = vmov 0 }
 0x5ba   : > { %v13329_v23 = vpop.f32.mrb[154].mxu0  ;;  %v19712_v19 = vsel %vm16941_vm2, 4294967295, %v19711_v19 }
 0x5bb   : > { %v4878_v13 = vpop.f32.mrb[155].mxu0  ;;  %19713 = vst [vmem:[#allocation64_spill] sm:$0xff] %v19712_v19  ;;  %v16947_v23 = vadd.s32 128, %v16913_v10 }
 0x5bc   : > { %v19715_v13 = vmov 0 }
 0x5bd   : > { %v19716_v13 = vsel %vm16952_vm3, 4294967295, %v19715_v13 }
 0x5be   : > { %19717 = vst [vmem:[#allocation70_spill] sm:$0xff] %v19716_v13 }
 0x5c0   : > { %v13332_v32 = vpop.f32.mrb[4].mxu0 }
 0x5c1   : > { %v5259_v28 = vmul.f32 %v13332_v32, %v16928_v30  ;;  %v4891_v31 = vpop.f32.mrb[5].mxu0 }
 0x5c2   : > { %v5257_v39 = vmul.f32 %v16928_v30, %v4891_v31  ;;  %v13333_v58 = vpop.f32.mrb[6].mxu0 }
 0x5c3   : > { %v16950_v38 = vadd.f32 %v16934_v25, %v5259_v28  ;;  %v4894_v60 = vpop.f32.mrb[7].mxu0  ;;  %v16980_v58 = vadd.s32 192, %v16913_v10 }
 0x5c4   : > { %v5335_v17 = vadd.f32 %v16934_v25, %v5257_v39  ;;  %v5258_v55 = vmul.f32 %v16928_v30, %v4894_v60  ;;  %v16990_v60 = vadd.s32 224, %v16913_v10 }
 0x5c5   : > { %19714 = vst [vmem:[#allocation65_spill] sm:$0xff] %v16950_v38  ;;  %v19208_v49 = vmax.f32 %v16950_v38, 0.0 }
 0x5c6   : > { %v5408_v28 = vmax.f32 %v5335_v17, 0.0  ;;  %v5336_v31 = vadd.f32 %v16934_v25, %v5258_v55  ;;  %v16993_v17 = vadd.s32 272, %v16913_v10 }
 0x5c7   : > { %v6287_v26 = vsel %vm16941_vm2, %v19208_v49, 0.0 }
 0x5c8   : > { %v6285_v55 = vsel %vm16952_vm3, %v5408_v28, 0.0  ;;  %v5409_v39 = vmax.f32 %v5336_v31, 0.0  ;;  %v13336_v32 = vpop.f32.mrb[8].mxu0  ;;  %v17000_v49 = vpack.c.bf16 %v19212_v59, %v6287_v26 }
 0x5c9   : > { %v5263_v38 = vmul.f32 %v13336_v32, %v16928_v30  ;;  %v4907_v19 = vpop.f32.mrb[9].mxu0  ;;  %v19730_v32 = vmov 0 }
 0x5ca   : > { %v17007_v13 = vpack.c.bf16 %v5409_v39, %v6285_v55  ;;  %v17009_v31 = vpack.c.bf16 %v5409_v39, %v5408_v28  ;;  %v5261_v22 = vmul.f32 %v16928_v30, %v4907_v19  ;;  %v13337_v37 = vpop.f32.mrb[10].mxu0  ;;  %v19727_v19 = vmov 0 }
 0x5cb   : > { %v17014_v26 = vadd.f32 %v16934_v25, %v5263_v38  ;;  %v4910_v59 = vpop.f32.mrb[11].mxu0  ;;  %v19728_v19 = vsel %vm17023_vm6, 4294967295, %v19727_v19  ;;  %v19731_v32 = vsel %vm17028_vm7, 4294967295, %v19730_v32  ;;  %v6444_v43 = vshll.u32 %v17000_v49, 16 }
 0x5cc   : > { %19724 = vst [vmem:[#allocation77_spill] sm:$0xff] %v17007_v13  ;;  %19725 = vst [vmem:[#allocation82_spill] sm:$0xff] %v17009_v31  ;;  %v6436_v55 = vshll.u32 %v17007_v13, 16  ;;  %v5339_v39 = vadd.f32 %v16934_v25, %v5261_v22  ;;  %v5262_v37 = vmul.f32 %v16928_v30, %v4910_v59  ;;  %v7441_v16 = vrot.slane %v17000_v49, 1 }
 0x5cd   : > { %19726 = vst [vmem:[#allocation83_spill] sm:$0xff] %v17014_v26  ;;  %19729 = vst [vmem:[#allocation88_spill] sm:$0xff] %v19728_v19  ;;  %v19217_v38 = vmax.f32 %v17014_v26, 0.0  ;;  %v6440_v31 = vshrl.u32 %v17007_v13, 16  ;;  %v19733_v18 = vrot.slane %v17007_v13, 1  ;;  %v6446_v13 = vrot.slane %v6444_v43, 1 }
 0x5ce   : > { %19732 = vst [vmem:[#allocation89_spill] sm:$0xff] %v19731_v32  ;;  %v6438_v28 = vrot.slane %v6436_v55, 1  ;;  %v5412_v22 = vmax.f32 %v5339_v39, 0.0  ;;  %v5340_v59 = vadd.f32 %v16934_v25, %v5262_v37  ;;  %v19735_v39 = vmov 0.0  }
 0x5cf   : > { %v6291_v50 = vsel %vm16958_vm4, %v19217_v38, 0.0  ;;  %v17050_v55 = vsel %vm19258_vm1, %v19733_v18, %v7441_v16  ;;  %v17061_v18 = vadd.s32 336, %v16913_v10  ;;  %v6448_v43 = vshrl.u32 %v17000_v49, 16 }
 0x5d0   : > { %19734 = vst [vmem:[#allocation94_spill] sm:$0xff] %v17050_v55  ;;  %v17053_v37 = vpack.c.bf16 %v19735_v39, %v6291_v50  ;;  %v6289_v26 = vsel %vm16969_vm5, %v5412_v22, 0.0  ;;  %v5413_v63 = vmax.f32 %v5340_v59, 0.0  ;;  %v13340_v53 = vpop.f32.mrb[12].mxu0  ;;  %v6439_v38 = vsel %vm19259_vm0, %v16841_v9, %v6438_v28 }
 0x5d1   : > { %v5267_v4 = vmul.f32 %v13340_v53, %v16928_v30  ;;  %v4923_v24 = vpop.f32.mrb[13].mxu0  ;;  %13419 = vmatmul.mubr.bf16.vlgmr.msra.gmra.mrb[52].mxu1 %v6439_v38  ;;  %v6442_v33 = vor.u32 %v6440_v31, %v6438_v28  ;;  %v19743_v38 = vand.u32 31, %v16947_v23  ;;  %v6450_v59 = vor.u32 %v6448_v43, %v6446_v13 }
 0x5d2   : > { %v6358_v55 = vpack.c.bf16 %v5413_v63, %v6289_v26  ;;  %v17063_v50 = vpack.c.bf16 %v5413_v63, %v5412_v22  ;;  %v5265_v6 = vmul.f32 %v16928_v30, %v4923_v24  ;;  %v13341_v62 = vpop.f32.mrb[14].mxu0  ;;  %13483 = vmatpush3.bf16.msra.mxu1 %v16846_v48  ;;  %v15311_v26 = vld [vmem:[#allocation7 + $0x10] sm:$0xff]   ;;  %v19739_v48 = vand.u32 31, %v16939_v46 }
 0x5d3   : > { %v17069_v9 = vadd.f32 %v16934_v25, %v5267_v4  ;;  %v4926_v53 = vpop.f32.mrb[15].mxu0  ;;  %v17072_v31 = vsel %vm19259_vm0, %v6442_v33, %v6446_v13  ;;  %13484 = vmatprep.subr.bf16.mxu1 %v15310_v51  ;;  %v19740_v4 = vmov 0  ;;  %v6460_v28 = vshll.u32 %v17053_v37, 16 }
 0x5d4   : > { %19736 = vst [vmem:[#allocation99_spill] sm:$0xff] %v17063_v50  ;;  %19738 = vst [vmem:[#allocation137_spill] sm:$0xff] %v17072_v31  ;;  %v5343_v24 = vadd.f32 %v16934_v25, %v5265_v6  ;;  %v5266_v62 = vmul.f32 %v16928_v30, %v4926_v53  ;;  %13422 = vmatprep.mubr.bf16.mxu1 %v17072_v31  ;;  %vm17081_vm8 = vcmp.le.s32.totalorder %v19739_v48, 16  ;;  %v6452_v33 = vshll.u32 %v6358_v55, 16  ;;  %v15312_v50 = vld [vmem:[#allocation7 + $0x18] sm:$0xff]  }
 0x5d5   : > { %19737 = vst [vmem:[#allocation136_spill] sm:$0xff] %v17069_v9  ;;  %v19741_v4 = vsel %vm17081_vm8, 4294967295, %v19740_v4  ;;  %v19225_v49 = vmax.f32 %v17069_v9, 0.0  ;;  %vm17089_vm9 = vcmp.ge.s32.totalorder %v19743_v38, 1  ;;  %v19744_v22 = vmov 0 }
 0x5d6   : > { %19742 = vst [vmem:[#allocation138_spill] sm:$0xff] %v19741_v4  ;;  %v19745_v22 = vsel %vm17089_vm9, 4294967295, %v19744_v22  ;;  %v17095_v53 = vadd.s32 320, %v16913_v10  ;;  %v7443_v46 = vrot.slane %v6358_v55, 1  ;;  %v5416_v48 = vmax.f32 %v5343_v24, 0.0  ;;  %13485 = vmatpush3.bf16.msra.mxu1 %v15310_v51 }
 0x5d7   : > { %19746 = vst [vmem:[#allocation140_spill] sm:$0xff] %v19745_v22  ;;  %v5344_v63 = vadd.f32 %v16934_v25, %v5266_v62  ;;  %v6454_v31 = vrot.slane %v6452_v33, 1  ;;  %v6295_v23 = vsel %vm17023_vm6, %v19225_v49, 0.0  ;;  %v6456_v38 = vshrl.u32 %v6358_v55, 16  ;;  %13486 = vmatprep.subr.bf16.mxu1 %v15311_v26 }
 0x5d8   : > { %v17103_v6 = vsel %vm19258_vm1, %v7441_v16, %v7443_v46  ;;  %v7445_v57 = vrot.slane %v17053_v37, 1  ;;  %v6293_v24 = vsel %vm17028_vm7, %v5416_v48, 0.0  ;;  %v13344_v13 = vpop.f32.mrb[16].mxu0  ;;  %v6462_v43 = vrot.slane %v6460_v28, 1 }
 0x5d9   : > { %19747 = vst [vmem:[#allocation141_spill] sm:$0xff] %v17103_v6  ;;  %v5417_v62 = vmax.f32 %v5344_v63, 0.0  ;;  %v17109_v51 = vsel %vm19259_vm0, %v6450_v59, %v6454_v31  ;;  %v17112_v33 = vpack.c.bf16 %v19735_v39, %v6295_v23  ;;  %v5271_v55 = vmul.f32 %v13344_v13, %v16928_v30  ;;  %v4939_v49 = vpop.f32.mrb[17].mxu0 }
 0x5da   : > { %19748 = vst [vmem:[#allocation103_spill] sm:$0xff] %v17109_v51  ;;  %13423 = vmatmul.mubr.bf16.gmra.mrb[56].mxu1 %v17109_v51  ;;  %v6458_v16 = vor.u32 %v6456_v38, %v6454_v31  ;;  %v17117_v6 = vsel %vm19258_vm1, %v7443_v46, %v7445_v57  ;;  %v5269_v63 = vmul.f32 %v16928_v30, %v4939_v49  ;;  %v13345_v59 = vpop.f32.mrb[18].mxu0  ;;  %v17130_v31 = vadd.s32 368, %v16913_v10 }
 0x5db   : > { %19749 = vst [vmem:[#allocation104_spill] sm:$0xff] %v17117_v6  ;;  %v6360_v9 = vpack.c.bf16 %v5417_v62, %v6293_v24  ;;  %v17119_v19 = vpack.c.bf16 %v5417_v62, %v5416_v48  ;;  %13487 = vmatpush3.bf16.msra.mxu1 %v15311_v26  ;;  %v17124_v23 = vadd.f32 %v16934_v25, %v5271_v55  ;;  %v4942_v13 = vpop.f32.mrb[19].mxu0  ;;  %v17133_v46 = vadd.s32 352, %v16913_v10  ;;  %v15313_v48 = vld [vmem:[#allocation7 + $0x20] sm:$0xff]   ;;  %v15314_v6 = vld [vmem:[#allocation7 + $0x28] sm:$0xff]  }
 0x5dc   : > { %v17127_v32 = vsel %vm19259_vm0, %v6458_v16, %v6462_v43  ;;  %13488 = vmatprep.subr.bf16.mxu1 %v15312_v50  ;;  %v5347_v49 = vadd.f32 %v16934_v25, %v5269_v63  ;;  %v5270_v26 = vmul.f32 %v16928_v30, %v4942_v13  ;;  %v19753_v38 = vand.u32 31, %v16963_v52 }
 0x5dd   : > { %19750 = vst [vmem:[#allocation105_spill] sm:$0xff] %v17119_v19  ;;  %19751 = vst [vmem:[#allocation106_spill] sm:$0xff] %v17124_v23  ;;  %13426 = vmatprep.mubr.bf16.mxu1 %v17127_v32  ;;  %v19754_v24 = vmov 0  ;;  %v6464_v62 = vshrl.u32 %v17053_v37, 16  ;;  %v6468_v55 = vshll.u32 %v6360_v9, 16  ;;  %v19235_v16 = vmax.f32 %v17124_v23, 0.0 }
 0x5de   : > { %19752 = vst [vmem:[#allocation107_spill] sm:$0xff] %v17127_v32  ;;  %vm17140_vm10 = vcmp.le.s32.totalorder %v19753_v38, 16  ;;  %v19757_v59 = vand.u32 31, %v16966_v1  ;;  %v19758_v28 = vmov 0  ;;  %v6476_v63 = vshll.u32 %v17112_v33, 16 }
 0x5df   : > { %v19755_v24 = vsel %vm17140_vm10, 4294967295, %v19754_v24  ;;  %v17154_v13 = vadd.s32 400, %v16913_v10  ;;  %v7447_v52 = vrot.slane %v6360_v9, 1  ;;  %v5420_v38 = vmax.f32 %v5347_v49, 0.0  ;;  %13489 = vmatpush3.bf16.msra.mxu1 %v15312_v50 }
 0x5e0   : > { %19756 = vst [vmem:[#allocation108_spill] sm:$0xff] %v19755_v24  ;;  %vm17148_vm11 = vcmp.ge.s32.totalorder %v19757_v59, 1  ;;  %v5348_v32 = vadd.f32 %v16934_v25, %v5270_v26  ;;  %v6466_v51 = vor.u32 %v6464_v62, %v6462_v43  ;;  %v6470_v37 = vrot.slane %v6468_v55, 1  ;;  %13490 = vmatprep.subr.bf16.mxu1 %v15313_v48  ;;  %v13348_v26 = vpop.f32.mrb[20].mxu0 }
 0x5e1   : > { %v19759_v28 = vsel %vm17148_vm11, 4294967295, %v19758_v28  ;;  %v6299_v1 = vsel %vm17081_vm8, %v19235_v16, 0.0  ;;  %v6472_v59 = vshrl.u32 %v6360_v9, 16  ;;  %v17162_v19 = vsel %vm19258_vm1, %v7445_v57, %v7447_v52  ;;  %v4955_v55 = vpop.f32.mrb[21].mxu0 }
 0x5e2   : > { %19760 = vst [vmem:[#allocation109_spill] sm:$0xff] %v19759_v28  ;;  %19761 = vst [vmem:[#allocation110_spill] sm:$0xff] %v17162_v19  ;;  %v7449_v36 = vrot.slane %v17112_v33, 1  ;;  %v17166_v49 = vpack.c.bf16 %v19735_v39, %v6299_v1  ;;  %v6297_v43 = vsel %vm17089_vm9, %v5420_v38, 0.0  ;;  %v5421_v50 = vmax.f32 %v5348_v32, 0.0  ;;  %v13349_v32 = vpop.f32.mrb[22].mxu0 }
 0x5e3   : > { %v17171_v62 = vsel %vm19259_vm0, %v6466_v51, %v6470_v37  ;;  %v5275_v9 = vmul.f32 %v13348_v26, %v16928_v30  ;;  %v6474_v57 = vor.u32 %v6472_v59, %v6470_v37  ;;  %v6478_v16 = vrot.slane %v6476_v63, 1  ;;  %13491 = vmatpush3.bf16.msra.mxu1 %v15313_v48  ;;  %v4958_v26 = vpop.f32.mrb[23].mxu0 }
 0x5e4   : > { %19762 = vst [vmem:[#allocation111_spill] sm:$0xff] %v17171_v62  ;;  %13427 = vmatmul.mubr.bf16.gmra.mrb[60].mxu1 %v17171_v62  ;;  %v17176_v19 = vsel %vm19258_vm1, %v7447_v52, %v7449_v36  ;;  %v6362_v1 = vpack.c.bf16 %v5421_v50, %v6297_v43  ;;  %v17178_v23 = vpack.c.bf16 %v5421_v50, %v5420_v38  ;;  %v6480_v63 = vshrl.u32 %v17112_v33, 16  ;;  %v15315_v38 = vld [vmem:[#allocation7 + $0x30] sm:$0xff]  }
 0x5e5   : > { %19763 = vst [vmem:[#allocation112_spill] sm:$0xff] %v17176_v19  ;;  %v5273_v4 = vmul.f32 %v16928_v30, %v4955_v55  ;;  %v17183_v51 = vadd.f32 %v16934_v25, %v5275_v9  ;;  %v17186_v62 = vsel %vm19259_vm0, %v6474_v57, %v6478_v16  ;;  %13492 = vmatprep.subr.bf16.mxu1 %v15314_v6  ;;  %v6492_v43 = vshll.u32 %v17166_v49, 16 }
 0x5e6   : > { %19765 = vst [vmem:[#allocation118_spill] sm:$0xff] %v17186_v62  ;;  %v5274_v59 = vmul.f32 %v16928_v30, %v4958_v26  ;;  %13430 = vmatprep.mubr.bf16.mxu1 %v17186_v62  ;;  %v6484_v48 = vshll.u32 %v6362_v1, 16  ;;  %v17197_v55 = vadd.s32 384, %v16913_v10  ;;  %v7451_v33 = vrot.slane %v6362_v1, 1 }
 0x5e7   : > { %19764 = vst [vmem:[#allocation113_spill] sm:$0xff] %v17183_v51  ;;  %v5351_v37 = vadd.f32 %v16934_v25, %v5273_v4  ;;  %v19244_v50 = vmax.f32 %v17183_v51, 0.0  ;;  %v19766_v4 = vand.u32 31, %v16975_v20  ;;  %v19767_v26 = vmov 0  ;;  %13493 = vmatpush3.bf16.msra.mxu1 %v15314_v6  ;;  %v15316_v20 = vld [vmem:[#allocation7 + $0x38] sm:$0xff]  }
 0x5e8   : > { %v5352_v32 = vadd.f32 %v16934_v25, %v5274_v59  ;;  %v6482_v52 = vor.u32 %v6480_v63, %v6478_v16  ;;  %v6486_v22 = vrot.slane %v6484_v48, 1  ;;  %v19769_v62 = vand.u32 31, %v16980_v58  ;;  %13494 = vmatprep.subr.bf16.mxu1 %v15315_v38  ;;  %v13352_v48 = vpop.f32.mrb[28].mxu0 }
 0x5e9   : > { %v5424_v57 = vmax.f32 %v5351_v37, 0.0  ;;  %vm17202_vm12 = vcmp.le.s32.totalorder %v19766_v4, 16  ;;  %v6303_v9 = vsel %vm17140_vm10, %v19244_v50, 0.0  ;;  %v6488_v59 = vshrl.u32 %v6362_v1, 16  ;;  %v4971_v19 = vpop.f32.mrb[29].mxu0 }
 0x5ea   : > { %v19768_v26 = vsel %vm17202_vm12, 4294967295, %v19767_v26  ;;  %vm17212_vm13 = vcmp.ge.s32.totalorder %v19769_v62, 1  ;;  %v17217_v4 = vsel %vm19258_vm1, %v7449_v36, %v7451_v33  ;;  %v7453_v16 = vrot.slane %v17166_v49, 1 }
 0x5eb   : > { %19772 = vst [vmem:[#allocation119_spill] sm:$0xff] %v17217_v4  ;;  %v6301_v6 = vsel %vm17148_vm11, %v5424_v57, 0.0  ;;  %v5425_v63 = vmax.f32 %v5352_v32, 0.0  ;;  %v17223_v50 = vsel %vm19259_vm0, %v6482_v52, %v6486_v22  ;;  %v6494_v58 = vrot.slane %v6492_v43, 1  ;;  %v13353_v52 = vpop.f32.mrb[30].mxu0  ;;  %13495 = vmatpush3.bf16.msra.mxu1 %v15315_v38 }
 0x5ec   : > { %19773 = vst [vmem:[#allocation121_spill] sm:$0xff] %v17223_v50  ;;  %v17226_v62 = vpack.c.bf16 %v19735_v39, %v6303_v9  ;;  %v14138_v1 = vadd.f32 %v13352_v48, %v16852_v61  ;;  %13431 = vmatmul.mubr.bf16.gmra.mrb[64].mxu1 %v17223_v50  ;;  %v6490_v36 = vor.u32 %v6488_v59, %v6486_v22  ;;  %v6496_v43 = vshrl.u32 %v17166_v49, 16  ;;  %v4974_v28 = vpop.f32.mrb[31].mxu0 }
 0x5ed   : > { %v17231_v4 = vsel %vm19258_vm1, %v7451_v33, %v7453_v16  ;;  %v6364_v51 = vpack.c.bf16 %v5425_v63, %v6301_v6  ;;  %v17233_v24 = vpack.c.bf16 %v5425_v63, %v5424_v57  ;;  %v14139_v32 = vadd.f32 %v4971_v19, %v16855_v14  ;;  %13496 = vmatprep.subr.bf16.mxu1 %v15316_v20  ;;  %v17245_v57 = vld [vmem:[#allocation7 + $0x80] sm:$0xff]  }
 0x5ee   : > { %19774 = vst [vmem:[#allocation123_spill] sm:$0xff] %v17231_v4  ;;  %v5279_v9 = vmul.f32 %v14138_v1, %v16928_v30  ;;  %v17239_v61 = vsel %vm19259_vm0, %v6490_v36, %v6494_v58  ;;  %v17243_v33 = vadd.s32 432, %v16913_v10  ;;  %v14140_v19 = vadd.f32 %v4974_v28, %v16857_v11 }
 0x5ef   : > { %19775 = vst [vmem:[#allocation124_spill] sm:$0xff] %v17239_v61  ;;  %v5277_v14 = vmul.f32 %v14139_v32, %v16928_v30  ;;  %13434 = vmatprep.mubr.bf16.mxu1 %v17239_v61  ;;  %v6498_v49 = vor.u32 %v6496_v43, %v6494_v58  ;;  %v6500_v38 = vshll.u32 %v6364_v51, 16  ;;  %v6508_v6 = vshll.u32 %v17226_v62, 16  ;;  %13497 = vmatpush3.bf16.msra.mxu1 %v15316_v20 }
 0x5f0   : > { %v17251_v59 = vadd.f32 %v16934_v25, %v5279_v9  ;;  %v7455_v63 = vrot.slane %v6364_v51, 1  ;;  %v19250_v48 = vrot.slane %v17226_v62, 1  ;;  %v5278_v36 = vmul.f32 %v14140_v19, %v16928_v30  ;;  %13562 = vmatprep.subr.bf16.mxu1 %v17245_v57  ;;  %v13356_v19 = vpop.f32.mrb[32].mxu0 }
 0x5f1   : > { %v5355_v1 = vadd.f32 %v16934_v25, %v5277_v14  ;;  %v19777_v32 = vand.u32 31, %v16987_v42  ;;  %v19778_v11 = vmov 0  ;;  %v6502_v28 = vrot.slane %v6500_v38, 1  ;;  %v4987_v22 = vpop.f32.mrb[33].mxu0 }
 0x5f2   : > { %19776 = vst [vmem:[#allocation125_spill] sm:$0xff] %v17251_v59  ;;  %v6504_v58 = vshrl.u32 %v6364_v51, 16  ;;  %v19251_v52 = vmax.f32 %v17251_v59, 0.0  ;;  %v19780_v43 = vand.u32 31, %v16990_v60  ;;  %v19781_v9 = vmov 0 }
 0x5f3   : > { %vm17259_vm14 = vcmp.le.s32.totalorder %v19777_v32, 16  ;;  %v17271_v14 = vadd.s32 416, %v16913_v10  ;;  %v17275_v42 = vsel %vm19258_vm1, %v7453_v16, %v7455_v63  ;;  %v17280_v51 = vsel %vm19258_vm1, %v7455_v63, %v19250_v48  ;;  %v13357_v48 = vpop.f32.mrb[34].mxu0 }
 0x5f4   : > { %v19779_v11 = vsel %vm17259_vm14, 4294967295, %v19778_v11  ;;  %vm17266_vm15 = vcmp.ge.s32.totalorder %v19780_v43, 1  ;;  %19783 = vst [vmem:[#allocation126_spill] sm:$0xff] %v17275_v42  ;;  %19784 = vst [vmem:[#allocation134_spill] sm:$0xff] %v17280_v51  ;;  %v5428_v20 = vmax.f32 %v5355_v1, 0.0  ;;  %v5356_v60 = vadd.f32 %v16934_v25, %v5278_v36 }
 0x5f5   : > { %v19782_v9 = vsel %vm17266_vm15, 4294967295, %v19781_v9  ;;  %v17284_v38 = vsel %vm19259_vm0, %v6498_v49, %v6502_v28  ;;  %v6506_v32 = vor.u32 %v6504_v58, %v6502_v28  ;;  %v6307_v43 = vsel %vm17202_vm12, %v19251_v52, 0.0 }
 0x5f6   : > { %19785 = vst [vmem:[#allocation127_spill] sm:$0xff] %v17284_v38  ;;  %v14141_v16 = vadd.f32 %v13356_v19, %v16859_v29  ;;  %13435 = vmatmul.mubr.bf16.gmra.mrb[68].mxu1 %v17284_v38  ;;  %v6510_v63 = vrot.slane %v6508_v6, 1  ;;  %v17293_v1 = vadd.s32 464, %v16913_v10  ;;  %v17296_v36 = vpack.c.bf16 %v19735_v39, %v6307_v43  ;;  %v4990_v29 = vpop.f32.mrb[35].mxu0 }
 0x5f7   : > { %v6305_v49 = vsel %vm17212_vm13, %v5428_v20, 0.0  ;;  %v5429_v28 = vmax.f32 %v5356_v60, 0.0  ;;  %v14142_v58 = vadd.f32 %v4987_v22, %v16861_v5  ;;  %v17307_v38 = vadd.s32 448, %v16913_v10 }
 0x5f8   : > { %v5283_v52 = vmul.f32 %v14141_v16, %v16928_v30  ;;  %v17303_v19 = vsel %vm19259_vm0, %v6506_v32, %v6510_v63  ;;  %v14143_v60 = vadd.f32 %v4990_v29, %v16863_v15  ;;  %v6512_v22 = vshrl.u32 %v17226_v62, 16 }
 0x5f9   : > { %19786 = vst [vmem:[#allocation128_spill] sm:$0xff] %v17303_v19  ;;  %v6366_v43 = vpack.c.bf16 %v5429_v28, %v6305_v49  ;;  %v17309_v61 = vpack.c.bf16 %v5429_v28, %v5428_v20  ;;  %v5281_v50 = vmul.f32 %v14142_v58, %v16928_v30  ;;  %13438 = vmatprep.mubr.bf16.mxu1 %v17303_v19  ;;  %v6524_v48 = vshll.u32 %v17296_v36, 16  ;;  %v13360_v19 = vpop.f32.mrb[36].mxu0  ;;  %v20003_v37 = vld [vmem:[#allocation125_spill] sm:$0xff] }
 0x5fa   : > { %v17315_v5 = vadd.f32 %v16934_v25, %v5283_v52  ;;  %v5282_v20 = vmul.f32 %v14143_v60, %v16928_v30  ;;  %v19788_v49 = vand.u32 31, %v16993_v17  ;;  %v19789_v28 = vmov 0  ;;  %v5003_v52 = vpop.f32.mrb[37].mxu0 }
 0x5fb   : > { %v5359_v16 = vadd.f32 %v16934_v25, %v5281_v50  ;;  %v6516_v15 = vshll.u32 %v6366_v43, 16  ;;  %v19791_v29 = vand.u32 31, %v17005_v27  ;;  %v19792_v6 = vmov 0  ;;  %v13361_v60 = vpop.f32.mrb[38].mxu0 }
 0x5fc   : > { %19787 = vst [vmem:[#allocation139_spill] sm:$0xff] %v17315_v5  ;;  %vm17324_vm1 = vcmp.le.s32.totalorder %v19788_v49, 16  ;;  %v19268_v58 = vmax.f32 %v17315_v5, 0.0  ;;  %v6514_v50 = vor.u32 %v6512_v22, %v6510_v63  ;;  %v7459_v32 = vrot.slane %v6366_v43, 1  ;;  %v5006_v59 = vpop.f32.mrb[39].mxu0 }
 0x5fd   : > { %v19790_v28 = vsel %vm17324_vm1, 4294967295, %v19789_v28  ;;  %vm17332_vm0 = vcmp.ge.s32.totalorder %v19791_v29, 1  ;;  %v5432_v17 = vmax.f32 %v5359_v16, 0.0  ;;  %v5360_v49 = vadd.f32 %v16934_v25, %v5282_v20 }
 0x5fe   : > { %v19793_v6 = vsel %vm17332_vm0, 4294967295, %v19792_v6  ;;  %v6518_v51 = vrot.slane %v6516_v15, 1  ;;  %v6528_v42 = vshrl.u32 %v17296_v36, 16  ;;  %v6311_v27 = vsel %vm17259_vm14, %v19268_v58, 0.0 }
 0x5ff   : > { %v14144_v29 = vadd.f32 %v13360_v19, %v16865_v21  ;;  %v6520_v4 = vshrl.u32 %v6366_v43, 16  ;;  %v6526_v63 = vrot.slane %v6524_v48, 1  ;;  %v17345_v22 = vpack.c.bf16 %v19735_v39, %v6311_v27 }
 0x600   : > { %v6309_v16 = vsel %vm17266_vm15, %v5432_v17, 0.0  ;;  %v5433_v20 = vmax.f32 %v5360_v49, 0.0  ;;  %v14145_v15 = vadd.f32 %v5003_v52, %v16867_v3  ;;  %vm19794_vm12 = vsmask.f32 7424 }
 0x601   : > { %v5287_v5 = vmul.f32 %v14144_v29, %v16928_v30  ;;  %v17352_v58 = vsel %vm19794_vm12, %v6514_v50, %v6518_v51  ;;  %v6522_v21 = vor.u32 %v6520_v4, %v6518_v51  ;;  %v19796_v19 = vrot.slane %v17226_v62, 1 }
 0x602   : > { %19795 = vst [vmem:[#allocation129_spill] sm:$0xff] %v17352_v58  ;;  %vm19797_vm14 = vcmask 1046528   ;;  %v6368_v48 = vpack.c.bf16 %v5433_v20, %v6309_v16  ;;  %v17359_v27 = vpack.c.bf16 %v5433_v20, %v5432_v17  ;;  %v5285_v49 = vmul.f32 %v14145_v15, %v16928_v30  ;;  %13439 = vmatmul.mubr.bf16.gmra.mrb[72].mxu1 %v17352_v58 }
 0x603   : > { %v17357_v43 = vsel %vm19797_vm14, %v19796_v19, %v7459_v32  ;;  %v14146_v3 = vadd.f32 %v5006_v59, %v16869_v0  ;;  %v17365_v52 = vadd.f32 %v16934_v25, %v5287_v5  ;;  %v17368_v50 = vsel %vm19794_vm12, %v6522_v21, %v6526_v63 }
 0x604   : > { %19798 = vst [vmem:[#allocation130_spill] sm:$0xff] %v17357_v43  ;;  %19799 = vst [vmem:[#allocation131_spill] sm:$0xff] %v17368_v50  ;;  %v6540_v4 = vshll.u32 %v17345_v22, 16  ;;  %v7461_v62 = vrot.slane %v17296_v36, 1  ;;  %v5363_v51 = vadd.f32 %v16934_v25, %v5285_v49  ;;  %13442 = vmatprep.mubr.bf16.mxu1 %v17368_v50  ;;  %v19800_v0 = vand.u32 31, %v17037_v12  ;;  %v13364_v49 = vpop.f32.mrb[40].mxu0 }
 0x605   : > { %v5286_v60 = vmul.f32 %v14146_v3, %v16928_v30  ;;  %v19801_v59 = vmov 0  ;;  %v6532_v5 = vshll.u32 %v6368_v48, 16  ;;  %v17382_v17 = vadd.s32 496, %v16913_v10  ;;  %v5019_v50 = vpop.f32.mrb[41].mxu0 }
 0x606   : > { %vm17377_vm14 = vcmp.le.s32.totalorder %v19800_v0, 16  ;;  %v19277_v29 = vmax.f32 %v17365_v52, 0.0  ;;  %v19803_v36 = vand.u32 31, %v17045_v44  ;;  %v19804_v16 = vmov 0  ;;  %v13365_v58 = vpop.f32.mrb[42].mxu0 }
 0x607   : > { %v19802_v59 = vsel %vm17377_vm14, 4294967295, %v19801_v59  ;;  %v6530_v20 = vor.u32 %v6528_v42, %v6526_v63  ;;  %vm19806_vm15 = vcmask 1046528   ;;  %v7463_v12 = vrot.slane %v6368_v48, 1  ;;  %v5022_v43 = vpop.f32.mrb[43].mxu0 }
 0x608   : > { %vm17387_vm12 = vcmp.ge.s32.totalorder %v19803_v36, 1  ;;  %v17392_v15 = vsel %vm19806_vm15, %v7459_v32, %v7461_v62  ;;  %v5436_v21 = vmax.f32 %v5363_v51, 0.0  ;;  %v5364_v19 = vadd.f32 %v16934_v25, %v5286_v60 }
 0x609   : > { %v19805_v16 = vsel %vm17387_vm12, 4294967295, %v19804_v16  ;;  %19807 = vst [vmem:[#allocation132_spill] sm:$0xff] %v17392_v15  ;;  %v6534_v3 = vrot.slane %v6532_v5, 1  ;;  %v6544_v0 = vshrl.u32 %v17345_v22, 16  ;;  %v6315_v44 = vsel %vm17324_vm1, %v19277_v29, 0.0 }
 0x60a   : > { %v14147_v36 = vadd.f32 %v13364_v49, %v16871_v47  ;;  %v6536_v42 = vshrl.u32 %v6368_v48, 16  ;;  %v6542_v63 = vrot.slane %v6540_v4, 1  ;;  %v17402_v32 = vpack.c.bf16 %v19735_v39, %v6315_v44 }
 0x60b   : > { %v6313_v51 = vsel %vm17332_vm0, %v5436_v21, 0.0  ;;  %v5437_v60 = vmax.f32 %v5364_v19, 0.0  ;;  %v14148_v5 = vadd.f32 %v5019_v50, %v16873_v35  ;;  %vm19808_vm15 = vsmask.f32 7424 }
 0x60c   : > { %v5291_v15 = vmul.f32 %v14147_v36, %v16928_v30  ;;  %v17409_v29 = vsel %vm19808_vm15, %v6530_v20, %v6534_v3  ;;  %v6538_v47 = vor.u32 %v6536_v42, %v6534_v3  ;;  %vm19810_vm1 = vcmask 1046528   ;;  %vm19812_vm0 = vmmov %vm19808_vm15 }
 0x60d   : > { %19809 = vst [vmem:[#allocation133_spill] sm:$0xff] %v17409_v29  ;;  %v17412_v48 = vsel %vm19810_vm1, %v7461_v62, %v7463_v12  ;;  %v6370_v4 = vpack.c.bf16 %v5437_v60, %v6313_v51  ;;  %v17414_v49 = vpack.c.bf16 %v5437_v60, %v5436_v21  ;;  %v5289_v44 = vmul.f32 %v14148_v5, %v16928_v30 }
 0x60e   : > { %19811 = vst [vmem:[#allocation135_spill] sm:$0xff] %v17412_v48  ;;  %v14149_v19 = vadd.f32 %v5022_v43, %v16875_v41  ;;  %13443 = vmatmul.mubr.bf16.gmra.mrb[76].mxu1 %v17409_v29  ;;  %v17420_v35 = vadd.f32 %v16934_v25, %v5291_v15  ;;  %v17423_v58 = vsel %vm19812_vm0, %v6538_v47, %v6542_v63  ;;  %v6556_v50 = vshll.u32 %v17402_v32, 16 }
 0x60f   : > { %19813 = vst [vmem:[#allocation115_spill] sm:$0xff] %v17423_v58  ;;  %v7465_v62 = vrot.slane %v17345_v22, 1  ;;  %v5367_v20 = vadd.f32 %v16934_v25, %v5289_v44  ;;  %13446 = vmatprep.mubr.bf16.mxu1 %v17423_v58  ;;  %v19814_v41 = vand.u32 31, %v17061_v18  ;;  %v19815_v43 = vmov 0  ;;  %v13368_v44 = vpop.f32.mrb[44].mxu0 }
 0x610   : > { %v5290_v21 = vmul.f32 %v14149_v19, %v16928_v30  ;;  %v6548_v15 = vshll.u32 %v6370_v4, 16  ;;  %v17437_v3 = vadd.s32 480, %v16913_v10  ;;  %v19286_v36 = vmax.f32 %v17420_v35, 0.0  ;;  %v5035_v58 = vpop.f32.mrb[45].mxu0 }
 0x611   : > { %vm17432_vm1 = vcmp.le.s32.totalorder %v19814_v41, 16  ;;  %v19817_v22 = vand.u32 31, %v17095_v53  ;;  %v19818_v42 = vmov 0  ;;  %v6546_v51 = vor.u32 %v6544_v0, %v6542_v63  ;;  %v13369_v29 = vpop.f32.mrb[46].mxu0 }
 0x612   : > { %v19816_v43 = vsel %vm17432_vm1, 4294967295, %v19815_v43  ;;  %vm19820_vm15 = vcmask 1046528   ;;  %v7467_v18 = vrot.slane %v6370_v4, 1  ;;  %v5440_v5 = vmax.f32 %v5367_v20, 0.0  ;;  %v5038_v48 = vpop.f32.mrb[47].mxu0 }
 0x613   : > { %vm17442_vm0 = vcmp.ge.s32.totalorder %v19817_v22, 1  ;;  %v17447_v60 = vsel %vm19820_vm15, %v7463_v12, %v7465_v62  ;;  %v5368_v47 = vadd.f32 %v16934_v25, %v5290_v21  ;;  %v6550_v19 = vrot.slane %v6548_v15, 1 }
 0x614   : > { %v19819_v42 = vsel %vm17442_vm0, 4294967295, %v19818_v42  ;;  %19821 = vst [vmem:[#allocation116_spill] sm:$0xff] %v17447_v60  ;;  %v6560_v41 = vshrl.u32 %v17402_v32, 16  ;;  %v6319_v53 = vsel %vm17377_vm14, %v19286_v36, 0.0  ;;  %v14150_v22 = vadd.f32 %v13368_v44, %v16877_v54 }
 0x615   : > { %v6552_v0 = vshrl.u32 %v6370_v4, 16  ;;  %v6558_v63 = vrot.slane %v6556_v50, 1  ;;  %v17457_v12 = vpack.c.bf16 %v19735_v39, %v6319_v53  ;;  %v6317_v20 = vsel %vm17387_vm12, %v5440_v5, 0.0 }
 0x616   : > { %v5441_v21 = vmax.f32 %v5368_v47, 0.0  ;;  %v14151_v15 = vadd.f32 %v5035_v58, %v16879_v8  ;;  %v5295_v60 = vmul.f32 %v14150_v22, %v16928_v30  ;;  %vm19822_vm15 = vsmask.f32 7424 }
 0x617   : > { %v17464_v36 = vsel %vm19822_vm15, %v6546_v51, %v6550_v19  ;;  %v6554_v54 = vor.u32 %v6552_v0, %v6550_v19  ;;  %vm19824_vm14 = vcmask 1046528   ;;  %v14152_v47 = vadd.f32 %v5038_v48, %v16881_v45  ;;  %vm19826_vm12 = vmmov %vm19822_vm15 }
 0x618   : > { %19823 = vst [vmem:[#allocation142_spill] sm:$0xff] %v17464_v36  ;;  %v17467_v4 = vsel %vm19824_vm14, %v7465_v62, %v7467_v18  ;;  %v6372_v50 = vpack.c.bf16 %v5441_v21, %v6317_v20  ;;  %v17469_v44 = vpack.c.bf16 %v5441_v21, %v5440_v5  ;;  %v5293_v53 = vmul.f32 %v14151_v15, %v16928_v30 }
 0x619   : > { %19825 = vst [vmem:[#allocation143_spill] sm:$0xff] %v17467_v4  ;;  %13447 = vmatmul.mubr.bf16.gmra.mrb[80].mxu1 %v17464_v36  ;;  %v17475_v8 = vadd.f32 %v16934_v25, %v5295_v60  ;;  %v17478_v29 = vsel %vm19826_vm12, %v6554_v54, %v6558_v63  ;;  %v6572_v58 = vshll.u32 %v17457_v12, 16  ;;  %v7469_v62 = vrot.slane %v17402_v32, 1 }
 0x61a   : > { %19827 = vst [vmem:[#allocation144_spill] sm:$0xff] %v17478_v29  ;;  %v5371_v51 = vadd.f32 %v16934_v25, %v5293_v53  ;;  %v5294_v5 = vmul.f32 %v14152_v47, %v16928_v30  ;;  %13450 = vmatprep.mubr.bf16.mxu1 %v17478_v29  ;;  %v19828_v45 = vand.u32 31, %v17130_v31  ;;  %v19829_v48 = vmov 0  ;;  %v13372_v53 = vpop.f32.mrb[48].mxu0 }
 0x61b   : > { %v6564_v60 = vshll.u32 %v6372_v50, 16  ;;  %v19294_v22 = vmax.f32 %v17475_v8, 0.0  ;;  %v19831_v0 = vand.u32 31, %v17133_v46  ;;  %v19832_v32 = vmov 0  ;;  %v5051_v19 = vpop.f32.mrb[49].mxu0 }
 0x61c   : > { %vm17487_vm14 = vcmp.le.s32.totalorder %v19828_v45, 16  ;;  %v6562_v20 = vor.u32 %v6560_v41, %v6558_v63  ;;  %vm19834_vm15 = vcmask 1046528   ;;  %v7471_v31 = vrot.slane %v6372_v50, 1  ;;  %v13373_v29 = vpop.f32.mrb[50].mxu0 }
 0x61d   : > { %v19830_v48 = vsel %vm17487_vm14, 4294967295, %v19829_v48  ;;  %vm17495_vm12 = vcmp.ge.s32.totalorder %v19831_v0, 1  ;;  %v17500_v21 = vsel %vm19834_vm15, %v7467_v18, %v7469_v62  ;;  %v5444_v15 = vmax.f32 %v5371_v51, 0.0 }
 0x61e   : > { %v19833_v32 = vsel %vm17495_vm12, 4294967295, %v19832_v32  ;;  %19835 = vst [vmem:[#allocation145_spill] sm:$0xff] %v17500_v21  ;;  %v5372_v54 = vadd.f32 %v16934_v25, %v5294_v5  ;;  %v6566_v47 = vrot.slane %v6564_v60, 1  ;;  %v6576_v45 = vshrl.u32 %v17457_v12, 16  ;;  %v5054_v21 = vpop.f32.mrb[51].mxu0 }
 0x61f   : > { %v6323_v46 = vsel %vm17432_vm1, %v19294_v22, 0.0  ;;  %v14153_v0 = vadd.f32 %v13372_v53, %v16883_v56  ;;  %v6568_v41 = vshrl.u32 %v6372_v50, 16  ;;  %v6574_v63 = vrot.slane %v6572_v58, 1 }
 0x620   : > { %v17510_v18 = vpack.c.bf16 %v19735_v39, %v6323_v46  ;;  %v6321_v51 = vsel %vm17442_vm0, %v5444_v15, 0.0  ;;  %v5445_v5 = vmax.f32 %v5372_v54, 0.0  ;;  %v14154_v60 = vadd.f32 %v5051_v19, %v16885_v40 }
 0x621   : > { %v5299_v36 = vmul.f32 %v14153_v0, %v16928_v30  ;;  %vm19836_vm15 = vsmask.f32 7424  ;;  %v6570_v56 = vor.u32 %v6568_v41, %v6566_v47  ;;  %vm19838_vm1 = vcmask 1046528  }
 0x622   : > { %v17517_v22 = vsel %vm19836_vm15, %v6562_v20, %v6566_v47  ;;  %v17520_v50 = vsel %vm19838_vm1, %v7469_v62, %v7471_v31  ;;  %v17522_v58 = vpack.c.bf16 %v5445_v5, %v6321_v51  ;;  %v17524_v53 = vpack.c.bf16 %v5445_v5, %v5444_v15  ;;  %vm19840_vm0 = vmmov %vm19836_vm15 }
 0x623   : > { %19837 = vst [vmem:[#allocation146_spill] sm:$0xff] %v17517_v22  ;;  %19839 = vst [vmem:[#allocation147_spill] sm:$0xff] %v17520_v50  ;;  %v5297_v46 = vmul.f32 %v14154_v60, %v16928_v30  ;;  %v14155_v54 = vadd.f32 %v5054_v21, %v16887_v34  ;;  %13451 = vmatmul.mubr.bf16.gmra.mrb[84].mxu1 %v17517_v22  ;;  %v17530_v40 = vadd.f32 %v16934_v25, %v5299_v36  ;;  %v19843_v21 = vmov 0  ;;  %v19855_v50 = vld [vmem:[#allocation25_spill] sm:$0xff] }
 0x624   : > { %v17533_v29 = vsel %vm19840_vm0, %v6570_v56, %v6574_v63  ;;  %v6588_v19 = vshll.u32 %v17510_v18, 16  ;;  %v7473_v62 = vrot.slane %v17457_v12, 1  ;;  %v19842_v34 = vand.u32 31, %v17154_v13 }
 0x625   : > { %19841 = vst [vmem:[#allocation148_spill] sm:$0xff] %v17533_v29  ;;  %v5375_v20 = vadd.f32 %v16934_v25, %v5297_v46  ;;  %v5298_v15 = vmul.f32 %v14155_v54, %v16928_v30  ;;  %13454 = vmatprep.mubr.bf16.mxu1 %v17533_v29  ;;  %v6580_v36 = vshll.u32 %v17522_v58, 16  ;;  %v19302_v0 = vmax.f32 %v17530_v40, 0.0  ;;  %v13376_v46 = vpop.f32.mrb[52].mxu0 }
 0x626   : > { %vm17542_vm1 = vcmp.le.s32.totalorder %v19842_v34, 16  ;;  %v19846_v12 = vand.u32 31, %v17197_v55  ;;  %v19847_v41 = vmov 0  ;;  %v6578_v51 = vor.u32 %v6576_v45, %v6574_v63  ;;  %v5067_v45 = vpop.f32.mrb[53].mxu0 }
 0x627   : > { %v19844_v21 = vsel %vm17542_vm1, 4294967295, %v19843_v21  ;;  %vm19849_vm15 = vcmask 1046528   ;;  %v7475_v13 = vrot.slane %v17522_v58, 1  ;;  %v5448_v60 = vmax.f32 %v5375_v20, 0.0  ;;  %v13377_v29 = vpop.f32.mrb[54].mxu0 }
 0x628   : > { %19845 = vst [vmem:[#allocation149_spill] sm:$0xff] %v19844_v21  ;;  %vm17551_vm0 = vcmp.ge.s32.totalorder %v19846_v12, 1  ;;  %v17556_v5 = vsel %vm19849_vm15, %v7471_v31, %v7473_v62  ;;  %v5376_v56 = vadd.f32 %v16934_v25, %v5298_v15  ;;  %v6582_v54 = vrot.slane %v6580_v36, 1 }
 0x629   : > { %v19848_v41 = vsel %vm17551_vm0, 4294967295, %v19847_v41  ;;  %19850 = vst [vmem:[#allocation150_spill] sm:$0xff] %v17556_v5  ;;  %v6592_v34 = vshrl.u32 %v17510_v18, 16  ;;  %v6327_v55 = vsel %vm17487_vm14, %v19302_v0, 0.0  ;;  %v14156_v12 = vadd.f32 %v13376_v46, %v16889_v2  ;;  %v5070_v5 = vpop.f32.mrb[55].mxu0  ;;  %v12664_v46 = vpop.f32.mrb[48].mxu1 }
 0x62a   : > { %v6584_v31 = vshrl.u32 %v17522_v58, 16  ;;  %v6590_v63 = vrot.slane %v6588_v19, 1  ;;  %v17568_v47 = vpack.c.bf16 %v19735_v39, %v6327_v55  ;;  %v6325_v20 = vsel %vm17495_vm12, %v5448_v60, 0.0  ;;  %v1317_v29 = vpop.f32.mrb[49].mxu1 }
 0x62b   : > { %v5449_v15 = vmax.f32 %v5376_v56, 0.0  ;;  %v14157_v36 = vadd.f32 %v5067_v45, %v16891_v7  ;;  %v5303_v22 = vmul.f32 %v14156_v12, %v16928_v30  ;;  %vm19851_vm15 = vsmask.f32 7424  ;;  %v13380_v29 = vpop.f32.mrb[56].mxu0 }
 0x62c   : > { %v17575_v0 = vsel %vm19851_vm15, %v6578_v51, %v6582_v54  ;;  %v6586_v2 = vor.u32 %v6584_v31, %v6582_v54  ;;  %vm19853_vm14 = vcmask 1046528   ;;  %v14158_v7 = vadd.f32 %v5070_v5, %v19855_v50  ;;  %v12665_v54 = vpop.f32.mrb[50].mxu1 }
 0x62d   : > { %19852 = vst [vmem:[#allocation151_spill] sm:$0xff] %v17575_v0  ;;  %v17578_v58 = vsel %vm19853_vm14, %v7473_v62, %v7475_v13  ;;  %v17580_v19 = vpack.c.bf16 %v5449_v15, %v6325_v20  ;;  %v17582_v55 = vpack.c.bf16 %v5449_v15, %v5448_v60  ;;  %v5301_v56 = vmul.f32 %v14157_v36, %v16928_v30  ;;  %v1320_v15 = vpop.f32.mrb[51].mxu1 }
 0x62e   : > { %19854 = vst [vmem:[#allocation152_spill] sm:$0xff] %v17578_v58  ;;  %13455 = vmatmul.mubr.bf16.gmra.mrb[88].mxu1 %v17575_v0  ;;  %v17588_v12 = vadd.f32 %v16934_v25, %v5303_v22  ;;  %v17591_v51 = vsel %vm19851_vm15, %v6586_v2, %v6590_v63  ;;  %v6604_v62 = vshll.u32 %v17568_v47, 16  ;;  %v7477_v45 = vrot.slane %v17510_v18, 1  ;;  %v19867_v15 = vld [vmem:[#allocation26_spill] sm:$0xff] }
 0x62f   : > { %19857 = vst [vmem:[#allocation153_spill] sm:$0xff] %v17591_v51  ;;  %v5379_v60 = vadd.f32 %v16934_v25, %v5301_v56  ;;  %v5302_v31 = vmul.f32 %v14158_v7, %v16928_v30  ;;  %13458 = vmatprep.mubr.bf16.mxu1 %v17591_v51  ;;  %v19858_v50 = vand.u32 31, %v17243_v33  ;;  %v19859_v5 = vmov 0 }
 0x630   : > { %19856 = vst [vmem:[#allocation25_spill] sm:$0xff] %v17588_v12  ;;  %v6596_v22 = vshll.u32 %v17580_v19, 16  ;;  %v17606_v20 = vadd.s32 512, %v16913_v10  ;;  %v19310_v18 = vmax.f32 %v17588_v12, 0.0  ;;  %v19862_v36 = vand.u32 31, %v17271_v14 }
 0x631   : > { %vm17600_vm14 = vcmp.le.s32.totalorder %v19858_v50, 16  ;;  %v19863_v30 = vmov 0  ;;  %v6594_v2 = vor.u32 %v6592_v34, %v6590_v63  ;;  %vm19865_vm12 = vcmask 1046528   ;;  %v5083_v34 = vpop.f32.mrb[57].mxu0 }
 0x632   : > { %v19860_v5 = vsel %vm17600_vm14, 4294967295, %v19859_v5  ;;  %vm17611_vm15 = vcmp.ge.s32.totalorder %v19862_v36, 1  ;;  %v17616_v33 = vsel %vm19865_vm12, %v7475_v13, %v7477_v45  ;;  %v7479_v46 = vrot.slane %v17580_v19, 1  ;;  %v13381_v0 = vpop.f32.mrb[58].mxu0 }
 0x633   : > { %19861 = vst [vmem:[#allocation154_spill] sm:$0xff] %v19860_v5  ;;  %v19864_v30 = vsel %vm17611_vm15, 4294967295, %v19863_v30  ;;  %19866 = vst [vmem:[#allocation155_spill] sm:$0xff] %v17616_v33  ;;  %v5452_v56 = vmax.f32 %v5379_v60, 0.0  ;;  %v5380_v7 = vadd.f32 %v16934_v25, %v5302_v31  ;;  %v6598_v54 = vrot.slane %v6596_v22, 1  ;;  %v19868_v31 = vld [vmem:[#allocation31_spill] sm:$0xff] }
 0x634   : > { %v6608_v50 = vshrl.u32 %v17568_v47, 16  ;;  %v6331_v14 = vsel %vm17542_vm1, %v19310_v18, 0.0  ;;  %v14159_v36 = vadd.f32 %v13380_v29, %v19867_v15  ;;  %v6600_v13 = vshrl.u32 %v17580_v19, 16  ;;  %v17636_v18 = vld [vmem:[%s19037_s3] ss:$0 sm:$0xff]  ;;  %v5086_v15 = vpop.f32.mrb[59].mxu0 }
 0x635   : > { %v6606_v63 = vrot.slane %v6604_v62, 1  ;;  %v17628_v51 = vpack.c.bf16 %v19735_v39, %v6331_v14  ;;  %v6329_v25 = vsel %vm17551_vm0, %v5452_v56, 0.0  ;;  %v5453_v60 = vmax.f32 %v5380_v7, 0.0  ;;  %v19893_v5 = vld [vmem:[#allocation41_spill] sm:$0xff] }
 0x636   : > { %v14160_v22 = vadd.f32 %v5083_v34, %v19868_v31  ;;  %v5307_v29 = vmul.f32 %v17636_v18, %v14159_v36  ;;  %vm19869_vm12 = vsmask.f32 7424  ;;  %v6602_v62 = vor.u32 %v6600_v13, %v6598_v54  ;;  %v19874_v34 = vld [vmem:[#allocation32_spill] sm:$0xff] }
 0x637   : > { %v17640_v19 = vsel %vm19869_vm12, %v6594_v2, %v6598_v54  ;;  %vm19871_vm1 = vcmask 1046528   ;;  %v6378_v33 = vpack.c.bf16 %v5453_v60, %v6329_v25  ;;  %v17645_v7 = vpack.c.bf16 %v5453_v60, %v5452_v56  ;;  %v17653_v36 = vld [vmem:[%s19037_s3 + $0x1] ss:$0 sm:$0xff] }
 0x638   : > { %19870 = vst [vmem:[#allocation26_spill] sm:$0xff] %v17640_v19  ;;  %v17643_v14 = vsel %vm19871_vm1, %v7477_v45, %v7479_v46  ;;  %v5305_v0 = vmul.f32 %v17636_v18, %v14160_v22  ;;  %v14161_v31 = vadd.f32 %v5086_v15, %v19874_v34  ;;  %13459 = vmatmul.mubr.bf16.gmra.mrb[92].mxu1 %v17640_v19  ;;  %v6620_v56 = vshll.u32 %v17628_v51, 16  ;;  %v13384_v19 = vpop.f32.mrb[60].mxu0 }
 0x639   : > { %19872 = vst [vmem:[#allocation31_spill] sm:$0xff] %v17643_v14  ;;  %19873 = vst [vmem:[#allocation156_spill] sm:$0xff] %v17645_v7  ;;  %v17656_v2 = vadd.f32 %v17653_v36, %v5307_v29  ;;  %v17659_v45 = vsel %vm19869_vm12, %v6602_v62, %v6606_v63  ;;  %v7481_v54 = vrot.slane %v17568_v47, 1  ;;  %v19877_v60 = vand.u32 31, %v17293_v1  ;;  %v5099_v4 = vpop.f32.mrb[61].mxu0 }
 0x63a   : > { %19876 = vst [vmem:[#allocation157_spill] sm:$0xff] %v17659_v45  ;;  %v5383_v13 = vadd.f32 %v17653_v36, %v5305_v0  ;;  %v5306_v25 = vmul.f32 %v17636_v18, %v14161_v31  ;;  %13462 = vmatprep.mubr.bf16.mxu1 %v17659_v45  ;;  %v19878_v22 = vmov 0  ;;  %v6612_v29 = vshll.u32 %v6378_v33, 16  ;;  %v13385_v12 = vpop.f32.mrb[62].mxu0 }
 0x63b   : > { %19875 = vst [vmem:[#allocation32_spill] sm:$0xff] %v17656_v2  ;;  %vm17668_vm1 = vcmp.le.s32.totalorder %v19877_v60, 16  ;;  %v19325_v62 = vmax.f32 %v17656_v2, 0.0  ;;  %v19881_v34 = vand.u32 31, %v17307_v38  ;;  %v19882_v47 = vmov 0  ;;  %v5102_v21 = vpop.f32.mrb[63].mxu0 }
 0x63c   : > { %v19879_v22 = vsel %vm17668_vm1, 4294967295, %v19878_v22  ;;  %v6610_v0 = vor.u32 %v6608_v50, %v6606_v63  ;;  %vm19884_vm0 = vcmask 1046528   ;;  %v7483_v1 = vrot.slane %v6378_v33, 1 }
 0x63d   : > { %19880 = vst [vmem:[#allocation158_spill] sm:$0xff] %v19879_v22  ;;  %vm17676_vm12 = vcmp.ge.s32.totalorder %v19881_v34, 1  ;;  %v17681_v31 = vsel %vm19884_vm0, %v7479_v46, %v7481_v54  ;;  %v5456_v60 = vmax.f32 %v5383_v13, 0.0  ;;  %v5384_v45 = vadd.f32 %v17653_v36, %v5306_v25  ;;  %v19886_v34 = vld [vmem:[#allocation35_spill] sm:$0xff]  ;;  %v19913_v22 = vld [vmem:[#allocation52_spill] sm:$0xff] }
 0x63e   : > { %v19883_v47 = vsel %vm17676_vm12, 4294967295, %v19882_v47  ;;  %19885 = vst [vmem:[#allocation159_spill] sm:$0xff] %v17681_v31  ;;  %v6614_v14 = vrot.slane %v6612_v29, 1  ;;  %v6624_v15 = vshrl.u32 %v17628_v51, 16  ;;  %v6335_v38 = vsel %vm17600_vm14, %v19325_v62, 0.0  ;;  %v19887_v29 = vld [vmem:[#allocation40_spill] sm:$0xff] }
 0x63f   : > { %v14162_v58 = vadd.f32 %v13384_v19, %v19886_v34  ;;  %v6616_v50 = vshrl.u32 %v6378_v33, 16  ;;  %v6622_v63 = vrot.slane %v6620_v56, 1  ;;  %v17691_v46 = vpack.c.bf16 %v19735_v39, %v6335_v38 }
 0x640   : > { %v6333_v13 = vsel %vm17611_vm15, %v5456_v60, 0.0  ;;  %v5457_v25 = vmax.f32 %v5384_v45, 0.0  ;;  %v14163_v31 = vadd.f32 %v5099_v4, %v19887_v29  ;;  %vm19888_vm0 = vsmask.f32 7424 }
 0x641   : > { %v5311_v2 = vmul.f32 %v17636_v18, %v14162_v58  ;;  %v17698_v62 = vsel %vm19888_vm0, %v6610_v0, %v6614_v14  ;;  %v6618_v19 = vor.u32 %v6616_v50, %v6614_v14  ;;  %vm19890_vm14 = vcmask 1046528   ;;  %vm19895_vm15 = vmmov %vm19888_vm0 }
 0x642   : > { %19889 = vst [vmem:[#allocation35_spill] sm:$0xff] %v17698_v62  ;;  %v17701_v33 = vsel %vm19890_vm14, %v7481_v54, %v7483_v1  ;;  %v6380_v56 = vpack.c.bf16 %v5457_v25, %v6333_v13  ;;  %v17703_v38 = vpack.c.bf16 %v5457_v25, %v5456_v60  ;;  %v5309_v34 = vmul.f32 %v17636_v18, %v14163_v31 }
 0x643   : > { %19891 = vst [vmem:[#allocation40_spill] sm:$0xff] %v17701_v33  ;;  %v14164_v45 = vadd.f32 %v5102_v21, %v19893_v5  ;;  %13463 = vmatmul.mubr.bf16.gmra.mrb[96].mxu1 %v17698_v62  ;;  %v17709_v4 = vadd.f32 %v17653_v36, %v5311_v2  ;;  %v17712_v58 = vsel %vm19895_vm15, %v6618_v19, %v6622_v63  ;;  %v6636_v12 = vshll.u32 %v17691_v46, 16 }
 0x644   : > { %19892 = vst [vmem:[#allocation160_spill] sm:$0xff] %v17703_v38  ;;  %19896 = vst [vmem:[#allocation161_spill] sm:$0xff] %v17712_v58  ;;  %v7485_v14 = vrot.slane %v17628_v51, 1  ;;  %v5387_v54 = vadd.f32 %v17653_v36, %v5309_v34  ;;  %13466 = vmatprep.mubr.bf16.mxu1 %v17712_v58  ;;  %v19897_v21 = vand.u32 31, %v17382_v17  ;;  %v19898_v5 = vmov 0  ;;  %v13388_v34 = vpop.f32.mrb[64].mxu0 }
 0x645   : > { %19894 = vst [vmem:[#allocation41_spill] sm:$0xff] %v17709_v4  ;;  %v5310_v0 = vmul.f32 %v17636_v18, %v14164_v45  ;;  %v6628_v2 = vshll.u32 %v6380_v56, 16  ;;  %v17726_v31 = vadd.s32 528, %v16913_v10  ;;  %v19336_v60 = vmax.f32 %v17709_v4, 0.0  ;;  %v5115_v58 = vpop.f32.mrb[65].mxu0 }
 0x646   : > { %vm17721_vm14 = vcmp.le.s32.totalorder %v19897_v21, 16  ;;  %v19901_v51 = vand.u32 31, %v17437_v3  ;;  %v19902_v50 = vmov 0  ;;  %v6626_v13 = vor.u32 %v6624_v15, %v6622_v63  ;;  %v19906_v21 = vld [vmem:[#allocation46_spill] sm:$0xff] }
 0x647   : > { %v19899_v5 = vsel %vm17721_vm14, 4294967295, %v19898_v5  ;;  %vm19904_vm0 = vcmask 1046528   ;;  %v7487_v17 = vrot.slane %v6380_v56, 1  ;;  %v5460_v29 = vmax.f32 %v5387_v54, 0.0 }
 0x648   : > { %19900 = vst [vmem:[#allocation162_spill] sm:$0xff] %v19899_v5  ;;  %vm17731_vm15 = vcmp.ge.s32.totalorder %v19901_v51, 1  ;;  %v17736_v25 = vsel %vm19904_vm0, %v7483_v1, %v7485_v14  ;;  %v5388_v19 = vadd.f32 %v17653_v36, %v5310_v0  ;;  %v6630_v45 = vrot.slane %v6628_v2, 1  ;;  %v19907_v2 = vld [vmem:[#allocation47_spill] sm:$0xff] }
 0x649   : > { %v19903_v50 = vsel %vm17731_vm15, 4294967295, %v19902_v50  ;;  %19905 = vst [vmem:[#allocation163_spill] sm:$0xff] %v17736_v25  ;;  %v6640_v10 = vshrl.u32 %v17691_v46, 16  ;;  %v6339_v3 = vsel %vm17668_vm1, %v19336_v60, 0.0  ;;  %v14165_v51 = vadd.f32 %v13388_v34, %v19906_v21  ;;  %v13389_v25 = vpop.f32.mrb[66].mxu0 }
 0x64a   : > { %v6632_v15 = vshrl.u32 %v6380_v56, 16  ;;  %v6638_v63 = vrot.slane %v6636_v12, 1  ;;  %v17746_v1 = vpack.c.bf16 %v19735_v39, %v6339_v3  ;;  %v6337_v54 = vsel %vm17676_vm12, %v5460_v29, 0.0  ;;  %v5118_v4 = vpop.f32.mrb[67].mxu0 }
 0x64b   : > { %v5461_v0 = vmax.f32 %v5388_v19, 0.0  ;;  %v14166_v62 = vadd.f32 %v5115_v58, %v19907_v2  ;;  %v5315_v33 = vmul.f32 %v17636_v18, %v14165_v51  ;;  %vm19908_vm0 = vsmask.f32 7424 }
 0x64c   : > { %v17753_v60 = vsel %vm19908_vm0, %v6626_v13, %v6630_v45  ;;  %v6634_v34 = vor.u32 %v6632_v15, %v6630_v45  ;;  %vm19910_vm1 = vcmask 1046528   ;;  %v14167_v19 = vadd.f32 %v5118_v4, %v19913_v22  ;;  %vm19915_vm12 = vmmov %vm19908_vm0 }
 0x64d   : > { %19909 = vst [vmem:[#allocation46_spill] sm:$0xff] %v17753_v60  ;;  %v17756_v56 = vsel %vm19910_vm1, %v7485_v14, %v7487_v17  ;;  %v6382_v12 = vpack.c.bf16 %v5461_v0, %v6337_v54  ;;  %v17758_v3 = vpack.c.bf16 %v5461_v0, %v5460_v29  ;;  %v5313_v21 = vmul.f32 %v17636_v18, %v14166_v62 }
 0x64e   : > { %19911 = vst [vmem:[#allocation47_spill] sm:$0xff] %v17756_v56  ;;  %13467 = vmatmul.mubr.bf16.gmra.mrb[100].mxu1 %v17753_v60  ;;  %v17764_v58 = vadd.f32 %v17653_v36, %v5315_v33  ;;  %v17767_v25 = vsel %vm19915_vm12, %v6634_v34, %v6638_v63  ;;  %v6652_v13 = vshll.u32 %v17746_v1, 16  ;;  %v7489_v14 = vrot.slane %v17691_v46, 1  ;;  %v13392_v34 = vpop.f32.mrb[68].mxu0  ;;  %v19924_v60 = vld [vmem:[#allocation58_spill] sm:$0xff] }
 0x64f   : > { %19912 = vst [vmem:[#allocation164_spill] sm:$0xff] %v17758_v3  ;;  %19916 = vst [vmem:[#allocation165_spill] sm:$0xff] %v17767_v25  ;;  %v5391_v45 = vadd.f32 %v17653_v36, %v5313_v21  ;;  %v5314_v29 = vmul.f32 %v17636_v18, %v14167_v19  ;;  %13470 = vmatprep.mubr.bf16.mxu1 %v17767_v25  ;;  %v6644_v62 = vshll.u32 %v6382_v12, 16  ;;  %v5617_v22 = vand.u32 31, %v17726_v31  ;;  %v19923_v19 = vld [vmem:[#allocation53_spill] sm:$0xff]  ;;  %v5131_v25 = vpop.f32.mrb[69].mxu0 }
 0x650   : > { %19914 = vst [vmem:[#allocation52_spill] sm:$0xff] %v17764_v58  ;;  %v19348_v4 = vmax.f32 %v17764_v58, 0.0  ;;  %v19917_v33 = vand.u32 31, %v17606_v20  ;;  %v19918_v51 = vmov 0  ;;  %v6642_v15 = vor.u32 %v6640_v10, %v6638_v63 }
 0x651   : > { %vm19921_vm12 = vcmask 1046528   ;;  %v7491_v54 = vrot.slane %v6382_v12, 1  ;;  %v5464_v0 = vmax.f32 %v5391_v45, 0.0  ;;  %v5392_v2 = vadd.f32 %v17653_v36, %v5314_v29 }
 0x652   : > { %vm17778_vm1 = vcmp.ge.s32.totalorder %v19917_v33, 1  ;;  %v17783_v46 = vsel %vm19921_vm12, %v7487_v17, %v7489_v14  ;;  %v6646_v21 = vrot.slane %v6644_v62, 1  ;;  %v6656_v31 = vshrl.u32 %v17746_v1, 16 }
 0x653   : > { %v19919_v51 = vsel %vm17778_vm1, 4294967295, %v19918_v51  ;;  %19922 = vst [vmem:[#allocation167_spill] sm:$0xff] %v17783_v46  ;;  %v6343_v20 = vsel %vm17721_vm14, %v19348_v4, 0.0  ;;  %v14168_v33 = vadd.f32 %v13392_v34, %v19923_v19  ;;  %v6648_v10 = vshrl.u32 %v6382_v12, 16  ;;  %v13393_v46 = vpop.f32.mrb[70].mxu0  ;;  %v19927_v19 = vld [vmem:[#allocation59_spill] sm:$0xff]  ;;  %vm19929_vm14 = vmmov %vm19908_vm0 }
 0x654   : > { %19920 = vst [vmem:[#allocation166_spill] sm:$0xff] %v19919_v51  ;;  %v6654_v63 = vrot.slane %v6652_v13, 1  ;;  %v6385_v17 = vpack.c.bf16 %v19735_v39, %v6343_v20  ;;  %v6341_v45 = vsel %vm17731_vm15, %v5464_v0, 0.0  ;;  %v5465_v29 = vmax.f32 %v5392_v2, 0.0  ;;  %v5134_v58 = vpop.f32.mrb[71].mxu0 }
 0x655   : > { %v14169_v62 = vadd.f32 %v5131_v25, %v19924_v60  ;;  %v5319_v56 = vmul.f32 %v17636_v18, %v14168_v33  ;;  %v17798_v5 = vsel %vm19908_vm0, %v6642_v15, %v6646_v21  ;;  %v6650_v4 = vor.u32 %v6648_v10, %v6646_v21 }
 0x656   : > { %19925 = vst [vmem:[#allocation53_spill] sm:$0xff] %v17798_v5  ;;  %v17801_v34 = vsel %vm19921_vm12, %v7489_v14, %v7491_v54  ;;  %v6384_v12 = vpack.c.bf16 %v5465_v29, %v6341_v45  ;;  %v17803_v13 = vpack.c.bf16 %v5465_v29, %v5464_v0  ;;  %v14170_v2 = vadd.f32 %v5134_v58, %v19927_v19 }
 0x657   : > { %v5317_v20 = vmul.f32 %v17636_v18, %v14169_v62  ;;  %13471 = vmatmul.mubr.bf16.gmra.mrb[104].mxu1 %v17798_v5  ;;  %v17809_v60 = vadd.f32 %v17653_v36, %v5319_v56  ;;  %v17812_v25 = vsel %vm19929_vm14, %v6650_v4, %v6654_v63  ;;  %v6668_v15 = vshll.u32 %v6385_v17, 16  ;;  %vm19935_vm14 = vmmov %vm19921_vm12 }
 0x658   : > { %19926 = vst [vmem:[#allocation58_spill] sm:$0xff] %v17803_v13  ;;  %19930 = vst [vmem:[#allocation168_spill] sm:$0xff] %v17812_v25  ;;  %v7493_v46 = vrot.slane %v17746_v1, 1  ;;  %v5318_v0 = vmul.f32 %v17636_v18, %v14170_v2  ;;  %13474 = vmatprep.mubr.bf16.mxu1 %v17812_v25  ;;  %v6660_v21 = vshll.u32 %v6384_v12, 16  ;;  %vm17818_vm0 = vcmp.le.s32.totalorder %v5617_v22, 16 }
 0x659   : > { %19928 = vst [vmem:[#allocation59_spill] sm:$0xff] %v17809_v60  ;;  %v5395_v14 = vadd.f32 %v17653_v36, %v5317_v20  ;;  %v19931_v58 = vmov 0  ;;  %v19351_v56 = vmax.f32 %v17809_v60, 0.0  ;;  %v6658_v33 = vor.u32 %v6656_v31, %v6654_v63  ;;  %vm19939_vm15 = vmmov %vm19935_vm14 }
 0x65a   : > { %v19932_v58 = vsel %vm17818_vm0, 4294967295, %v19931_v58  ;;  %v17824_v4 = vsel %vm19921_vm12, %v7491_v54, %v7493_v46  ;;  %v7495_v10 = vrot.slane %v6384_v12, 1  ;;  %v5396_v1 = vadd.f32 %v17653_v36, %v5318_v0 }
 0x65b   : > { %19933 = vst [vmem:[#allocation169_spill] sm:$0xff] %v19932_v58  ;;  %19934 = vst [vmem:[#allocation170_spill] sm:$0xff] %v17824_v4  ;;  %v5468_v45 = vmax.f32 %v5395_v14, 0.0  ;;  %v6662_v29 = vrot.slane %v6660_v21, 1  ;;  %v6664_v62 = vshrl.u32 %v6384_v12, 16  ;;  %v6670_v18 = vrot.slane %v6668_v15, 1 }
 0x65c   : > { %v17828_v20 = vsel %vm19935_vm14, %v7493_v46, %v7495_v10  ;;  %v7497_v22 = vrot.slane %v6385_v17, 1  ;;  %v6347_v19 = vsel %vm17818_vm0, %v19351_v56, 0.0  ;;  %v5469_v31 = vmax.f32 %v5396_v1, 0.0 }
 0x65d   : > { %19936 = vst [vmem:[#allocation171_spill] sm:$0xff] %v17828_v20  ;;  %v6345_v54 = vsel %vm17778_vm1, %v5468_v45, 0.0  ;;  %vm19937_vm12 = vsmask.f32 7424  ;;  %v6666_v36 = vor.u32 %v6664_v62, %v6662_v29  ;;  %v17843_v15 = vpack.c.bf16 %v19735_v39, %v6347_v19 }
 0x65e   : > { %v17837_v63 = vsel %vm19937_vm12, %v6658_v33, %v6662_v29  ;;  %v6402_v2 = vpack.c.bf16 %v6345_v54, %v6345_v54  ;;  %v17840_v12 = vsel %vm19939_vm15, %v7495_v10, %v7497_v22  ;;  %v7934_v46 = vpack.c.bf16 %v5469_v31, %v6345_v54  ;;  %vm19943_vm14 = vmmov %vm19937_vm12 }
 0x65f   : > { %19938 = vst [vmem:[#allocation172_spill] sm:$0xff] %v17837_v63  ;;  %19940 = vst [vmem:[#allocation173_spill] sm:$0xff] %v17840_v12  ;;  %v17845_v14 = vpack.c.bf16 %v5469_v31, %v5468_v45  ;;  %13475 = vmatmul.mubr.bf16.gmra.mrb[108].mxu1 %v17837_v63  ;;  %v17849_v0 = vsel %vm19943_vm14, %v6666_v36, %v6670_v18  ;;  %v6672_v21 = vshrl.u32 %v6385_v17, 16  ;;  %v8381_v10 = vshll.u32 %v17843_v15, 16 }
 0x660   : > { %19941 = vst [vmem:[#allocation174_spill] sm:$0xff] %v17843_v15  ;;  %19944 = vst [vmem:[#allocation176_spill] sm:$0xff] %v17849_v0  ;;  %13478 = vmatprep.mubr.bf16.mxu1 %v17849_v0  ;;  %v6676_v33 = vshll.u32 %v6402_v2, 16  ;;  %v7499_v1 = vrot.slane %v6402_v2, 1  ;;  %v8373_v29 = vshll.u32 %v7934_v46, 16  ;;  %v8817_v62 = vrot.slane %v7934_v46, 1 }
 0x661   : > { %19942 = vst [vmem:[#allocation175_spill] sm:$0xff] %v17845_v14  ;;  %v19358_v19 = vrot.slane %v17843_v15, 1  ;;  %v6674_v56 = vor.u32 %v6672_v21, %v6670_v18  ;;  %v8377_v63 = vshrl.u32 %v7934_v46, 16  ;;  %vm19945_vm12 = vmmov %vm19939_vm15  ;;  %vm19949_vm0 = vsmask.f32 7424 }
 0x662   : > { %v6678_v54 = vrot.slane %v6676_v33, 1  ;;  %v17855_v45 = vsel %vm19939_vm15, %v7497_v22, %v7499_v1  ;;  %v8375_v31 = vrot.slane %v8373_v29, 1  ;;  %v17858_v36 = vsel %vm19945_vm12, %v7497_v22, %v8817_v62  ;;  %vm19947_vm14 = vmmov %vm19945_vm12  ;;  %v15319_v29 = vld [vmem:[#allocation7 + $0x90] sm:$0xff]   ;;  %v15320_v33 = vld [vmem:[#allocation7 + $0x98] sm:$0xff]  }
 0x663   : > { %19946 = vst [vmem:[#allocation177_spill] sm:$0xff] %v17858_v36  ;;  %v17863_v17 = vsel %vm19947_vm14, %v8817_v62, %v19358_v19  ;;  %vm19950_vm1 = vmmov %vm19949_vm0  ;;  %v17869_v21 = vrot.slane %v8381_v10, 1  ;;  %v19359_v22 = vmov 0.0|0.0   ;;  %vm19443_vm12 = vmmov 1   ;;  %v19967_v10 = vld [vmem:[#allocation99_spill] sm:$0xff]  ;;  %v19976_v36 = vld [vmem:[#allocation105_spill] sm:$0xff] }
 0x664   : > { %19948 = vst [vmem:[#allocation178_spill] sm:$0xff] %v17863_v17  ;;  %v6679_v2 = vsel %vm19949_vm0, %v6674_v56, %v6678_v54  ;;  %v17867_v0 = vsel %vm19950_vm1, %v6674_v56, %v8375_v31  ;;  %v8379_v18 = vor.u32 %v8377_v63, %v8375_v31  ;;  %vm19953_vm15 = vmmov %vm19949_vm0  ;;  %v15318_v56 = vld [vmem:[#allocation7 + $0x88] sm:$0xff]   ;;  %v19958_v63 = vld [vmem:[#allocation82_spill] sm:$0xff]  ;;  %v19994_v5 = vmov 0 }
 0x665   : > { %19951 = vst [vmem:[#allocation179_spill] sm:$0xff] %v17867_v0  ;;  %19952 = vst [vmem:[#allocation180_spill] sm:$0xff] %v17869_v21  ;;  %v19962_v54 = vld [vmem:[#allocation65_spill] sm:$0xff]  ;;  %v19998_v60 = vmov 0  ;;  %v20006_v58 = vmov 0  ;;  %v20014_v14 = vmov 0 }
 0x666   : > { %v17873_v46 = vsel %vm19953_vm15, %v8379_v18, %v17869_v21  ;;  %vm17879_vm14 = vmpackc.low %vm19443_vm12, %vm16952_vm3  ;;  %v19963_v31 = vmax.f32 %v19962_v54, 0.0  ;;  %v19971_v18 = vld [vmem:[#allocation83_spill] sm:$0xff]  ;;  %v15322_v54 = vld [vmem:[#allocation7 + $0xa8] sm:$0xff]  }
 0x667   : > { %13479 = vmatmul.mubr.bf16.gmra.mrb[112].mxu1 %v6679_v2  ;;  %19954 = vst [vmem:[#allocation181_spill] sm:$0xff] %v17873_v46  ;;  %vm17891_vm1 = vmpackc.low %vm19443_vm12, %vm16941_vm2  ;;  %v19972_v19 = vmax.f32 %v19971_v18, 0.0  ;;  %v19980_v18 = vld [vmem:[#allocation136_spill] sm:$0xff]  ;;  %v15338_v1 = vld [vmem:[#allocation7 + $0x128] sm:$0xff]  }
 0x668   : > { %13498 = vmatprep.mubr.bf16.mxu1 %v19359_v22  ;;  %v17898_v2 = vpack.c.bf16 %v19735_v39, %v19963_v31  ;;  %vm17903_vm3 = vmpackc.low %vm19443_vm12, %vm16969_vm5  ;;  %v19981_v21 = vmax.f32 %v19980_v18, 0.0  ;;  %v19988_v18 = vld [vmem:[#allocation106_spill] sm:$0xff]  ;;  %v15340_v62 = vld [vmem:[#allocation7 + $0x138] sm:$0xff]  }
 0x669   : > { %vm17916_vm2 = vmpackc.low %vm19443_vm12, %vm16958_vm4  ;;  %v19989_v0 = vmax.f32 %v19988_v18, 0.0 }
 0x66a   : > { %vm17928_vm5 = vmpackc.low %vm19443_vm12, %vm17028_vm7  ;;  %v17948_v15 = vpack.c.bf16 %v19735_v39, %v19981_v21  ;;  %v17963_v21 = vld [vmem:[#allocation7 + $0xc0] sm:$0xff]  }
 0x66b   : > { %vm17941_vm4 = vmpackc.low %vm19443_vm12, %vm17023_vm6  ;;  %v17975_v25 = vpack.c.bf16 %v19735_v39, %v19989_v0  ;;  %v19996_v0 = vld [vmem:[#allocation113_spill] sm:$0xff] }
 0x66c   : > { %vm17953_vm7 = vmpackc.low %vm19443_vm12, %vm17089_vm9  ;;  %v19997_v46 = vmax.f32 %v19996_v0, 0.0  ;;  %v20004_v0 = vmax.f32 %v20003_v37, 0.0 }
 0x66d   : > { %vm17968_vm6 = vmpackc.low %vm19443_vm12, %vm17081_vm8 }
 0x66e   : > { %vm17980_vm9 = vmpackc.low %vm19443_vm12, %vm17148_vm11  ;;  %v18001_v18 = vpack.c.bf16 %v19735_v39, %v19997_v46  ;;  %v18026_v46 = vpack.c.bf16 %v19735_v39, %v20004_v0  ;;  %v20291_v17 = vld [vmem:[#allocation181_spill] sm:$0xff] }
 0x66f   : > { %13499 = vmatmul.mubr.bf16.vlgmr.msra.gmra.mrb[52].mxu1 %v19359_v22  ;;  %v17923_v22 = vpack.c.bf16 %v19735_v39, %v19972_v19  ;;  %v15323_v19 = vld [vmem:[#allocation7 + $0xb0] sm:$0xff]   ;;  %vm17994_vm8 = vmpackc.low %vm19443_vm12, %vm17140_vm10  ;;  %vm20000_vm10 = vnez %v19768_v26  ;;  %v20009_v26 = vmov 0 }
 0x670   : > { %13502 = vmatprep.mubr.msk.bf16.mxu1 %vm17879_vm14, %v19958_v63  ;;  %13563 = vmatpush3.bf16.msra.mxu1 %v17245_v57  ;;  %v19995_v5 = vsel %vm17994_vm8, 4294967295, %v19994_v5  ;;  %vm18006_vm11 = vmpackc.low %vm19443_vm12, %vm17212_vm13  ;;  %vm20005_vm13 = vnez %v19782_v9  ;;  %v20011_v9 = vld [vmem:[#allocation139_spill] sm:$0xff] }
 0x671   : > { %13564 = vmatprep.subr.bf16.mxu1 %v15318_v56  ;;  %v19999_v60 = vsel %vm18006_vm11, 4294967295, %v19998_v60  ;;  %vm18019_vm0 = vmpackc.low %vm19443_vm12, %vm20000_vm10  ;;  %vm20008_vm10 = vnez %v19779_v11  ;;  %v20012_v37 = vmax.f32 %v20011_v9, 0.0  ;;  %v20017_v11 = vmov 0 }
 0x672   : > { %vm18031_vm15 = vmpackc.low %vm19443_vm12, %vm20005_vm13  ;;  %vm20013_vm13 = vnez %v19793_v6  ;;  %v20019_v6 = vmax.f32 %v17365_v52, 0.0  ;;  %v20026_v52 = vmax.f32 %v17420_v35, 0.0  ;;  %v20033_v35 = vmax.f32 %v17475_v8, 0.0 }
 0x673   : > { %v20007_v58 = vsel %vm18031_vm15, 4294967295, %v20006_v58  ;;  %v18051_v0 = vpack.c.bf16 %v19735_v39, %v20012_v37  ;;  %v20021_v37 = vmov 0  ;;  %v20041_v8 = vmax.f32 %v17530_v40, 0.0 }
 0x674   : > { %13565 = vmatpush3.bf16.msra.mxu1 %v15318_v56  ;;  %v15321_v56 = vld [vmem:[#allocation7 + $0xa0] sm:$0xff]   ;;  %v18076_v9 = vpack.c.bf16 %v19735_v39, %v20019_v6  ;;  %v20028_v6 = vmov 0  ;;  %v20049_v40 = vmov 0 }
 0x675   : > { %13566 = vmatprep.subr.bf16.mxu1 %v15319_v29 }
 0x677   : > { %13503 = vmatmul.mubr.msk.bf16.gmra.mrb[56].mxu1 %vm17891_vm1, %v17898_v2 }
 0x678   : > { %13506 = vmatprep.mubr.msk.bf16.mxu1 %vm17903_vm3, %v19967_v10  ;;  %13567 = vmatpush3.bf16.msra.mxu1 %v15319_v29  ;;  %v20255_v29 = vld [vmem:[#allocation58_spill] sm:$0xff] }
 0x679   : > { %13568 = vmatprep.subr.bf16.mxu1 %v15320_v33 }
 0x67c   : > { %13569 = vmatpush3.bf16.msra.mxu1 %v15320_v33  ;;  %v15324_v33 = vld [vmem:[#allocation7 + $0xb8] sm:$0xff]  }
 0x67d   : > { %13570 = vmatprep.subr.bf16.mxu1 %v15321_v56 }
 0x67f   : > { %13507 = vmatmul.mubr.msk.bf16.gmra.mrb[60].mxu1 %vm17916_vm2, %v17923_v22 }
 0x680   : > { %13510 = vmatprep.mubr.msk.bf16.mxu1 %vm17928_vm5, %v19976_v36  ;;  %13571 = vmatpush3.bf16.msra.mxu1 %v15321_v56 }
 0x681   : > { %13572 = vmatprep.subr.bf16.mxu1 %v15322_v54 }
 0x684   : > { %13573 = vmatpush3.bf16.msra.mxu1 %v15322_v54 }
 0x685   : > { %13574 = vmatprep.subr.bf16.mxu1 %v15323_v19 }
 0x687   : > { %13511 = vmatmul.mubr.msk.bf16.gmra.mrb[64].mxu1 %vm17941_vm4, %v17948_v15 }
 0x688   : > { %13514 = vmatprep.mubr.msk.bf16.mxu1 %vm17953_vm7, %v17178_v23  ;;  %13575 = vmatpush3.bf16.msra.mxu1 %v15323_v19  ;;  %v20259_v19 = vld [vmem:[#allocation175_spill] sm:$0xff] }
 0x689   : > { %13576 = vmatprep.subr.bf16.mxu1 %v15324_v33 }
 0x68c   : > { %13577 = vmatpush3.bf16.msra.mxu1 %v15324_v33  ;;  %v20001_v33 = vmov 0 }
 0x68d   : > { %13642 = vmatprep.subr.bf16.mxu1 %v17963_v21  ;;  %v20002_v33 = vsel %vm18019_vm0, 4294967295, %v20001_v33 }
 0x68f   : > { %13515 = vmatmul.mubr.msk.bf16.gmra.mrb[68].mxu1 %vm17968_vm6, %v17975_v25 }
 0x690   : > { %13518 = vmatprep.mubr.msk.bf16.mxu1 %vm17980_vm9, %v17233_v24 }
 0x697   : > { %13519 = vmatmul.mubr.msk.bf16.gmra.mrb[72].mxu1 %vm17994_vm8, %v18001_v18 }
 0x698   : > { %13522 = vmatprep.mubr.msk.bf16.mxu1 %vm18006_vm11, %v17309_v61  ;;  %vm18044_vm11 = vmpackc.low %vm19443_vm12, %vm20008_vm10  ;;  %vm20016_vm10 = vnez %v19790_v28  ;;  %v20024_v28 = vmov 0 }
 0x699   : > { %v20010_v26 = vsel %vm18044_vm11, 4294967295, %v20009_v26 }
 0x69f   : > { %13523 = vmatmul.mubr.msk.bf16.gmra.mrb[76].mxu1 %vm18019_vm0, %v18026_v46  ;;  %vm18056_vm0 = vmpackc.low %vm19443_vm12, %vm20013_vm13  ;;  %vm20020_vm13 = vnez %v19805_v16  ;;  %v18101_v16 = vpack.c.bf16 %v19735_v39, %v20026_v52  ;;  %v20035_v52 = vmov 0 }
 0x6a0   : > { %13526 = vmatprep.mubr.msk.bf16.mxu1 %vm18031_vm15, %v17359_v27  ;;  %v20015_v14 = vsel %vm18056_vm0, 4294967295, %v20014_v14  ;;  %vm18069_vm15 = vmpackc.low %vm19443_vm12, %vm20016_vm10  ;;  %vm20023_vm10 = vnez %v19802_v59  ;;  %v20031_v59 = vmov 0 }
 0x6a1   : > { %v20018_v11 = vsel %vm18069_vm15, 4294967295, %v20017_v11 }
 0x6a7   : > { %13527 = vmatmul.mubr.msk.bf16.gmra.mrb[80].mxu1 %vm18044_vm11, %v18051_v0  ;;  %vm18081_vm11 = vmpackc.low %vm19443_vm12, %vm20020_vm13  ;;  %vm20027_vm13 = vnez %v19819_v42  ;;  %v18126_v42 = vpack.c.bf16 %v19735_v39, %v20033_v35  ;;  %v20044_v35 = vmov 0 }
 0x6a8   : > { %13530 = vmatprep.mubr.msk.bf16.mxu1 %vm18056_vm0, %v17414_v49  ;;  %v20022_v37 = vsel %vm18081_vm11, 4294967295, %v20021_v37  ;;  %vm18094_vm0 = vmpackc.low %vm19443_vm12, %vm20023_vm10  ;;  %vm20030_vm10 = vnez %v19816_v43  ;;  %v20038_v43 = vmov 0 }
 0x6a9   : > { %v20025_v28 = vsel %vm18094_vm0, 4294967295, %v20024_v28 }
 0x6af   : > { %13531 = vmatmul.mubr.msk.bf16.gmra.mrb[84].mxu1 %vm18069_vm15, %v18076_v9  ;;  %vm18106_vm15 = vmpackc.low %vm19443_vm12, %vm20027_vm13  ;;  %vm20034_vm13 = vnez %v19833_v32  ;;  %v18151_v32 = vpack.c.bf16 %v19735_v39, %v20041_v8 }
 0x6b0   : > { %13534 = vmatprep.mubr.msk.bf16.mxu1 %vm18081_vm11, %v17469_v44  ;;  %v20029_v6 = vsel %vm18106_vm15, 4294967295, %v20028_v6  ;;  %vm18119_vm11 = vmpackc.low %vm19443_vm12, %vm20030_vm10  ;;  %vm20037_vm10 = vnez %v19830_v48  ;;  %v20047_v48 = vld [vmem:[#allocation149_spill] sm:$0xff] }
 0x6b1   : > { %v20032_v59 = vsel %vm18119_vm11, 4294967295, %v20031_v59  ;;  %20042 = vst [vmem:[#allocation82_spill] sm:$0xff] %v18151_v32 }
 0x6b7   : > { %13535 = vmatmul.mubr.msk.bf16.gmra.mrb[88].mxu1 %vm18094_vm0, %v18101_v16  ;;  %vm18131_vm0 = vmpackc.low %vm19443_vm12, %vm20034_vm13  ;;  %vm20043_vm13 = vnez %v19848_v41  ;;  %v20052_v41 = vld [vmem:[#allocation25_spill] sm:$0xff] }
 0x6b8   : > { %13538 = vmatprep.mubr.msk.bf16.mxu1 %vm18106_vm15, %v17524_v53  ;;  %v20036_v52 = vsel %vm18131_vm0, 4294967295, %v20035_v52  ;;  %vm18144_vm15 = vmpackc.low %vm19443_vm12, %vm20037_vm10  ;;  %vm20048_vm10 = vnez %v20047_v48  ;;  %v20053_v8 = vmax.f32 %v20052_v41, 0.0  ;;  %v20059_v48 = vld [vmem:[#allocation154_spill] sm:$0xff]  ;;  %v20061_v41 = vmov 0 }
 0x6b9   : > { %v20039_v43 = vsel %vm18144_vm15, 4294967295, %v20038_v43 }
 0x6ba   : > { %20040 = vst [vmem:[#allocation70_spill] sm:$0xff] %v20039_v43  ;;  %v18176_v51 = vpack.c.bf16 %v19735_v39, %v20053_v8  ;;  %v20056_v43 = vmov 0 }
 0x6bc   : > { %20054 = vst [vmem:[#allocation76_spill] sm:$0xff] %v18176_v51 }
 0x6bf   : > { %13539 = vmatmul.mubr.msk.bf16.gmra.mrb[92].mxu1 %vm18119_vm11, %v18126_v42  ;;  %vm18156_vm11 = vmpackc.low %vm19443_vm12, %vm20043_vm13  ;;  %vm20055_vm13 = vnez %v19864_v30  ;;  %v20064_v30 = vld [vmem:[#allocation32_spill] sm:$0xff] }
 0x6c0   : > { %13542 = vmatprep.mubr.msk.bf16.mxu1 %vm18131_vm0, %v17582_v55  ;;  %v20045_v35 = vsel %vm18156_vm11, 4294967295, %v20044_v35  ;;  %vm18169_vm0 = vmpackc.low %vm19443_vm12, %vm20048_vm10  ;;  %vm20060_vm10 = vnez %v20059_v48  ;;  %v20065_v8 = vmax.f32 %v20064_v30, 0.0  ;;  %v20071_v48 = vld [vmem:[#allocation158_spill] sm:$0xff]  ;;  %v20073_v30 = vmov 0 }
 0x6c1   : > { %20046 = vst [vmem:[#allocation64_spill] sm:$0xff] %v20045_v35  ;;  %v20050_v40 = vsel %vm18169_vm0, 4294967295, %v20049_v40 }
 0x6c2   : > { %20051 = vst [vmem:[#allocation65_spill] sm:$0xff] %v20050_v40  ;;  %v18201_v35 = vpack.c.bf16 %v19735_v39, %v20065_v8  ;;  %v20068_v40 = vmov 0 }
 0x6c4   : > { %20066 = vst [vmem:[#allocation83_spill] sm:$0xff] %v18201_v35 }
 0x6c7   : > { %13543 = vmatmul.mubr.msk.bf16.gmra.mrb[96].mxu1 %vm18144_vm15, %v18151_v32  ;;  %vm18181_vm15 = vmpackc.low %vm19443_vm12, %vm20055_vm13  ;;  %vm20067_vm13 = vnez %v19883_v47  ;;  %v20076_v47 = vld [vmem:[#allocation41_spill] sm:$0xff] }
 0x6c8   : > { %13546 = vmatprep.mubr.msk.bf16.mxu1 %vm18156_vm11, %v17645_v7  ;;  %v20057_v43 = vsel %vm18181_vm15, 4294967295, %v20056_v43  ;;  %vm18194_vm11 = vmpackc.low %vm19443_vm12, %vm20060_vm10  ;;  %vm20072_vm10 = vnez %v20071_v48  ;;  %v20077_v8 = vmax.f32 %v20076_v47, 0.0  ;;  %v20083_v48 = vld [vmem:[#allocation162_spill] sm:$0xff]  ;;  %v20085_v47 = vmov 0 }
 0x6c9   : > { %20058 = vst [vmem:[#allocation99_spill] sm:$0xff] %v20057_v43  ;;  %v20062_v41 = vsel %vm18194_vm11, 4294967295, %v20061_v41 }
 0x6ca   : > { %20063 = vst [vmem:[#allocation71_spill] sm:$0xff] %v20062_v41  ;;  %v18226_v43 = vpack.c.bf16 %v19735_v39, %v20077_v8  ;;  %v20080_v41 = vmov 0 }
 0x6cc   : > { %20078 = vst [vmem:[#allocation88_spill] sm:$0xff] %v18226_v43 }
 0x6cf   : > { %13547 = vmatmul.mubr.msk.bf16.gmra.mrb[100].mxu1 %vm18169_vm0, %v18176_v51  ;;  %vm18206_vm0 = vmpackc.low %vm19443_vm12, %vm20067_vm13  ;;  %vm20079_vm13 = vnez %v19903_v50  ;;  %v20088_v50 = vld [vmem:[#allocation52_spill] sm:$0xff] }
 0x6d0   : > { %13550 = vmatprep.mubr.msk.bf16.mxu1 %vm18181_vm15, %v17703_v38  ;;  %v20069_v40 = vsel %vm18206_vm0, 4294967295, %v20068_v40  ;;  %vm18219_vm15 = vmpackc.low %vm19443_vm12, %vm20072_vm10  ;;  %vm20084_vm10 = vnez %v20083_v48  ;;  %v20089_v8 = vmax.f32 %v20088_v50, 0.0  ;;  %v15326_v48 = vld [vmem:[#allocation7 + $0xc8] sm:$0xff]   ;;  %v20096_v50 = vld [vmem:[#allocation94_spill] sm:$0xff] }
 0x6d1   : > { %20070 = vst [vmem:[#allocation89_spill] sm:$0xff] %v20069_v40  ;;  %v20074_v30 = vsel %vm18219_vm15, 4294967295, %v20073_v30 }
 0x6d2   : > { %20075 = vst [vmem:[#allocation105_spill] sm:$0xff] %v20074_v30  ;;  %v18251_v40 = vpack.c.bf16 %v19735_v39, %v20089_v8  ;;  %v15327_v8 = vld [vmem:[#allocation7 + $0xd0] sm:$0xff]   ;;  %v20097_v39 = vld [vmem:[#allocation141_spill] sm:$0xff] }
 0x6d4   : > { %20090 = vst [vmem:[#allocation138_spill] sm:$0xff] %v18251_v40 }
 0x6d7   : > { %13551 = vmatmul.mubr.msk.bf16.gmra.mrb[104].mxu1 %vm18194_vm11, %v18201_v35  ;;  %vm18231_vm11 = vmpackc.low %vm19443_vm12, %vm20079_vm13  ;;  %vm20095_vm13 = vcmask 1046528  }
 0x6d8   : > { %13554 = vmatprep.mubr.msk.bf16.mxu1 %vm18206_vm0, %v17758_v3  ;;  %v20081_v41 = vsel %vm18231_vm11, 4294967295, %v20080_v41  ;;  %vm18244_vm0 = vmpackc.low %vm19443_vm12, %vm20084_vm10  ;;  %v20091_v3 = vmov 0.0|0.0   ;;  %vm20123_vm10 = vnez %v20007_v58  ;;  %vm20125_vm12 = vnez %v20015_v14  ;;  %v20250_v57 = vld [vmem:[#allocation89_spill] sm:$0xff] }
 0x6d9   : > { %20082 = vst [vmem:[#allocation136_spill] sm:$0xff] %v20081_v41  ;;  %v20086_v47 = vsel %vm18244_vm0, 4294967295, %v20085_v47  ;;  %v18254_v35 = vrot.slane %v20091_v3, 1  ;;  %v20093_v41 = vld [vmem:[#allocation77_spill] sm:$0xff]  ;;  %v15328_v3 = vld [vmem:[#allocation7 + $0xd8] sm:$0xff]  }
 0x6da   : > { %20087 = vst [vmem:[#allocation140_spill] sm:$0xff] %v20086_v47  ;;  %v20098_v47 = vld [vmem:[#allocation104_spill] sm:$0xff]  ;;  %v20253_v31 = vld [vmem:[#allocation105_spill] sm:$0xff] }
 0x6db   : > { %20092 = vst [vmem:[#allocation106_spill] sm:$0xff] %v18254_v35  ;;  %v20257_v56 = vld [vmem:[#allocation138_spill] sm:$0xff] }
 0x6df   : > { %13555 = vmatmul.mubr.msk.bf16.gmra.mrb[108].mxu1 %vm18219_vm15, %v18226_v43 }
 0x6e0   : > { %13558 = vmatprep.mubr.msk.bf16.mxu1 %vm18231_vm11, %v17803_v13  ;;  %v20094_v13 = vrot.slane %v20093_v41, 1  ;;  %v15329_v41 = vld [vmem:[#allocation7 + $0xe0] sm:$0xff]  }
 0x6e2   : > { %v7440_v30 = vsel %vm20095_vm13, %v18254_v35, %v20094_v13  ;;  %v15330_v13 = vld [vmem:[#allocation7 + $0xe8] sm:$0xff]   ;;  %vm20124_vm13 = vnez %v20010_v26 }
 0x6e7   : > { %13559 = vmatmul.mubr.msk.bf16.gmra.mrb[112].mxu1 %vm18244_vm0, %v18251_v40  ;;  %v20113_v40 = vld [vmem:[#allocation152_spill] sm:$0xff] }
 0x6e8   : > { %13578 = vmatprep.mubr.bf16.mxu1 %v18254_v35  ;;  %v20100_v35 = vld [vmem:[#allocation112_spill] sm:$0xff] }
 0x6ef   : > { %13579 = vmatmul.mubr.bf16.vlgmr.msra.gmra.mrb[52].mxu1 %v7440_v30  ;;  %v20099_v30 = vld [vmem:[#allocation110_spill] sm:$0xff] }
 0x6f0   : > { %13582 = vmatprep.mubr.bf16.mxu1 %v20096_v50  ;;  %13643 = vmatpush3.bf16.msra.mxu1 %v17963_v21  ;;  %v15331_v21 = vld [vmem:[#allocation7 + $0xf0] sm:$0xff]   ;;  %v20101_v50 = vld [vmem:[#allocation119_spill] sm:$0xff] }
 0x6f1   : > { %13644 = vmatprep.subr.bf16.mxu1 %v15326_v48 }
 0x6f4   : > { %13645 = vmatpush3.bf16.msra.mxu1 %v15326_v48  ;;  %v15332_v48 = vld [vmem:[#allocation7 + $0xf8] sm:$0xff]  }
 0x6f5   : > { %13646 = vmatprep.subr.bf16.mxu1 %v15327_v8 }
 0x6f7   : > { %13583 = vmatmul.mubr.bf16.gmra.mrb[56].mxu1 %v20097_v39  ;;  %v20102_v39 = vld [vmem:[#allocation123_spill] sm:$0xff] }
 0x6f8   : > { %13586 = vmatprep.mubr.bf16.mxu1 %v20098_v47  ;;  %13647 = vmatpush3.bf16.msra.mxu1 %v15327_v8  ;;  %v15333_v8 = vld [vmem:[#allocation7 + $0x100] sm:$0xff]  }
 0x6f9   : > { %13648 = vmatprep.subr.bf16.mxu1 %v15328_v3  ;;  %v20108_v47 = vld [vmem:[#allocation116_spill] sm:$0xff] }
 0x6fc   : > { %13649 = vmatpush3.bf16.msra.mxu1 %v15328_v3  ;;  %v20103_v3 = vld [vmem:[#allocation126_spill] sm:$0xff] }
 0x6fd   : > { %13650 = vmatprep.subr.bf16.mxu1 %v15329_v41 }
 0x6ff   : > { %13587 = vmatmul.mubr.bf16.gmra.mrb[60].mxu1 %v20099_v30  ;;  %v20104_v30 = vld [vmem:[#allocation134_spill] sm:$0xff] }
 0x700   : > { %13590 = vmatprep.mubr.bf16.mxu1 %v20100_v35  ;;  %13651 = vmatpush3.bf16.msra.mxu1 %v15329_v41  ;;  %v20105_v35 = vld [vmem:[#allocation130_spill] sm:$0xff]  ;;  %v20106_v41 = vld [vmem:[#allocation132_spill] sm:$0xff] }
 0x701   : > { %13652 = vmatprep.subr.bf16.mxu1 %v15330_v13 }
 0x704   : > { %13653 = vmatpush3.bf16.msra.mxu1 %v15330_v13  ;;  %v20107_v13 = vld [vmem:[#allocation135_spill] sm:$0xff] }
 0x705   : > { %13654 = vmatprep.subr.bf16.mxu1 %v15331_v21 }
 0x707   : > { %13591 = vmatmul.mubr.bf16.gmra.mrb[64].mxu1 %v20101_v50  ;;  %v20109_v50 = vld [vmem:[#allocation143_spill] sm:$0xff] }
 0x708   : > { %13594 = vmatprep.mubr.bf16.mxu1 %v20102_v39  ;;  %13655 = vmatpush3.bf16.msra.mxu1 %v15331_v21  ;;  %v20110_v39 = vld [vmem:[#allocation145_spill] sm:$0xff]  ;;  %v20111_v21 = vld [vmem:[#allocation147_spill] sm:$0xff] }
 0x709   : > { %13656 = vmatprep.subr.bf16.mxu1 %v15332_v48 }
 0x70c   : > { %13657 = vmatpush3.bf16.msra.mxu1 %v15332_v48  ;;  %v20112_v48 = vld [vmem:[#allocation150_spill] sm:$0xff] }
 0x70d   : > { %13722 = vmatprep.subr.bf16.mxu1 %v15333_v8 }
 0x70f   : > { %13595 = vmatmul.mubr.bf16.gmra.mrb[68].mxu1 %v20103_v3  ;;  %v20114_v3 = vld [vmem:[#allocation155_spill] sm:$0xff] }
 0x710   : > { %13598 = vmatprep.mubr.bf16.mxu1 %v20104_v30  ;;  %v20115_v30 = vld [vmem:[#allocation31_spill] sm:$0xff] }
 0x717   : > { %13599 = vmatmul.mubr.bf16.gmra.mrb[72].mxu1 %v20105_v35  ;;  %v20116_v35 = vld [vmem:[#allocation159_spill] sm:$0xff] }
 0x718   : > { %13602 = vmatprep.mubr.bf16.mxu1 %v20106_v41  ;;  %v20117_v41 = vld [vmem:[#allocation40_spill] sm:$0xff] }
 0x71f   : > { %13603 = vmatmul.mubr.bf16.gmra.mrb[76].mxu1 %v20107_v13  ;;  %v20118_v13 = vld [vmem:[#allocation163_spill] sm:$0xff] }
 0x720   : > { %13606 = vmatprep.mubr.bf16.mxu1 %v20108_v47  ;;  %v20119_v47 = vld [vmem:[#allocation47_spill] sm:$0xff] }
 0x727   : > { %13607 = vmatmul.mubr.bf16.gmra.mrb[80].mxu1 %v20109_v50  ;;  %v20120_v50 = vld [vmem:[#allocation167_spill] sm:$0xff] }
 0x728   : > { %13610 = vmatprep.mubr.bf16.mxu1 %v20110_v39 }
 0x72f   : > { %13611 = vmatmul.mubr.bf16.gmra.mrb[84].mxu1 %v20111_v21 }
 0x730   : > { %13614 = vmatprep.mubr.bf16.mxu1 %v20112_v48 }
 0x737   : > { %13615 = vmatmul.mubr.bf16.gmra.mrb[88].mxu1 %v20113_v40 }
 0x738   : > { %13618 = vmatprep.mubr.bf16.mxu1 %v20114_v3 }
 0x73f   : > { %13619 = vmatmul.mubr.bf16.gmra.mrb[92].mxu1 %v20115_v30 }
 0x740   : > { %13622 = vmatprep.mubr.bf16.mxu1 %v20116_v35 }
 0x747   : > { %13623 = vmatmul.mubr.bf16.gmra.mrb[96].mxu1 %v20117_v41  ;;  %v15334_v41 = vld [vmem:[#allocation7 + $0x108] sm:$0xff]  }
 0x748   : > { %13626 = vmatprep.mubr.bf16.mxu1 %v20118_v13 }
 0x74f   : > { %13627 = vmatmul.mubr.bf16.gmra.mrb[100].mxu1 %v20119_v47 }
 0x750   : > { %13630 = vmatprep.mubr.bf16.mxu1 %v20120_v50 }
 0x757   : > { %13631 = vmatmul.mubr.bf16.gmra.mrb[104].mxu1 %v17801_v34 }
 0x758   : > { %13634 = vmatprep.mubr.bf16.mxu1 %v17824_v4 }
 0x75f   : > { %13635 = vmatmul.mubr.bf16.gmra.mrb[108].mxu1 %v17828_v20  ;;  %v15335_v20 = vld [vmem:[#allocation7 + $0x110] sm:$0xff]  }
 0x760   : > { %13638 = vmatprep.mubr.bf16.mxu1 %v17840_v12  ;;  %v15336_v12 = vld [vmem:[#allocation7 + $0x118] sm:$0xff]  }
 0x767   : > { %13639 = vmatmul.mubr.bf16.gmra.mrb[112].mxu1 %v17855_v45  ;;  %v15337_v45 = vld [vmem:[#allocation7 + $0x120] sm:$0xff]  }
 0x768   : > { %13658 = vmatprep.mubr.msk.bf16.mxu1 %vm17879_vm14, %v19958_v63  ;;  %v15339_v63 = vld [vmem:[#allocation7 + $0x130] sm:$0xff]   ;;  %vm20121_vm14 = vnez %v19999_v60 }
 0x76f   : > { %13659 = vmatmul.mubr.msk.bf16.vlgmr.msra.gmra.mrb[52].mxu1 %vm17891_vm1, %v17898_v2  ;;  %vm20122_vm1 = vnez %v20002_v33  ;;  %v20134_v2 = vld [vmem:[#allocation64_spill] sm:$0xff] }
 0x770   : > { %13662 = vmatprep.mubr.msk.bf16.mxu1 %vm17903_vm3, %v19967_v10  ;;  %13723 = vmatpush3.bf16.msra.mxu1 %v15333_v8  ;;  %v20136_v8 = vld [vmem:[#allocation65_spill] sm:$0xff] }
 0x771   : > { %13724 = vmatprep.subr.bf16.mxu1 %v15334_v41 }
 0x774   : > { %13725 = vmatpush3.bf16.msra.mxu1 %v15334_v41  ;;  %v20138_v41 = vld [vmem:[#allocation99_spill] sm:$0xff] }
 0x775   : > { %13726 = vmatprep.subr.bf16.mxu1 %v15335_v20 }
 0x777   : > { %13663 = vmatmul.mubr.msk.bf16.gmra.mrb[56].mxu1 %vm17916_vm2, %v17923_v22 }
 0x778   : > { %13666 = vmatprep.mubr.msk.bf16.mxu1 %vm17928_vm5, %v19976_v36  ;;  %13727 = vmatpush3.bf16.msra.mxu1 %v15335_v20  ;;  %v15341_v20 = vld [vmem:[#allocation7 + $0x140] sm:$0xff]  }
 0x779   : > { %13728 = vmatprep.subr.bf16.mxu1 %v15336_v12 }
 0x77c   : > { %13729 = vmatpush3.bf16.msra.mxu1 %v15336_v12  ;;  %v20132_v12 = vld [vmem:[#allocation70_spill] sm:$0xff] }
 0x77d   : > { %13730 = vmatprep.subr.bf16.mxu1 %v15337_v45 }
 0x77f   : > { %13667 = vmatmul.mubr.msk.bf16.gmra.mrb[60].mxu1 %vm17941_vm4, %v17948_v15 }
 0x780   : > { %13670 = vmatprep.mubr.msk.bf16.mxu1 %vm17953_vm7, %v17178_v23  ;;  %13731 = vmatpush3.bf16.msra.mxu1 %v15337_v45  ;;  %v20140_v45 = vld [vmem:[#allocation83_spill] sm:$0xff] }
 0x781   : > { %13732 = vmatprep.subr.bf16.mxu1 %v15338_v1 }
 0x784   : > { %13733 = vmatpush3.bf16.msra.mxu1 %v15338_v1  ;;  %v20141_v1 = vld [vmem:[#allocation71_spill] sm:$0xff] }
 0x785   : > { %13734 = vmatprep.subr.bf16.mxu1 %v15339_v63 }
 0x787   : > { %13671 = vmatmul.mubr.msk.bf16.gmra.mrb[64].mxu1 %vm17968_vm6, %v17975_v25 }
 0x788   : > { %13674 = vmatprep.mubr.msk.bf16.mxu1 %vm17980_vm9, %v17233_v24  ;;  %13735 = vmatpush3.bf16.msra.mxu1 %v15339_v63  ;;  %v20143_v63 = vld [vmem:[#allocation164_spill] sm:$0xff] }
 0x789   : > { %13736 = vmatprep.subr.bf16.mxu1 %v15340_v62 }
 0x78c   : > { %13737 = vmatpush3.bf16.msra.mxu1 %v15340_v62  ;;  %v20144_v62 = vld [vmem:[#allocation89_spill] sm:$0xff] }
 0x78d   : > { %13802 = vmatprep.subr.bf16.mxu1 %v15341_v20 }
 0x78f   : > { %13675 = vmatmul.mubr.msk.bf16.gmra.mrb[68].mxu1 %vm17994_vm8, %v18001_v18  ;;  %vm20126_vm8 = vnez %v20018_v11 }
 0x790   : > { %13678 = vmatprep.mubr.msk.bf16.mxu1 %vm20121_vm14, %v17309_v61  ;;  %vm20127_vm14 = vnez %v20022_v37 }
 0x797   : > { %13679 = vmatmul.mubr.msk.bf16.gmra.mrb[72].mxu1 %vm20122_vm1, %v18026_v46  ;;  %vm20128_vm1 = vnez %v20025_v28 }
 0x798   : > { %13682 = vmatprep.mubr.msk.bf16.mxu1 %vm20123_vm10, %v17359_v27  ;;  %vm20129_vm10 = vnez %v20029_v6 }
 0x79f   : > { %13683 = vmatmul.mubr.msk.bf16.gmra.mrb[76].mxu1 %vm20124_vm13, %v18051_v0  ;;  %vm20130_vm13 = vnez %v20032_v59 }
 0x7a0   : > { %13686 = vmatprep.mubr.msk.bf16.mxu1 %vm20125_vm12, %v17414_v49  ;;  %vm20131_vm12 = vnez %v20036_v52 }
 0x7a7   : > { %13687 = vmatmul.mubr.msk.bf16.gmra.mrb[80].mxu1 %vm20126_vm8, %v18076_v9  ;;  %vm20133_vm8 = vnez %v20132_v12  ;;  %v20158_v12 = vld [vmem:[#allocation169_spill] sm:$0xff] }
 0x7a8   : > { %13690 = vmatprep.mubr.msk.bf16.mxu1 %vm20127_vm14, %v17469_v44  ;;  %vm20135_vm14 = vnez %v20134_v2  ;;  %v20147_v2 = vld [vmem:[#allocation58_spill] sm:$0xff] }
 0x7af   : > { %13691 = vmatmul.mubr.msk.bf16.gmra.mrb[84].mxu1 %vm20128_vm1, %v18101_v16  ;;  %vm20137_vm1 = vnez %v20136_v8  ;;  %v20149_v8 = vld [vmem:[#allocation166_spill] sm:$0xff] }
 0x7b0   : > { %13694 = vmatprep.mubr.msk.bf16.mxu1 %vm20129_vm10, %v17524_v53  ;;  %vm20139_vm10 = vnez %v20138_v41  ;;  %v20152_v41 = vmov 0 }
 0x7b7   : > { %13695 = vmatmul.mubr.msk.bf16.gmra.mrb[88].mxu1 %vm20130_vm13, %v18126_v42  ;;  %vm20142_vm13 = vnez %v20141_v1  ;;  %v20155_v1 = vld [vmem:[#allocation138_spill] sm:$0xff] }
 0x7b8   : > { %13698 = vmatprep.mubr.msk.bf16.mxu1 %vm20131_vm12, %v17582_v55  ;;  %vm20145_vm12 = vnez %v20144_v62  ;;  %v20157_v62 = vld [vmem:[#allocation175_spill] sm:$0xff] }
 0x7bf   : > { %13699 = vmatmul.mubr.msk.bf16.gmra.mrb[92].mxu1 %vm20133_vm8, %v18151_v32  ;;  %v20200_v32 = vld [vmem:[#allocation20_spill] sm:$0xff] }
 0x7c0   : > { %13702 = vmatprep.mubr.msk.bf16.mxu1 %vm20135_vm14, %v17645_v7  ;;  %vm20151_vm14 = vmmov 1   ;;  %v20160_v7 = vmov 0 }
 0x7c7   : > { %13703 = vmatmul.mubr.msk.bf16.gmra.mrb[96].mxu1 %vm20137_vm1, %v18176_v51  ;;  %vm20150_vm1 = vnez %v20149_v8  ;;  %v20163_v8 = vld [vmem:[#allocation59_spill] sm:$0xff]  ;;  %v20199_v51 = vld [vmem:[#allocation180_spill] sm:$0xff] }
 0x7c8   : > { %13706 = vmatprep.mubr.msk.bf16.mxu1 %vm20139_vm10, %v17703_v38  ;;  %vm18385_vm10 = vmpackc.low %vm20151_vm14, %vm20150_vm1  ;;  %v20170_v38 = vld [vmem:[#allocation111_spill] sm:$0xff]  ;;  %vm20231_vm1 = vnez %v20022_v37  ;;  %v15367_v37 = vld [vmem:[#allocation7 + $0x210] sm:$0xff]  }
 0x7c9   : > { %v20153_v41 = vsel %vm18385_vm10, 4294967295, %v20152_v41 }
 0x7ca   : > { %20154 = vst [vmem:[#allocation109_spill] sm:$0xff] %v20153_v41  ;;  %v15342_v41 = vld [vmem:[#allocation7 + $0x148] sm:$0xff]  }
 0x7cf   : > { %13707 = vmatmul.mubr.msk.bf16.gmra.mrb[100].mxu1 %vm20142_vm13, %v20140_v45  ;;  %v20167_v45 = vld [vmem:[#allocation137_spill] sm:$0xff] }
 0x7d0   : > { %13710 = vmatprep.mubr.msk.bf16.mxu1 %vm20145_vm12, %v20143_v63 }
 0x7d7   : > { %13711 = vmatmul.mubr.msk.bf16.gmra.mrb[104].mxu1 %vm18219_vm15, %v18226_v43  ;;  %vm20159_vm15 = vnez %v20158_v12  ;;  %v20165_v43 = vmov 0.0   ;;  %v20169_v12 = vld [vmem:[#allocation107_spill] sm:$0xff] }
 0x7d8   : > { %13714 = vmatprep.mubr.msk.bf16.mxu1 %vm18231_vm11, %v20147_v2  ;;  %vm18398_vm12 = vmpackc.low %vm20151_vm14, %vm20159_vm15  ;;  %v20164_v2 = vmax.f32 %v20163_v8, 0.0  ;;  %v15344_v8 = vld [vmem:[#allocation7 + $0x158] sm:$0xff]   ;;  %vm20201_vm15 = vsmask.f32 7424  ;;  %vm20223_vm14 = vcmask 1046528  }
 0x7d9   : > { %v20161_v7 = vsel %vm18398_vm12, 4294967295, %v20160_v7 }
 0x7da   : > { %20162 = vst [vmem:[#allocation108_spill] sm:$0xff] %v20161_v7  ;;  %v18405_v63 = vpack.c.bf16 %v20165_v43, %v20164_v2  ;;  %v20171_v43 = vld [vmem:[#allocation118_spill] sm:$0xff]  ;;  %v15345_v2 = vld [vmem:[#allocation7 + $0x160] sm:$0xff]   ;;  %v20172_v7 = vld [vmem:[#allocation121_spill] sm:$0xff] }
 0x7dc   : > { %20166 = vst [vmem:[#allocation113_spill] sm:$0xff] %v18405_v63 }
 0x7df   : > { %13715 = vmatmul.mubr.msk.bf16.gmra.mrb[108].mxu1 %vm18244_vm0, %v20155_v1  ;;  %v15343_v1 = vld [vmem:[#allocation7 + $0x150] sm:$0xff]  }
 0x7e0   : > { %13718 = vmatprep.mubr.msk.bf16.mxu1 %vm18385_vm10, %v20157_v62  ;;  %v20168_v62 = vld [vmem:[#allocation103_spill] sm:$0xff] }
 0x7e7   : > { %13719 = vmatmul.mubr.msk.bf16.gmra.mrb[112].mxu1 %vm18398_vm12, %v18405_v63  ;;  %v20186_v63 = vld [vmem:[#allocation26_spill] sm:$0xff] }
 0x7e8   : > { %13738 = vmatprep.mubr.bf16.mxu1 %v20167_v45  ;;  %v15346_v45 = vld [vmem:[#allocation7 + $0x168] sm:$0xff]  }
 0x7ef   : > { %13739 = vmatmul.mubr.bf16.vlgmr.msra.gmra.mrb[52].mxu1 %v20168_v62  ;;  %v20173_v62 = vld [vmem:[#allocation124_spill] sm:$0xff] }
 0x7f0   : > { %13742 = vmatprep.mubr.bf16.mxu1 %v20169_v12  ;;  %13803 = vmatpush3.bf16.msra.mxu1 %v15341_v20  ;;  %v15347_v20 = vld [vmem:[#allocation7 + $0x170] sm:$0xff]   ;;  %v20174_v12 = vld [vmem:[#allocation127_spill] sm:$0xff] }
 0x7f1   : > { %13804 = vmatprep.subr.bf16.mxu1 %v15342_v41 }
 0x7f4   : > { %13805 = vmatpush3.bf16.msra.mxu1 %v15342_v41  ;;  %v15348_v41 = vld [vmem:[#allocation7 + $0x178] sm:$0xff]  }
 0x7f5   : > { %13806 = vmatprep.subr.bf16.mxu1 %v15343_v1 }
 0x7f7   : > { %13743 = vmatmul.mubr.bf16.gmra.mrb[56].mxu1 %v20170_v38  ;;  %v20175_v38 = vld [vmem:[#allocation128_spill] sm:$0xff] }
 0x7f8   : > { %13746 = vmatprep.mubr.bf16.mxu1 %v20171_v43  ;;  %13807 = vmatpush3.bf16.msra.mxu1 %v15343_v1  ;;  %v15349_v1 = vld [vmem:[#allocation7 + $0x180] sm:$0xff]  }
 0x7f9   : > { %13808 = vmatprep.subr.bf16.mxu1 %v15344_v8  ;;  %v20181_v43 = vld [vmem:[#allocation144_spill] sm:$0xff] }
 0x7fc   : > { %13809 = vmatpush3.bf16.msra.mxu1 %v15344_v8  ;;  %v20176_v8 = vld [vmem:[#allocation129_spill] sm:$0xff] }
 0x7fd   : > { %13810 = vmatprep.subr.bf16.mxu1 %v15345_v2 }
 0x7ff   : > { %13747 = vmatmul.mubr.bf16.gmra.mrb[60].mxu1 %v20172_v7  ;;  %v20177_v7 = vld [vmem:[#allocation131_spill] sm:$0xff] }
 0x800   : > { %13750 = vmatprep.mubr.bf16.mxu1 %v20173_v62  ;;  %13811 = vmatpush3.bf16.msra.mxu1 %v15345_v2  ;;  %v20178_v62 = vld [vmem:[#allocation133_spill] sm:$0xff]  ;;  %v20179_v2 = vld [vmem:[#allocation115_spill] sm:$0xff] }
 0x801   : > { %13812 = vmatprep.subr.bf16.mxu1 %v15346_v45 }
 0x804   : > { %13813 = vmatpush3.bf16.msra.mxu1 %v15346_v45  ;;  %v20180_v45 = vld [vmem:[#allocation142_spill] sm:$0xff] }
 0x805   : > { %13814 = vmatprep.subr.bf16.mxu1 %v15347_v20 }
 0x807   : > { %13751 = vmatmul.mubr.bf16.gmra.mrb[64].mxu1 %v20174_v12  ;;  %v20182_v12 = vld [vmem:[#allocation146_spill] sm:$0xff] }
 0x808   : > { %13754 = vmatprep.mubr.bf16.mxu1 %v20175_v38  ;;  %13815 = vmatpush3.bf16.msra.mxu1 %v15347_v20  ;;  %v20183_v38 = vld [vmem:[#allocation148_spill] sm:$0xff]  ;;  %v20184_v20 = vld [vmem:[#allocation151_spill] sm:$0xff] }
 0x809   : > { %13816 = vmatprep.subr.bf16.mxu1 %v15348_v41 }
 0x80c   : > { %13817 = vmatpush3.bf16.msra.mxu1 %v15348_v41  ;;  %v20185_v41 = vld [vmem:[#allocation153_spill] sm:$0xff] }
 0x80d   : > { %13882 = vmatprep.subr.bf16.mxu1 %v15349_v1 }
 0x80f   : > { %13755 = vmatmul.mubr.bf16.gmra.mrb[68].mxu1 %v20176_v8  ;;  %v20187_v8 = vld [vmem:[#allocation157_spill] sm:$0xff] }
 0x810   : > { %13758 = vmatprep.mubr.bf16.mxu1 %v20177_v7  ;;  %v20188_v7 = vld [vmem:[#allocation35_spill] sm:$0xff] }
 0x817   : > { %13759 = vmatmul.mubr.bf16.gmra.mrb[72].mxu1 %v20178_v62  ;;  %v20189_v62 = vld [vmem:[#allocation161_spill] sm:$0xff] }
 0x818   : > { %13762 = vmatprep.mubr.bf16.mxu1 %v20179_v2  ;;  %v20190_v2 = vld [vmem:[#allocation46_spill] sm:$0xff] }
 0x81f   : > { %13763 = vmatmul.mubr.bf16.gmra.mrb[76].mxu1 %v20180_v45  ;;  %v20191_v45 = vld [vmem:[#allocation165_spill] sm:$0xff] }
 0x820   : > { %13766 = vmatprep.mubr.bf16.mxu1 %v20181_v43  ;;  %v20192_v43 = vld [vmem:[#allocation53_spill] sm:$0xff] }
 0x827   : > { %13767 = vmatmul.mubr.bf16.gmra.mrb[80].mxu1 %v20182_v12  ;;  %v20193_v12 = vld [vmem:[#allocation168_spill] sm:$0xff] }
 0x828   : > { %13770 = vmatprep.mubr.bf16.mxu1 %v20183_v38  ;;  %v20194_v38 = vld [vmem:[#allocation172_spill] sm:$0xff] }
 0x82f   : > { %13771 = vmatmul.mubr.bf16.gmra.mrb[84].mxu1 %v20184_v20  ;;  %v20195_v20 = vld [vmem:[#allocation176_spill] sm:$0xff] }
 0x830   : > { %13774 = vmatprep.mubr.bf16.mxu1 %v20185_v41  ;;  %v20196_v41 = vld [vmem:[#allocation179_spill] sm:$0xff] }
 0x837   : > { %13775 = vmatmul.mubr.bf16.gmra.mrb[88].mxu1 %v20186_v63  ;;  %v20197_v63 = vld [vmem:[#allocation181_spill] sm:$0xff] }
 0x838   : > { %13778 = vmatprep.mubr.bf16.mxu1 %v20187_v8  ;;  %v20198_v8 = vld [vmem:[#allocation174_spill] sm:$0xff] }
 0x83f   : > { %13779 = vmatmul.mubr.bf16.gmra.mrb[92].mxu1 %v20188_v7  ;;  %v8385_v7 = vshrl.u32 %v20198_v8, 16 }
 0x840   : > { %13782 = vmatprep.mubr.bf16.mxu1 %v20189_v62 }
 0x841   : > { %v8387_v62 = vor.u32 %v8385_v7, %v20199_v51  ;;  %v20205_v7 = vld [vmem:[#allocation110_spill] sm:$0xff]  ;;  %v20206_v51 = vld [vmem:[#allocation112_spill] sm:$0xff] }
 0x847   : > { %13783 = vmatmul.mubr.bf16.gmra.mrb[96].mxu1 %v20190_v2  ;;  %v18445_v2 = vsel %vm20201_vm15, %v8387_v62, %v20200_v32  ;;  %v15353_v62 = vld [vmem:[#allocation7 + $0x1a0] sm:$0xff]   ;;  %v20207_v32 = vld [vmem:[#allocation119_spill] sm:$0xff]  ;;  %vm20232_vm15 = vnez %v20025_v28 }
 0x848   : > { %13786 = vmatprep.mubr.bf16.mxu1 %v20191_v45  ;;  %v15368_v28 = vld [vmem:[#allocation7 + $0x218] sm:$0xff]  }
 0x84f   : > { %13787 = vmatmul.mubr.bf16.gmra.mrb[100].mxu1 %v20192_v43  ;;  %v20202_v43 = vld [vmem:[#allocation94_spill] sm:$0xff] }
 0x850   : > { %13790 = vmatprep.mubr.bf16.mxu1 %v20193_v12  ;;  %v15350_v12 = vld [vmem:[#allocation7 + $0x188] sm:$0xff]  }
 0x857   : > { %13791 = vmatmul.mubr.bf16.gmra.mrb[104].mxu1 %v20194_v38  ;;  %v20203_v38 = vld [vmem:[#allocation141_spill] sm:$0xff] }
 0x858   : > { %13794 = vmatprep.mubr.bf16.mxu1 %v20195_v20  ;;  %v20204_v20 = vld [vmem:[#allocation104_spill] sm:$0xff] }
 0x85f   : > { %13795 = vmatmul.mubr.bf16.gmra.mrb[108].mxu1 %v20196_v41  ;;  %v15352_v41 = vld [vmem:[#allocation7 + $0x198] sm:$0xff]  }
 0x860   : > { %13798 = vmatprep.mubr.bf16.mxu1 %v20197_v63  ;;  %v15351_v63 = vld [vmem:[#allocation7 + $0x190] sm:$0xff]  }
 0x867   : > { %13799 = vmatmul.mubr.bf16.gmra.mrb[112].mxu1 %v18445_v2 }
 0x868   : > { %13818 = vmatprep.mubr.bf16.mxu1 %v20202_v43  ;;  %v15354_v43 = vld [vmem:[#allocation7 + $0x1a8] sm:$0xff]  }
 0x86f   : > { %13819 = vmatmul.mubr.bf16.vlgmr.msra.gmra.mrb[52].mxu1 %v20203_v38  ;;  %v20208_v38 = vld [vmem:[#allocation123_spill] sm:$0xff] }
 0x870   : > { %13822 = vmatprep.mubr.bf16.mxu1 %v20204_v20  ;;  %13883 = vmatpush3.bf16.msra.mxu1 %v15349_v1  ;;  %v15355_v1 = vld [vmem:[#allocation7 + $0x1b0] sm:$0xff]  }
 0x871   : > { %13884 = vmatprep.subr.bf16.mxu1 %v15350_v12  ;;  %v20209_v20 = vld [vmem:[#allocation126_spill] sm:$0xff] }
 0x874   : > { %13885 = vmatpush3.bf16.msra.mxu1 %v15350_v12  ;;  %v15356_v12 = vld [vmem:[#allocation7 + $0x1b8] sm:$0xff]  }
 0x875   : > { %13886 = vmatprep.subr.bf16.mxu1 %v15351_v63 }
 0x877   : > { %13823 = vmatmul.mubr.bf16.gmra.mrb[56].mxu1 %v20205_v7  ;;  %v20210_v7 = vld [vmem:[#allocation134_spill] sm:$0xff] }
 0x878   : > { %13826 = vmatprep.mubr.bf16.mxu1 %v20206_v51  ;;  %13887 = vmatpush3.bf16.msra.mxu1 %v15351_v63  ;;  %v15357_v63 = vld [vmem:[#allocation7 + $0x1c0] sm:$0xff]  }
 0x879   : > { %13888 = vmatprep.subr.bf16.mxu1 %v15352_v41 }
 0x87c   : > { %13889 = vmatpush3.bf16.msra.mxu1 %v15352_v41  ;;  %v20211_v41 = vld [vmem:[#allocation130_spill] sm:$0xff] }
 0x87d   : > { %13890 = vmatprep.subr.bf16.mxu1 %v15353_v62 }
 0x87f   : > { %13827 = vmatmul.mubr.bf16.gmra.mrb[60].mxu1 %v20207_v32  ;;  %v20212_v32 = vld [vmem:[#allocation132_spill] sm:$0xff] }
 0x880   : > { %13830 = vmatprep.mubr.bf16.mxu1 %v20208_v38  ;;  %13891 = vmatpush3.bf16.msra.mxu1 %v15353_v62  ;;  %v20213_v38 = vld [vmem:[#allocation135_spill] sm:$0xff]  ;;  %v20214_v62 = vld [vmem:[#allocation116_spill] sm:$0xff] }
 0x881   : > { %13892 = vmatprep.subr.bf16.mxu1 %v15354_v43 }
 0x884   : > { %13893 = vmatpush3.bf16.msra.mxu1 %v15354_v43  ;;  %v20215_v43 = vld [vmem:[#allocation143_spill] sm:$0xff] }
 0x885   : > { %13894 = vmatprep.subr.bf16.mxu1 %v15355_v1 }
 0x887   : > { %13831 = vmatmul.mubr.bf16.gmra.mrb[64].mxu1 %v20209_v20 }
 0x888   : > { %13834 = vmatprep.mubr.bf16.mxu1 %v20210_v7  ;;  %13895 = vmatpush3.bf16.msra.mxu1 %v15355_v1  ;;  %v20216_v1 = vld [vmem:[#allocation40_spill] sm:$0xff] }
 0x889   : > { %13896 = vmatprep.subr.bf16.mxu1 %v15356_v12 }
 0x88c   : > { %13897 = vmatpush3.bf16.msra.mxu1 %v15356_v12  ;;  %v20217_v12 = vld [vmem:[#allocation171_spill] sm:$0xff] }
 0x88d   : > { %13962 = vmatprep.subr.bf16.mxu1 %v15357_v63 }
 0x88f   : > { %13835 = vmatmul.mubr.bf16.gmra.mrb[68].mxu1 %v20211_v41 }
 0x890   : > { %13838 = vmatprep.mubr.bf16.mxu1 %v20212_v32 }
 0x897   : > { %13839 = vmatmul.mubr.bf16.gmra.mrb[72].mxu1 %v20213_v38 }
 0x898   : > { %13842 = vmatprep.mubr.bf16.mxu1 %v20214_v62 }
 0x89f   : > { %13843 = vmatmul.mubr.bf16.gmra.mrb[76].mxu1 %v20215_v43 }
 0x8a0   : > { %13846 = vmatprep.mubr.bf16.mxu1 %v20110_v39 }
 0x8a7   : > { %13847 = vmatmul.mubr.bf16.gmra.mrb[80].mxu1 %v20111_v21 }
 0x8a8   : > { %13850 = vmatprep.mubr.bf16.mxu1 %v20112_v48 }
 0x8af   : > { %13851 = vmatmul.mubr.bf16.gmra.mrb[84].mxu1 %v20113_v40  ;;  %v20218_v40 = vld [vmem:[#allocation173_spill] sm:$0xff] }
 0x8b0   : > { %13854 = vmatprep.mubr.bf16.mxu1 %v20114_v3  ;;  %v20219_v3 = vld [vmem:[#allocation177_spill] sm:$0xff] }
 0x8b7   : > { %13855 = vmatmul.mubr.bf16.gmra.mrb[88].mxu1 %v20115_v30  ;;  %v20220_v30 = vld [vmem:[#allocation178_spill] sm:$0xff] }
 0x8b8   : > { %13858 = vmatprep.mubr.bf16.mxu1 %v20116_v35  ;;  %v20221_v35 = vld [vmem:[#allocation106_spill] sm:$0xff] }
 0x8bf   : > { %13859 = vmatmul.mubr.bf16.gmra.mrb[92].mxu1 %v20216_v1  ;;  %v20222_v1 = vrot.slane %v20198_v8, 1  ;;  %v15359_v8 = vld [vmem:[#allocation7 + $0x1d0] sm:$0xff]  }
 0x8c0   : > { %13862 = vmatprep.mubr.bf16.mxu1 %v20118_v13 }
 0x8c1   : > { %v18483_v13 = vsel %vm20223_vm14, %v20222_v1, %v20221_v35  ;;  %v15360_v1 = vld [vmem:[#allocation7 + $0x1d8] sm:$0xff]   ;;  %vm20233_vm14 = vnez %v20029_v6  ;;  %v20268_v6 = vld [vmem:[#allocation124_spill] sm:$0xff] }
 0x8c7   : > { %13863 = vmatmul.mubr.bf16.gmra.mrb[96].mxu1 %v20119_v47 }
 0x8c8   : > { %13866 = vmatprep.mubr.bf16.mxu1 %v20120_v50 }
 0x8cf   : > { %13867 = vmatmul.mubr.bf16.gmra.mrb[100].mxu1 %v17801_v34 }
 0x8d0   : > { %13870 = vmatprep.mubr.bf16.mxu1 %v17824_v4  ;;  %v15358_v4 = vld [vmem:[#allocation7 + $0x1c8] sm:$0xff]  }
 0x8d7   : > { %13871 = vmatmul.mubr.bf16.gmra.mrb[104].mxu1 %v20217_v12 }
 0x8d8   : > { %13874 = vmatprep.mubr.bf16.mxu1 %v20218_v40 }
 0x8df   : > { %13875 = vmatmul.mubr.bf16.gmra.mrb[108].mxu1 %v20219_v3 }
 0x8e0   : > { %13878 = vmatprep.mubr.bf16.mxu1 %v20220_v30 }
 0x8e7   : > { %13879 = vmatmul.mubr.bf16.gmra.mrb[112].mxu1 %v18483_v13 }
 0x8e8   : > { %13898 = vmatprep.mubr.msk.bf16.mxu1 %vm17903_vm3, %v19967_v10  ;;  %vm20224_vm3 = vnez %v19995_v5  ;;  %v20252_v10 = vld [vmem:[#allocation88_spill] sm:$0xff]  ;;  %v20294_v5 = vld [vmem:[#allocation114_spill] sm:$0xff] }
 0x8ef   : > { %13899 = vmatmul.mubr.msk.bf16.vlgmr.msra.gmra.mrb[52].mxu1 %vm17916_vm2, %v17923_v22  ;;  %v15361_v22 = vld [vmem:[#allocation7 + $0x1e0] sm:$0xff]   ;;  %vm20225_vm2 = vnez %v19999_v60  ;;  %v20242_v60 = vld [vmem:[#allocation65_spill] sm:$0xff] }
 0x8f0   : > { %13902 = vmatprep.mubr.msk.bf16.mxu1 %vm17928_vm5, %v19976_v36  ;;  %13963 = vmatpush3.bf16.msra.mxu1 %v15357_v63  ;;  %v15362_v36 = vld [vmem:[#allocation7 + $0x1e8] sm:$0xff]   ;;  %vm20226_vm5 = vnez %v20002_v33  ;;  %v20270_v63 = vld [vmem:[#allocation128_spill] sm:$0xff] }
 0x8f1   : > { %13964 = vmatprep.subr.bf16.mxu1 %v15358_v4 }
 0x8f4   : > { %13965 = vmatpush3.bf16.msra.mxu1 %v15358_v4  ;;  %v15363_v4 = vld [vmem:[#allocation7 + $0x1f0] sm:$0xff]  }
 0x8f5   : > { %13966 = vmatprep.subr.bf16.mxu1 %v15359_v8 }
 0x8f7   : > { %13903 = vmatmul.mubr.msk.bf16.gmra.mrb[56].mxu1 %vm17941_vm4, %v17948_v15  ;;  %vm20227_vm4 = vnez %v20007_v58  ;;  %v20245_v58 = vld [vmem:[#allocation99_spill] sm:$0xff] }
 0x8f8   : > { %13906 = vmatprep.mubr.msk.bf16.mxu1 %vm17953_vm7, %v17178_v23  ;;  %13967 = vmatpush3.bf16.msra.mxu1 %v15359_v8  ;;  %v15364_v23 = vld [vmem:[#allocation7 + $0x1f8] sm:$0xff]   ;;  %vm20228_vm7 = vnez %v20010_v26  ;;  %v15371_v8 = vld [vmem:[#allocation7 + $0x230] sm:$0xff]  }
 0x8f9   : > { %13968 = vmatprep.subr.bf16.mxu1 %v15360_v1  ;;  %v20247_v15 = vld [vmem:[#allocation83_spill] sm:$0xff] }
 0x8fa   : > { %v20264_v26 = vld [vmem:[#allocation107_spill] sm:$0xff] }
 0x8fc   : > { %13969 = vmatpush3.bf16.msra.mxu1 %v15360_v1  ;;  %v15372_v1 = vld [vmem:[#allocation7 + $0x238] sm:$0xff]  }
 0x8fd   : > { %13970 = vmatprep.subr.bf16.mxu1 %v15361_v22 }
 0x8ff   : > { %13907 = vmatmul.mubr.msk.bf16.gmra.mrb[60].mxu1 %vm17968_vm6, %v17975_v25  ;;  %v15365_v25 = vld [vmem:[#allocation7 + $0x200] sm:$0xff]   ;;  %vm20229_vm6 = vnez %v20015_v14  ;;  %v20285_v14 = vld [vmem:[#allocation46_spill] sm:$0xff] }
 0x900   : > { %13910 = vmatprep.mubr.msk.bf16.mxu1 %vm17980_vm9, %v17233_v24  ;;  %13971 = vmatpush3.bf16.msra.mxu1 %v15361_v22  ;;  %vm20230_vm9 = vnez %v20018_v11  ;;  %v20236_v24 = vld [vmem:[#allocation82_spill] sm:$0xff]  ;;  %v20265_v11 = vld [vmem:[#allocation111_spill] sm:$0xff]  ;;  %v20271_v22 = vld [vmem:[#allocation129_spill] sm:$0xff] }
 0x901   : > { %13972 = vmatprep.subr.bf16.mxu1 %v15362_v36 }
 0x904   : > { %13973 = vmatpush3.bf16.msra.mxu1 %v15362_v36  ;;  %v20272_v36 = vld [vmem:[#allocation131_spill] sm:$0xff] }
 0x905   : > { %13974 = vmatprep.subr.bf16.mxu1 %v15363_v4 }
 0x907   : > { %13911 = vmatmul.mubr.msk.bf16.gmra.mrb[64].mxu1 %vm20224_vm3, %v18001_v18  ;;  %vm20234_vm3 = vnez %v20032_v59  ;;  %v20261_v18 = vld [vmem:[#allocation113_spill] sm:$0xff]  ;;  %v15369_v59 = vld [vmem:[#allocation7 + $0x220] sm:$0xff]  }
 0x908   : > { %13914 = vmatprep.mubr.msk.bf16.mxu1 %vm20225_vm2, %v17309_v61  ;;  %13975 = vmatpush3.bf16.msra.mxu1 %v15363_v4  ;;  %vm20235_vm2 = vnez %v20036_v52  ;;  %v20269_v52 = vld [vmem:[#allocation127_spill] sm:$0xff]  ;;  %v20273_v4 = vld [vmem:[#allocation133_spill] sm:$0xff]  ;;  %v20277_v61 = vld [vmem:[#allocation146_spill] sm:$0xff] }
 0x909   : > { %13976 = vmatprep.subr.bf16.mxu1 %v15364_v23 }
 0x90c   : > { %13977 = vmatpush3.bf16.msra.mxu1 %v15364_v23  ;;  %v20274_v23 = vld [vmem:[#allocation115_spill] sm:$0xff] }
 0x90d   : > { %14042 = vmatprep.subr.bf16.mxu1 %v15365_v25 }
 0x90f   : > { %13915 = vmatmul.mubr.msk.bf16.gmra.mrb[68].mxu1 %vm20226_vm5, %v18026_v46  ;;  %v20263_v46 = vmov 0.0|0.0  }
 0x910   : > { %13918 = vmatprep.mubr.msk.bf16.mxu1 %vm20227_vm4, %v17359_v27  ;;  %v20238_v27 = vld [vmem:[#allocation156_spill] sm:$0xff]  ;;  %vm20243_vm4 = vnez %v20242_v60  ;;  %v20281_v60 = vld [vmem:[#allocation26_spill] sm:$0xff] }
 0x917   : > { %13919 = vmatmul.mubr.msk.bf16.gmra.mrb[72].mxu1 %vm20228_vm7, %v18051_v0  ;;  %vm20246_vm7 = vnez %v20245_v58  ;;  %v15366_v0 = vld [vmem:[#allocation7 + $0x208] sm:$0xff]   ;;  %v20283_v58 = vld [vmem:[#allocation35_spill] sm:$0xff] }
 0x918   : > { %13922 = vmatprep.mubr.msk.bf16.mxu1 %vm20229_vm6, %v17414_v49  ;;  %v20239_v49 = vld [vmem:[#allocation64_spill] sm:$0xff]  ;;  %vm20251_vm6 = vnez %v20250_v57 }
 0x919   : > { %vm20240_vm5 = vnez %v20239_v49  ;;  %v20279_v49 = vld [vmem:[#allocation151_spill] sm:$0xff]  ;;  %v20287_v57 = vld [vmem:[#allocation168_spill] sm:$0xff] }
 0x91f   : > { %13923 = vmatmul.mubr.msk.bf16.gmra.mrb[76].mxu1 %vm20230_vm9, %v18076_v9  ;;  %v20266_v9 = vld [vmem:[#allocation118_spill] sm:$0xff] }
 0x920   : > { %13926 = vmatprep.mubr.msk.bf16.mxu1 %vm20231_vm1, %v17469_v44  ;;  %v20241_v44 = vld [vmem:[#allocation76_spill] sm:$0xff] }
 0x927   : > { %13927 = vmatmul.mubr.msk.bf16.gmra.mrb[80].mxu1 %vm20232_vm15, %v18101_v16  ;;  %v20267_v16 = vld [vmem:[#allocation121_spill] sm:$0xff] }
 0x928   : > { %13930 = vmatprep.mubr.msk.bf16.mxu1 %vm20233_vm14, %v17524_v53  ;;  %v20244_v53 = vld [vmem:[#allocation160_spill] sm:$0xff] }
 0x92f   : > { %13931 = vmatmul.mubr.msk.bf16.gmra.mrb[84].mxu1 %vm20234_vm3, %v18126_v42  ;;  %v15370_v42 = vld [vmem:[#allocation7 + $0x228] sm:$0xff]  }
 0x930   : > { %13934 = vmatprep.mubr.msk.bf16.mxu1 %vm20235_vm2, %v17582_v55  ;;  %v20249_v55 = vld [vmem:[#allocation164_spill] sm:$0xff] }
 0x937   : > { %13935 = vmatmul.mubr.msk.bf16.gmra.mrb[88].mxu1 %vm20133_vm8, %v20236_v24  ;;  %vm20254_vm8 = vnez %v20253_v31  ;;  %v20276_v24 = vld [vmem:[#allocation144_spill] sm:$0xff] }
 0x938   : > { %13938 = vmatprep.mubr.msk.bf16.mxu1 %vm20240_vm5, %v20238_v27  ;;  %v20278_v27 = vld [vmem:[#allocation148_spill] sm:$0xff] }
 0x939   : > { %v20289_v31 = vld [vmem:[#allocation176_spill] sm:$0xff] }
 0x93f   : > { %13939 = vmatmul.mubr.msk.bf16.gmra.mrb[92].mxu1 %vm20243_vm4, %v20241_v44  ;;  %v20280_v44 = vld [vmem:[#allocation153_spill] sm:$0xff] }
 0x940   : > { %13942 = vmatprep.mubr.msk.bf16.mxu1 %vm20246_vm7, %v20244_v53  ;;  %v20282_v53 = vld [vmem:[#allocation157_spill] sm:$0xff] }
 0x947   : > { %13943 = vmatmul.mubr.msk.bf16.gmra.mrb[96].mxu1 %vm20142_vm13, %v20247_v15  ;;  %v20284_v15 = vld [vmem:[#allocation161_spill] sm:$0xff] }
 0x948   : > { %13946 = vmatprep.mubr.msk.bf16.mxu1 %vm20251_vm6, %v20249_v55  ;;  %v20286_v55 = vld [vmem:[#allocation53_spill] sm:$0xff] }
 0x94f   : > { %13947 = vmatmul.mubr.msk.bf16.gmra.mrb[100].mxu1 %vm20254_vm8, %v20252_v10  ;;  %v20288_v10 = vld [vmem:[#allocation172_spill] sm:$0xff] }
 0x950   : > { %13950 = vmatprep.mubr.msk.bf16.mxu1 %vm18231_vm11, %v20255_v29  ;;  %v20290_v29 = vld [vmem:[#allocation179_spill] sm:$0xff] }
 0x957   : > { %13951 = vmatmul.mubr.msk.bf16.gmra.mrb[104].mxu1 %vm18244_vm0, %v20257_v56  ;;  %v20292_v56 = vld [vmem:[#allocation117_spill] sm:$0xff] }
 0x958   : > { %13954 = vmatprep.mubr.msk.bf16.mxu1 %vm18385_vm10, %v20259_v19  ;;  %v4784_v54 = vrot.slane %v20292_v56, 1  ;;  %v20293_v19 = vld [vmem:[#allocation20_spill] sm:$0xff]  ;;  %vm10723_vm10 = vcmask 1045504  }
 0x95f   : > { %13955 = vmatmul.mubr.msk.bf16.gmra.mrb[108].mxu1 %vm18398_vm12, %v20261_v18  ;;  %vm20295_vm12 = vcmask 1046528   ;;  %v20296_v18 = vld [vmem:[#allocation120_spill] sm:$0xff] }
 0x960   : > { %13958 = vmatprep.mubr.bf16.mxu1 %v20263_v46  ;;  %v4786_v33 = vrot.slane %v20296_v18, 1  ;;  %vm20299_vm11 = vmmov %vm20295_vm12  ;;  %v20319_v18 = vld [vmem:[#allocation21_spill] sm:$0xff] }
 0x961   : > { %vm20300_vm0 = vmmov %vm20299_vm11 }
 0x967   : > { %13959 = vmatmul.mubr.bf16.gmra.mrb[112].mxu1 %v20263_v46  ;;  %v20297_v46 = vld [vmem:[#allocation122_spill] sm:$0xff] }
 0x968   : > { %13978 = vmatprep.mubr.bf16.mxu1 %v20264_v26  ;;  %v4788_v26 = vrot.slane %v20297_v46, 1 }
 0x96f   : > { %13979 = vmatmul.mubr.bf16.vlgmr.msra.gmra.mrb[52].mxu1 %v20265_v11  ;;  %v4787_v11 = vsel %vm20299_vm11, %v4784_v54, %v4786_v33 }
 0x970   : > { %13982 = vmatprep.mubr.bf16.mxu1 %v20266_v9  ;;  %14043 = vmatpush3.bf16.msra.mxu1 %v15365_v25  ;;  %v20275_v25 = vld [vmem:[#allocation142_spill] sm:$0xff] }
 0x971   : > { %14044 = vmatprep.subr.bf16.mxu1 %v15366_v0  ;;  %v20301_v9 = vld [vmem:[#allocation110_spill] sm:$0xff] }
 0x974   : > { %14045 = vmatpush3.bf16.msra.mxu1 %v15366_v0  ;;  %v20298_v0 = vld [vmem:[#allocation104_spill] sm:$0xff] }
 0x975   : > { %14046 = vmatprep.subr.bf16.mxu1 %v15367_v37 }
 0x977   : > { %13983 = vmatmul.mubr.bf16.gmra.mrb[56].mxu1 %v20267_v16  ;;  %v20313_v16 = vld [vmem:[#allocation12_spill] sm:$0xff] }
 0x978   : > { %13986 = vmatprep.mubr.bf16.mxu1 %v20268_v6  ;;  %14047 = vmatpush3.bf16.msra.mxu1 %v15367_v37  ;;  %v20302_v37 = vld [vmem:[#allocation119_spill] sm:$0xff]  ;;  %v20314_v6 = vld [vmem:[#allocation13_spill] sm:$0xff] }
 0x979   : > { %14048 = vmatprep.subr.bf16.mxu1 %v15368_v28 }
 0x97c   : > { %14049 = vmatpush3.bf16.msra.mxu1 %v15368_v28  ;;  %v20303_v28 = vld [vmem:[#allocation123_spill] sm:$0xff] }
 0x97d   : > { %14050 = vmatprep.subr.bf16.mxu1 %v15369_v59 }
 0x97f   : > { %13987 = vmatmul.mubr.bf16.gmra.mrb[60].mxu1 %v20269_v52 }
 0x980   : > { %13990 = vmatprep.mubr.bf16.mxu1 %v20270_v63  ;;  %14051 = vmatpush3.bf16.msra.mxu1 %v15369_v59  ;;  %v10725_v59 = vrot.slane %v20314_v6, 2  ;;  %v18661_v63 = vld [vmem:[%s19038_s4 + $0x1] ss:$0 sm:$0xff] }
 0x981   : > { %14052 = vmatprep.subr.bf16.mxu1 %v15370_v42 }
 0x984   : > { %14053 = vmatpush3.bf16.msra.mxu1 %v15370_v42 }
 0x985   : > { %14054 = vmatprep.subr.bf16.mxu1 %v15371_v8 }
 0x987   : > { %13991 = vmatmul.mubr.bf16.gmra.mrb[64].mxu1 %v20271_v22 }
 0x988   : > { %13994 = vmatprep.mubr.bf16.mxu1 %v20272_v36  ;;  %14055 = vmatpush3.bf16.msra.mxu1 %v15371_v8  ;;  %v20315_v8 = vld [vmem:[#allocation16_spill] sm:$0xff] }
 0x989   : > { %14056 = vmatprep.subr.bf16.mxu1 %v15372_v1 }
 0x98c   : > { %14057 = vmatpush3.bf16.msra.mxu1 %v15372_v1  ;;  %v10731_v1 = vrot.slane %v20315_v8, 2 }
 0x98f   : > { %13995 = vmatmul.mubr.bf16.gmra.mrb[68].mxu1 %v20273_v4 }
 0x990   : > { %13998 = vmatprep.mubr.bf16.mxu1 %v20274_v23 }
 0x997   : > { %13999 = vmatmul.mubr.bf16.gmra.mrb[72].mxu1 %v20275_v25 }
 0x998   : > { %14002 = vmatprep.mubr.bf16.mxu1 %v20276_v24 }
 0x99f   : > { %14003 = vmatmul.mubr.bf16.gmra.mrb[76].mxu1 %v20277_v61 }
 0x9a0   : > { %14006 = vmatprep.mubr.bf16.mxu1 %v20278_v27 }
 0x9a7   : > { %14007 = vmatmul.mubr.bf16.gmra.mrb[80].mxu1 %v20279_v49 }
 0x9a8   : > { %14010 = vmatprep.mubr.bf16.mxu1 %v20280_v44 }
 0x9af   : > { %14011 = vmatmul.mubr.bf16.gmra.mrb[84].mxu1 %v20281_v60 }
 0x9b0   : > { %14014 = vmatprep.mubr.bf16.mxu1 %v20282_v53 }
 0x9b7   : > { %14015 = vmatmul.mubr.bf16.gmra.mrb[88].mxu1 %v20283_v58 }
 0x9b8   : > { %14018 = vmatprep.mubr.bf16.mxu1 %v20284_v15 }
 0x9bf   : > { %14019 = vmatmul.mubr.bf16.gmra.mrb[92].mxu1 %v20285_v14 }
 0x9c0   : > { %14022 = vmatprep.mubr.bf16.mxu1 %v20191_v45  ;;  %v4785_v45 = vsel %vm20295_vm12, %v20294_v5, %v4784_v54  ;;  %v20318_v54 = vld [vmem:[#allocation17_spill] sm:$0xff] }
 0x9c1   : > { %13395 = vmatmul.mubr.bf16.gmra.mrb[156].mxu0 %v4785_v45 }
 0x9c2   : > { %13398 = vmatprep.mubr.bf16.mxu0 %v4787_v11 }
 0x9c7   : > { %14023 = vmatmul.mubr.bf16.gmra.mrb[96].mxu1 %v20286_v55 }
 0x9c8   : > { %14026 = vmatprep.mubr.bf16.mxu1 %v20287_v57 }
 0x9cf   : > { %14027 = vmatmul.mubr.bf16.gmra.mrb[100].mxu1 %v20288_v10  ;;  %v20316_v10 = vld [vmem:[#allocation18_spill] sm:$0xff] }
 0x9d0   : > { %14030 = vmatprep.mubr.bf16.mxu1 %v20289_v31  ;;  %v10735_v31 = vrot.slane %v20316_v10, 2 }
 0x9d7   : > { %14031 = vmatmul.mubr.bf16.gmra.mrb[104].mxu1 %v20290_v29  ;;  %v20317_v29 = vld [vmem:[#allocation19_spill] sm:$0xff] }
 0x9d8   : > { %14034 = vmatprep.mubr.bf16.mxu1 %v20291_v17  ;;  %v10737_v17 = vrot.slane %v20317_v29, 2 }
 0x9df   : > { %14035 = vmatmul.mubr.bf16.gmra.mrb[108].mxu1 %v18445_v2  ;;  %v4789_v2 = vsel %vm20300_vm0, %v4786_v33, %v4788_v26  ;;  %v10739_v33 = vrot.slane %v20319_v18, 2 }
 0x9e0   : > { %14038 = vmatprep.mubr.bf16.mxu1 %v20293_v19  ;;  %13399 = vmatmul.mubr.bf16.gmra.mrb[160].mxu0 %v4789_v2 }
 0x9e7   : > { %14039 = vmatmul.mubr.bf16.gmra.mrb[112].mxu1 %v20293_v19  ;;  %v10733_v19 = vrot.slane %v20318_v54, 2 }
 0x9e8   : > { %14058 = vmatprep.mubr.bf16.mxu1 %v20298_v0  ;;  %v10738_v0 = vsel %vm10723_vm10, %v10735_v31, %v10737_v17 }
 0x9ef   : > { %14059 = vmatmul.mubr.bf16.vlgmr.msra.gmra.mrb[52].mxu1 %v20301_v9 }
 0x9f0   : > { %14062 = vmatprep.mubr.bf16.mxu1 %v20206_v51  ;;  %v20304_v51 = vld [vmem:[#allocation152_spill] sm:$0xff] }
 0x9f7   : > { %14063 = vmatmul.mubr.bf16.gmra.mrb[56].mxu1 %v20302_v37  ;;  %v10734_v37 = vsel %vm10723_vm10, %v10731_v1, %v10733_v19 }
 0x9f8   : > { %14066 = vmatprep.mubr.bf16.mxu1 %v20303_v28 }
 0x9ff   : > { %14067 = vmatmul.mubr.bf16.gmra.mrb[60].mxu1 %v20209_v20  ;;  %v20305_v20 = vld [vmem:[#allocation155_spill] sm:$0xff] }
 0xa00   : > { %14070 = vmatprep.mubr.bf16.mxu1 %v20210_v7  ;;  %v20306_v7 = vld [vmem:[#allocation31_spill] sm:$0xff] }
 0xa07   : > { %14071 = vmatmul.mubr.bf16.gmra.mrb[64].mxu1 %v20211_v41  ;;  %v20307_v41 = vld [vmem:[#allocation159_spill] sm:$0xff] }
 0xa08   : > { %14074 = vmatprep.mubr.bf16.mxu1 %v20212_v32  ;;  %v20308_v32 = vld [vmem:[#allocation40_spill] sm:$0xff] }
 0xa0f   : > { %14075 = vmatmul.mubr.bf16.gmra.mrb[68].mxu1 %v20213_v38  ;;  %v20309_v38 = vld [vmem:[#allocation163_spill] sm:$0xff] }
 0xa10   : > { %14078 = vmatprep.mubr.bf16.mxu1 %v20214_v62 }
 0xa17   : > { %14079 = vmatmul.mubr.bf16.gmra.mrb[72].mxu1 %v20215_v43  ;;  %v20312_v43 = vld [vmem:[#allocation15_spill] sm:$0xff] }
 0xa18   : > { %14082 = vmatprep.mubr.bf16.mxu1 %v20110_v39  ;;  %v20310_v39 = vld [vmem:[#allocation170_spill] sm:$0xff] }
 0xa1f   : > { %14083 = vmatmul.mubr.bf16.gmra.mrb[76].mxu1 %v20111_v21 }
 0xa20   : > { %14086 = vmatprep.mubr.bf16.mxu1 %v20112_v48 }
 0xa27   : > { %14087 = vmatmul.mubr.bf16.gmra.mrb[80].mxu1 %v20304_v51 }
 0xa28   : > { %14090 = vmatprep.mubr.bf16.mxu1 %v20305_v20 }
 0xa2f   : > { %14091 = vmatmul.mubr.bf16.gmra.mrb[84].mxu1 %v20306_v7  ;;  %v10740_v7 = vsel %vm10723_vm10, %v10737_v17, %v10739_v33  ;;  %v20327_v17 = vld [vmem:[#allocation33_spill] sm:$0xff] }
 0xa30   : > { %14094 = vmatprep.mubr.bf16.mxu1 %v20307_v41 }
 0xa37   : > { %14095 = vmatmul.mubr.bf16.gmra.mrb[88].mxu1 %v20308_v32 }
 0xa38   : > { %14098 = vmatprep.mubr.bf16.mxu1 %v20309_v38 }
 0xa3f   : > { %14099 = vmatmul.mubr.bf16.gmra.mrb[92].mxu1 %v20119_v47 }
 0xa40   : > { %14102 = vmatprep.mubr.bf16.mxu1 %v20120_v50 }
 0xa47   : > { %14103 = vmatmul.mubr.bf16.gmra.mrb[96].mxu1 %v17801_v34 }
 0xa48   : > { %14106 = vmatprep.mubr.bf16.mxu1 %v20310_v39  ;;  %v10736_v39 = vsel %vm10723_vm10, %v10733_v19, %v10735_v31 }
 0xa4f   : > { %14107 = vmatmul.mubr.bf16.gmra.mrb[100].mxu1 %v20217_v12 }
 0xa50   : > { %14110 = vmatprep.mubr.bf16.mxu1 %v20218_v40  ;;  %v18652_v40 = vld [vmem:[%s19038_s4] ss:$0 sm:$0xff] }
 0xa57   : > { %14111 = vmatmul.mubr.bf16.gmra.mrb[104].mxu1 %v20219_v3  ;;  %v20311_v3 = vld [vmem:[#allocation14_spill] sm:$0xff] }
 0xa58   : > { %14114 = vmatprep.mubr.bf16.mxu1 %v20220_v30  ;;  %v10727_v30 = vrot.slane %v20311_v3, 2 }
 0xa5a   : > { %v10728_v14 = vsel %vm10723_vm10, %v10725_v59, %v10727_v30 }
 0xa5f   : > { %14115 = vmatmul.mubr.bf16.gmra.mrb[108].mxu1 %v18483_v13  ;;  %v10729_v13 = vrot.slane %v20312_v43, 2 }
 0xa60   : > { %14118 = vmatprep.mubr.bf16.mxu1 %v20221_v35 }
 0xa61   : > { %v10730_v4 = vsel %vm10723_vm10, %v10727_v30, %v10729_v13  ;;  %v10732_v60 = vsel %vm10723_vm10, %v10729_v13, %v10731_v1  ;;  %v20322_v30 = vld [vmem:[#allocation22_spill] sm:$0xff] }
 0xa62   : > { %v10741_v43 = vrot.slane %v20322_v30, 2 }
 0xa67   : > { %14119 = vmatmul.mubr.bf16.gmra.mrb[112].mxu1 %v20221_v35  ;;  %v10724_v35 = vrot.slane %v20313_v16, 2  ;;  %v20323_v16 = vld [vmem:[#allocation27_spill] sm:$0xff] }
 0xa69   : > { %v10726_v61 = vsel %vm10723_vm10, %v10724_v35, %v10725_v59  ;;  %v10747_v35 = vrot.slane %v20323_v16, 2 }
 0xa94   : > { %v13396_v47 = vpop.f32.mrb[156].mxu0 }
 0xa95   : > { %v5147_v50 = vpop.f32.mrb[157].mxu0 }
 0xa96   : > { %v13397_v34 = vpop.f32.mrb[158].mxu0 }
 0xa97   : > { %v5150_v21 = vpop.f32.mrb[159].mxu0  ;;  %v20320_v34 = vld [vmem:[#allocation23_spill] sm:$0xff] }
 0xa98   : > { %v10743_v21 = vrot.slane %v20320_v34, 2 }
 0xab3   : > { %v13400_v48 = vpop.f32.mrb[160].mxu0 }
 0xab4   : > { %v5163_v62 = vpop.f32.mrb[161].mxu0  ;;  %v20321_v48 = vld [vmem:[#allocation24_spill] sm:$0xff] }
 0xab5   : > { %v13401_v12 = vpop.f32.mrb[162].mxu0  ;;  %v10745_v62 = vrot.slane %v20321_v48, 2 }
 0xab6   : > { %v5166_v42 = vpop.f32.mrb[163].mxu0 }
 0xab7   : > { %v10746_v42 = vsel %vm10723_vm10, %v10743_v21, %v10745_v62 }
 0xac2   : > { %v14060_v52 = vpop.f32.mrb[52].mxu1 }
 0xac3   : > { %v10527_v22 = vmul.f32 %v14060_v52, %v18652_v40  ;;  %v10201_v36 = vpop.f32.mrb[53].mxu1 }
 0xac4   : > { %v10525_v23 = vmul.f32 %v18652_v40, %v10201_v36  ;;  %v14061_v25 = vpop.f32.mrb[54].mxu1 }
 0xac5   : > { %v10596_v24 = vadd.f32 %v18661_v63, %v10527_v22  ;;  %v10528_v27 = vmul.f32 %v14061_v25, %v18652_v40  ;;  %v10204_v49 = vpop.f32.mrb[55].mxu1  ;;  %v10742_v22 = vsel %vm10723_vm10, %v10739_v33, %v10741_v43  ;;  %v10748_v25 = vsel %vm10723_vm10, %v10745_v62, %v10747_v35  ;;  %v20331_v62 = vld [vmem:[#allocation38_spill] sm:$0xff] }
 0xac6   : > { %v10594_v44 = vadd.f32 %v18661_v63, %v10525_v23  ;;  %v10526_v53 = vmul.f32 %v18652_v40, %v10204_v49  ;;  %v10744_v49 = vsel %vm10723_vm10, %v10741_v43, %v10743_v21 }
 0xac7   : > { %v10919_v58 = vadd.f32 %v10730_v4, %v10596_v24  ;;  %v10597_v15 = vadd.f32 %v18661_v63, %v10528_v27 }
 0xac8   : > { %v10917_v55 = vadd.f32 %v10726_v61, %v10594_v44  ;;  %v10595_v57 = vadd.f32 %v18661_v63, %v10526_v53  ;;  %v20324_v53 = vld [vmem:[#allocation29_spill] sm:$0xff] }
 0xac9   : > { %10983 = vst [vmem:[%s18679_s9 + $0x10] sm:$0xff] %v10919_v58  ;;  %v10920_v56 = vadd.f32 %v10732_v60, %v10597_v15  ;;  %v10751_v58 = vrot.slane %v20324_v53, 2  ;;  %v20325_v15 = vld [vmem:[#allocation30_spill] sm:$0xff] }
 0xaca   : > { %10981 = vst [vmem:[%s18679_s9] sm:$0xff] %v10917_v55  ;;  %v10918_v5 = vadd.f32 %v10728_v14, %v10595_v57  ;;  %v14064_v45 = vpop.f32.mrb[56].mxu1  ;;  %v10753_v14 = vrot.slane %v20325_v15, 2  ;;  %v20326_v57 = vld [vmem:[#allocation28_spill] sm:$0xff] }
 0xacb   : > { %10984 = vst [vmem:[%s18679_s9 + $0x18] sm:$0xff] %v10920_v56  ;;  %v10531_v46 = vmul.f32 %v14064_v45, %v18652_v40  ;;  %v10217_v26 = vpop.f32.mrb[57].mxu1  ;;  %v10749_v10 = vrot.slane %v20326_v57, 2  ;;  %v10755_v56 = vrot.slane %v20327_v17, 2 }
 0xacc   : > { %10982 = vst [vmem:[%s18679_s9 + $0x8] sm:$0xff] %v10918_v5  ;;  %v10529_v11 = vmul.f32 %v18652_v40, %v10217_v26  ;;  %v14065_v2 = vpop.f32.mrb[58].mxu1  ;;  %v10754_v5 = vsel %vm10723_vm10, %v10751_v58, %v10753_v14 }
 0xacd   : > { %v10600_v9 = vadd.f32 %v18661_v63, %v10531_v46  ;;  %v10532_v28 = vmul.f32 %v14065_v2, %v18652_v40  ;;  %v10220_v51 = vpop.f32.mrb[59].mxu1  ;;  %v10750_v46 = vsel %vm10723_vm10, %v10747_v35, %v10749_v10  ;;  %v10756_v2 = vsel %vm10723_vm10, %v10753_v14, %v10755_v56  ;;  %v20335_v14 = vld [vmem:[#allocation44_spill] sm:$0xff] }
 0xace   : > { %v10598_v20 = vadd.f32 %v18661_v63, %v10529_v11  ;;  %v10530_v41 = vmul.f32 %v18652_v40, %v10220_v51  ;;  %v10752_v51 = vsel %vm10723_vm10, %v10749_v10, %v10751_v58 }
 0xacf   : > { %v10923_v32 = vadd.f32 %v10738_v0, %v10600_v9  ;;  %v10601_v38 = vadd.f32 %v18661_v63, %v10532_v28 }
 0xad0   : > { %v10921_v47 = vadd.f32 %v10734_v37, %v10598_v20  ;;  %v10599_v50 = vadd.f32 %v18661_v63, %v10530_v41  ;;  %v20328_v41 = vld [vmem:[#allocation36_spill] sm:$0xff] }
 0xad1   : > { %10987 = vst [vmem:[%s18679_s9 + $0x30] sm:$0xff] %v10923_v32  ;;  %v10924_v3 = vadd.f32 %v10740_v7, %v10601_v38  ;;  %v10759_v32 = vrot.slane %v20328_v41, 2  ;;  %v20329_v38 = vld [vmem:[#allocation37_spill] sm:$0xff] }
 0xad2   : > { %10985 = vst [vmem:[%s18679_s9 + $0x20] sm:$0xff] %v10921_v47  ;;  %v10922_v13 = vadd.f32 %v10736_v39, %v10599_v50  ;;  %v14068_v12 = vpop.f32.mrb[60].mxu1  ;;  %v10761_v39 = vrot.slane %v20329_v38, 2  ;;  %v20330_v50 = vld [vmem:[#allocation34_spill] sm:$0xff] }
 0xad3   : > { %10988 = vst [vmem:[%s18679_s9 + $0x38] sm:$0xff] %v10924_v3  ;;  %v10535_v6 = vmul.f32 %v14068_v12, %v18652_v40  ;;  %v10233_v59 = vpop.f32.mrb[61].mxu1  ;;  %v10757_v34 = vrot.slane %v20330_v50, 2  ;;  %v10763_v3 = vrot.slane %v20331_v62, 2 }
 0xad4   : > { %10986 = vst [vmem:[%s18679_s9 + $0x28] sm:$0xff] %v10922_v13  ;;  %v10533_v52 = vmul.f32 %v18652_v40, %v10233_v59  ;;  %v14069_v8 = vpop.f32.mrb[62].mxu1  ;;  %v10762_v13 = vsel %vm10723_vm10, %v10759_v32, %v10761_v39 }
 0xad5   : > { %v10604_v1 = vadd.f32 %v18661_v63, %v10535_v6  ;;  %v10536_v36 = vmul.f32 %v14069_v8, %v18652_v40  ;;  %v10236_v4 = vpop.f32.mrb[63].mxu1  ;;  %v10758_v6 = vsel %vm10723_vm10, %v10755_v56, %v10757_v34  ;;  %v10764_v8 = vsel %vm10723_vm10, %v10761_v39, %v10763_v3  ;;  %v20339_v39 = vld [vmem:[#allocation50_spill] sm:$0xff] }
 0xad6   : > { %v10602_v23 = vadd.f32 %v18661_v63, %v10533_v52  ;;  %v10534_v24 = vmul.f32 %v18652_v40, %v10236_v4  ;;  %v10760_v4 = vsel %vm10723_vm10, %v10757_v34, %v10759_v32 }
 0xad7   : > { %v10927_v61 = vadd.f32 %v10746_v42, %v10604_v1  ;;  %v10605_v27 = vadd.f32 %v18661_v63, %v10536_v36 }
 0xad8   : > { %v10925_v44 = vadd.f32 %v10742_v22, %v10602_v23  ;;  %v10603_v60 = vadd.f32 %v18661_v63, %v10534_v24  ;;  %v20332_v24 = vld [vmem:[#allocation42_spill] sm:$0xff] }
 0xad9   : > { %10991 = vst [vmem:[%s18679_s9 + $0x50] sm:$0xff] %v10927_v61  ;;  %v10928_v55 = vadd.f32 %v10748_v25, %v10605_v27  ;;  %v10767_v61 = vrot.slane %v20332_v24, 2  ;;  %v20333_v27 = vld [vmem:[#allocation43_spill] sm:$0xff] }
 0xada   : > { %10989 = vst [vmem:[%s18679_s9 + $0x40] sm:$0xff] %v10925_v44  ;;  %v10926_v31 = vadd.f32 %v10744_v49, %v10603_v60  ;;  %v14072_v29 = vpop.f32.mrb[64].mxu1  ;;  %v10769_v49 = vrot.slane %v20333_v27, 2  ;;  %v20334_v60 = vld [vmem:[#allocation39_spill] sm:$0xff] }
 0xadb   : > { %10992 = vst [vmem:[%s18679_s9 + $0x58] sm:$0xff] %v10928_v55  ;;  %v10539_v54 = vmul.f32 %v14072_v29, %v18652_v40  ;;  %v10249_v19 = vpop.f32.mrb[65].mxu1  ;;  %v10765_v53 = vrot.slane %v20334_v60, 2  ;;  %v10771_v55 = vrot.slane %v20335_v14, 2 }
 0xadc   : > { %10990 = vst [vmem:[%s18679_s9 + $0x48] sm:$0xff] %v10926_v31  ;;  %v10537_v45 = vmul.f32 %v18652_v40, %v10249_v19  ;;  %v14073_v18 = vpop.f32.mrb[66].mxu1  ;;  %v10770_v31 = vsel %vm10723_vm10, %v10767_v61, %v10769_v49 }
 0xadd   : > { %v10608_v33 = vadd.f32 %v18661_v63, %v10539_v54  ;;  %v10540_v26 = vmul.f32 %v14073_v18, %v18652_v40  ;;  %v10252_v0 = vpop.f32.mrb[67].mxu1  ;;  %v10766_v54 = vsel %vm10723_vm10, %v10763_v3, %v10765_v53  ;;  %v10772_v18 = vsel %vm10723_vm10, %v10769_v49, %v10771_v55  ;;  %v20343_v49 = vld [vmem:[#allocation56_spill] sm:$0xff] }
 0xade   : > { %v10606_v11 = vadd.f32 %v18661_v63, %v10537_v45  ;;  %v10538_v9 = vmul.f32 %v18652_v40, %v10252_v0  ;;  %v10768_v0 = vsel %vm10723_vm10, %v10765_v53, %v10767_v61 }
 0xadf   : > { %v10931_v37 = vadd.f32 %v10754_v5, %v10608_v33  ;;  %v10609_v28 = vadd.f32 %v18661_v63, %v10540_v26 }
 0xae0   : > { %v10929_v20 = vadd.f32 %v10750_v46, %v10606_v11  ;;  %v10607_v7 = vadd.f32 %v18661_v63, %v10538_v9  ;;  %v20336_v9 = vld [vmem:[#allocation48_spill] sm:$0xff] }
 0xae1   : > { %10995 = vst [vmem:[%s18679_s9 + $0x70] sm:$0xff] %v10931_v37  ;;  %v10932_v47 = vadd.f32 %v10756_v2, %v10609_v28  ;;  %v10775_v37 = vrot.slane %v20336_v9, 2  ;;  %v20337_v28 = vld [vmem:[#allocation49_spill] sm:$0xff] }
 0xae2   : > { %10993 = vst [vmem:[%s18679_s9 + $0x60] sm:$0xff] %v10929_v20  ;;  %v10930_v21 = vadd.f32 %v10752_v51, %v10607_v7  ;;  %v14076_v48 = vpop.f32.mrb[68].mxu1  ;;  %v10777_v51 = vrot.slane %v20337_v28, 2  ;;  %v20338_v7 = vld [vmem:[#allocation45_spill] sm:$0xff] }
 0xae3   : > { %10996 = vst [vmem:[%s18679_s9 + $0x78] sm:$0xff] %v10932_v47  ;;  %v10543_v30 = vmul.f32 %v14076_v48, %v18652_v40  ;;  %v10265_v43 = vpop.f32.mrb[69].mxu1  ;;  %v10773_v41 = vrot.slane %v20338_v7, 2  ;;  %v10779_v47 = vrot.slane %v20339_v39, 2 }
 0xae4   : > { %10994 = vst [vmem:[%s18679_s9 + $0x68] sm:$0xff] %v10930_v21  ;;  %v10541_v12 = vmul.f32 %v18652_v40, %v10265_v43  ;;  %v14077_v16 = vpop.f32.mrb[70].mxu1  ;;  %v10778_v21 = vsel %vm10723_vm10, %v10775_v37, %v10777_v51 }
 0xae5   : > { %v10612_v35 = vadd.f32 %v18661_v63, %v10543_v30  ;;  %v10544_v59 = vmul.f32 %v14077_v16, %v18652_v40  ;;  %v10268_v42 = vpop.f32.mrb[71].mxu1  ;;  %v10774_v30 = vsel %vm10723_vm10, %v10771_v55, %v10773_v41  ;;  %v10780_v16 = vsel %vm10723_vm10, %v10777_v51, %v10779_v47  ;;  %v20347_v51 = vld [vmem:[#allocation62_spill] sm:$0xff] }
 0xae6   : > { %v10610_v52 = vadd.f32 %v18661_v63, %v10541_v12  ;;  %v10542_v1 = vmul.f32 %v18652_v40, %v10268_v42  ;;  %v10776_v42 = vsel %vm10723_vm10, %v10773_v41, %v10775_v37 }
 0xae7   : > { %v10935_v22 = vadd.f32 %v10762_v13, %v10612_v35  ;;  %v10613_v36 = vadd.f32 %v18661_v63, %v10544_v59 }
 0xae8   : > { %v10933_v23 = vadd.f32 %v10758_v6, %v10610_v52  ;;  %v10611_v25 = vadd.f32 %v18661_v63, %v10542_v1  ;;  %v20340_v1 = vld [vmem:[#allocation54_spill] sm:$0xff] }
 0xae9   : > { %10999 = vst [vmem:[%s18679_s9 + $0x90] sm:$0xff] %v10935_v22  ;;  %v10936_v44 = vadd.f32 %v10764_v8, %v10613_v36  ;;  %v10783_v22 = vrot.slane %v20340_v1, 2  ;;  %v20341_v36 = vld [vmem:[#allocation55_spill] sm:$0xff] }
 0xaea   : > { %10997 = vst [vmem:[%s18679_s9 + $0x80] sm:$0xff] %v10933_v23  ;;  %v10934_v58 = vadd.f32 %v10760_v4, %v10611_v25  ;;  %v14080_v15 = vpop.f32.mrb[72].mxu1  ;;  %v10785_v4 = vrot.slane %v20341_v36, 2  ;;  %v20342_v25 = vld [vmem:[#allocation51_spill] sm:$0xff] }
 0xaeb   : > { %11000 = vst [vmem:[%s18679_s9 + $0x98] sm:$0xff] %v10936_v44  ;;  %v10547_v57 = vmul.f32 %v14080_v15, %v18652_v40  ;;  %v10281_v10 = vpop.f32.mrb[73].mxu1  ;;  %v10781_v24 = vrot.slane %v20342_v25, 2  ;;  %v10787_v44 = vrot.slane %v20343_v49, 2 }
 0xaec   : > { %10998 = vst [vmem:[%s18679_s9 + $0x88] sm:$0xff] %v10934_v58  ;;  %v10545_v29 = vmul.f32 %v18652_v40, %v10281_v10  ;;  %v14081_v17 = vpop.f32.mrb[74].mxu1  ;;  %v10786_v58 = vsel %vm10723_vm10, %v10783_v22, %v10785_v4 }
 0xaed   : > { %v10616_v56 = vadd.f32 %v18661_v63, %v10547_v57  ;;  %v10548_v19 = vmul.f32 %v14081_v17, %v18652_v40  ;;  %v10284_v5 = vpop.f32.mrb[75].mxu1  ;;  %v10782_v57 = vsel %vm10723_vm10, %v10779_v47, %v10781_v24  ;;  %v10788_v17 = vsel %vm10723_vm10, %v10785_v4, %v10787_v44  ;;  %v20351_v4 = vld [vmem:[#allocation68_spill] sm:$0xff] }
 0xaee   : > { %v10614_v45 = vadd.f32 %v18661_v63, %v10545_v29  ;;  %v10546_v33 = vmul.f32 %v18652_v40, %v10284_v5  ;;  %v10784_v5 = vsel %vm10723_vm10, %v10781_v24, %v10783_v22 }
 0xaef   : > { %v10939_v46 = vadd.f32 %v10770_v31, %v10616_v56  ;;  %v10617_v26 = vadd.f32 %v18661_v63, %v10548_v19 }
 0xaf0   : > { %v10937_v11 = vadd.f32 %v10766_v54, %v10614_v45  ;;  %v10615_v2 = vadd.f32 %v18661_v63, %v10546_v33  ;;  %v20344_v33 = vld [vmem:[#allocation60_spill] sm:$0xff] }
 0xaf1   : > { %11003 = vst [vmem:[%s18679_s9 + $0xb0] sm:$0xff] %v10939_v46  ;;  %v10940_v20 = vadd.f32 %v10772_v18, %v10617_v26  ;;  %v10791_v46 = vrot.slane %v20344_v33, 2  ;;  %v20345_v26 = vld [vmem:[#allocation61_spill] sm:$0xff] }
 0xaf2   : > { %11001 = vst [vmem:[%s18679_s9 + $0xa0] sm:$0xff] %v10937_v11  ;;  %v10938_v32 = vadd.f32 %v10768_v0, %v10615_v2  ;;  %v14084_v38 = vpop.f32.mrb[76].mxu1  ;;  %v10793_v0 = vrot.slane %v20345_v26, 2  ;;  %v20346_v2 = vld [vmem:[#allocation57_spill] sm:$0xff] }
 0xaf3   : > { %11004 = vst [vmem:[%s18679_s9 + $0xb8] sm:$0xff] %v10940_v20  ;;  %v10551_v50 = vmul.f32 %v14084_v38, %v18652_v40  ;;  %v10297_v34 = vpop.f32.mrb[77].mxu1  ;;  %v10789_v9 = vrot.slane %v20346_v2, 2  ;;  %v10795_v20 = vrot.slane %v20347_v51, 2 }
 0xaf4   : > { %11002 = vst [vmem:[%s18679_s9 + $0xa8] sm:$0xff] %v10938_v32  ;;  %v10549_v48 = vmul.f32 %v18652_v40, %v10297_v34  ;;  %v14085_v62 = vpop.f32.mrb[78].mxu1  ;;  %v10794_v32 = vsel %vm10723_vm10, %v10791_v46, %v10793_v0 }
 0xaf5   : > { %v10620_v3 = vadd.f32 %v18661_v63, %v10551_v50  ;;  %v10552_v43 = vmul.f32 %v14085_v62, %v18652_v40  ;;  %v10300_v13 = vpop.f32.mrb[79].mxu1  ;;  %v10790_v50 = vsel %vm10723_vm10, %v10787_v44, %v10789_v9  ;;  %v10796_v62 = vsel %vm10723_vm10, %v10793_v0, %v10795_v20  ;;  %v20355_v0 = vld [vmem:[#allocation74_spill] sm:$0xff] }
 0xaf6   : > { %v10618_v12 = vadd.f32 %v18661_v63, %v10549_v48  ;;  %v10550_v35 = vmul.f32 %v18652_v40, %v10300_v13  ;;  %v10792_v13 = vsel %vm10723_vm10, %v10789_v9, %v10791_v46 }
 0xaf7   : > { %v10943_v6 = vadd.f32 %v10778_v21, %v10620_v3  ;;  %v10621_v59 = vadd.f32 %v18661_v63, %v10552_v43 }
 0xaf8   : > { %v10941_v52 = vadd.f32 %v10774_v30, %v10618_v12  ;;  %v10619_v8 = vadd.f32 %v18661_v63, %v10550_v35  ;;  %v20348_v35 = vld [vmem:[#allocation66_spill] sm:$0xff] }
 0xaf9   : > { %11007 = vst [vmem:[%s18679_s9 + $0xd0] sm:$0xff] %v10943_v6  ;;  %v10944_v23 = vadd.f32 %v10780_v16, %v10621_v59  ;;  %v10799_v6 = vrot.slane %v20348_v35, 2  ;;  %v20349_v59 = vld [vmem:[#allocation67_spill] sm:$0xff] }
 0xafa   : > { %11005 = vst [vmem:[%s18679_s9 + $0xc0] sm:$0xff] %v10941_v52  ;;  %v10942_v61 = vadd.f32 %v10776_v42, %v10619_v8  ;;  %v14088_v27 = vpop.f32.mrb[80].mxu1  ;;  %v10801_v42 = vrot.slane %v20349_v59, 2  ;;  %v20350_v8 = vld [vmem:[#allocation63_spill] sm:$0xff] }
 0xafb   : > { %11008 = vst [vmem:[%s18679_s9 + $0xd8] sm:$0xff] %v10944_v23  ;;  %v10555_v60 = vmul.f32 %v14088_v27, %v18652_v40  ;;  %v10313_v53 = vpop.f32.mrb[81].mxu1  ;;  %v10797_v1 = vrot.slane %v20350_v8, 2  ;;  %v10803_v23 = vrot.slane %v20351_v4, 2 }
 0xafc   : > { %11006 = vst [vmem:[%s18679_s9 + $0xc8] sm:$0xff] %v10942_v61  ;;  %v10553_v15 = vmul.f32 %v18652_v40, %v10313_v53  ;;  %v14089_v14 = vpop.f32.mrb[82].mxu1  ;;  %v10802_v61 = vsel %vm10723_vm10, %v10799_v6, %v10801_v42 }
 0xafd   : > { %v10624_v55 = vadd.f32 %v18661_v63, %v10555_v60  ;;  %v10556_v10 = vmul.f32 %v14089_v14, %v18652_v40  ;;  %v10316_v31 = vpop.f32.mrb[83].mxu1  ;;  %v10798_v60 = vsel %vm10723_vm10, %v10795_v20, %v10797_v1  ;;  %v10804_v14 = vsel %vm10723_vm10, %v10801_v42, %v10803_v23  ;;  %v20359_v42 = vld [vmem:[#allocation80_spill] sm:$0xff] }
 0xafe   : > { %v10622_v29 = vadd.f32 %v18661_v63, %v10553_v15  ;;  %v10554_v56 = vmul.f32 %v18652_v40, %v10316_v31  ;;  %v10800_v31 = vsel %vm10723_vm10, %v10797_v1, %v10799_v6 }
 0xaff   : > { %v10947_v54 = vadd.f32 %v10786_v58, %v10624_v55  ;;  %v10625_v19 = vadd.f32 %v18661_v63, %v10556_v10 }
 0xb00   : > { %v10945_v45 = vadd.f32 %v10782_v57, %v10622_v29  ;;  %v10623_v18 = vadd.f32 %v18661_v63, %v10554_v56  ;;  %v20352_v56 = vld [vmem:[#allocation72_spill] sm:$0xff] }
 0xb01   : > { %11011 = vst [vmem:[%s18679_s9 + $0xf0] sm:$0xff] %v10947_v54  ;;  %v10948_v11 = vadd.f32 %v10788_v17, %v10625_v19  ;;  %v10807_v54 = vrot.slane %v20352_v56, 2  ;;  %v20353_v19 = vld [vmem:[#allocation73_spill] sm:$0xff] }
 0xb02   : > { %11009 = vst [vmem:[%s18679_s9 + $0xe0] sm:$0xff] %v10945_v45  ;;  %v10946_v37 = vadd.f32 %v10784_v5, %v10623_v18  ;;  %v14092_v28 = vpop.f32.mrb[84].mxu1  ;;  %v10809_v5 = vrot.slane %v20353_v19, 2  ;;  %v20354_v18 = vld [vmem:[#allocation69_spill] sm:$0xff] }
 0xb03   : > { %11012 = vst [vmem:[%s18679_s9 + $0xf8] sm:$0xff] %v10948_v11  ;;  %v10559_v7 = vmul.f32 %v14092_v28, %v18652_v40  ;;  %v10329_v41 = vpop.f32.mrb[85].mxu1  ;;  %v10805_v33 = vrot.slane %v20354_v18, 2  ;;  %v10811_v11 = vrot.slane %v20355_v0, 2 }
 0xb04   : > { %11010 = vst [vmem:[%s18679_s9 + $0xe8] sm:$0xff] %v10946_v37  ;;  %v10557_v38 = vmul.f32 %v18652_v40, %v10329_v41  ;;  %v14093_v39 = vpop.f32.mrb[86].mxu1  ;;  %v10810_v37 = vsel %vm10723_vm10, %v10807_v54, %v10809_v5 }
 0xb05   : > { %v10628_v47 = vadd.f32 %v18661_v63, %v10559_v7  ;;  %v10560_v34 = vmul.f32 %v14093_v39, %v18652_v40  ;;  %v10332_v21 = vpop.f32.mrb[87].mxu1  ;;  %v10806_v7 = vsel %vm10723_vm10, %v10803_v23, %v10805_v33  ;;  %v10812_v39 = vsel %vm10723_vm10, %v10809_v5, %v10811_v11  ;;  %v20363_v5 = vld [vmem:[#allocation86_spill] sm:$0xff] }
 0xb06   : > { %v10626_v48 = vadd.f32 %v18661_v63, %v10557_v38  ;;  %v10558_v3 = vmul.f32 %v18652_v40, %v10332_v21  ;;  %v10808_v21 = vsel %vm10723_vm10, %v10805_v33, %v10807_v54 }
 0xb07   : > { %v10951_v30 = vadd.f32 %v10794_v32, %v10628_v47  ;;  %v10629_v43 = vadd.f32 %v18661_v63, %v10560_v34 }
 0xb08   : > { %v10949_v12 = vadd.f32 %v10790_v50, %v10626_v48  ;;  %v10627_v16 = vadd.f32 %v18661_v63, %v10558_v3  ;;  %v20356_v3 = vld [vmem:[#allocation78_spill] sm:$0xff] }
 0xb09   : > { %11015 = vst [vmem:[%s18679_s9 + $0x110] sm:$0xff] %v10951_v30  ;;  %v10952_v52 = vadd.f32 %v10796_v62, %v10629_v43  ;;  %v10815_v30 = vrot.slane %v20356_v3, 2  ;;  %v20357_v43 = vld [vmem:[#allocation79_spill] sm:$0xff] }
 0xb0a   : > { %11013 = vst [vmem:[%s18679_s9 + $0x100] sm:$0xff] %v10949_v12  ;;  %v10950_v22 = vadd.f32 %v10792_v13, %v10627_v16  ;;  %v14096_v36 = vpop.f32.mrb[88].mxu1  ;;  %v10817_v13 = vrot.slane %v20357_v43, 2  ;;  %v20358_v16 = vld [vmem:[#allocation75_spill] sm:$0xff] }
 0xb0b   : > { %11016 = vst [vmem:[%s18679_s9 + $0x118] sm:$0xff] %v10952_v52  ;;  %v10563_v25 = vmul.f32 %v14096_v36, %v18652_v40  ;;  %v10345_v24 = vpop.f32.mrb[89].mxu1  ;;  %v10813_v35 = vrot.slane %v20358_v16, 2  ;;  %v10819_v52 = vrot.slane %v20359_v42, 2 }
 0xb0c   : > { %11014 = vst [vmem:[%s18679_s9 + $0x108] sm:$0xff] %v10950_v22  ;;  %v10561_v27 = vmul.f32 %v18652_v40, %v10345_v24  ;;  %v14097_v49 = vpop.f32.mrb[90].mxu1  ;;  %v10818_v22 = vsel %vm10723_vm10, %v10815_v30, %v10817_v13 }
 0xb0d   : > { %v10632_v44 = vadd.f32 %v18661_v63, %v10563_v25  ;;  %v10564_v53 = vmul.f32 %v14097_v49, %v18652_v40  ;;  %v10348_v58 = vpop.f32.mrb[91].mxu1  ;;  %v10814_v25 = vsel %vm10723_vm10, %v10811_v11, %v10813_v35  ;;  %v10820_v49 = vsel %vm10723_vm10, %v10817_v13, %v10819_v52  ;;  %v20367_v13 = vld [vmem:[#allocation92_spill] sm:$0xff] }
 0xb0e   : > { %v10630_v15 = vadd.f32 %v18661_v63, %v10561_v27  ;;  %v10562_v55 = vmul.f32 %v18652_v40, %v10348_v58  ;;  %v10816_v58 = vsel %vm10723_vm10, %v10813_v35, %v10815_v30 }
 0xb0f   : > { %v10955_v57 = vadd.f32 %v10802_v61, %v10632_v44  ;;  %v10633_v10 = vadd.f32 %v18661_v63, %v10564_v53 }
 0xb10   : > { %v10953_v29 = vadd.f32 %v10798_v60, %v10630_v15  ;;  %v10631_v17 = vadd.f32 %v18661_v63, %v10562_v55  ;;  %v20360_v55 = vld [vmem:[#allocation84_spill] sm:$0xff] }
 0xb11   : > { %11019 = vst [vmem:[%s18679_s9 + $0x130] sm:$0xff] %v10955_v57  ;;  %v10956_v45 = vadd.f32 %v10804_v14, %v10633_v10  ;;  %v10823_v57 = vrot.slane %v20360_v55, 2  ;;  %v20361_v10 = vld [vmem:[#allocation85_spill] sm:$0xff] }
 0xb12   : > { %11017 = vst [vmem:[%s18679_s9 + $0x120] sm:$0xff] %v10953_v29  ;;  %v10954_v46 = vadd.f32 %v10800_v31, %v10631_v17  ;;  %v14100_v26 = vpop.f32.mrb[92].mxu1  ;;  %v10825_v31 = vrot.slane %v20361_v10, 2  ;;  %v20362_v17 = vld [vmem:[#allocation81_spill] sm:$0xff] }
 0xb13   : > { %11020 = vst [vmem:[%s18679_s9 + $0x138] sm:$0xff] %v10956_v45  ;;  %v10567_v2 = vmul.f32 %v14100_v26, %v18652_v40  ;;  %v10361_v9 = vpop.f32.mrb[93].mxu1  ;;  %v10821_v56 = vrot.slane %v20362_v17, 2  ;;  %v10827_v45 = vrot.slane %v20363_v5, 2 }
 0xb14   : > { %11018 = vst [vmem:[%s18679_s9 + $0x128] sm:$0xff] %v10954_v46  ;;  %v10565_v28 = vmul.f32 %v18652_v40, %v10361_v9  ;;  %v14101_v51 = vpop.f32.mrb[94].mxu1  ;;  %v10826_v46 = vsel %vm10723_vm10, %v10823_v57, %v10825_v31 }
 0xb15   : > { %v10636_v20 = vadd.f32 %v18661_v63, %v10567_v2  ;;  %v10568_v41 = vmul.f32 %v14101_v51, %v18652_v40  ;;  %v10364_v32 = vpop.f32.mrb[95].mxu1  ;;  %v10822_v2 = vsel %vm10723_vm10, %v10819_v52, %v10821_v56  ;;  %v10828_v51 = vsel %vm10723_vm10, %v10825_v31, %v10827_v45  ;;  %v20371_v31 = vld [vmem:[#allocation97_spill] sm:$0xff] }
 0xb16   : > { %v10634_v38 = vadd.f32 %v18661_v63, %v10565_v28  ;;  %v10566_v47 = vmul.f32 %v18652_v40, %v10364_v32  ;;  %v10824_v32 = vsel %vm10723_vm10, %v10821_v56, %v10823_v57 }
 0xb17   : > { %v10959_v50 = vadd.f32 %v10810_v37, %v10636_v20  ;;  %v10637_v34 = vadd.f32 %v18661_v63, %v10568_v41 }
 0xb18   : > { %v10957_v48 = vadd.f32 %v10806_v7, %v10634_v38  ;;  %v10635_v62 = vadd.f32 %v18661_v63, %v10566_v47  ;;  %v20364_v47 = vld [vmem:[#allocation90_spill] sm:$0xff] }
 0xb19   : > { %11023 = vst [vmem:[%s18679_s9 + $0x150] sm:$0xff] %v10959_v50  ;;  %v10960_v12 = vadd.f32 %v10812_v39, %v10637_v34  ;;  %v10831_v50 = vrot.slane %v20364_v47, 2  ;;  %v20365_v34 = vld [vmem:[#allocation91_spill] sm:$0xff] }
 0xb1a   : > { %11021 = vst [vmem:[%s18679_s9 + $0x140] sm:$0xff] %v10957_v48  ;;  %v10958_v6 = vadd.f32 %v10808_v21, %v10635_v62  ;;  %v14104_v59 = vpop.f32.mrb[96].mxu1  ;;  %v10833_v21 = vrot.slane %v20365_v34, 2  ;;  %v20366_v62 = vld [vmem:[#allocation87_spill] sm:$0xff] }
 0xb1b   : > { %11024 = vst [vmem:[%s18679_s9 + $0x158] sm:$0xff] %v10960_v12  ;;  %v10571_v8 = vmul.f32 %v14104_v59, %v18652_v40  ;;  %v10377_v1 = vpop.f32.mrb[97].mxu1  ;;  %v10829_v3 = vrot.slane %v20366_v62, 2  ;;  %v10835_v12 = vrot.slane %v20367_v13, 2 }
 0xb1c   : > { %11022 = vst [vmem:[%s18679_s9 + $0x148] sm:$0xff] %v10958_v6  ;;  %v10569_v36 = vmul.f32 %v18652_v40, %v10377_v1  ;;  %v14105_v4 = vpop.f32.mrb[98].mxu1  ;;  %v10834_v6 = vsel %vm10723_vm10, %v10831_v50, %v10833_v21 }
 0xb1d   : > { %v10640_v23 = vadd.f32 %v18661_v63, %v10571_v8  ;;  %v10572_v24 = vmul.f32 %v14105_v4, %v18652_v40  ;;  %v10380_v61 = vpop.f32.mrb[99].mxu1  ;;  %v10830_v8 = vsel %vm10723_vm10, %v10827_v45, %v10829_v3  ;;  %v10836_v4 = vsel %vm10723_vm10, %v10833_v21, %v10835_v12  ;;  %v20375_v21 = vld [vmem:[#allocation102_spill] sm:$0xff] }
 0xb1e   : > { %v10638_v27 = vadd.f32 %v18661_v63, %v10569_v36  ;;  %v10570_v44 = vmul.f32 %v18652_v40, %v10380_v61  ;;  %v10832_v61 = vsel %vm10723_vm10, %v10829_v3, %v10831_v50 }
 0xb1f   : > { %v10963_v60 = vadd.f32 %v10818_v22, %v10640_v23  ;;  %v10641_v53 = vadd.f32 %v18661_v63, %v10572_v24 }
 0xb20   : > { %v10961_v15 = vadd.f32 %v10814_v25, %v10638_v27  ;;  %v10639_v14 = vadd.f32 %v18661_v63, %v10570_v44  ;;  %v20368_v44 = vld [vmem:[#allocation95_spill] sm:$0xff] }
 0xb21   : > { %11027 = vst [vmem:[%s18679_s9 + $0x170] sm:$0xff] %v10963_v60  ;;  %v10964_v29 = vadd.f32 %v10820_v49, %v10641_v53  ;;  %v10839_v60 = vrot.slane %v20368_v44, 2  ;;  %v20369_v53 = vld [vmem:[#allocation96_spill] sm:$0xff] }
 0xb22   : > { %11025 = vst [vmem:[%s18679_s9 + $0x160] sm:$0xff] %v10961_v15  ;;  %v10962_v54 = vadd.f32 %v10816_v58, %v10639_v14  ;;  %v14108_v19 = vpop.f32.mrb[100].mxu1  ;;  %v10841_v58 = vrot.slane %v20369_v53, 2  ;;  %v20370_v14 = vld [vmem:[#allocation93_spill] sm:$0xff] }
 0xb23   : > { %11028 = vst [vmem:[%s18679_s9 + $0x178] sm:$0xff] %v10964_v29  ;;  %v10575_v18 = vmul.f32 %v14108_v19, %v18652_v40  ;;  %v10393_v33 = vpop.f32.mrb[101].mxu1  ;;  %v10837_v55 = vrot.slane %v20370_v14, 2  ;;  %v10843_v29 = vrot.slane %v20371_v31, 2 }
 0xb24   : > { %11026 = vst [vmem:[%s18679_s9 + $0x168] sm:$0xff] %v10962_v54  ;;  %v10573_v26 = vmul.f32 %v18652_v40, %v10393_v33  ;;  %v14109_v0 = vpop.f32.mrb[102].mxu1  ;;  %v10842_v54 = vsel %vm10723_vm10, %v10839_v60, %v10841_v58 }
 0xb25   : > { %v10644_v11 = vadd.f32 %v18661_v63, %v10575_v18  ;;  %v10576_v9 = vmul.f32 %v14109_v0, %v18652_v40  ;;  %v10396_v37 = vpop.f32.mrb[103].mxu1  ;;  %v10838_v18 = vsel %vm10723_vm10, %v10835_v12, %v10837_v55  ;;  %v10844_v0 = vsel %vm10723_vm10, %v10841_v58, %v10843_v29 }
 0xb26   : > { %v10642_v28 = vadd.f32 %v18661_v63, %v10573_v26  ;;  %v10574_v20 = vmul.f32 %v18652_v40, %v10396_v37  ;;  %v10840_v37 = vsel %vm10723_vm10, %v10837_v55, %v10839_v60 }
 0xb27   : > { %v10967_v7 = vadd.f32 %v10826_v46, %v10644_v11  ;;  %v10645_v41 = vadd.f32 %v18661_v63, %v10576_v9 }
 0xb28   : > { %v10965_v38 = vadd.f32 %v10822_v2, %v10642_v28  ;;  %v10643_v39 = vadd.f32 %v18661_v63, %v10574_v20  ;;  %v20372_v20 = vld [vmem:[#allocation100_spill] sm:$0xff] }
 0xb29   : > { %11031 = vst [vmem:[%s18679_s9 + $0x190] sm:$0xff] %v10967_v7  ;;  %v10968_v48 = vadd.f32 %v10828_v51, %v10645_v41  ;;  %v10847_v7 = vrot.slane %v20372_v20, 2  ;;  %v20373_v41 = vld [vmem:[#allocation101_spill] sm:$0xff] }
 0xb2a   : > { %11029 = vst [vmem:[%s18679_s9 + $0x180] sm:$0xff] %v10965_v38  ;;  %v10966_v30 = vadd.f32 %v10824_v32, %v10643_v39  ;;  %v14112_v43 = vpop.f32.mrb[104].mxu1  ;;  %v10849_v32 = vrot.slane %v20373_v41, 2  ;;  %v20374_v39 = vld [vmem:[#allocation98_spill] sm:$0xff] }
 0xb2b   : > { %11032 = vst [vmem:[%s18679_s9 + $0x198] sm:$0xff] %v10968_v48  ;;  %v10579_v16 = vmul.f32 %v14112_v43, %v18652_v40  ;;  %v10409_v35 = vpop.f32.mrb[105].mxu1  ;;  %v10845_v47 = vrot.slane %v20374_v39, 2  ;;  %v10851_v48 = vrot.slane %v20375_v21, 2 }
 0xb2c   : > { %11030 = vst [vmem:[%s18679_s9 + $0x188] sm:$0xff] %v10966_v30  ;;  %v10577_v59 = vmul.f32 %v18652_v40, %v10409_v35  ;;  %v14113_v42 = vpop.f32.mrb[106].mxu1  ;;  %v10850_v30 = vsel %vm10723_vm10, %v10847_v7, %v10849_v32 }
 0xb2d   : > { %v10648_v52 = vadd.f32 %v18661_v63, %v10579_v16  ;;  %v10580_v1 = vmul.f32 %v14113_v42, %v18652_v40  ;;  %v10412_v22 = vpop.f32.mrb[107].mxu1  ;;  %v10846_v16 = vsel %vm10723_vm10, %v10843_v29, %v10845_v47  ;;  %v10852_v42 = vsel %vm10723_vm10, %v10849_v32, %v10851_v48 }
 0xb2e   : > { %v10646_v36 = vadd.f32 %v18661_v63, %v10577_v59  ;;  %v10578_v23 = vmul.f32 %v18652_v40, %v10412_v22  ;;  %v10848_v22 = vsel %vm10723_vm10, %v10845_v47, %v10847_v7 }
 0xb2f   : > { %v10971_v25 = vadd.f32 %v10834_v6, %v10648_v52  ;;  %v10649_v24 = vadd.f32 %v18661_v63, %v10580_v1 }
 0xb30   : > { %v10969_v27 = vadd.f32 %v10830_v8, %v10646_v36  ;;  %v10647_v49 = vadd.f32 %v18661_v63, %v10578_v23 }
 0xb31   : > { %11035 = vst [vmem:[%s18679_s9 + $0x1b0] sm:$0xff] %v10971_v25  ;;  %v10972_v15 = vadd.f32 %v10836_v4, %v10649_v24 }
 0xb32   : > { %11033 = vst [vmem:[%s18679_s9 + $0x1a0] sm:$0xff] %v10969_v27  ;;  %v10970_v57 = vadd.f32 %v10832_v61, %v10647_v49  ;;  %v14116_v10 = vpop.f32.mrb[108].mxu1 }
 0xb33   : > { %11036 = vst [vmem:[%s18679_s9 + $0x1b8] sm:$0xff] %v10972_v15  ;;  %v10583_v17 = vmul.f32 %v14116_v10, %v18652_v40  ;;  %v10425_v56 = vpop.f32.mrb[109].mxu1 }
 0xb34   : > { %11034 = vst [vmem:[%s18679_s9 + $0x1a8] sm:$0xff] %v10970_v57  ;;  %v10581_v19 = vmul.f32 %v18652_v40, %v10425_v56  ;;  %v14117_v5 = vpop.f32.mrb[110].mxu1 }
 0xb35   : > { %v10652_v45 = vadd.f32 %v18661_v63, %v10583_v17  ;;  %v10584_v33 = vmul.f32 %v14117_v5, %v18652_v40  ;;  %v10428_v46 = vpop.f32.mrb[111].mxu1 }
 0xb36   : > { %v10650_v26 = vadd.f32 %v18661_v63, %v10581_v19  ;;  %v10582_v11 = vmul.f32 %v18652_v40, %v10428_v46 }
 0xb37   : > { %v10975_v2 = vadd.f32 %v10842_v54, %v10652_v45  ;;  %v10653_v9 = vadd.f32 %v18661_v63, %v10584_v33 }
 0xb38   : > { %v10973_v28 = vadd.f32 %v10838_v18, %v10650_v26  ;;  %v10651_v51 = vadd.f32 %v18661_v63, %v10582_v11 }
 0xb39   : > { %11039 = vst [vmem:[%s18679_s9 + $0x1d0] sm:$0xff] %v10975_v2  ;;  %v10976_v38 = vadd.f32 %v10844_v0, %v10653_v9 }
 0xb3a   : > { %11037 = vst [vmem:[%s18679_s9 + $0x1c0] sm:$0xff] %v10973_v28  ;;  %v10974_v50 = vadd.f32 %v10840_v37, %v10651_v51  ;;  %v14120_v34 = vpop.f32.mrb[112].mxu1 }
 0xb3b   : > { %11040 = vst [vmem:[%s18679_s9 + $0x1d8] sm:$0xff] %v10976_v38  ;;  %v10587_v62 = vmul.f32 %v14120_v34, %v18652_v40  ;;  %v10441_v3 = vpop.f32.mrb[113].mxu1 }
 0xb3c   : > { %11038 = vst [vmem:[%s18679_s9 + $0x1c8] sm:$0xff] %v10974_v50  ;;  %v10585_v43 = vmul.f32 %v18652_v40, %v10441_v3  ;;  %v14121_v13 = vpop.f32.mrb[114].mxu1 }
 0xb3d   : > { %v10656_v12 = vadd.f32 %v18661_v63, %v10587_v62  ;;  %v10588_v35 = vmul.f32 %v14121_v13, %v18652_v40  ;;  %v10444_v6 = vpop.f32.mrb[115].mxu1 }
 0xb3e   : > { %v10654_v59 = vadd.f32 %v18661_v63, %v10585_v43  ;;  %v10586_v52 = vmul.f32 %v18652_v40, %v10444_v6 }
 0xb3f   : > { %v10979_v8 = vadd.f32 %v10850_v30, %v10656_v12  ;;  %v10657_v1 = vadd.f32 %v18661_v63, %v10588_v35 }
 0xb40   : > { %v10977_v36 = vadd.f32 %v10846_v16, %v10654_v59  ;;  %v10655_v4 = vadd.f32 %v18661_v63, %v10586_v52 }
 0xb41   : > { %11043 = vst [vmem:[%s18679_s9 + $0x1f0] sm:$0xff] %v10979_v8  ;;  %v10980_v23 = vadd.f32 %v10852_v42, %v10657_v1 }
 0xb42   : > { %11041 = vst [vmem:[%s18679_s9 + $0x1e0] sm:$0xff] %v10977_v36  ;;  %v10978_v40 = vadd.f32 %v10848_v22, %v10655_v4 }
 0xb43   : > { %11044 = vst [vmem:[%s18679_s9 + $0x1f8] sm:$0xff] %v10980_v23 }
 0xb44   : > { %11042 = vst [vmem:[%s18679_s9 + $0x1e8] sm:$0xff] %v10978_v40 }
 0xb45   : > { %15474 = shalt.err (!%p15471_p1)
}
 0xb46   : > { %s15475_s7 = scalar_lea.hbm %s18985_s8, 8192  ;;  %s15479_s14 = scalar_lea.hbm %s19039_s5, 16384 }
 0xb47   : > { %p15476_p13 = scmp.ne.s32.totalorder %s18985_s8, %s15475_s7  ;;  %p15480_p4 = scmp.lt.u32.totalorder %s18985_s8, %s19039_s5 }
 0xb48   : > { %p15481_p5 = scmp.lt.u32.totalorder %s15479_s14, %s15475_s7  ;;  %p15483_p11 = scmp.lt.u32.totalorder %s15475_s7, %s18985_s8 }
 0xb49   : > { %p15477_p6 = pnand %p15476_p13, %p20376_p0 }
 0xb4a   : > { %p15482_p8 = por %p15481_p5, %p15480_p4 }
 0xb4b   : > { %p15478_p10 = pneg %p15477_p6 }
 0xb4c   : > { %p15484_p2 = por %p15483_p11, %p15482_p8 }
 0xb4e   : > { %p15485_p3 = pnand %p15484_p2, %p15478_p10 }
 0xb50   : > { %15488 = shalt.err (!%p15485_p3)
}
 0xb51   : > { %s15543_s10 = smov 128   ;;  %s15544_s26 = smov 8  }
 0xb52   : > { %15164 = dma.vmem_to_hbm [thread:$0]  (%p20376_p0), %s18987_s24, 8192, %s18985_s8, %s11046_s22, %s15543_s10, %s15543_s10, %s15544_s26  }
 0xb53 PF: > { %s11074_s16 = sand.u32 1, %s15519_s18   ;;  %p20377_p7 = scmp.ne.s32.totalorder %s19462_s25, 0 }
 0xb54   : > { %p20378_p9 = scmp.ge.s32.totalorder %s15531_s21, 2  ;;  %s11075_s11 = scalar_lea.sflag [#allocation4], %s11074_s16 }
 0xb56   : > { %p15178_p12 = pnand %p20378_p9, %p20377_p7 }
 0xb58   : > { %15514 = dma.done.wait (!%p15178_p12), %s11075_s11, 8192  }
 0xb59   : > { %15516 = vsyncadd (!%p15178_p12), %s11075_s11, 4294959104  ;;  %p19_p1 = scmp.ge.s32.totalorder %s15691_s29, 4   ;;  %s20379_s18 = smov %s15523_s19 }
 0xb5a   : > { %s20380_s19 = smov %s15527_s20  ;;  %s20381_s20 = smov %s15707_s27 }
 0xb5b   : > { %s20382_s21 = smov %s15691_s29  ;;  %21 = sbr.rel (!%p19_p1) target bundleno = 6 (0x6), region = 109 }
 0xb62   :  { %11080 = vsyncpa [#allocation3], 1 }
 0xb63   :  { %11082 = vsyncpa [#allocation3 + $0x1], 1 }
 0xb64   :  { %11083 = vsyncpa [#allocation6], 1 }
 0xb65   :  { %11084 = vsyncpa [#allocation4], 1 }
 0xb66   :  { %11086 = vsyncpa [#allocation4 + $0x1], 1 }

</bundles_post_ra>
